<compile_context>
chip_gen: v7x
topology: tpu7x:2x2x1
jax: 0.10.0
libtpu: 0.0.40
codegen_flags: <defaults>
</compile_context>

<pallas_src>
import functools

import jax
import jax.numpy as jnp
from jax import lax
from jax.experimental import pallas as pl
from jax.experimental.pallas import tpu as pltpu


N_HIDDEN = 128        # hard-coded in the module (self.n_hidden = 128)
NUM_LAYERS = 3        # hard-coded in the module (self.num_layers = 3)
_B_ALIGN = 16         # sublane tile for bf16 matmul LHS (covers f32's 8 too)
_V_TILE = 256         # lane-dense vocab tile for the final FC (multiple of 128)


def _round_up(x, m):
    return ((x + m - 1) // m) * m


# ----------------------------------------------------------------------------
# Fused Pallas kernel: 3 LSTM layers (wavefront) + vocab-tiled FC projection.
# ----------------------------------------------------------------------------

def _lstm_gen_fused_kernel(
    x_ref,                        # (T*Bp, E)   bf16 embedded tokens (batch-padded)
    h0_ref, c0_ref,               # (L, Bp, H)  f32 initial states
    wih0_ref, whh0_ref, b0_ref,   # layer 0: (E,4H) bf16, (H,4H) bf16, (1,4H) f32
    wcat1_ref, b1_ref,            # layer 1: (2H,4H) bf16 = [W_ih; W_hh], (1,4H) f32
    wcat2_ref, b2_ref,            # layer 2
    fcw_ref, fcb_ref,             # (H, Vt) bf16, (1, Vt) f32 -- current vocab tile
    logits_ref,                   # (T*Bp, Vt) f32            -- current vocab tile
    hn_ref, cn_ref,               # (L, Bp, H) f32 final states
    xw0_scratch,                  # (T*Bp, 4H) f32  hoisted layer-0 input projection
    y2_scratch,                   # (T*Bp, H)  bf16 top-layer outputs (FC input)
    *, T, Bp, H):

    j = pl.program_id(0)          # vocab-tile index; recurrence runs only at j == 0

    def apply_gates(gates, c):
        # Gate columns pre-permuted to i|f|o|g: one contiguous sigmoid over 3H
        # lanes + one tanh over H lanes (2 EUP launches per step instead of 4).
        sig = jax.nn.sigmoid(gates[:, :3 * H])
        i_g = sig[:, 0 * H:1 * H]
        f_g = sig[:, 1 * H:2 * H]
        o_g = sig[:, 2 * H:3 * H]
        g_g = jnp.tanh(gates[:, 3 * H:4 * H])
        c_new = f_g * c + i_g * g_g
        h_new = o_g * jnp.tanh(c_new)
        return h_new, c_new

    def step_l0(t, h, c):
        # Layer 0: input projection hoisted (xw0_scratch); only h @ W_hh on the
        # per-step path.  W_hh read from VMEM inside the step (not held live).
        if isinstance(t, int):
            pre = xw0_scratch[t * Bp:(t + 1) * Bp, :]
        else:
            pre = xw0_scratch[pl.ds(pl.multiple_of(t * Bp, Bp), Bp), :]
        gates = pre + jnp.dot(h.astype(jnp.bfloat16), whh0_ref[...],
                              preferred_element_type=jnp.float32)
        return apply_gates(gates, c)

    def step_fused(x_in, h, c, wcat_ref, b_ref):
        # Layers 1/2: fused [x_t ; h_{t-1}] @ [W_ih ; W_hh], K = 256.
        # TODO(synk): h is cast to bf16 for the MXU; keep it f32 if exact
        #             PyTorch fidelity over very long sequences is required.
        inp = jnp.concatenate([x_in, h.astype(jnp.bfloat16)], axis=-1)
        gates = jnp.dot(inp, wcat_ref[...],
                        preferred_element_type=jnp.float32) + b_ref[...]
        return apply_gates(gates, c)

    def write_y2(t, h2):
        v = h2.astype(jnp.bfloat16)
        if isinstance(t, int):
            y2_scratch[t * Bp:(t + 1) * Bp, :] = v
        else:
            y2_scratch[pl.ds(pl.multiple_of(t * Bp, Bp), Bp), :] = v

    @pl.when(j == 0)
    def _recurrence():
        # Hoisted layer-0 input projection over all T*Bp rows, bias folded.
        xw0_scratch[...] = (
            jnp.dot(x_ref[...], wih0_ref[...],
                    preferred_element_type=jnp.float32) + b0_ref[...])

        h0, c0 = h0_ref[0], c0_ref[0]
        h1, c1 = h0_ref[1], c0_ref[1]
        h2, c2 = h0_ref[2], c0_ref[2]

        # ---- Wavefront over diagonals d = t + layer (chain length T + L - 1).
        # Cells on a diagonal are independent; process layers top-down so each
        # consumer reads the previous diagonal's output before it is replaced.

        # Prologue d = 0: layer 0 @ t=0
        h0, c0 = step_l0(0, h0, c0)
        y0_prev = h0.astype(jnp.bfloat16)              # layer-0 out @ t=0
        # Prologue d = 1: layer 1 @ t=0, layer 0 @ t=1
        h1, c1 = step_fused(y0_prev, h1, c1, wcat1_ref, b1_ref)
        y1_prev = h1.astype(jnp.bfloat16)              # layer-1 out @ t=0
        h0, c0 = step_l0(1, h0, c0)
        y0_prev = h0.astype(jnp.bfloat16)              # layer-0 out @ t=1

        # Steady state d = 2 .. T-1: all three layers active.
        def body(d, carry):
            h0, c0, h1, c1, h2, c2, y0_prev, y1_prev = carry
            nh2, nc2 = step_fused(y1_prev, h2, c2, wcat2_ref, b2_ref)   # t = d-2
            write_y2(d - 2, nh2)
            nh1, nc1 = step_fused(y0_prev, h1, c1, wcat1_ref, b1_ref)   # t = d-1
            nh0, nc0 = step_l0(d, h0, c0)                               # t = d
            return (nh0, nc0, nh1, nc1, nh2, nc2,
                    nh0.astype(jnp.bfloat16), nh1.astype(jnp.bfloat16))

        carry = (h0, c0, h1, c1, h2, c2, y0_prev, y1_prev)
        carry = lax.fori_loop(2, T, body, carry, unroll=True)
        h0, c0, h1, c1, h2, c2, y0_prev, y1_prev = carry

        # Epilogue d = T: layer 2 @ t=T-2, layer 1 @ t=T-1
        h2, c2 = step_fused(y1_prev, h2, c2, wcat2_ref, b2_ref)
        write_y2(T - 2, h2)
        h1, c1 = step_fused(y0_prev, h1, c1, wcat1_ref, b1_ref)
        y1_prev = h1.astype(jnp.bfloat16)
        # Epilogue d = T+1: layer 2 @ t=T-1
        h2, c2 = step_fused(y1_prev, h2, c2, wcat2_ref, b2_ref)
        write_y2(T - 1, h2)

        hn_ref[0], cn_ref[0] = h0, c0
        hn_ref[1], cn_ref[1] = h1, c1
        hn_ref[2], cn_ref[2] = h2, c2
        # TODO(synk): inter-layer dropout (p=0.2) skipped — inference semantics.

    # ---- Final vocab projection for this V tile (runs for every tile j;
    # y2_scratch persists across grid iterations).  Lane-dense output store.
    logits_ref[...] = (
        jnp.dot(y2_scratch[...], fcw_ref[...],
                preferred_element_type=jnp.float32) + fcb_ref[...])


# ----------------------------------------------------------------------------
# Parameters (canonical PyTorch layout) + kernel-ready packing
# ----------------------------------------------------------------------------

def init_params(key, vocab_size, embedding_dim):
    ks = jax.random.split(key, 2 + 4 * NUM_LAYERS + 2)
    ki = iter(range(len(ks)))
    scale = 0.05

    def bf16_representable(w):      # so kernel's bf16 cast is lossless
        return w.astype(jnp.bfloat16).astype(jnp.float32)

    params = {}
    params["embedding"] = bf16_representable(
        scale * jax.random.normal(ks[next(ki)], (vocab_size, embedding_dim), jnp.float32))

    params["lstm"] = []
    for layer in range(NUM_LAYERS):
        d_in = embedding_dim if layer == 0 else N_HIDDEN
        params["lstm"].append({
            # Canonical nn.LSTM layout: (4H, d_in)/(4H, H), gate order i|f|g|o.
            "w_ih": bf16_representable(
                scale * jax.random.normal(ks[next(ki)], (4 * N_HIDDEN, d_in), jnp.float32)),
            "w_hh": bf16_representable(
                scale * jax.random.normal(ks[next(ki)], (4 * N_HIDDEN, N_HIDDEN), jnp.float32)),
            "b_ih": scale * jax.random.normal(ks[next(ki)], (4 * N_HIDDEN,), jnp.float32),
            "b_hh": scale * jax.random.normal(ks[next(ki)], (4 * N_HIDDEN,), jnp.float32),
        })

    params["fc_w"] = bf16_representable(
        scale * jax.random.normal(ks[next(ki)], (vocab_size, N_HIDDEN), jnp.float32))
    params["fc_b"] = scale * jax.random.normal(ks[next(ki)], (vocab_size,), jnp.float32)
    return params


def prepare_kernel_params(params):
    """Transpose / gate-permute (i|f|g|o -> i|f|o|g) / concat / bf16-cast once."""
    H = N_HIDDEN

    def permute_gates(w):           # permute along gate axis 0 of (4H, ...)
        return jnp.concatenate(
            [w[0:H], w[H:2 * H], w[3 * H:4 * H], w[2 * H:3 * H]], axis=0)

    kp = {"embedding": params["embedding"]}
    for l in range(NUM_LAYERS):
        p = params["lstm"][l]
        wih_t = jnp.transpose(permute_gates(p["w_ih"])).astype(jnp.bfloat16)   # (d_in,4H)
        whh_t = jnp.transpose(permute_gates(p["w_hh"])).astype(jnp.bfloat16)   # (H,4H)
        b = permute_gates(p["b_ih"] + p["b_hh"]).reshape(1, 4 * H)             # (1,4H) f32
        if l == 0:
            kp["wih0"], kp["whh0"], kp["b0"] = wih_t, whh_t, b
        else:
            kp[f"wcat{l}"] = jnp.concatenate([wih_t, whh_t], axis=0)           # (2H,4H)
            kp[f"b{l}"] = b
    kp["fc_w_t"] = jnp.transpose(params["fc_w"]).astype(jnp.bfloat16)          # (H,V)
    kp["fc_b"] = params["fc_b"].reshape(1, -1)                                 # (1,V) f32
    return kp


# ----------------------------------------------------------------------------
# Model wrapper (mirrors LSTM_Generator.forward)
# ----------------------------------------------------------------------------

@jax.jit
def lstm_generator_forward(kparams, X, prev_state):
    """X: (T, B) int32 token ids; prev_state: (h0, c0) each (NUM_LAYERS, B, H)."""
    h0, c0 = prev_state
    T, B = X.shape
    E = kparams["embedding"].shape[1]
    V = kparams["fc_w_t"].shape[-1]
    H = N_HIDDEN
    assert T >= 2, "wavefront kernel assumes seq_len >= 2"

    Bp = _round_up(B, _B_ALIGN)
    Vt = _V_TILE if V % _V_TILE == 0 else V
    n_vt = V // Vt

    # Embedding lookup (XLA gather), pad batch to the sublane tile, bf16 for MXU.
    x = jnp.take(kparams["embedding"], X.reshape(-1), axis=0).reshape(T, B, E)
    x = jnp.pad(x, ((0, 0), (0, Bp - B), (0, 0))).astype(jnp.bfloat16)
    x = x.reshape(T * Bp, E)
    h0p = jnp.pad(h0, ((0, 0), (0, Bp - B), (0, 0)))
    c0p = jnp.pad(c0, ((0, 0), (0, Bp - B), (0, 0)))

    kernel = functools.partial(_lstm_gen_fused_kernel, T=T, Bp=Bp, H=H)
    const2 = lambda j: (0, 0)
    const3 = lambda j: (0, 0, 0)

    logits2d, h_n, c_n = pl.pallas_call(
        kernel,
        out_shape=(
            jax.ShapeDtypeStruct((T * Bp, V), jnp.float32),             # logits
            jax.ShapeDtypeStruct((NUM_LAYERS, Bp, H), jnp.float32),     # h_T
            jax.ShapeDtypeStruct((NUM_LAYERS, Bp, H), jnp.float32),     # c_T
        ),
        grid_spec=pltpu.PrefetchScalarGridSpec(
            num_scalar_prefetch=0,
            grid=(n_vt,),                                               # vocab tiles
            in_specs=[
                pl.BlockSpec((T * Bp, E), const2),
                pl.BlockSpec((NUM_LAYERS, Bp, H), const3),
                pl.BlockSpec((NUM_LAYERS, Bp, H), const3),
                # layer 0
                pl.BlockSpec((E, 4 * H), const2),
                pl.BlockSpec((H, 4 * H), const2),
                pl.BlockSpec((1, 4 * H), const2),
                # layer 1 (fused [W_ih; W_hh])
                pl.BlockSpec((2 * H, 4 * H), const2),
                pl.BlockSpec((1, 4 * H), const2),
                # layer 2
                pl.BlockSpec((2 * H, 4 * H), const2),
                pl.BlockSpec((1, 4 * H), const2),
                # FC: tiled over the vocab grid axis -> bounded VMEM at real
                # vocab sizes; next fc_w tile DMA overlaps the current matmul.
                pl.BlockSpec((H, Vt), lambda j: (0, j)),
                pl.BlockSpec((1, Vt), lambda j: (0, j)),
            ],
            out_specs=[
                pl.BlockSpec((T * Bp, Vt), lambda j: (0, j)),
                pl.BlockSpec((NUM_LAYERS, Bp, H), const3),
                pl.BlockSpec((NUM_LAYERS, Bp, H), const3),
            ],
            scratch_shapes=[
                pltpu.VMEM((T * Bp, 4 * H), jnp.float32),   # hoisted layer-0 proj
                pltpu.VMEM((T * Bp, H), jnp.bfloat16),      # top-layer outputs
            ],
        ),
        compiler_params=pltpu.CompilerParams(
            # Vocab tiles reuse y2_scratch written at j == 0 -> serial axis.
            # TODO(synk): on v7x, a leading "parallel" batch axis would engage
            #             the second TensorCore; omitted at this tiny batch.
            dimension_semantics=("arbitrary",),
            vmem_limit_bytes=32 * 1024 * 1024,
        ),
    )(x, h0p, c0p,
      kparams["wih0"], kparams["whh0"], kparams["b0"],
      kparams["wcat1"], kparams["b1"],
      kparams["wcat2"], kparams["b2"],
      kparams["fc_w_t"], kparams["fc_b"])

    logits = logits2d.reshape(T, Bp, V)[:, :B, :]
    return logits, (h_n[:, :B, :], c_n[:, :B, :])


# ----------------------------------------------------------------------------
# Pure-JAX reference (eval-mode nn.LSTM semantics, canonical weights)
# ----------------------------------------------------------------------------

def _reference_forward(params, X, prev_state):
    h0, c0 = prev_state
    T, B = X.shape
    H = N_HIDDEN
    x = jnp.take(params["embedding"], X.reshape(-1), axis=0).reshape(T, B, -1)
    hs, cs = [], []
    for l in range(NUM_LAYERS):
        p = params["lstm"][l]
        wih_t, whh_t = p["w_ih"].T, p["w_hh"].T
        b = (p["b_ih"] + p["b_hh"]).reshape(1, -1)
        h, c = h0[l], c0[l]
        ys = []
        for t in range(T):
            gates = x[t] @ wih_t + h @ whh_t + b
            i_g = jax.nn.sigmoid(gates[:, 0 * H:1 * H])
            f_g = jax.nn.sigmoid(gates[:, 1 * H:2 * H])
            g_g = jnp.tanh(gates[:, 2 * H:3 * H])
            o_g = jax.nn.sigmoid(gates[:, 3 * H:4 * H])
            c = f_g * c + i_g * g_g
            h = o_g * jnp.tanh(c)
            ys.append(h)
        x = jnp.stack(ys, axis=0)
        hs.append(h)
        cs.append(c)
    logits = x @ params["fc_w"].T + params["fc_b"].reshape(1, 1, -1)
    return logits, (jnp.stack(hs, 0), jnp.stack(cs, 0))


if __name__ == "__main__":
    vocab_size = 512        # multiple of _V_TILE -> exercises the vocab-tiled FC
    embedding_dim = 64
    seq_len = 8
    batch = 2

    key = jax.random.PRNGKey(0)
    k_params, k_tokens = jax.random.split(key)

    params = init_params(k_params, vocab_size, embedding_dim)
    kparams = prepare_kernel_params(params)

    X = jax.random.randint(k_tokens, (seq_len, batch), 0, vocab_size, dtype=jnp.int32)
    h0 = jnp.zeros((NUM_LAYERS, batch, N_HIDDEN), jnp.float32)
    c0 = jnp.zeros((NUM_LAYERS, batch, N_HIDDEN), jnp.float32)

    logits, (h_n, c_n) = lstm_generator_forward(kparams, X, (h0, c0))
    jax.block_until_ready((logits, h_n, c_n))

    assert logits.shape == (seq_len, batch, vocab_size)
    assert h_n.shape == (NUM_LAYERS, batch, N_HIDDEN)
    assert c_n.shape == (NUM_LAYERS, batch, N_HIDDEN)
    assert bool(jnp.all(jnp.isfinite(logits)))

    # Correctness vs. pure-JAX reference (bf16 activation casts => loose tol).
    ref_logits, (ref_h, ref_c) = _reference_forward(params, X, (h0, c0))
    assert float(jnp.max(jnp.abs(logits - ref_logits))) < 5e-2
    assert float(jnp.max(jnp.abs(h_n - ref_h))) < 5e-2
    assert float(jnp.max(jnp.abs(c_n - ref_c))) < 5e-2

    print("KERNEL_OK")
</pallas_src>

<mosaic_0001>
module attributes {stable_mosaic.version = 11 : i64} {
  func.func @_lstm_gen_fused_kernel(%arg0: i32, %arg1: memref<128x64xbf16, #tpu.memory_space<vmem>>, %arg2: memref<3x16x128xf32, #tpu.memory_space<vmem>>, %arg3: memref<3x16x128xf32, #tpu.memory_space<vmem>>, %arg4: memref<64x512xbf16, #tpu.memory_space<vmem>>, %arg5: memref<128x512xbf16, #tpu.memory_space<vmem>>, %arg6: memref<1x512xf32, #tpu.memory_space<vmem>>, %arg7: memref<256x512xbf16, #tpu.memory_space<vmem>>, %arg8: memref<1x512xf32, #tpu.memory_space<vmem>>, %arg9: memref<256x512xbf16, #tpu.memory_space<vmem>>, %arg10: memref<1x512xf32, #tpu.memory_space<vmem>>, %arg11: memref<128x256xbf16, #tpu.memory_space<vmem>>, %arg12: memref<1x256xf32, #tpu.memory_space<vmem>>, %arg13: memref<128x256xf32, #tpu.memory_space<vmem>>, %arg14: memref<3x16x128xf32, #tpu.memory_space<vmem>>, %arg15: memref<3x16x128xf32, #tpu.memory_space<vmem>>, %arg16: memref<128x512xf32, #tpu.memory_space<vmem>>, %arg17: memref<128x128xbf16, #tpu.memory_space<vmem>>) attributes {dimension_semantics = [#tpu.dimension_semantics<arbitrary>], iteration_bounds = array<i64: 2>, scalar_prefetch = 0 : i64, scratch_operands = 2 : i64, tpu.core_type = #tpu.core_type<tc>, window_params = [{pipeline_mode = #tpu.pipeline_mode<synchronous>, transform_indices = @transform_0, window_bounds = array<i64: 128, 64>}, {pipeline_mode = #tpu.pipeline_mode<synchronous>, transform_indices = @transform_1, window_bounds = array<i64: 3, 16, 128>}, {pipeline_mode = #tpu.pipeline_mode<synchronous>, transform_indices = @transform_2, window_bounds = array<i64: 3, 16, 128>}, {pipeline_mode = #tpu.pipeline_mode<synchronous>, transform_indices = @transform_3, window_bounds = array<i64: 64, 512>}, {pipeline_mode = #tpu.pipeline_mode<synchronous>, transform_indices = @transform_4, window_bounds = array<i64: 128, 512>}, {pipeline_mode = #tpu.pipeline_mode<synchronous>, transform_indices = @transform_5, window_bounds = array<i64: 1, 512>}, {pipeline_mode = #tpu.pipeline_mode<synchronous>, transform_indices = @transform_6, window_bounds = array<i64: 256, 512>}, {pipeline_mode = #tpu.pipeline_mode<synchronous>, transform_indices = @transform_7, window_bounds = array<i64: 1, 512>}, {pipeline_mode = #tpu.pipeline_mode<synchronous>, transform_indices = @transform_8, window_bounds = array<i64: 256, 512>}, {pipeline_mode = #tpu.pipeline_mode<synchronous>, transform_indices = @transform_9, window_bounds = array<i64: 1, 512>}, {transform_indices = @transform_10, window_bounds = array<i64: 128, 256>}, {transform_indices = @transform_11, window_bounds = array<i64: 1, 256>}, {transform_indices = @transform_12, window_bounds = array<i64: 128, 256>}, {pipeline_mode = #tpu.pipeline_mode<synchronous>, transform_indices = @transform_13, window_bounds = array<i64: 3, 16, 128>}, {pipeline_mode = #tpu.pipeline_mode<synchronous>, transform_indices = @transform_14, window_bounds = array<i64: 3, 16, 128>}]} {
    %c0_i32 = arith.constant 0 : i32
    %0 = arith.cmpi eq, %arg0, %c0_i32 : i32
    %1 = arith.extui %0 : i1 to i32
    %c0_i32_0 = arith.constant 0 : i32
    %2 = arith.cmpi ne, %1, %c0_i32_0 : i32
    scf.if %2 {
      %c0_8 = arith.constant 0 : index
      %c0_9 = arith.constant 0 : index
      %10 = vector.load %arg1[%c0_8, %c0_9] : memref<128x64xbf16, #tpu.memory_space<vmem>>, vector<128x64xbf16>
      %c0_10 = arith.constant 0 : index
      %c0_11 = arith.constant 0 : index
      %11 = vector.load %arg4[%c0_10, %c0_11] : memref<64x512xbf16, #tpu.memory_space<vmem>>, vector<64x512xbf16>
      %cst_12 = arith.constant dense<0.000000e+00> : vector<128x512xf32>
      %12 = tpu.matmul %10, %11, %cst_12 {dimension_numbers = #tpu.dot_dimension_numbers<[1], [0], [0], [1], [0, 0, 1, 1], [], []>} : vector<128x64xbf16>, vector<64x512xbf16>, vector<128x512xf32> -> vector<128x512xf32>
      %c0_13 = arith.constant 0 : index
      %c0_14 = arith.constant 0 : index
      %13 = vector.load %arg6[%c0_13, %c0_14] : memref<1x512xf32, #tpu.memory_space<vmem>>, vector<1x512xf32>
      %14 = vector.broadcast %13 : vector<1x512xf32> to vector<128x512xf32>
      %15 = arith.addf %12, %14 : vector<128x512xf32>
      %c0_15 = arith.constant 0 : index
      %c0_16 = arith.constant 0 : index
      %16 = vector.load %arg16[%c0_15, %c0_16] : memref<128x512xf32, #tpu.memory_space<vmem>>, vector<128x512xf32>
      tpu.vector_store %arg16[%c0_15, %c0_16], %15 {strides = array<i32>} : memref<128x512xf32, #tpu.memory_space<vmem>>, vector<128x512xf32>,
      %c0_17 = arith.constant 0 : index
      %c0_18 = arith.constant 0 : index
      %c0_19 = arith.constant 0 : index
      %17 = vector.load %arg2[%c0_17, %c0_18, %c0_19] : memref<3x16x128xf32, #tpu.memory_space<vmem>>, vector<1x16x128xf32>
      %18 = vector.shape_cast %17 : vector<1x16x128xf32> to vector<16x128xf32>
      %c0_20 = arith.constant 0 : index
      %c0_21 = arith.constant 0 : index
      %c0_22 = arith.constant 0 : index
      %19 = vector.load %arg3[%c0_20, %c0_21, %c0_22] : memref<3x16x128xf32, #tpu.memory_space<vmem>>, vector<1x16x128xf32>
      %20 = vector.shape_cast %19 : vector<1x16x128xf32> to vector<16x128xf32>
      %c1 = arith.constant 1 : index
      %c0_23 = arith.constant 0 : index
      %c0_24 = arith.constant 0 : index
      %21 = vector.load %arg2[%c1, %c0_23, %c0_24] : memref<3x16x128xf32, #tpu.memory_space<vmem>>, vector<1x16x128xf32>
      %22 = vector.shape_cast %21 : vector<1x16x128xf32> to vector<16x128xf32>
      %c1_25 = arith.constant 1 : index
      %c0_26 = arith.constant 0 : index
      %c0_27 = arith.constant 0 : index
      %23 = vector.load %arg3[%c1_25, %c0_26, %c0_27] : memref<3x16x128xf32, #tpu.memory_space<vmem>>, vector<1x16x128xf32>
      %24 = vector.shape_cast %23 : vector<1x16x128xf32> to vector<16x128xf32>
      %c2 = arith.constant 2 : index
      %c0_28 = arith.constant 0 : index
      %c0_29 = arith.constant 0 : index
      %25 = vector.load %arg2[%c2, %c0_28, %c0_29] : memref<3x16x128xf32, #tpu.memory_space<vmem>>, vector<1x16x128xf32>
      %26 = vector.shape_cast %25 : vector<1x16x128xf32> to vector<16x128xf32>
      %c2_30 = arith.constant 2 : index
      %c0_31 = arith.constant 0 : index
      %c0_32 = arith.constant 0 : index
      %27 = vector.load %arg3[%c2_30, %c0_31, %c0_32] : memref<3x16x128xf32, #tpu.memory_space<vmem>>, vector<1x16x128xf32>
      %28 = vector.shape_cast %27 : vector<1x16x128xf32> to vector<16x128xf32>
      %c0_33 = arith.constant 0 : index
      %c0_34 = arith.constant 0 : index
      %29 = vector.load %arg16[%c0_33, %c0_34] : memref<128x512xf32, #tpu.memory_space<vmem>>, vector<16x512xf32>
      %30 = arith.truncf %18 : vector<16x128xf32> to vector<16x128xbf16>
      %c0_35 = arith.constant 0 : index
      %c0_36 = arith.constant 0 : index
      %31 = vector.load %arg5[%c0_35, %c0_36] : memref<128x512xbf16, #tpu.memory_space<vmem>>, vector<128x512xbf16>
      %cst_37 = arith.constant dense<0.000000e+00> : vector<16x512xf32>
      %32 = tpu.matmul %30, %31, %cst_37 {dimension_numbers = #tpu.dot_dimension_numbers<[1], [0], [0], [1], [0, 0, 1, 1], [], []>} : vector<16x128xbf16>, vector<128x512xbf16>, vector<16x512xf32> -> vector<16x512xf32>
      %33 = arith.addf %29, %32 : vector<16x512xf32>
      %34 = vector.extract_strided_slice %33 {offsets = [0, 0], sizes = [16, 384], strides = [1, 1]} : vector<16x512xf32> to vector<16x384xf32>
      %35 = arith.negf %34 : vector<16x384xf32>
      %36 = math.exp %35 : vector<16x384xf32>
      %cst_38 = arith.constant 1.000000e+00 : f32
      %37 = vector.broadcast %cst_38 : f32 to vector<16x384xf32>
      %38 = arith.addf %37, %36 : vector<16x384xf32>
      %39 = arith.divf %37, %38 : vector<16x384xf32>
      %40 = vector.extract_strided_slice %39 {offsets = [0, 0], sizes = [16, 128], strides = [1, 1]} : vector<16x384xf32> to vector<16x128xf32>
      %41 = vector.extract_strided_slice %39 {offsets = [0, 128], sizes = [16, 128], strides = [1, 1]} : vector<16x384xf32> to vector<16x128xf32>
      %42 = vector.extract_strided_slice %39 {offsets = [0, 256], sizes = [16, 128], strides = [1, 1]} : vector<16x384xf32> to vector<16x128xf32>
      %43 = vector.extract_strided_slice %33 {offsets = [0, 384], sizes = [16, 128], strides = [1, 1]} : vector<16x512xf32> to vector<16x128xf32>
      %44 = math.tanh %43 : vector<16x128xf32>
      %45 = arith.mulf %41, %20 : vector<16x128xf32>
      %46 = arith.mulf %40, %44 : vector<16x128xf32>
      %47 = arith.addf %45, %46 : vector<16x128xf32>
      %48 = math.tanh %47 : vector<16x128xf32>
      %49 = arith.mulf %42, %48 : vector<16x128xf32>
      %50 = arith.truncf %49 : vector<16x128xf32> to vector<16x128xbf16>
      %51 = arith.truncf %22 : vector<16x128xf32> to vector<16x128xbf16>
      %52 = tpu.concatenate %50, %51 in 1 : vector<16x128xbf16>, vector<16x128xbf16> -> vector<16x256xbf16>
      %c0_39 = arith.constant 0 : index
      %c0_40 = arith.constant 0 : index
      %53 = vector.load %arg7[%c0_39, %c0_40] : memref<256x512xbf16, #tpu.memory_space<vmem>>, vector<256x512xbf16>
      %cst_41 = arith.constant dense<0.000000e+00> : vector<16x512xf32>
      %54 = tpu.matmul %52, %53, %cst_41 {dimension_numbers = #tpu.dot_dimension_numbers<[1], [0], [0], [1], [0, 0, 1, 1], [], []>} : vector<16x256xbf16>, vector<256x512xbf16>, vector<16x512xf32> -> vector<16x512xf32>
      %c0_42 = arith.constant 0 : index
      %c0_43 = arith.constant 0 : index
      %55 = vector.load %arg8[%c0_42, %c0_43] : memref<1x512xf32, #tpu.memory_space<vmem>>, vector<1x512xf32>
      %56 = vector.broadcast %55 : vector<1x512xf32> to vector<16x512xf32>
      %57 = arith.addf %54, %56 : vector<16x512xf32>
      %58 = vector.extract_strided_slice %57 {offsets = [0, 0], sizes = [16, 384], strides = [1, 1]} : vector<16x512xf32> to vector<16x384xf32>
      %59 = arith.negf %58 : vector<16x384xf32>
      %60 = math.exp %59 : vector<16x384xf32>
      %cst_44 = arith.constant 1.000000e+00 : f32
      %61 = vector.broadcast %cst_44 : f32 to vector<16x384xf32>
      %62 = arith.addf %61, %60 : vector<16x384xf32>
      %63 = arith.divf %61, %62 : vector<16x384xf32>
      %64 = vector.extract_strided_slice %63 {offsets = [0, 0], sizes = [16, 128], strides = [1, 1]} : vector<16x384xf32> to vector<16x128xf32>
      %65 = vector.extract_strided_slice %63 {offsets = [0, 128], sizes = [16, 128], strides = [1, 1]} : vector<16x384xf32> to vector<16x128xf32>
      %66 = vector.extract_strided_slice %63 {offsets = [0, 256], sizes = [16, 128], strides = [1, 1]} : vector<16x384xf32> to vector<16x128xf32>
      %67 = vector.extract_strided_slice %57 {offsets = [0, 384], sizes = [16, 128], strides = [1, 1]} : vector<16x512xf32> to vector<16x128xf32>
      %68 = math.tanh %67 : vector<16x128xf32>
      %69 = arith.mulf %65, %24 : vector<16x128xf32>
      %70 = arith.mulf %64, %68 : vector<16x128xf32>
      %71 = arith.addf %69, %70 : vector<16x128xf32>
      %72 = math.tanh %71 : vector<16x128xf32>
      %73 = arith.mulf %66, %72 : vector<16x128xf32>
      %74 = arith.truncf %73 : vector<16x128xf32> to vector<16x128xbf16>
      %c16 = arith.constant 16 : index
      %c0_45 = arith.constant 0 : index
      %75 = vector.load %arg16[%c16, %c0_45] : memref<128x512xf32, #tpu.memory_space<vmem>>, vector<16x512xf32>
      %76 = arith.truncf %49 : vector<16x128xf32> to vector<16x128xbf16>
      %c0_46 = arith.constant 0 : index
      %c0_47 = arith.constant 0 : index
      %77 = vector.load %arg5[%c0_46, %c0_47] : memref<128x512xbf16, #tpu.memory_space<vmem>>, vector<128x512xbf16>
      %cst_48 = arith.constant dense<0.000000e+00> : vector<16x512xf32>
      %78 = tpu.matmul %76, %77, %cst_48 {dimension_numbers = #tpu.dot_dimension_numbers<[1], [0], [0], [1], [0, 0, 1, 1], [], []>} : vector<16x128xbf16>, vector<128x512xbf16>, vector<16x512xf32> -> vector<16x512xf32>
      %79 = arith.addf %75, %78 : vector<16x512xf32>
      %80 = vector.extract_strided_slice %79 {offsets = [0, 0], sizes = [16, 384], strides = [1, 1]} : vector<16x512xf32> to vector<16x384xf32>
      %81 = arith.negf %80 : vector<16x384xf32>
      %82 = math.exp %81 : vector<16x384xf32>
      %cst_49 = arith.constant 1.000000e+00 : f32
      %83 = vector.broadcast %cst_49 : f32 to vector<16x384xf32>
      %84 = arith.addf %83, %82 : vector<16x384xf32>
      %85 = arith.divf %83, %84 : vector<16x384xf32>
      %86 = vector.extract_strided_slice %85 {offsets = [0, 0], sizes = [16, 128], strides = [1, 1]} : vector<16x384xf32> to vector<16x128xf32>
      %87 = vector.extract_strided_slice %85 {offsets = [0, 128], sizes = [16, 128], strides = [1, 1]} : vector<16x384xf32> to vector<16x128xf32>
      %88 = vector.extract_strided_slice %85 {offsets = [0, 256], sizes = [16, 128], strides = [1, 1]} : vector<16x384xf32> to vector<16x128xf32>
      %89 = vector.extract_strided_slice %79 {offsets = [0, 384], sizes = [16, 128], strides = [1, 1]} : vector<16x512xf32> to vector<16x128xf32>
      %90 = math.tanh %89 : vector<16x128xf32>
      %91 = arith.mulf %87, %47 : vector<16x128xf32>
      %92 = arith.mulf %86, %90 : vector<16x128xf32>
      %93 = arith.addf %91, %92 : vector<16x128xf32>
      %94 = math.tanh %93 : vector<16x128xf32>
      %95 = arith.mulf %88, %94 : vector<16x128xf32>
      %96 = arith.truncf %95 : vector<16x128xf32> to vector<16x128xbf16>
      %c2_i32 = arith.constant 2 : i32
      %97 = arith.truncf %26 : vector<16x128xf32> to vector<16x128xbf16>
      %98 = tpu.concatenate %74, %97 in 1 : vector<16x128xbf16>, vector<16x128xbf16> -> vector<16x256xbf16>
      %c0_50 = arith.constant 0 : index
      %c0_51 = arith.constant 0 : index
      %99 = vector.load %arg9[%c0_50, %c0_51] : memref<256x512xbf16, #tpu.memory_space<vmem>>, vector<256x512xbf16>
      %cst_52 = arith.constant dense<0.000000e+00> : vector<16x512xf32>
      %100 = tpu.matmul %98, %99, %cst_52 {dimension_numbers = #tpu.dot_dimension_numbers<[1], [0], [0], [1], [0, 0, 1, 1], [], []>} : vector<16x256xbf16>, vector<256x512xbf16>, vector<16x512xf32> -> vector<16x512xf32>
      %c0_53 = arith.constant 0 : index
      %c0_54 = arith.constant 0 : index
      %101 = vector.load %arg10[%c0_53, %c0_54] : memref<1x512xf32, #tpu.memory_space<vmem>>, vector<1x512xf32>
      %102 = vector.broadcast %101 : vector<1x512xf32> to vector<16x512xf32>
      %103 = arith.addf %100, %102 : vector<16x512xf32>
      %104 = vector.extract_strided_slice %103 {offsets = [0, 0], sizes = [16, 384], strides = [1, 1]} : vector<16x512xf32> to vector<16x384xf32>
      %105 = arith.negf %104 : vector<16x384xf32>
      %106 = math.exp %105 : vector<16x384xf32>
      %cst_55 = arith.constant 1.000000e+00 : f32
      %107 = vector.broadcast %cst_55 : f32 to vector<16x384xf32>
      %108 = arith.addf %107, %106 : vector<16x384xf32>
      %109 = arith.divf %107, %108 : vector<16x384xf32>
      %110 = vector.extract_strided_slice %109 {offsets = [0, 0], sizes = [16, 128], strides = [1, 1]} : vector<16x384xf32> to vector<16x128xf32>
      %111 = vector.extract_strided_slice %109 {offsets = [0, 128], sizes = [16, 128], strides = [1, 1]} : vector<16x384xf32> to vector<16x128xf32>
      %112 = vector.extract_strided_slice %109 {offsets = [0, 256], sizes = [16, 128], strides = [1, 1]} : vector<16x384xf32> to vector<16x128xf32>
      %113 = vector.extract_strided_slice %103 {offsets = [0, 384], sizes = [16, 128], strides = [1, 1]} : vector<16x512xf32> to vector<16x128xf32>
      %114 = math.tanh %113 : vector<16x128xf32>
      %115 = arith.mulf %111, %28 : vector<16x128xf32>
      %116 = arith.mulf %110, %114 : vector<16x128xf32>
      %117 = arith.addf %115, %116 : vector<16x128xf32>
      %118 = math.tanh %117 : vector<16x128xf32>
      %119 = arith.mulf %112, %118 : vector<16x128xf32>
      %c2_i32_56 = arith.constant 2 : i32
      %120 = arith.subi %c2_i32, %c2_i32_56 : i32
      %121 = arith.truncf %119 : vector<16x128xf32> to vector<16x128xbf16>
      %c16_i32 = arith.constant 16 : i32
      %122 = arith.muli %120, %c16_i32 : i32
      %123 = tpu.assume_multiple %122, 16 : i32
      %124 = arith.index_cast %123 : i32 to index
      %c0_57 = arith.constant 0 : index
      %125 = vector.load %arg17[%124, %c0_57] : memref<128x128xbf16, #tpu.memory_space<vmem>>, vector<16x128xbf16>
      tpu.vector_store %arg17[%124, %c0_57], %121 {strides = array<i32>} : memref<128x128xbf16, #tpu.memory_space<vmem>>, vector<16x128xbf16>,
      %126 = arith.truncf %73 : vector<16x128xf32> to vector<16x128xbf16>
      %127 = tpu.concatenate %96, %126 in 1 : vector<16x128xbf16>, vector<16x128xbf16> -> vector<16x256xbf16>
      %c0_58 = arith.constant 0 : index
      %c0_59 = arith.constant 0 : index
      %128 = vector.load %arg7[%c0_58, %c0_59] : memref<256x512xbf16, #tpu.memory_space<vmem>>, vector<256x512xbf16>
      %cst_60 = arith.constant dense<0.000000e+00> : vector<16x512xf32>
      %129 = tpu.matmul %127, %128, %cst_60 {dimension_numbers = #tpu.dot_dimension_numbers<[1], [0], [0], [1], [0, 0, 1, 1], [], []>} : vector<16x256xbf16>, vector<256x512xbf16>, vector<16x512xf32> -> vector<16x512xf32>
      %c0_61 = arith.constant 0 : index
      %c0_62 = arith.constant 0 : index
      %130 = vector.load %arg8[%c0_61, %c0_62] : memref<1x512xf32, #tpu.memory_space<vmem>>, vector<1x512xf32>
      %131 = vector.broadcast %130 : vector<1x512xf32> to vector<16x512xf32>
      %132 = arith.addf %129, %131 : vector<16x512xf32>
      %133 = vector.extract_strided_slice %132 {offsets = [0, 0], sizes = [16, 384], strides = [1, 1]} : vector<16x512xf32> to vector<16x384xf32>
      %134 = arith.negf %133 : vector<16x384xf32>
      %135 = math.exp %134 : vector<16x384xf32>
      %cst_63 = arith.constant 1.000000e+00 : f32
      %136 = vector.broadcast %cst_63 : f32 to vector<16x384xf32>
      %137 = arith.addf %136, %135 : vector<16x384xf32>
      %138 = arith.divf %136, %137 : vector<16x384xf32>
      %139 = vector.extract_strided_slice %138 {offsets = [0, 0], sizes = [16, 128], strides = [1, 1]} : vector<16x384xf32> to vector<16x128xf32>
      %140 = vector.extract_strided_slice %138 {offsets = [0, 128], sizes = [16, 128], strides = [1, 1]} : vector<16x384xf32> to vector<16x128xf32>
      %141 = vector.extract_strided_slice %138 {offsets = [0, 256], sizes = [16, 128], strides = [1, 1]} : vector<16x384xf32> to vector<16x128xf32>
      %142 = vector.extract_strided_slice %132 {offsets = [0, 384], sizes = [16, 128], strides = [1, 1]} : vector<16x512xf32> to vector<16x128xf32>
      %143 = math.tanh %142 : vector<16x128xf32>
      %144 = arith.mulf %140, %71 : vector<16x128xf32>
      %145 = arith.mulf %139, %143 : vector<16x128xf32>
      %146 = arith.addf %144, %145 : vector<16x128xf32>
      %147 = math.tanh %146 : vector<16x128xf32>
      %148 = arith.mulf %141, %147 : vector<16x128xf32>
      %c16_i32_64 = arith.constant 16 : i32
      %149 = arith.muli %c2_i32, %c16_i32_64 : i32
      %150 = tpu.assume_multiple %149, 16 : i32
      %151 = arith.index_cast %150 : i32 to index
      %c0_65 = arith.constant 0 : index
      %152 = vector.load %arg16[%151, %c0_65] : memref<128x512xf32, #tpu.memory_space<vmem>>, vector<16x512xf32>
      %153 = arith.truncf %95 : vector<16x128xf32> to vector<16x128xbf16>
      %c0_66 = arith.constant 0 : index
      %c0_67 = arith.constant 0 : index
      %154 = vector.load %arg5[%c0_66, %c0_67] : memref<128x512xbf16, #tpu.memory_space<vmem>>, vector<128x512xbf16>
      %cst_68 = arith.constant dense<0.000000e+00> : vector<16x512xf32>
      %155 = tpu.matmul %153, %154, %cst_68 {dimension_numbers = #tpu.dot_dimension_numbers<[1], [0], [0], [1], [0, 0, 1, 1], [], []>} : vector<16x128xbf16>, vector<128x512xbf16>, vector<16x512xf32> -> vector<16x512xf32>
      %156 = arith.addf %152, %155 : vector<16x512xf32>
      %157 = vector.extract_strided_slice %156 {offsets = [0, 0], sizes = [16, 384], strides = [1, 1]} : vector<16x512xf32> to vector<16x384xf32>
      %158 = arith.negf %157 : vector<16x384xf32>
      %159 = math.exp %158 : vector<16x384xf32>
      %cst_69 = arith.constant 1.000000e+00 : f32
      %160 = vector.broadcast %cst_69 : f32 to vector<16x384xf32>
      %161 = arith.addf %160, %159 : vector<16x384xf32>
      %162 = arith.divf %160, %161 : vector<16x384xf32>
      %163 = vector.extract_strided_slice %162 {offsets = [0, 0], sizes = [16, 128], strides = [1, 1]} : vector<16x384xf32> to vector<16x128xf32>
      %164 = vector.extract_strided_slice %162 {offsets = [0, 128], sizes = [16, 128], strides = [1, 1]} : vector<16x384xf32> to vector<16x128xf32>
      %165 = vector.extract_strided_slice %162 {offsets = [0, 256], sizes = [16, 128], strides = [1, 1]} : vector<16x384xf32> to vector<16x128xf32>
      %166 = vector.extract_strided_slice %156 {offsets = [0, 384], sizes = [16, 128], strides = [1, 1]} : vector<16x512xf32> to vector<16x128xf32>
      %167 = math.tanh %166 : vector<16x128xf32>
      %168 = arith.mulf %164, %93 : vector<16x128xf32>
      %169 = arith.mulf %163, %167 : vector<16x128xf32>
      %170 = arith.addf %168, %169 : vector<16x128xf32>
      %171 = math.tanh %170 : vector<16x128xf32>
      %172 = arith.mulf %165, %171 : vector<16x128xf32>
      %173 = arith.truncf %172 : vector<16x128xf32> to vector<16x128xbf16>
      %174 = arith.truncf %148 : vector<16x128xf32> to vector<16x128xbf16>
      %c3_i32 = arith.constant 3 : i32
      %175 = arith.truncf %119 : vector<16x128xf32> to vector<16x128xbf16>
      %176 = tpu.concatenate %174, %175 in 1 : vector<16x128xbf16>, vector<16x128xbf16> -> vector<16x256xbf16>
      %c0_70 = arith.constant 0 : index
      %c0_71 = arith.constant 0 : index
      %177 = vector.load %arg9[%c0_70, %c0_71] : memref<256x512xbf16, #tpu.memory_space<vmem>>, vector<256x512xbf16>
      %cst_72 = arith.constant dense<0.000000e+00> : vector<16x512xf32>
      %178 = tpu.matmul %176, %177, %cst_72 {dimension_numbers = #tpu.dot_dimension_numbers<[1], [0], [0], [1], [0, 0, 1, 1], [], []>} : vector<16x256xbf16>, vector<256x512xbf16>, vector<16x512xf32> -> vector<16x512xf32>
      %c0_73 = arith.constant 0 : index
      %c0_74 = arith.constant 0 : index
      %179 = vector.load %arg10[%c0_73, %c0_74] : memref<1x512xf32, #tpu.memory_space<vmem>>, vector<1x512xf32>
      %180 = vector.broadcast %179 : vector<1x512xf32> to vector<16x512xf32>
      %181 = arith.addf %178, %180 : vector<16x512xf32>
      %182 = vector.extract_strided_slice %181 {offsets = [0, 0], sizes = [16, 384], strides = [1, 1]} : vector<16x512xf32> to vector<16x384xf32>
      %183 = arith.negf %182 : vector<16x384xf32>
      %184 = math.exp %183 : vector<16x384xf32>
      %cst_75 = arith.constant 1.000000e+00 : f32
      %185 = vector.broadcast %cst_75 : f32 to vector<16x384xf32>
      %186 = arith.addf %185, %184 : vector<16x384xf32>
      %187 = arith.divf %185, %186 : vector<16x384xf32>
      %188 = vector.extract_strided_slice %187 {offsets = [0, 0], sizes = [16, 128], strides = [1, 1]} : vector<16x384xf32> to vector<16x128xf32>
      %189 = vector.extract_strided_slice %187 {offsets = [0, 128], sizes = [16, 128], strides = [1, 1]} : vector<16x384xf32> to vector<16x128xf32>
      %190 = vector.extract_strided_slice %187 {offsets = [0, 256], sizes = [16, 128], strides = [1, 1]} : vector<16x384xf32> to vector<16x128xf32>
      %191 = vector.extract_strided_slice %181 {offsets = [0, 384], sizes = [16, 128], strides = [1, 1]} : vector<16x512xf32> to vector<16x128xf32>
      %192 = math.tanh %191 : vector<16x128xf32>
      %193 = arith.mulf %189, %117 : vector<16x128xf32>
      %194 = arith.mulf %188, %192 : vector<16x128xf32>
      %195 = arith.addf %193, %194 : vector<16x128xf32>
      %196 = math.tanh %195 : vector<16x128xf32>
      %197 = arith.mulf %190, %196 : vector<16x128xf32>
      %c2_i32_76 = arith.constant 2 : i32
      %198 = arith.subi %c3_i32, %c2_i32_76 : i32
      %199 = arith.truncf %197 : vector<16x128xf32> to vector<16x128xbf16>
      %c16_i32_77 = arith.constant 16 : i32
      %200 = arith.muli %198, %c16_i32_77 : i32
      %201 = tpu.assume_multiple %200, 16 : i32
      %202 = arith.index_cast %201 : i32 to index
      %c0_78 = arith.constant 0 : index
      %203 = vector.load %arg17[%202, %c0_78] : memref<128x128xbf16, #tpu.memory_space<vmem>>, vector<16x128xbf16>
      tpu.vector_store %arg17[%202, %c0_78], %199 {strides = array<i32>} : memref<128x128xbf16, #tpu.memory_space<vmem>>, vector<16x128xbf16>,
      %204 = arith.truncf %148 : vector<16x128xf32> to vector<16x128xbf16>
      %205 = tpu.concatenate %173, %204 in 1 : vector<16x128xbf16>, vector<16x128xbf16> -> vector<16x256xbf16>
      %c0_79 = arith.constant 0 : index
      %c0_80 = arith.constant 0 : index
      %206 = vector.load %arg7[%c0_79, %c0_80] : memref<256x512xbf16, #tpu.memory_space<vmem>>, vector<256x512xbf16>
      %cst_81 = arith.constant dense<0.000000e+00> : vector<16x512xf32>
      %207 = tpu.matmul %205, %206, %cst_81 {dimension_numbers = #tpu.dot_dimension_numbers<[1], [0], [0], [1], [0, 0, 1, 1], [], []>} : vector<16x256xbf16>, vector<256x512xbf16>, vector<16x512xf32> -> vector<16x512xf32>
      %c0_82 = arith.constant 0 : index
      %c0_83 = arith.constant 0 : index
      %208 = vector.load %arg8[%c0_82, %c0_83] : memref<1x512xf32, #tpu.memory_space<vmem>>, vector<1x512xf32>
      %209 = vector.broadcast %208 : vector<1x512xf32> to vector<16x512xf32>
      %210 = arith.addf %207, %209 : vector<16x512xf32>
      %211 = vector.extract_strided_slice %210 {offsets = [0, 0], sizes = [16, 384], strides = [1, 1]} : vector<16x512xf32> to vector<16x384xf32>
      %212 = arith.negf %211 : vector<16x384xf32>
      %213 = math.exp %212 : vector<16x384xf32>
      %cst_84 = arith.constant 1.000000e+00 : f32
      %214 = vector.broadcast %cst_84 : f32 to vector<16x384xf32>
      %215 = arith.addf %214, %213 : vector<16x384xf32>
      %216 = arith.divf %214, %215 : vector<16x384xf32>
      %217 = vector.extract_strided_slice %216 {offsets = [0, 0], sizes = [16, 128], strides = [1, 1]} : vector<16x384xf32> to vector<16x128xf32>
      %218 = vector.extract_strided_slice %216 {offsets = [0, 128], sizes = [16, 128], strides = [1, 1]} : vector<16x384xf32> to vector<16x128xf32>
      %219 = vector.extract_strided_slice %216 {offsets = [0, 256], sizes = [16, 128], strides = [1, 1]} : vector<16x384xf32> to vector<16x128xf32>
      %220 = vector.extract_strided_slice %210 {offsets = [0, 384], sizes = [16, 128], strides = [1, 1]} : vector<16x512xf32> to vector<16x128xf32>
      %221 = math.tanh %220 : vector<16x128xf32>
      %222 = arith.mulf %218, %146 : vector<16x128xf32>
      %223 = arith.mulf %217, %221 : vector<16x128xf32>
      %224 = arith.addf %222, %223 : vector<16x128xf32>
      %225 = math.tanh %224 : vector<16x128xf32>
      %226 = arith.mulf %219, %225 : vector<16x128xf32>
      %c16_i32_85 = arith.constant 16 : i32
      %227 = arith.muli %c3_i32, %c16_i32_85 : i32
      %228 = tpu.assume_multiple %227, 16 : i32
      %229 = arith.index_cast %228 : i32 to index
      %c0_86 = arith.constant 0 : index
      %230 = vector.load %arg16[%229, %c0_86] : memref<128x512xf32, #tpu.memory_space<vmem>>, vector<16x512xf32>
      %231 = arith.truncf %172 : vector<16x128xf32> to vector<16x128xbf16>
      %c0_87 = arith.constant 0 : index
      %c0_88 = arith.constant 0 : index
      %232 = vector.load %arg5[%c0_87, %c0_88] : memref<128x512xbf16, #tpu.memory_space<vmem>>, vector<128x512xbf16>
      %cst_89 = arith.constant dense<0.000000e+00> : vector<16x512xf32>
      %233 = tpu.matmul %231, %232, %cst_89 {dimension_numbers = #tpu.dot_dimension_numbers<[1], [0], [0], [1], [0, 0, 1, 1], [], []>} : vector<16x128xbf16>, vector<128x512xbf16>, vector<16x512xf32> -> vector<16x512xf32>
      %234 = arith.addf %230, %233 : vector<16x512xf32>
      %235 = vector.extract_strided_slice %234 {offsets = [0, 0], sizes = [16, 384], strides = [1, 1]} : vector<16x512xf32> to vector<16x384xf32>
      %236 = arith.negf %235 : vector<16x384xf32>
      %237 = math.exp %236 : vector<16x384xf32>
      %cst_90 = arith.constant 1.000000e+00 : f32
      %238 = vector.broadcast %cst_90 : f32 to vector<16x384xf32>
      %239 = arith.addf %238, %237 : vector<16x384xf32>
      %240 = arith.divf %238, %239 : vector<16x384xf32>
      %241 = vector.extract_strided_slice %240 {offsets = [0, 0], sizes = [16, 128], strides = [1, 1]} : vector<16x384xf32> to vector<16x128xf32>
      %242 = vector.extract_strided_slice %240 {offsets = [0, 128], sizes = [16, 128], strides = [1, 1]} : vector<16x384xf32> to vector<16x128xf32>
      %243 = vector.extract_strided_slice %240 {offsets = [0, 256], sizes = [16, 128], strides = [1, 1]} : vector<16x384xf32> to vector<16x128xf32>
      %244 = vector.extract_strided_slice %234 {offsets = [0, 384], sizes = [16, 128], strides = [1, 1]} : vector<16x512xf32> to vector<16x128xf32>
      %245 = math.tanh %244 : vector<16x128xf32>
      %246 = arith.mulf %242, %170 : vector<16x128xf32>
      %247 = arith.mulf %241, %245 : vector<16x128xf32>
      %248 = arith.addf %246, %247 : vector<16x128xf32>
      %249 = math.tanh %248 : vector<16x128xf32>
      %250 = arith.mulf %243, %249 : vector<16x128xf32>
      %251 = arith.truncf %250 : vector<16x128xf32> to vector<16x128xbf16>
      %252 = arith.truncf %226 : vector<16x128xf32> to vector<16x128xbf16>
      %c4_i32 = arith.constant 4 : i32
      %253 = arith.truncf %197 : vector<16x128xf32> to vector<16x128xbf16>
      %254 = tpu.concatenate %252, %253 in 1 : vector<16x128xbf16>, vector<16x128xbf16> -> vector<16x256xbf16>
      %c0_91 = arith.constant 0 : index
      %c0_92 = arith.constant 0 : index
      %255 = vector.load %arg9[%c0_91, %c0_92] : memref<256x512xbf16, #tpu.memory_space<vmem>>, vector<256x512xbf16>
      %cst_93 = arith.constant dense<0.000000e+00> : vector<16x512xf32>
      %256 = tpu.matmul %254, %255, %cst_93 {dimension_numbers = #tpu.dot_dimension_numbers<[1], [0], [0], [1], [0, 0, 1, 1], [], []>} : vector<16x256xbf16>, vector<256x512xbf16>, vector<16x512xf32> -> vector<16x512xf32>
      %c0_94 = arith.constant 0 : index
      %c0_95 = arith.constant 0 : index
      %257 = vector.load %arg10[%c0_94, %c0_95] : memref<1x512xf32, #tpu.memory_space<vmem>>, vector<1x512xf32>
      %258 = vector.broadcast %257 : vector<1x512xf32> to vector<16x512xf32>
      %259 = arith.addf %256, %258 : vector<16x512xf32>
      %260 = vector.extract_strided_slice %259 {offsets = [0, 0], sizes = [16, 384], strides = [1, 1]} : vector<16x512xf32> to vector<16x384xf32>
      %261 = arith.negf %260 : vector<16x384xf32>
      %262 = math.exp %261 : vector<16x384xf32>
      %cst_96 = arith.constant 1.000000e+00 : f32
      %263 = vector.broadcast %cst_96 : f32 to vector<16x384xf32>
      %264 = arith.addf %263, %262 : vector<16x384xf32>
      %265 = arith.divf %263, %264 : vector<16x384xf32>
      %266 = vector.extract_strided_slice %265 {offsets = [0, 0], sizes = [16, 128], strides = [1, 1]} : vector<16x384xf32> to vector<16x128xf32>
      %267 = vector.extract_strided_slice %265 {offsets = [0, 128], sizes = [16, 128], strides = [1, 1]} : vector<16x384xf32> to vector<16x128xf32>
      %268 = vector.extract_strided_slice %265 {offsets = [0, 256], sizes = [16, 128], strides = [1, 1]} : vector<16x384xf32> to vector<16x128xf32>
      %269 = vector.extract_strided_slice %259 {offsets = [0, 384], sizes = [16, 128], strides = [1, 1]} : vector<16x512xf32> to vector<16x128xf32>
      %270 = math.tanh %269 : vector<16x128xf32>
      %271 = arith.mulf %267, %195 : vector<16x128xf32>
      %272 = arith.mulf %266, %270 : vector<16x128xf32>
      %273 = arith.addf %271, %272 : vector<16x128xf32>
      %274 = math.tanh %273 : vector<16x128xf32>
      %275 = arith.mulf %268, %274 : vector<16x128xf32>
      %c2_i32_97 = arith.constant 2 : i32
      %276 = arith.subi %c4_i32, %c2_i32_97 : i32
      %277 = arith.truncf %275 : vector<16x128xf32> to vector<16x128xbf16>
      %c16_i32_98 = arith.constant 16 : i32
      %278 = arith.muli %276, %c16_i32_98 : i32
      %279 = tpu.assume_multiple %278, 16 : i32
      %280 = arith.index_cast %279 : i32 to index
      %c0_99 = arith.constant 0 : index
      %281 = vector.load %arg17[%280, %c0_99] : memref<128x128xbf16, #tpu.memory_space<vmem>>, vector<16x128xbf16>
      tpu.vector_store %arg17[%280, %c0_99], %277 {strides = array<i32>} : memref<128x128xbf16, #tpu.memory_space<vmem>>, vector<16x128xbf16>,
      %282 = arith.truncf %226 : vector<16x128xf32> to vector<16x128xbf16>
      %283 = tpu.concatenate %251, %282 in 1 : vector<16x128xbf16>, vector<16x128xbf16> -> vector<16x256xbf16>
      %c0_100 = arith.constant 0 : index
      %c0_101 = arith.constant 0 : index
      %284 = vector.load %arg7[%c0_100, %c0_101] : memref<256x512xbf16, #tpu.memory_space<vmem>>, vector<256x512xbf16>
      %cst_102 = arith.constant dense<0.000000e+00> : vector<16x512xf32>
      %285 = tpu.matmul %283, %284, %cst_102 {dimension_numbers = #tpu.dot_dimension_numbers<[1], [0], [0], [1], [0, 0, 1, 1], [], []>} : vector<16x256xbf16>, vector<256x512xbf16>, vector<16x512xf32> -> vector<16x512xf32>
      %c0_103 = arith.constant 0 : index
      %c0_104 = arith.constant 0 : index
      %286 = vector.load %arg8[%c0_103, %c0_104] : memref<1x512xf32, #tpu.memory_space<vmem>>, vector<1x512xf32>
      %287 = vector.broadcast %286 : vector<1x512xf32> to vector<16x512xf32>
      %288 = arith.addf %285, %287 : vector<16x512xf32>
      %289 = vector.extract_strided_slice %288 {offsets = [0, 0], sizes = [16, 384], strides = [1, 1]} : vector<16x512xf32> to vector<16x384xf32>
      %290 = arith.negf %289 : vector<16x384xf32>
      %291 = math.exp %290 : vector<16x384xf32>
      %cst_105 = arith.constant 1.000000e+00 : f32
      %292 = vector.broadcast %cst_105 : f32 to vector<16x384xf32>
      %293 = arith.addf %292, %291 : vector<16x384xf32>
      %294 = arith.divf %292, %293 : vector<16x384xf32>
      %295 = vector.extract_strided_slice %294 {offsets = [0, 0], sizes = [16, 128], strides = [1, 1]} : vector<16x384xf32> to vector<16x128xf32>
      %296 = vector.extract_strided_slice %294 {offsets = [0, 128], sizes = [16, 128], strides = [1, 1]} : vector<16x384xf32> to vector<16x128xf32>
      %297 = vector.extract_strided_slice %294 {offsets = [0, 256], sizes = [16, 128], strides = [1, 1]} : vector<16x384xf32> to vector<16x128xf32>
      %298 = vector.extract_strided_slice %288 {offsets = [0, 384], sizes = [16, 128], strides = [1, 1]} : vector<16x512xf32> to vector<16x128xf32>
      %299 = math.tanh %298 : vector<16x128xf32>
      %300 = arith.mulf %296, %224 : vector<16x128xf32>
      %301 = arith.mulf %295, %299 : vector<16x128xf32>
      %302 = arith.addf %300, %301 : vector<16x128xf32>
      %303 = math.tanh %302 : vector<16x128xf32>
      %304 = arith.mulf %297, %303 : vector<16x128xf32>
      %c16_i32_106 = arith.constant 16 : i32
      %305 = arith.muli %c4_i32, %c16_i32_106 : i32
      %306 = tpu.assume_multiple %305, 16 : i32
      %307 = arith.index_cast %306 : i32 to index
      %c0_107 = arith.constant 0 : index
      %308 = vector.load %arg16[%307, %c0_107] : memref<128x512xf32, #tpu.memory_space<vmem>>, vector<16x512xf32>
      %309 = arith.truncf %250 : vector<16x128xf32> to vector<16x128xbf16>
      %c0_108 = arith.constant 0 : index
      %c0_109 = arith.constant 0 : index
      %310 = vector.load %arg5[%c0_108, %c0_109] : memref<128x512xbf16, #tpu.memory_space<vmem>>, vector<128x512xbf16>
      %cst_110 = arith.constant dense<0.000000e+00> : vector<16x512xf32>
      %311 = tpu.matmul %309, %310, %cst_110 {dimension_numbers = #tpu.dot_dimension_numbers<[1], [0], [0], [1], [0, 0, 1, 1], [], []>} : vector<16x128xbf16>, vector<128x512xbf16>, vector<16x512xf32> -> vector<16x512xf32>
      %312 = arith.addf %308, %311 : vector<16x512xf32>
      %313 = vector.extract_strided_slice %312 {offsets = [0, 0], sizes = [16, 384], strides = [1, 1]} : vector<16x512xf32> to vector<16x384xf32>
      %314 = arith.negf %313 : vector<16x384xf32>
      %315 = math.exp %314 : vector<16x384xf32>
      %cst_111 = arith.constant 1.000000e+00 : f32
      %316 = vector.broadcast %cst_111 : f32 to vector<16x384xf32>
      %317 = arith.addf %316, %315 : vector<16x384xf32>
      %318 = arith.divf %316, %317 : vector<16x384xf32>
      %319 = vector.extract_strided_slice %318 {offsets = [0, 0], sizes = [16, 128], strides = [1, 1]} : vector<16x384xf32> to vector<16x128xf32>
      %320 = vector.extract_strided_slice %318 {offsets = [0, 128], sizes = [16, 128], strides = [1, 1]} : vector<16x384xf32> to vector<16x128xf32>
      %321 = vector.extract_strided_slice %318 {offsets = [0, 256], sizes = [16, 128], strides = [1, 1]} : vector<16x384xf32> to vector<16x128xf32>
      %322 = vector.extract_strided_slice %312 {offsets = [0, 384], sizes = [16, 128], strides = [1, 1]} : vector<16x512xf32> to vector<16x128xf32>
      %323 = math.tanh %322 : vector<16x128xf32>
      %324 = arith.mulf %320, %248 : vector<16x128xf32>
      %325 = arith.mulf %319, %323 : vector<16x128xf32>
      %326 = arith.addf %324, %325 : vector<16x128xf32>
      %327 = math.tanh %326 : vector<16x128xf32>
      %328 = arith.mulf %321, %327 : vector<16x128xf32>
      %329 = arith.truncf %328 : vector<16x128xf32> to vector<16x128xbf16>
      %330 = arith.truncf %304 : vector<16x128xf32> to vector<16x128xbf16>
      %c5_i32 = arith.constant 5 : i32
      %331 = arith.truncf %275 : vector<16x128xf32> to vector<16x128xbf16>
      %332 = tpu.concatenate %330, %331 in 1 : vector<16x128xbf16>, vector<16x128xbf16> -> vector<16x256xbf16>
      %c0_112 = arith.constant 0 : index
      %c0_113 = arith.constant 0 : index
      %333 = vector.load %arg9[%c0_112, %c0_113] : memref<256x512xbf16, #tpu.memory_space<vmem>>, vector<256x512xbf16>
      %cst_114 = arith.constant dense<0.000000e+00> : vector<16x512xf32>
      %334 = tpu.matmul %332, %333, %cst_114 {dimension_numbers = #tpu.dot_dimension_numbers<[1], [0], [0], [1], [0, 0, 1, 1], [], []>} : vector<16x256xbf16>, vector<256x512xbf16>, vector<16x512xf32> -> vector<16x512xf32>
      %c0_115 = arith.constant 0 : index
      %c0_116 = arith.constant 0 : index
      %335 = vector.load %arg10[%c0_115, %c0_116] : memref<1x512xf32, #tpu.memory_space<vmem>>, vector<1x512xf32>
      %336 = vector.broadcast %335 : vector<1x512xf32> to vector<16x512xf32>
      %337 = arith.addf %334, %336 : vector<16x512xf32>
      %338 = vector.extract_strided_slice %337 {offsets = [0, 0], sizes = [16, 384], strides = [1, 1]} : vector<16x512xf32> to vector<16x384xf32>
      %339 = arith.negf %338 : vector<16x384xf32>
      %340 = math.exp %339 : vector<16x384xf32>
      %cst_117 = arith.constant 1.000000e+00 : f32
      %341 = vector.broadcast %cst_117 : f32 to vector<16x384xf32>
      %342 = arith.addf %341, %340 : vector<16x384xf32>
      %343 = arith.divf %341, %342 : vector<16x384xf32>
      %344 = vector.extract_strided_slice %343 {offsets = [0, 0], sizes = [16, 128], strides = [1, 1]} : vector<16x384xf32> to vector<16x128xf32>
      %345 = vector.extract_strided_slice %343 {offsets = [0, 128], sizes = [16, 128], strides = [1, 1]} : vector<16x384xf32> to vector<16x128xf32>
      %346 = vector.extract_strided_slice %343 {offsets = [0, 256], sizes = [16, 128], strides = [1, 1]} : vector<16x384xf32> to vector<16x128xf32>
      %347 = vector.extract_strided_slice %337 {offsets = [0, 384], sizes = [16, 128], strides = [1, 1]} : vector<16x512xf32> to vector<16x128xf32>
      %348 = math.tanh %347 : vector<16x128xf32>
      %349 = arith.mulf %345, %273 : vector<16x128xf32>
      %350 = arith.mulf %344, %348 : vector<16x128xf32>
      %351 = arith.addf %349, %350 : vector<16x128xf32>
      %352 = math.tanh %351 : vector<16x128xf32>
      %353 = arith.mulf %346, %352 : vector<16x128xf32>
      %c2_i32_118 = arith.constant 2 : i32
      %354 = arith.subi %c5_i32, %c2_i32_118 : i32
      %355 = arith.truncf %353 : vector<16x128xf32> to vector<16x128xbf16>
      %c16_i32_119 = arith.constant 16 : i32
      %356 = arith.muli %354, %c16_i32_119 : i32
      %357 = tpu.assume_multiple %356, 16 : i32
      %358 = arith.index_cast %357 : i32 to index
      %c0_120 = arith.constant 0 : index
      %359 = vector.load %arg17[%358, %c0_120] : memref<128x128xbf16, #tpu.memory_space<vmem>>, vector<16x128xbf16>
      tpu.vector_store %arg17[%358, %c0_120], %355 {strides = array<i32>} : memref<128x128xbf16, #tpu.memory_space<vmem>>, vector<16x128xbf16>,
      %360 = arith.truncf %304 : vector<16x128xf32> to vector<16x128xbf16>
      %361 = tpu.concatenate %329, %360 in 1 : vector<16x128xbf16>, vector<16x128xbf16> -> vector<16x256xbf16>
      %c0_121 = arith.constant 0 : index
      %c0_122 = arith.constant 0 : index
      %362 = vector.load %arg7[%c0_121, %c0_122] : memref<256x512xbf16, #tpu.memory_space<vmem>>, vector<256x512xbf16>
      %cst_123 = arith.constant dense<0.000000e+00> : vector<16x512xf32>
      %363 = tpu.matmul %361, %362, %cst_123 {dimension_numbers = #tpu.dot_dimension_numbers<[1], [0], [0], [1], [0, 0, 1, 1], [], []>} : vector<16x256xbf16>, vector<256x512xbf16>, vector<16x512xf32> -> vector<16x512xf32>
      %c0_124 = arith.constant 0 : index
      %c0_125 = arith.constant 0 : index
      %364 = vector.load %arg8[%c0_124, %c0_125] : memref<1x512xf32, #tpu.memory_space<vmem>>, vector<1x512xf32>
      %365 = vector.broadcast %364 : vector<1x512xf32> to vector<16x512xf32>
      %366 = arith.addf %363, %365 : vector<16x512xf32>
      %367 = vector.extract_strided_slice %366 {offsets = [0, 0], sizes = [16, 384], strides = [1, 1]} : vector<16x512xf32> to vector<16x384xf32>
      %368 = arith.negf %367 : vector<16x384xf32>
      %369 = math.exp %368 : vector<16x384xf32>
      %cst_126 = arith.constant 1.000000e+00 : f32
      %370 = vector.broadcast %cst_126 : f32 to vector<16x384xf32>
      %371 = arith.addf %370, %369 : vector<16x384xf32>
      %372 = arith.divf %370, %371 : vector<16x384xf32>
      %373 = vector.extract_strided_slice %372 {offsets = [0, 0], sizes = [16, 128], strides = [1, 1]} : vector<16x384xf32> to vector<16x128xf32>
      %374 = vector.extract_strided_slice %372 {offsets = [0, 128], sizes = [16, 128], strides = [1, 1]} : vector<16x384xf32> to vector<16x128xf32>
      %375 = vector.extract_strided_slice %372 {offsets = [0, 256], sizes = [16, 128], strides = [1, 1]} : vector<16x384xf32> to vector<16x128xf32>
      %376 = vector.extract_strided_slice %366 {offsets = [0, 384], sizes = [16, 128], strides = [1, 1]} : vector<16x512xf32> to vector<16x128xf32>
      %377 = math.tanh %376 : vector<16x128xf32>
      %378 = arith.mulf %374, %302 : vector<16x128xf32>
      %379 = arith.mulf %373, %377 : vector<16x128xf32>
      %380 = arith.addf %378, %379 : vector<16x128xf32>
      %381 = math.tanh %380 : vector<16x128xf32>
      %382 = arith.mulf %375, %381 : vector<16x128xf32>
      %c16_i32_127 = arith.constant 16 : i32
      %383 = arith.muli %c5_i32, %c16_i32_127 : i32
      %384 = tpu.assume_multiple %383, 16 : i32
      %385 = arith.index_cast %384 : i32 to index
      %c0_128 = arith.constant 0 : index
      %386 = vector.load %arg16[%385, %c0_128] : memref<128x512xf32, #tpu.memory_space<vmem>>, vector<16x512xf32>
      %387 = arith.truncf %328 : vector<16x128xf32> to vector<16x128xbf16>
      %c0_129 = arith.constant 0 : index
      %c0_130 = arith.constant 0 : index
      %388 = vector.load %arg5[%c0_129, %c0_130] : memref<128x512xbf16, #tpu.memory_space<vmem>>, vector<128x512xbf16>
      %cst_131 = arith.constant dense<0.000000e+00> : vector<16x512xf32>
      %389 = tpu.matmul %387, %388, %cst_131 {dimension_numbers = #tpu.dot_dimension_numbers<[1], [0], [0], [1], [0, 0, 1, 1], [], []>} : vector<16x128xbf16>, vector<128x512xbf16>, vector<16x512xf32> -> vector<16x512xf32>
      %390 = arith.addf %386, %389 : vector<16x512xf32>
      %391 = vector.extract_strided_slice %390 {offsets = [0, 0], sizes = [16, 384], strides = [1, 1]} : vector<16x512xf32> to vector<16x384xf32>
      %392 = arith.negf %391 : vector<16x384xf32>
      %393 = math.exp %392 : vector<16x384xf32>
      %cst_132 = arith.constant 1.000000e+00 : f32
      %394 = vector.broadcast %cst_132 : f32 to vector<16x384xf32>
      %395 = arith.addf %394, %393 : vector<16x384xf32>
      %396 = arith.divf %394, %395 : vector<16x384xf32>
      %397 = vector.extract_strided_slice %396 {offsets = [0, 0], sizes = [16, 128], strides = [1, 1]} : vector<16x384xf32> to vector<16x128xf32>
      %398 = vector.extract_strided_slice %396 {offsets = [0, 128], sizes = [16, 128], strides = [1, 1]} : vector<16x384xf32> to vector<16x128xf32>
      %399 = vector.extract_strided_slice %396 {offsets = [0, 256], sizes = [16, 128], strides = [1, 1]} : vector<16x384xf32> to vector<16x128xf32>
      %400 = vector.extract_strided_slice %390 {offsets = [0, 384], sizes = [16, 128], strides = [1, 1]} : vector<16x512xf32> to vector<16x128xf32>
      %401 = math.tanh %400 : vector<16x128xf32>
      %402 = arith.mulf %398, %326 : vector<16x128xf32>
      %403 = arith.mulf %397, %401 : vector<16x128xf32>
      %404 = arith.addf %402, %403 : vector<16x128xf32>
      %405 = math.tanh %404 : vector<16x128xf32>
      %406 = arith.mulf %399, %405 : vector<16x128xf32>
      %407 = arith.truncf %406 : vector<16x128xf32> to vector<16x128xbf16>
      %408 = arith.truncf %382 : vector<16x128xf32> to vector<16x128xbf16>
      %c6_i32 = arith.constant 6 : i32
      %409 = arith.truncf %353 : vector<16x128xf32> to vector<16x128xbf16>
      %410 = tpu.concatenate %408, %409 in 1 : vector<16x128xbf16>, vector<16x128xbf16> -> vector<16x256xbf16>
      %c0_133 = arith.constant 0 : index
      %c0_134 = arith.constant 0 : index
      %411 = vector.load %arg9[%c0_133, %c0_134] : memref<256x512xbf16, #tpu.memory_space<vmem>>, vector<256x512xbf16>
      %cst_135 = arith.constant dense<0.000000e+00> : vector<16x512xf32>
      %412 = tpu.matmul %410, %411, %cst_135 {dimension_numbers = #tpu.dot_dimension_numbers<[1], [0], [0], [1], [0, 0, 1, 1], [], []>} : vector<16x256xbf16>, vector<256x512xbf16>, vector<16x512xf32> -> vector<16x512xf32>
      %c0_136 = arith.constant 0 : index
      %c0_137 = arith.constant 0 : index
      %413 = vector.load %arg10[%c0_136, %c0_137] : memref<1x512xf32, #tpu.memory_space<vmem>>, vector<1x512xf32>
      %414 = vector.broadcast %413 : vector<1x512xf32> to vector<16x512xf32>
      %415 = arith.addf %412, %414 : vector<16x512xf32>
      %416 = vector.extract_strided_slice %415 {offsets = [0, 0], sizes = [16, 384], strides = [1, 1]} : vector<16x512xf32> to vector<16x384xf32>
      %417 = arith.negf %416 : vector<16x384xf32>
      %418 = math.exp %417 : vector<16x384xf32>
      %cst_138 = arith.constant 1.000000e+00 : f32
      %419 = vector.broadcast %cst_138 : f32 to vector<16x384xf32>
      %420 = arith.addf %419, %418 : vector<16x384xf32>
      %421 = arith.divf %419, %420 : vector<16x384xf32>
      %422 = vector.extract_strided_slice %421 {offsets = [0, 0], sizes = [16, 128], strides = [1, 1]} : vector<16x384xf32> to vector<16x128xf32>
      %423 = vector.extract_strided_slice %421 {offsets = [0, 128], sizes = [16, 128], strides = [1, 1]} : vector<16x384xf32> to vector<16x128xf32>
      %424 = vector.extract_strided_slice %421 {offsets = [0, 256], sizes = [16, 128], strides = [1, 1]} : vector<16x384xf32> to vector<16x128xf32>
      %425 = vector.extract_strided_slice %415 {offsets = [0, 384], sizes = [16, 128], strides = [1, 1]} : vector<16x512xf32> to vector<16x128xf32>
      %426 = math.tanh %425 : vector<16x128xf32>
      %427 = arith.mulf %423, %351 : vector<16x128xf32>
      %428 = arith.mulf %422, %426 : vector<16x128xf32>
      %429 = arith.addf %427, %428 : vector<16x128xf32>
      %430 = math.tanh %429 : vector<16x128xf32>
      %431 = arith.mulf %424, %430 : vector<16x128xf32>
      %c2_i32_139 = arith.constant 2 : i32
      %432 = arith.subi %c6_i32, %c2_i32_139 : i32
      %433 = arith.truncf %431 : vector<16x128xf32> to vector<16x128xbf16>
      %c16_i32_140 = arith.constant 16 : i32
      %434 = arith.muli %432, %c16_i32_140 : i32
      %435 = tpu.assume_multiple %434, 16 : i32
      %436 = arith.index_cast %435 : i32 to index
      %c0_141 = arith.constant 0 : index
      %437 = vector.load %arg17[%436, %c0_141] : memref<128x128xbf16, #tpu.memory_space<vmem>>, vector<16x128xbf16>
      tpu.vector_store %arg17[%436, %c0_141], %433 {strides = array<i32>} : memref<128x128xbf16, #tpu.memory_space<vmem>>, vector<16x128xbf16>,
      %438 = arith.truncf %382 : vector<16x128xf32> to vector<16x128xbf16>
      %439 = tpu.concatenate %407, %438 in 1 : vector<16x128xbf16>, vector<16x128xbf16> -> vector<16x256xbf16>
      %c0_142 = arith.constant 0 : index
      %c0_143 = arith.constant 0 : index
      %440 = vector.load %arg7[%c0_142, %c0_143] : memref<256x512xbf16, #tpu.memory_space<vmem>>, vector<256x512xbf16>
      %cst_144 = arith.constant dense<0.000000e+00> : vector<16x512xf32>
      %441 = tpu.matmul %439, %440, %cst_144 {dimension_numbers = #tpu.dot_dimension_numbers<[1], [0], [0], [1], [0, 0, 1, 1], [], []>} : vector<16x256xbf16>, vector<256x512xbf16>, vector<16x512xf32> -> vector<16x512xf32>
      %c0_145 = arith.constant 0 : index
      %c0_146 = arith.constant 0 : index
      %442 = vector.load %arg8[%c0_145, %c0_146] : memref<1x512xf32, #tpu.memory_space<vmem>>, vector<1x512xf32>
      %443 = vector.broadcast %442 : vector<1x512xf32> to vector<16x512xf32>
      %444 = arith.addf %441, %443 : vector<16x512xf32>
      %445 = vector.extract_strided_slice %444 {offsets = [0, 0], sizes = [16, 384], strides = [1, 1]} : vector<16x512xf32> to vector<16x384xf32>
      %446 = arith.negf %445 : vector<16x384xf32>
      %447 = math.exp %446 : vector<16x384xf32>
      %cst_147 = arith.constant 1.000000e+00 : f32
      %448 = vector.broadcast %cst_147 : f32 to vector<16x384xf32>
      %449 = arith.addf %448, %447 : vector<16x384xf32>
      %450 = arith.divf %448, %449 : vector<16x384xf32>
      %451 = vector.extract_strided_slice %450 {offsets = [0, 0], sizes = [16, 128], strides = [1, 1]} : vector<16x384xf32> to vector<16x128xf32>
      %452 = vector.extract_strided_slice %450 {offsets = [0, 128], sizes = [16, 128], strides = [1, 1]} : vector<16x384xf32> to vector<16x128xf32>
      %453 = vector.extract_strided_slice %450 {offsets = [0, 256], sizes = [16, 128], strides = [1, 1]} : vector<16x384xf32> to vector<16x128xf32>
      %454 = vector.extract_strided_slice %444 {offsets = [0, 384], sizes = [16, 128], strides = [1, 1]} : vector<16x512xf32> to vector<16x128xf32>
      %455 = math.tanh %454 : vector<16x128xf32>
      %456 = arith.mulf %452, %380 : vector<16x128xf32>
      %457 = arith.mulf %451, %455 : vector<16x128xf32>
      %458 = arith.addf %456, %457 : vector<16x128xf32>
      %459 = math.tanh %458 : vector<16x128xf32>
      %460 = arith.mulf %453, %459 : vector<16x128xf32>
      %c16_i32_148 = arith.constant 16 : i32
      %461 = arith.muli %c6_i32, %c16_i32_148 : i32
      %462 = tpu.assume_multiple %461, 16 : i32
      %463 = arith.index_cast %462 : i32 to index
      %c0_149 = arith.constant 0 : index
      %464 = vector.load %arg16[%463, %c0_149] : memref<128x512xf32, #tpu.memory_space<vmem>>, vector<16x512xf32>
      %465 = arith.truncf %406 : vector<16x128xf32> to vector<16x128xbf16>
      %c0_150 = arith.constant 0 : index
      %c0_151 = arith.constant 0 : index
      %466 = vector.load %arg5[%c0_150, %c0_151] : memref<128x512xbf16, #tpu.memory_space<vmem>>, vector<128x512xbf16>
      %cst_152 = arith.constant dense<0.000000e+00> : vector<16x512xf32>
      %467 = tpu.matmul %465, %466, %cst_152 {dimension_numbers = #tpu.dot_dimension_numbers<[1], [0], [0], [1], [0, 0, 1, 1], [], []>} : vector<16x128xbf16>, vector<128x512xbf16>, vector<16x512xf32> -> vector<16x512xf32>
      %468 = arith.addf %464, %467 : vector<16x512xf32>
      %469 = vector.extract_strided_slice %468 {offsets = [0, 0], sizes = [16, 384], strides = [1, 1]} : vector<16x512xf32> to vector<16x384xf32>
      %470 = arith.negf %469 : vector<16x384xf32>
      %471 = math.exp %470 : vector<16x384xf32>
      %cst_153 = arith.constant 1.000000e+00 : f32
      %472 = vector.broadcast %cst_153 : f32 to vector<16x384xf32>
      %473 = arith.addf %472, %471 : vector<16x384xf32>
      %474 = arith.divf %472, %473 : vector<16x384xf32>
      %475 = vector.extract_strided_slice %474 {offsets = [0, 0], sizes = [16, 128], strides = [1, 1]} : vector<16x384xf32> to vector<16x128xf32>
      %476 = vector.extract_strided_slice %474 {offsets = [0, 128], sizes = [16, 128], strides = [1, 1]} : vector<16x384xf32> to vector<16x128xf32>
      %477 = vector.extract_strided_slice %474 {offsets = [0, 256], sizes = [16, 128], strides = [1, 1]} : vector<16x384xf32> to vector<16x128xf32>
      %478 = vector.extract_strided_slice %468 {offsets = [0, 384], sizes = [16, 128], strides = [1, 1]} : vector<16x512xf32> to vector<16x128xf32>
      %479 = math.tanh %478 : vector<16x128xf32>
      %480 = arith.mulf %476, %404 : vector<16x128xf32>
      %481 = arith.mulf %475, %479 : vector<16x128xf32>
      %482 = arith.addf %480, %481 : vector<16x128xf32>
      %483 = math.tanh %482 : vector<16x128xf32>
      %484 = arith.mulf %477, %483 : vector<16x128xf32>
      %485 = arith.truncf %484 : vector<16x128xf32> to vector<16x128xbf16>
      %486 = arith.truncf %460 : vector<16x128xf32> to vector<16x128xbf16>
      %c7_i32 = arith.constant 7 : i32
      %487 = arith.truncf %431 : vector<16x128xf32> to vector<16x128xbf16>
      %488 = tpu.concatenate %486, %487 in 1 : vector<16x128xbf16>, vector<16x128xbf16> -> vector<16x256xbf16>
      %c0_154 = arith.constant 0 : index
      %c0_155 = arith.constant 0 : index
      %489 = vector.load %arg9[%c0_154, %c0_155] : memref<256x512xbf16, #tpu.memory_space<vmem>>, vector<256x512xbf16>
      %cst_156 = arith.constant dense<0.000000e+00> : vector<16x512xf32>
      %490 = tpu.matmul %488, %489, %cst_156 {dimension_numbers = #tpu.dot_dimension_numbers<[1], [0], [0], [1], [0, 0, 1, 1], [], []>} : vector<16x256xbf16>, vector<256x512xbf16>, vector<16x512xf32> -> vector<16x512xf32>
      %c0_157 = arith.constant 0 : index
      %c0_158 = arith.constant 0 : index
      %491 = vector.load %arg10[%c0_157, %c0_158] : memref<1x512xf32, #tpu.memory_space<vmem>>, vector<1x512xf32>
      %492 = vector.broadcast %491 : vector<1x512xf32> to vector<16x512xf32>
      %493 = arith.addf %490, %492 : vector<16x512xf32>
      %494 = vector.extract_strided_slice %493 {offsets = [0, 0], sizes = [16, 384], strides = [1, 1]} : vector<16x512xf32> to vector<16x384xf32>
      %495 = arith.negf %494 : vector<16x384xf32>
      %496 = math.exp %495 : vector<16x384xf32>
      %cst_159 = arith.constant 1.000000e+00 : f32
      %497 = vector.broadcast %cst_159 : f32 to vector<16x384xf32>
      %498 = arith.addf %497, %496 : vector<16x384xf32>
      %499 = arith.divf %497, %498 : vector<16x384xf32>
      %500 = vector.extract_strided_slice %499 {offsets = [0, 0], sizes = [16, 128], strides = [1, 1]} : vector<16x384xf32> to vector<16x128xf32>
      %501 = vector.extract_strided_slice %499 {offsets = [0, 128], sizes = [16, 128], strides = [1, 1]} : vector<16x384xf32> to vector<16x128xf32>
      %502 = vector.extract_strided_slice %499 {offsets = [0, 256], sizes = [16, 128], strides = [1, 1]} : vector<16x384xf32> to vector<16x128xf32>
      %503 = vector.extract_strided_slice %493 {offsets = [0, 384], sizes = [16, 128], strides = [1, 1]} : vector<16x512xf32> to vector<16x128xf32>
      %504 = math.tanh %503 : vector<16x128xf32>
      %505 = arith.mulf %501, %429 : vector<16x128xf32>
      %506 = arith.mulf %500, %504 : vector<16x128xf32>
      %507 = arith.addf %505, %506 : vector<16x128xf32>
      %508 = math.tanh %507 : vector<16x128xf32>
      %509 = arith.mulf %502, %508 : vector<16x128xf32>
      %c2_i32_160 = arith.constant 2 : i32
      %510 = arith.subi %c7_i32, %c2_i32_160 : i32
      %511 = arith.truncf %509 : vector<16x128xf32> to vector<16x128xbf16>
      %c16_i32_161 = arith.constant 16 : i32
      %512 = arith.muli %510, %c16_i32_161 : i32
      %513 = tpu.assume_multiple %512, 16 : i32
      %514 = arith.index_cast %513 : i32 to index
      %c0_162 = arith.constant 0 : index
      %515 = vector.load %arg17[%514, %c0_162] : memref<128x128xbf16, #tpu.memory_space<vmem>>, vector<16x128xbf16>
      tpu.vector_store %arg17[%514, %c0_162], %511 {strides = array<i32>} : memref<128x128xbf16, #tpu.memory_space<vmem>>, vector<16x128xbf16>,
      %516 = arith.truncf %460 : vector<16x128xf32> to vector<16x128xbf16>
      %517 = tpu.concatenate %485, %516 in 1 : vector<16x128xbf16>, vector<16x128xbf16> -> vector<16x256xbf16>
      %c0_163 = arith.constant 0 : index
      %c0_164 = arith.constant 0 : index
      %518 = vector.load %arg7[%c0_163, %c0_164] : memref<256x512xbf16, #tpu.memory_space<vmem>>, vector<256x512xbf16>
      %cst_165 = arith.constant dense<0.000000e+00> : vector<16x512xf32>
      %519 = tpu.matmul %517, %518, %cst_165 {dimension_numbers = #tpu.dot_dimension_numbers<[1], [0], [0], [1], [0, 0, 1, 1], [], []>} : vector<16x256xbf16>, vector<256x512xbf16>, vector<16x512xf32> -> vector<16x512xf32>
      %c0_166 = arith.constant 0 : index
      %c0_167 = arith.constant 0 : index
      %520 = vector.load %arg8[%c0_166, %c0_167] : memref<1x512xf32, #tpu.memory_space<vmem>>, vector<1x512xf32>
      %521 = vector.broadcast %520 : vector<1x512xf32> to vector<16x512xf32>
      %522 = arith.addf %519, %521 : vector<16x512xf32>
      %523 = vector.extract_strided_slice %522 {offsets = [0, 0], sizes = [16, 384], strides = [1, 1]} : vector<16x512xf32> to vector<16x384xf32>
      %524 = arith.negf %523 : vector<16x384xf32>
      %525 = math.exp %524 : vector<16x384xf32>
      %cst_168 = arith.constant 1.000000e+00 : f32
      %526 = vector.broadcast %cst_168 : f32 to vector<16x384xf32>
      %527 = arith.addf %526, %525 : vector<16x384xf32>
      %528 = arith.divf %526, %527 : vector<16x384xf32>
      %529 = vector.extract_strided_slice %528 {offsets = [0, 0], sizes = [16, 128], strides = [1, 1]} : vector<16x384xf32> to vector<16x128xf32>
      %530 = vector.extract_strided_slice %528 {offsets = [0, 128], sizes = [16, 128], strides = [1, 1]} : vector<16x384xf32> to vector<16x128xf32>
      %531 = vector.extract_strided_slice %528 {offsets = [0, 256], sizes = [16, 128], strides = [1, 1]} : vector<16x384xf32> to vector<16x128xf32>
      %532 = vector.extract_strided_slice %522 {offsets = [0, 384], sizes = [16, 128], strides = [1, 1]} : vector<16x512xf32> to vector<16x128xf32>
      %533 = math.tanh %532 : vector<16x128xf32>
      %534 = arith.mulf %530, %458 : vector<16x128xf32>
      %535 = arith.mulf %529, %533 : vector<16x128xf32>
      %536 = arith.addf %534, %535 : vector<16x128xf32>
      %537 = math.tanh %536 : vector<16x128xf32>
      %538 = arith.mulf %531, %537 : vector<16x128xf32>
      %c16_i32_169 = arith.constant 16 : i32
      %539 = arith.muli %c7_i32, %c16_i32_169 : i32
      %540 = tpu.assume_multiple %539, 16 : i32
      %541 = arith.index_cast %540 : i32 to index
      %c0_170 = arith.constant 0 : index
      %542 = vector.load %arg16[%541, %c0_170] : memref<128x512xf32, #tpu.memory_space<vmem>>, vector<16x512xf32>
      %543 = arith.truncf %484 : vector<16x128xf32> to vector<16x128xbf16>
      %c0_171 = arith.constant 0 : index
      %c0_172 = arith.constant 0 : index
      %544 = vector.load %arg5[%c0_171, %c0_172] : memref<128x512xbf16, #tpu.memory_space<vmem>>, vector<128x512xbf16>
      %cst_173 = arith.constant dense<0.000000e+00> : vector<16x512xf32>
      %545 = tpu.matmul %543, %544, %cst_173 {dimension_numbers = #tpu.dot_dimension_numbers<[1], [0], [0], [1], [0, 0, 1, 1], [], []>} : vector<16x128xbf16>, vector<128x512xbf16>, vector<16x512xf32> -> vector<16x512xf32>
      %546 = arith.addf %542, %545 : vector<16x512xf32>
      %547 = vector.extract_strided_slice %546 {offsets = [0, 0], sizes = [16, 384], strides = [1, 1]} : vector<16x512xf32> to vector<16x384xf32>
      %548 = arith.negf %547 : vector<16x384xf32>
      %549 = math.exp %548 : vector<16x384xf32>
      %cst_174 = arith.constant 1.000000e+00 : f32
      %550 = vector.broadcast %cst_174 : f32 to vector<16x384xf32>
      %551 = arith.addf %550, %549 : vector<16x384xf32>
      %552 = arith.divf %550, %551 : vector<16x384xf32>
      %553 = vector.extract_strided_slice %552 {offsets = [0, 0], sizes = [16, 128], strides = [1, 1]} : vector<16x384xf32> to vector<16x128xf32>
      %554 = vector.extract_strided_slice %552 {offsets = [0, 128], sizes = [16, 128], strides = [1, 1]} : vector<16x384xf32> to vector<16x128xf32>
      %555 = vector.extract_strided_slice %552 {offsets = [0, 256], sizes = [16, 128], strides = [1, 1]} : vector<16x384xf32> to vector<16x128xf32>
      %556 = vector.extract_strided_slice %546 {offsets = [0, 384], sizes = [16, 128], strides = [1, 1]} : vector<16x512xf32> to vector<16x128xf32>
      %557 = math.tanh %556 : vector<16x128xf32>
      %558 = arith.mulf %554, %482 : vector<16x128xf32>
      %559 = arith.mulf %553, %557 : vector<16x128xf32>
      %560 = arith.addf %558, %559 : vector<16x128xf32>
      %561 = math.tanh %560 : vector<16x128xf32>
      %562 = arith.mulf %555, %561 : vector<16x128xf32>
      %563 = arith.truncf %562 : vector<16x128xf32> to vector<16x128xbf16>
      %564 = arith.truncf %538 : vector<16x128xf32> to vector<16x128xbf16>
      %c6_i32_175 = arith.constant 6 : i32
      %565 = arith.truncf %509 : vector<16x128xf32> to vector<16x128xbf16>
      %566 = tpu.concatenate %564, %565 in 1 : vector<16x128xbf16>, vector<16x128xbf16> -> vector<16x256xbf16>
      %c0_176 = arith.constant 0 : index
      %c0_177 = arith.constant 0 : index
      %567 = vector.load %arg9[%c0_176, %c0_177] : memref<256x512xbf16, #tpu.memory_space<vmem>>, vector<256x512xbf16>
      %cst_178 = arith.constant dense<0.000000e+00> : vector<16x512xf32>
      %568 = tpu.matmul %566, %567, %cst_178 {dimension_numbers = #tpu.dot_dimension_numbers<[1], [0], [0], [1], [0, 0, 1, 1], [], []>} : vector<16x256xbf16>, vector<256x512xbf16>, vector<16x512xf32> -> vector<16x512xf32>
      %c0_179 = arith.constant 0 : index
      %c0_180 = arith.constant 0 : index
      %569 = vector.load %arg10[%c0_179, %c0_180] : memref<1x512xf32, #tpu.memory_space<vmem>>, vector<1x512xf32>
      %570 = vector.broadcast %569 : vector<1x512xf32> to vector<16x512xf32>
      %571 = arith.addf %568, %570 : vector<16x512xf32>
      %572 = vector.extract_strided_slice %571 {offsets = [0, 0], sizes = [16, 384], strides = [1, 1]} : vector<16x512xf32> to vector<16x384xf32>
      %573 = arith.negf %572 : vector<16x384xf32>
      %574 = math.exp %573 : vector<16x384xf32>
      %cst_181 = arith.constant 1.000000e+00 : f32
      %575 = vector.broadcast %cst_181 : f32 to vector<16x384xf32>
      %576 = arith.addf %575, %574 : vector<16x384xf32>
      %577 = arith.divf %575, %576 : vector<16x384xf32>
      %578 = vector.extract_strided_slice %577 {offsets = [0, 0], sizes = [16, 128], strides = [1, 1]} : vector<16x384xf32> to vector<16x128xf32>
      %579 = vector.extract_strided_slice %577 {offsets = [0, 128], sizes = [16, 128], strides = [1, 1]} : vector<16x384xf32> to vector<16x128xf32>
      %580 = vector.extract_strided_slice %577 {offsets = [0, 256], sizes = [16, 128], strides = [1, 1]} : vector<16x384xf32> to vector<16x128xf32>
      %581 = vector.extract_strided_slice %571 {offsets = [0, 384], sizes = [16, 128], strides = [1, 1]} : vector<16x512xf32> to vector<16x128xf32>
      %582 = math.tanh %581 : vector<16x128xf32>
      %583 = arith.mulf %579, %507 : vector<16x128xf32>
      %584 = arith.mulf %578, %582 : vector<16x128xf32>
      %585 = arith.addf %583, %584 : vector<16x128xf32>
      %586 = math.tanh %585 : vector<16x128xf32>
      %587 = arith.mulf %580, %586 : vector<16x128xf32>
      %588 = arith.truncf %587 : vector<16x128xf32> to vector<16x128xbf16>
      %c96 = arith.constant 96 : index
      %c0_182 = arith.constant 0 : index
      %589 = vector.load %arg17[%c96, %c0_182] : memref<128x128xbf16, #tpu.memory_space<vmem>>, vector<16x128xbf16>
      tpu.vector_store %arg17[%c96, %c0_182], %588 {strides = array<i32>} : memref<128x128xbf16, #tpu.memory_space<vmem>>, vector<16x128xbf16>,
      %590 = arith.truncf %538 : vector<16x128xf32> to vector<16x128xbf16>
      %591 = tpu.concatenate %563, %590 in 1 : vector<16x128xbf16>, vector<16x128xbf16> -> vector<16x256xbf16>
      %c0_183 = arith.constant 0 : index
      %c0_184 = arith.constant 0 : index
      %592 = vector.load %arg7[%c0_183, %c0_184] : memref<256x512xbf16, #tpu.memory_space<vmem>>, vector<256x512xbf16>
      %cst_185 = arith.constant dense<0.000000e+00> : vector<16x512xf32>
      %593 = tpu.matmul %591, %592, %cst_185 {dimension_numbers = #tpu.dot_dimension_numbers<[1], [0], [0], [1], [0, 0, 1, 1], [], []>} : vector<16x256xbf16>, vector<256x512xbf16>, vector<16x512xf32> -> vector<16x512xf32>
      %c0_186 = arith.constant 0 : index
      %c0_187 = arith.constant 0 : index
      %594 = vector.load %arg8[%c0_186, %c0_187] : memref<1x512xf32, #tpu.memory_space<vmem>>, vector<1x512xf32>
      %595 = vector.broadcast %594 : vector<1x512xf32> to vector<16x512xf32>
      %596 = arith.addf %593, %595 : vector<16x512xf32>
      %597 = vector.extract_strided_slice %596 {offsets = [0, 0], sizes = [16, 384], strides = [1, 1]} : vector<16x512xf32> to vector<16x384xf32>
      %598 = arith.negf %597 : vector<16x384xf32>
      %599 = math.exp %598 : vector<16x384xf32>
      %cst_188 = arith.constant 1.000000e+00 : f32
      %600 = vector.broadcast %cst_188 : f32 to vector<16x384xf32>
      %601 = arith.addf %600, %599 : vector<16x384xf32>
      %602 = arith.divf %600, %601 : vector<16x384xf32>
      %603 = vector.extract_strided_slice %602 {offsets = [0, 0], sizes = [16, 128], strides = [1, 1]} : vector<16x384xf32> to vector<16x128xf32>
      %604 = vector.extract_strided_slice %602 {offsets = [0, 128], sizes = [16, 128], strides = [1, 1]} : vector<16x384xf32> to vector<16x128xf32>
      %605 = vector.extract_strided_slice %602 {offsets = [0, 256], sizes = [16, 128], strides = [1, 1]} : vector<16x384xf32> to vector<16x128xf32>
      %606 = vector.extract_strided_slice %596 {offsets = [0, 384], sizes = [16, 128], strides = [1, 1]} : vector<16x512xf32> to vector<16x128xf32>
      %607 = math.tanh %606 : vector<16x128xf32>
      %608 = arith.mulf %604, %536 : vector<16x128xf32>
      %609 = arith.mulf %603, %607 : vector<16x128xf32>
      %610 = arith.addf %608, %609 : vector<16x128xf32>
      %611 = math.tanh %610 : vector<16x128xf32>
      %612 = arith.mulf %605, %611 : vector<16x128xf32>
      %613 = arith.truncf %612 : vector<16x128xf32> to vector<16x128xbf16>
      %614 = arith.truncf %587 : vector<16x128xf32> to vector<16x128xbf16>
      %615 = tpu.concatenate %613, %614 in 1 : vector<16x128xbf16>, vector<16x128xbf16> -> vector<16x256xbf16>
      %c0_189 = arith.constant 0 : index
      %c0_190 = arith.constant 0 : index
      %616 = vector.load %arg9[%c0_189, %c0_190] : memref<256x512xbf16, #tpu.memory_space<vmem>>, vector<256x512xbf16>
      %cst_191 = arith.constant dense<0.000000e+00> : vector<16x512xf32>
      %617 = tpu.matmul %615, %616, %cst_191 {dimension_numbers = #tpu.dot_dimension_numbers<[1], [0], [0], [1], [0, 0, 1, 1], [], []>} : vector<16x256xbf16>, vector<256x512xbf16>, vector<16x512xf32> -> vector<16x512xf32>
      %c0_192 = arith.constant 0 : index
      %c0_193 = arith.constant 0 : index
      %618 = vector.load %arg10[%c0_192, %c0_193] : memref<1x512xf32, #tpu.memory_space<vmem>>, vector<1x512xf32>
      %619 = vector.broadcast %618 : vector<1x512xf32> to vector<16x512xf32>
      %620 = arith.addf %617, %619 : vector<16x512xf32>
      %621 = vector.extract_strided_slice %620 {offsets = [0, 0], sizes = [16, 384], strides = [1, 1]} : vector<16x512xf32> to vector<16x384xf32>
      %622 = arith.negf %621 : vector<16x384xf32>
      %623 = math.exp %622 : vector<16x384xf32>
      %cst_194 = arith.constant 1.000000e+00 : f32
      %624 = vector.broadcast %cst_194 : f32 to vector<16x384xf32>
      %625 = arith.addf %624, %623 : vector<16x384xf32>
      %626 = arith.divf %624, %625 : vector<16x384xf32>
      %627 = vector.extract_strided_slice %626 {offsets = [0, 0], sizes = [16, 128], strides = [1, 1]} : vector<16x384xf32> to vector<16x128xf32>
      %628 = vector.extract_strided_slice %626 {offsets = [0, 128], sizes = [16, 128], strides = [1, 1]} : vector<16x384xf32> to vector<16x128xf32>
      %629 = vector.extract_strided_slice %626 {offsets = [0, 256], sizes = [16, 128], strides = [1, 1]} : vector<16x384xf32> to vector<16x128xf32>
      %630 = vector.extract_strided_slice %620 {offsets = [0, 384], sizes = [16, 128], strides = [1, 1]} : vector<16x512xf32> to vector<16x128xf32>
      %631 = math.tanh %630 : vector<16x128xf32>
      %632 = arith.mulf %628, %585 : vector<16x128xf32>
      %633 = arith.mulf %627, %631 : vector<16x128xf32>
      %634 = arith.addf %632, %633 : vector<16x128xf32>
      %635 = math.tanh %634 : vector<16x128xf32>
      %636 = arith.mulf %629, %635 : vector<16x128xf32>
      %637 = arith.truncf %636 : vector<16x128xf32> to vector<16x128xbf16>
      %c112 = arith.constant 112 : index
      %c0_195 = arith.constant 0 : index
      %638 = vector.load %arg17[%c112, %c0_195] : memref<128x128xbf16, #tpu.memory_space<vmem>>, vector<16x128xbf16>
      tpu.vector_store %arg17[%c112, %c0_195], %637 {strides = array<i32>} : memref<128x128xbf16, #tpu.memory_space<vmem>>, vector<16x128xbf16>,
      %c0_196 = arith.constant 0 : index
      %c0_197 = arith.constant 0 : index
      %c0_198 = arith.constant 0 : index
      %639 = vector.load %arg14[%c0_196, %c0_197, %c0_198] : memref<3x16x128xf32, #tpu.memory_space<vmem>>, vector<1x16x128xf32>
      %640 = vector.shape_cast %639 : vector<1x16x128xf32> to vector<16x128xf32>
      %641 = vector.shape_cast %562 : vector<16x128xf32> to vector<1x16x128xf32>
      tpu.vector_store %arg14[%c0_196, %c0_197, %c0_198], %641 {strides = array<i32>} : memref<3x16x128xf32, #tpu.memory_space<vmem>>, vector<1x16x128xf32>,
      %c0_199 = arith.constant 0 : index
      %c0_200 = arith.constant 0 : index
      %c0_201 = arith.constant 0 : index
      %642 = vector.load %arg15[%c0_199, %c0_200, %c0_201] : memref<3x16x128xf32, #tpu.memory_space<vmem>>, vector<1x16x128xf32>
      %643 = vector.shape_cast %642 : vector<1x16x128xf32> to vector<16x128xf32>
      %644 = vector.shape_cast %560 : vector<16x128xf32> to vector<1x16x128xf32>
      tpu.vector_store %arg15[%c0_199, %c0_200, %c0_201], %644 {strides = array<i32>} : memref<3x16x128xf32, #tpu.memory_space<vmem>>, vector<1x16x128xf32>,
      %c1_202 = arith.constant 1 : index
      %c0_203 = arith.constant 0 : index
      %c0_204 = arith.constant 0 : index
      %645 = vector.load %arg14[%c1_202, %c0_203, %c0_204] : memref<3x16x128xf32, #tpu.memory_space<vmem>>, vector<1x16x128xf32>
      %646 = vector.shape_cast %645 : vector<1x16x128xf32> to vector<16x128xf32>
      %647 = vector.shape_cast %612 : vector<16x128xf32> to vector<1x16x128xf32>
      tpu.vector_store %arg14[%c1_202, %c0_203, %c0_204], %647 {strides = array<i32>} : memref<3x16x128xf32, #tpu.memory_space<vmem>>, vector<1x16x128xf32>,
      %c1_205 = arith.constant 1 : index
      %c0_206 = arith.constant 0 : index
      %c0_207 = arith.constant 0 : index
      %648 = vector.load %arg15[%c1_205, %c0_206, %c0_207] : memref<3x16x128xf32, #tpu.memory_space<vmem>>, vector<1x16x128xf32>
      %649 = vector.shape_cast %648 : vector<1x16x128xf32> to vector<16x128xf32>
      %650 = vector.shape_cast %610 : vector<16x128xf32> to vector<1x16x128xf32>
      tpu.vector_store %arg15[%c1_205, %c0_206, %c0_207], %650 {strides = array<i32>} : memref<3x16x128xf32, #tpu.memory_space<vmem>>, vector<1x16x128xf32>,
      %c2_208 = arith.constant 2 : index
      %c0_209 = arith.constant 0 : index
      %c0_210 = arith.constant 0 : index
      %651 = vector.load %arg14[%c2_208, %c0_209, %c0_210] : memref<3x16x128xf32, #tpu.memory_space<vmem>>, vector<1x16x128xf32>
      %652 = vector.shape_cast %651 : vector<1x16x128xf32> to vector<16x128xf32>
      %653 = vector.shape_cast %636 : vector<16x128xf32> to vector<1x16x128xf32>
      tpu.vector_store %arg14[%c2_208, %c0_209, %c0_210], %653 {strides = array<i32>} : memref<3x16x128xf32, #tpu.memory_space<vmem>>, vector<1x16x128xf32>,
      %c2_211 = arith.constant 2 : index
      %c0_212 = arith.constant 0 : index
      %c0_213 = arith.constant 0 : index
      %654 = vector.load %arg15[%c2_211, %c0_212, %c0_213] : memref<3x16x128xf32, #tpu.memory_space<vmem>>, vector<1x16x128xf32>
      %655 = vector.shape_cast %654 : vector<1x16x128xf32> to vector<16x128xf32>
      %656 = vector.shape_cast %634 : vector<16x128xf32> to vector<1x16x128xf32>
      tpu.vector_store %arg15[%c2_211, %c0_212, %c0_213], %656 {strides = array<i32>} : memref<3x16x128xf32, #tpu.memory_space<vmem>>, vector<1x16x128xf32>,
    } else {
    }
    %c0 = arith.constant 0 : index
    %c0_1 = arith.constant 0 : index
    %3 = vector.load %arg17[%c0, %c0_1] : memref<128x128xbf16, #tpu.memory_space<vmem>>, vector<128x128xbf16>
    %c0_2 = arith.constant 0 : index
    %c0_3 = arith.constant 0 : index
    %4 = vector.load %arg11[%c0_2, %c0_3] : memref<128x256xbf16, #tpu.memory_space<vmem>>, vector<128x256xbf16>
    %cst = arith.constant dense<0.000000e+00> : vector<128x256xf32>
    %5 = tpu.matmul %3, %4, %cst {dimension_numbers = #tpu.dot_dimension_numbers<[1], [0], [0], [1], [0, 0, 1, 1], [], []>} : vector<128x128xbf16>, vector<128x256xbf16>, vector<128x256xf32> -> vector<128x256xf32>
    %c0_4 = arith.constant 0 : index
    %c0_5 = arith.constant 0 : index
    %6 = vector.load %arg12[%c0_4, %c0_5] : memref<1x256xf32, #tpu.memory_space<vmem>>, vector<1x256xf32>
    %7 = vector.broadcast %6 : vector<1x256xf32> to vector<128x256xf32>
    %8 = arith.addf %5, %7 : vector<128x256xf32>
    %c0_6 = arith.constant 0 : index
    %c0_7 = arith.constant 0 : index
    %9 = vector.load %arg13[%c0_6, %c0_7] : memref<128x256xf32, #tpu.memory_space<vmem>>, vector<128x256xf32>
    tpu.vector_store %arg13[%c0_6, %c0_7], %8 {strides = array<i32>} : memref<128x256xf32, #tpu.memory_space<vmem>>, vector<128x256xf32>,
    return
  }
  func.func @transform_0(%arg0: i32) -> (i32, i32) {
    %c0_i32 = arith.constant 0 : i32
    %c0_i32_0 = arith.constant 0 : i32
    %c0_i32_1 = arith.constant 0 : i32
    return %c0_i32, %c0_i32_0 : i32, i32
  }
  func.func @transform_1(%arg0: i32) -> (i32, i32, i32) {
    %c0_i32 = arith.constant 0 : i32
    %c0_i32_0 = arith.constant 0 : i32
    %c0_i32_1 = arith.constant 0 : i32
    %c0_i32_2 = arith.constant 0 : i32
    return %c0_i32, %c0_i32_0, %c0_i32_1 : i32, i32, i32
  }
  func.func @transform_2(%arg0: i32) -> (i32, i32, i32) {
    %c0_i32 = arith.constant 0 : i32
    %c0_i32_0 = arith.constant 0 : i32
    %c0_i32_1 = arith.constant 0 : i32
    %c0_i32_2 = arith.constant 0 : i32
    return %c0_i32, %c0_i32_0, %c0_i32_1 : i32, i32, i32
  }
  func.func @transform_3(%arg0: i32) -> (i32, i32) {
    %c0_i32 = arith.constant 0 : i32
    %c0_i32_0 = arith.constant 0 : i32
    %c0_i32_1 = arith.constant 0 : i32
    return %c0_i32, %c0_i32_0 : i32, i32
  }
  func.func @transform_4(%arg0: i32) -> (i32, i32) {
    %c0_i32 = arith.constant 0 : i32
    %c0_i32_0 = arith.constant 0 : i32
    %c0_i32_1 = arith.constant 0 : i32
    return %c0_i32, %c0_i32_0 : i32, i32
  }
  func.func @transform_5(%arg0: i32) -> (i32, i32) {
    %c0_i32 = arith.constant 0 : i32
    %c0_i32_0 = arith.constant 0 : i32
    %c0_i32_1 = arith.constant 0 : i32
    return %c0_i32, %c0_i32_0 : i32, i32
  }
  func.func @transform_6(%arg0: i32) -> (i32, i32) {
    %c0_i32 = arith.constant 0 : i32
    %c0_i32_0 = arith.constant 0 : i32
    %c0_i32_1 = arith.constant 0 : i32
    return %c0_i32, %c0_i32_0 : i32, i32
  }
  func.func @transform_7(%arg0: i32) -> (i32, i32) {
    %c0_i32 = arith.constant 0 : i32
    %c0_i32_0 = arith.constant 0 : i32
    %c0_i32_1 = arith.constant 0 : i32
    return %c0_i32, %c0_i32_0 : i32, i32
  }
  func.func @transform_8(%arg0: i32) -> (i32, i32) {
    %c0_i32 = arith.constant 0 : i32
    %c0_i32_0 = arith.constant 0 : i32
    %c0_i32_1 = arith.constant 0 : i32
    return %c0_i32, %c0_i32_0 : i32, i32
  }
  func.func @transform_9(%arg0: i32) -> (i32, i32) {
    %c0_i32 = arith.constant 0 : i32
    %c0_i32_0 = arith.constant 0 : i32
    %c0_i32_1 = arith.constant 0 : i32
    return %c0_i32, %c0_i32_0 : i32, i32
  }
  func.func @transform_10(%arg0: i32) -> (i32, i32) {
    %c0_i32 = arith.constant 0 : i32
    %c0_i32_0 = arith.constant 0 : i32
    return %c0_i32, %arg0 : i32, i32
  }
  func.func @transform_11(%arg0: i32) -> (i32, i32) {
    %c0_i32 = arith.constant 0 : i32
    %c0_i32_0 = arith.constant 0 : i32
    return %c0_i32, %arg0 : i32, i32
  }
  func.func @transform_12(%arg0: i32) -> (i32, i32) {
    %c0_i32 = arith.constant 0 : i32
    %c0_i32_0 = arith.constant 0 : i32
    return %c0_i32, %arg0 : i32, i32
  }
  func.func @transform_13(%arg0: i32) -> (i32, i32, i32) {
    %c0_i32 = arith.constant 0 : i32
    %c0_i32_0 = arith.constant 0 : i32
    %c0_i32_1 = arith.constant 0 : i32
    %c0_i32_2 = arith.constant 0 : i32
    return %c0_i32, %c0_i32_0, %c0_i32_1 : i32, i32, i32
  }
  func.func @transform_14(%arg0: i32) -> (i32, i32, i32) {
    %c0_i32 = arith.constant 0 : i32
    %c0_i32_0 = arith.constant 0 : i32
    %c0_i32_1 = arith.constant 0 : i32
    %c0_i32_2 = arith.constant 0 : i32
    return %c0_i32, %c0_i32_0, %c0_i32_1 : i32, i32, i32
  }
}

</mosaic_0001>

<bundles_post_ra>
// kernel: lstm_generator_forward.1
= control target key start
LH: loop header
LB: loop body
LE: loop exit
PB: predicated region body
PF: predicated region fallthrough
CT: control target
= control target key end

     0   :  { %s20616_s0 = inlined_call_operand.vmem [shape: bf16[128,64], index: 0, kind: input, shape index: {}]   ;;  %s20617_s1 = inlined_call_operand.vmem [shape: f32[3,16,128], index: 1, kind: input, shape index: {}]   ;;  %s20618_s2 = inlined_call_operand.vmem [shape: f32[3,16,128], index: 2, kind: input, shape index: {}]   ;;  %s20619_s3 = inlined_call_operand.hbm [shape: bf16[64,512], index: 3, kind: input, shape index: {}]   ;;  %s20620_s4 = inlined_call_operand.vmem [shape: bf16[128,512], index: 4, kind: input, shape index: {}]   ;;  %s20621_s5 = inlined_call_operand.vmem [shape: f32[1,512], index: 5, kind: input, shape index: {}]   ;;  %s20622_s6 = inlined_call_operand.vmem [shape: bf16[256,512], index: 6, kind: input, shape index: {}]   ;;  %s20623_s7 = inlined_call_operand.vmem [shape: f32[1,512], index: 7, kind: input, shape index: {}]   ;;  %s20624_s8 = inlined_call_operand.hbm [shape: bf16[256,512], index: 8, kind: input, shape index: {}]   ;;  %s20625_s9 = inlined_call_operand.vmem [shape: f32[1,512], index: 9, kind: input, shape index: {}]   ;;  %s20626_s10 = inlined_call_operand.hbm [shape: bf16[128,512], index: 10, kind: input, shape index: {}]   ;;  %s20627_s11 = inlined_call_operand.vmem [shape: f32[1,512], index: 11, kind: input, shape index: {}]   ;;  %s20628_s12 = inlined_call_operand.vmem [shape: f32[128,512], index: 12, kind: output, shape index: {0}]   ;;  %s20629_s13 = inlined_call_operand.vmem [shape: f32[3,16,128], index: 13, kind: output, shape index: {1}]   ;;  %s20630_s14 = inlined_call_operand.vmem [shape: f32[3,16,128], index: 14, kind: output, shape index: {2}]  }
   0x1   :  { %20643 = sst [smem:[#allocation16_spill]] %s20618_s2 }
   0x2   :  { %20644 = sst [smem:[#allocation17_spill]] %s20623_s7 }
   0x3   :  { %20645 = sst [smem:[#allocation18_spill]] %s20625_s9 }
   0x4   :  { %20646 = sst [smem:[#allocation19_spill]] %s20628_s12 }
   0x5   :  { %20647 = sst [smem:[#allocation20_spill]] %s20629_s13 }
   0x6   :  { %20648 = sst [smem:[#allocation21_spill]] %s20630_s14 }
   0x7   :  { %20 = vsyncpa [#allocation5], 0 }
   0x8   :  { %21 = vsyncpa [#allocation7], 0  ;;  %s17389_s29 = smov 0   ;;  %s17391_s30 = smov 0  }
   0x9   :  { %s17393_s15 = smov 0   ;;  %s17395_s16 = smov 0  }
   0xa LB: > { %s17408_s17 = sadd.s32 4294967295, %s17303_s16   ;;  %s17411_s18 = sadd.s32 1, %s17303_s16   ;;  %s17303_s16 = sphi %s17395_s16, %s20677_s16   ;;  %s17299_s15 = sphi %s17393_s15, %s20681_s15   ;;  %s17295_s30 = sphi %s17391_s30, %s20680_s30   ;;  %s17291_s29 = sphi %s17389_s29, %s20679_s29  }
   0xb   : > { %20649 = sst [smem:[#allocation13_spill]] %s17411_s18  ;;  %s241_s19 = ssub.s32 %s17303_s16, %s17411_s18 }
   0xc   : > { %s244_s20 = sadd.s32 1, %s17299_s15  ;;  %p242_p0 = scmp.eq.s32.totalorder %s241_s19, 0 }
   0xd   : > { %p251_p1 = scmp.ne.s32.totalorder %s17299_s15, %s17295_s30  ;;  %p252_p2 = scmp.eq.s32.totalorder %s17303_s16, 0 }
   0xe   : > { %p257_p3 = scmp.ne.s32.totalorder %s17295_s30, %s17291_s29  ;;  %p20634_p5 = scmp.eq.s32.totalorder %s17408_s17, 0 }
   0xf   : > { %s17421_s21 = scalar_select %p242_p0, %s17299_s15, %s244_s20  }
  0x10   : > { %p17423_p4 = por %p252_p2, %p251_p1  ;;  %p307_p6 = scmp.eq.s32.totalorder %s17408_s17, 1 }
  0x11   : > { %20650 = sst [smem:[#allocation14_spill]] %s17421_s21  ;;  %p12752_p7 = scmp.ge.s32.totalorder %s17303_s16, 1 }
  0x12   : > { %p17432_p8 = por %p20634_p5, %p257_p3  ;;  %p362_p9 = scmp.lt.s32.totalorder %s17303_s16, 3 }
  0x13   : > { %p17437_p10 = por %p307_p6, %p251_p1  ;;  %s17305_s26 = smov [#allocation4]  }
  0x14   : > { %s20652_s23 = scalar_select %p17432_p8, 1, 0 }
  0x15   : > { %s20653_s24 = scalar_select %p17437_p10, 1, 0 }
  0x16   : > { %p17442_p12 = pnand %p12752_p7, %p362_p9  ;;  %s383_s27 = sshll.u32 %s17305_s26, 4  ;;  %s384_s27 = int_to_ptr.vmem [resolvable:$true] %s383_s27 }
  0x17   : > { %20654 = sst [smem:[#allocation15_spill]] %s20653_s24  ;;  %p14404_p1 = scmp.lt.s32.totalorder %s17303_s16, 2 }
  0x18   : > { %s20655_s25 = scalar_select %p17442_p12, 1, 0 }
  0x19   : > { %p14391_p13 = pneg %p17442_p12  ;;  %p17458_p2 = pnand %p14404_p1, %p17423_p4 }
  0x1a   : > { %s17175_s26 = scalar_lea.hbm %s20619_s3, 2048 }
  0x1b   : > { %p17450_p0 = pnand %p14391_p13, %p20634_p5  ;;  %p17176_p3 = scmp.ne.s32.totalorder %s20619_s3, %s17175_s26 }
  0x1c   : > { %s20657_s19 = scalar_select %p17458_p2, 1, 0 }
  0x1d   : > { %p17177_p6 = pneg %p17450_p0  ;;  %p17182_p4 = scmp.lt.u32.totalorder %s17175_s26, %s20619_s3 }
  0x1f   : > { %p17178_p7 = pnand %p17177_p6, %p17176_p3 }
  0x21   : > { %p17179_p9 = pneg %p17178_p7 }
  0x23   : > { %p17184_p13 = pnand %p17182_p4, %p17179_p9 }
  0x25   : > { %17187 = shalt.err (!%p17184_p13)
}
  0x26   : > { %s17188_s24 = scalar_lea.vmem %s384_s27, 2048  ;;  %p17196_p10 = scmp.lt.s32.totalorder %s384_s27, %s384_s27 }
  0x27   : > { %p17189_p1 = scmp.ne.s32.totalorder %s384_s27, %s17188_s24  ;;  %p17197_p8 = scmp.lt.s32.totalorder %s17188_s24, %s17188_s24 }
  0x29   : > { %p17191_p11 = pnand %p17189_p1, %p17177_p6  ;;  %p17198_p12 = por %p17197_p8, %p17196_p10 }
  0x2b   : > { %p17192_p5 = pneg %p17191_p11 }
  0x2d   : > { %p17199_p2 = pnand %p17198_p12, %p17192_p5 }
  0x2f   : > { %17202 = shalt.err (!%p17199_p2)
}
  0x30   : > { %s17306_s12 = smov 256   ;;  %s17307_s18 = smov 16  }
  0x31   : > { %14394 = dma.hbm_to_vmem [thread:$0]  (!%p17450_p0), %s20619_s3, 2048, %s384_s27, [#allocation5], %s17306_s12, %s17306_s12, %s17307_s18  }
  0x32   : > { %s17308_s20 = smov [#allocation6]   ;;  %s17203_s24 = scalar_lea.hbm %s20624_s8, 8192 }
  0x33   : > { %s408_s26 = sshll.u32 %s17308_s20, 4  ;;  %p17204_p5 = scmp.ne.s32.totalorder %s20624_s8, %s17203_s24  ;;  %s409_s26 = int_to_ptr.vmem [resolvable:$true] %s408_s26 }
  0x34   : > { %p17210_p11 = scmp.lt.u32.totalorder %s17203_s24, %s20624_s8 }
  0x35   : > { %p17206_p8 = pnand %p17204_p5, %p17177_p6 }
  0x37   : > { %p17207_p10 = pneg %p17206_p8 }
  0x39   : > { %p17212_p12 = pnand %p17210_p11, %p17207_p10 }
  0x3b   : > { %17215 = shalt.err (!%p17212_p12)
}
  0x3c   : > { %s17216_s27 = scalar_lea.vmem %s409_s26, 8192  ;;  %p17224_p9 = scmp.lt.s32.totalorder %s409_s26, %s409_s26 }
  0x3d   : > { %p17217_p2 = scmp.ne.s32.totalorder %s409_s26, %s17216_s27  ;;  %p17225_p4 = scmp.lt.s32.totalorder %s17216_s27, %s17216_s27 }
  0x3f   : > { %p17219_p3 = pnand %p17217_p2, %p17177_p6  ;;  %p17226_p13 = por %p17225_p4, %p17224_p9 }
  0x41   : > { %p17220_p7 = pneg %p17219_p3 }
  0x43   : > { %p17227_p1 = pnand %p17226_p13, %p17220_p7 }
  0x45   : > { %17230 = shalt.err (!%p17227_p1)
}
  0x46   : > { %14397 = dma.hbm_to_vmem [thread:$0]  (!%p17450_p0), %s20624_s8, 8192, %s409_s26, [#allocation7], %s17306_s12, %s17306_s12, %s17307_s18  }
  0x47   : > { %s427_s9 = sand.u32 1, %s17299_s15   ;;  %s14235_s13 = sshll.u32 %s17303_s16, 7 }
  0x48   : > { %s12756_s14 = sshll.u32 %s427_s9, 7  ;;  %s17513_s20 = scalar_lea.hbm %s20626_s10, %s14235_s13 }
  0x49   : > { %s429_s28 = scalar_lea.vmem [#allocation8], %s12756_s14  ;;  %s20658_s24 = sand.u32 1, %s17303_s16  }
  0x4a   : > { %s436_s22 = sshll.u32 %s429_s28, 4  ;;  %s17519_s27 = scalar_lea.sflag [#allocation5], %s20658_s24  ;;  %s17515_s22 = int_to_ptr.vmem [resolvable:$true] %s436_s22 }
  0x4b   : > { %s17231_s18 = scalar_lea.hbm %s17513_s20, 2048  ;;  %p20659_p6 = scmp.ne.s32.totalorder %s20657_s19, 0 }
  0x4c   : > { %p17232_p0 = scmp.ne.s32.totalorder %s17513_s20, %s17231_s18  ;;  %s17236_s7 = scalar_lea.hbm %s20626_s10, 4096 }
  0x4d   : > { %p17233_p5 = pneg %p20659_p6  ;;  %p17237_p11 = scmp.lt.u32.totalorder %s17513_s20, %s20626_s10 }
  0x4e   : > { %p17238_p12 = scmp.lt.u32.totalorder %s17236_s7, %s17231_s18  ;;  %p17240_p3 = scmp.lt.u32.totalorder %s17231_s18, %s17513_s20 }
  0x4f   : > { %p17234_p8 = pnand %p17233_p5, %p17232_p0 }
  0x50   : > { %p17239_p2 = por %p17238_p12, %p17237_p11 }
  0x51   : > { %p17235_p10 = pneg %p17234_p8 }
  0x52   : > { %p17241_p7 = por %p17240_p3, %p17239_p2 }
  0x54   : > { %p17242_p9 = pnand %p17241_p7, %p17235_p10 }
  0x56   : > { %17245 = shalt.err (!%p17242_p9)
}
  0x57   : > { %s17246_s16 = scalar_lea.vmem %s17515_s22, 2048  ;;  %s17309_s14 = smov [#allocation8]  }
  0x58   : > { %p17247_p4 = scmp.ne.s32.totalorder %s17515_s22, %s17246_s16  ;;  %s17251_s21 = sshll.u32 %s17309_s14, 4  ;;  %s17252_s21 = int_to_ptr.vmem [resolvable:$false] %s17251_s21 }
  0x59   : > { %s17253_s29 = scalar_lea.vmem %s17252_s21, 4096  ;;  %p17254_p0 = scmp.lt.s32.totalorder %s17515_s22, %s17252_s21 }
  0x5a   : > { %p17249_p13 = pnand %p17247_p4, %p17233_p5  ;;  %p17255_p8 = scmp.lt.s32.totalorder %s17253_s29, %s17246_s16 }
  0x5c   : > { %p17250_p1 = pneg %p17249_p13  ;;  %p17256_p11 = por %p17255_p8, %p17254_p0 }
  0x5e   : > { %p17257_p12 = pnand %p17256_p11, %p17250_p1 }
  0x60   : > { %17260 = shalt.err (!%p17257_p12)
}
  0x61   : > { %s17310_s28 = smov 128   ;;  %s17311_s24 = smov 8  }
  0x62   : > { %14401 = dma.hbm_to_vmem [thread:$0]  (!%p20659_p6), %s17513_s20, 2048, %s17515_s22, %s17519_s27, %s17306_s12, %s17310_s28, %s17311_s24  }
  0x63   : > { %p20660_p5 = scmp.ne.s32.totalorder %s20655_s25, 0 }
  0x64   : > { %p20661_p10 = scmp.eq.s32.totalorder (!%p20660_p5), %s17408_s17, 0 }
  0x65   : > { %456 = sbr.rel (%p20660_p5) target bundleno = 3574 (0xdf6), region = 68 }
  0x6c   : > { %17278 = dma.done.wait (%p20661_p10), [#allocation5], 2048   ;;  %p20662_p2 = pmov %p20661_p10 }
  0x6e   : > { %17280 = vsyncadd (%p20662_p2), [#allocation5], 4294965248  ;;  %p20663_p3 = pmov %p20662_p2 }
  0x6f   : > { %p20664_p7 = pmov %p20662_p2 }
  0x70   : > { %17282 = dma.done.wait (%p20663_p3), [#allocation7], 8192  }
  0x71   : > { %17284 = vsyncadd (%p20664_p7), [#allocation7], 4294959104  ;;  %s466_s19 = sand.u32 1, %s17408_s17   ;;  %s468_s12 = sand.u32 1, %s17295_s30  }
  0x72   : > { %s12762_s20 = sshll.u32 %s468_s12, 7  ;;  %s467_s25 = scalar_lea.sflag [#allocation5], %s466_s19 }
  0x73   : > { %s17560_s22 = scalar_lea.vmem [#allocation8], %s12762_s20  ;;  %p20665_p6 = scmp.ne.s32.totalorder %s20652_s23, 0 }
  0x75   : > { %17286 = dma.done.wait (%p20665_p6), %s467_s25, 2048  }
  0x76   : > { %17288 = vsyncadd (%p20665_p6), %s467_s25, 4294965248  ;;  %s12763_s27 = sshll.u32 %s468_s12, 8  ;;  %s12764_s18 = sshll.u32 %s17408_s17, 1 }
  0x77   : > { %p520_p9 = scmp.lt.s32.totalorder %s12764_s18, 3  ;;  %s17573_s9 = scalar_lea.vmem [#allocation9], %s12763_s27 }
  0x78   : > { %p20666_p4 = scmp.ne.s32.totalorder %s17408_s17, 0 }
  0x79   : > { %s20683_s18 = smov (!%p520_p9, %s12764_s18), 3  ;;  %v14447_v0 = vld [vmem:[#allocation4 + $0x4] ss:$16 sps:$4 sm:$0xff] (!%p20666_p4)   ;;  %v14449_v1 = vld [vmem:[#allocation4 + $0xc] ss:$16 sps:$4 sm:$0xff] (!%p20666_p4)   ;;  %v17312_v2 = vmov (!%p20666_p4), 0  }
  0x7a   : > { %s522_s7 = scalar_lea.vmem %s20627_s11, %s20683_s18  ;;  %529 = sbr.rel (%p20666_p4) target bundleno = 3289 (0xcd9), region = 84  ;;  %761 = vmatprep.mubr.bf16.mxu0 (!%p20666_p4), %v17312_v2  ;;  %874 = vmatprep.mubr.bf16.mxu1 (!%p20666_p4), %v17312_v2  ;;  %v14451_v3 = vld [vmem:[#allocation4] ss:$16 sps:$4 sm:$0xff] (!%p20666_p4)   ;;  %v14452_v4 = vld [vmem:[#allocation4 + $0x8] ss:$16 sps:$4 sm:$0xff] (!%p20666_p4)   ;;  %vm704_vm0 = vcmask (!%p20666_p4), 523264  }
  0x7b   : > { %729 = vmatprep.subr.bf16.mxu0 (!%p20666_p4), %v14447_v0  ;;  %842 = vmatprep.subr.bf16.mxu1 (!%p20666_p4), %v14449_v1  ;;  %v14453_v5 = vld [vmem:[#allocation4 + $0x24] ss:$16 sps:$4 sm:$0xff] (!%p20666_p4)   ;;  %v14455_v6 = vld [vmem:[#allocation4 + $0x2c] ss:$16 sps:$4 sm:$0xff] (!%p20666_p4)   ;;  %v14457_v7 = vld [vmem:[#allocation4 + $0x20] ss:$16 sps:$4 sm:$0xff] (!%p20666_p4)  }
  0x7c   : > { %730 = vmatpush1.bf16.msra.mxu0 (!%p20666_p4), %v14451_v3  ;;  %843 = vmatpush1.bf16.msra.mxu1 (!%p20666_p4), %v14452_v4  ;;  %v14458_v8 = vld [vmem:[#allocation4 + $0x28] ss:$16 sps:$4 sm:$0xff] (!%p20666_p4)   ;;  %v14459_v9 = vld [vmem:[#allocation4 + $0x44] ss:$16 sps:$4 sm:$0xff] (!%p20666_p4)   ;;  %v14461_v10 = vld [vmem:[#allocation4 + $0x4c] ss:$16 sps:$4 sm:$0xff] (!%p20666_p4)  }
  0x7d   : > { %731 = vmatprep.subr.bf16.mxu0 (!%p20666_p4), %v14453_v5  ;;  %844 = vmatprep.subr.bf16.mxu1 (!%p20666_p4), %v14455_v6  ;;  %v14463_v11 = vld [vmem:[#allocation4 + $0x40] ss:$16 sps:$4 sm:$0xff] (!%p20666_p4)   ;;  %v14464_v12 = vld [vmem:[#allocation4 + $0x48] ss:$16 sps:$4 sm:$0xff] (!%p20666_p4)   ;;  %v14465_v13 = vld [vmem:[#allocation4 + $0x64] ss:$16 sps:$4 sm:$0xff] (!%p20666_p4)  }
  0x7e   : > { %v14467_v14 = vld [vmem:[#allocation4 + $0x6c] ss:$16 sps:$4 sm:$0xff] (!%p20666_p4)   ;;  %v14469_v15 = vld [vmem:[#allocation4 + $0x60] ss:$16 sps:$4 sm:$0xff] (!%p20666_p4)   ;;  %v14470_v16 = vld [vmem:[#allocation4 + $0x68] ss:$16 sps:$4 sm:$0xff] (!%p20666_p4)  }
  0x7f   : > { %v14474_v17 = vld [vmem:[%s20620_s4 + $0x4] ss:$16 sps:$4 sm:$0xff] (!%p20666_p4)   ;;  %v14472_v19 = vld [vmem:[%s20620_s4] ss:$16 sps:$4 sm:$0xff] (!%p20666_p4)   ;;  %v14481_v20 = vld [vmem:[%s20620_s4 + $0xc] ss:$16 sps:$4 sm:$0xff] (!%p20666_p4)  }
  0x80   : > { %732 = vmatpush1.bf16.msra.mxu0 (!%p20666_p4), %v14457_v7  ;;  %845 = vmatpush1.bf16.msra.mxu1 (!%p20666_p4), %v14458_v8  ;;  %v14471_v18 = vld [vmem:[%s20616_s0] sm:$0xff] (!%p20666_p4)   ;;  %v14479_v22 = vld [vmem:[%s20620_s4 + $0x8] ss:$16 sps:$4 sm:$0xff] (!%p20666_p4)   ;;  %v14488_v24 = vld [vmem:[%s20620_s4 + $0x2c] ss:$16 sps:$4 sm:$0xff] (!%p20666_p4)   ;;  %s20667_s2 = sld [smem:[#allocation16_spill]] (!%p20666_p4) }
  0x81   : > { %733 = vmatprep.subr.bf16.mxu0 %v14459_v9  ;;  %846 = vmatprep.subr.bf16.mxu1 %v14461_v10  ;;  %v14478_v21 = vld [vmem:[%s20620_s4 + $0x24] ss:$16 sps:$4 sm:$0xff]   ;;  %v14476_v23 = vld [vmem:[%s20620_s4 + $0x20] ss:$16 sps:$4 sm:$0xff]   ;;  %v14486_v26 = vld [vmem:[%s20620_s4 + $0x28] ss:$16 sps:$4 sm:$0xff]  }
  0x82   : > { %v14485_v25 = vld [vmem:[%s20620_s4 + $0x44] ss:$16 sps:$4 sm:$0xff]   ;;  %v14475_v27 = vld [vmem:[%s20616_s0 + $0x8] sm:$0xff]   ;;  %v14483_v28 = vld [vmem:[%s20620_s4 + $0x40] ss:$16 sps:$4 sm:$0xff]   ;;  %s20668_s16 = sld [smem:[#allocation17_spill]] }
  0x83   : > { %v14492_v29 = vld [vmem:[%s20620_s4 + $0x64] ss:$16 sps:$4 sm:$0xff]   ;;  %v14495_v30 = vld [vmem:[%s20620_s4 + $0x4c] ss:$16 sps:$4 sm:$0xff]   ;;  %v14493_v31 = vld [vmem:[%s20620_s4 + $0x48] ss:$16 sps:$4 sm:$0xff]  }
  0x84   : > { %734 = vmatpush1.bf16.msra.mxu0 %v14463_v11  ;;  %847 = vmatpush1.bf16.msra.mxu1 %v14464_v12  ;;  %v14502_v32 = vld [vmem:[%s20620_s4 + $0x6c] ss:$16 sps:$4 sm:$0xff]   ;;  %v14490_v33 = vld [vmem:[%s20620_s4 + $0x60] ss:$16 sps:$4 sm:$0xff]   ;;  %v14499_v34 = vld [vmem:[%s20620_s4 + $0x84] ss:$16 sps:$4 sm:$0xff]  }
  0x85   : > { %735 = vmatprep.subr.bf16.mxu0 %v14465_v13  ;;  %848 = vmatprep.subr.bf16.mxu1 %v14467_v14  ;;  %v14500_v35 = vld [vmem:[%s20620_s4 + $0x68] ss:$16 sps:$4 sm:$0xff]   ;;  %v14482_v36 = vld [vmem:[%s20616_s0 + $0x10] sm:$0xff]   ;;  %v14509_v38 = vld [vmem:[%s20620_s4 + $0x8c] ss:$16 sps:$4 sm:$0xff]   ;;  %s20670_s24 = sld [smem:[#allocation18_spill]] }
  0x86   : > { %v14497_v37 = vld [vmem:[%s20620_s4 + $0x80] ss:$16 sps:$4 sm:$0xff]   ;;  %v14506_v39 = vld [vmem:[%s20620_s4 + $0xa4] ss:$16 sps:$4 sm:$0xff]   ;;  %v14507_v40 = vld [vmem:[%s20620_s4 + $0x88] ss:$16 sps:$4 sm:$0xff]  }
  0x87   : > { %v14516_v41 = vld [vmem:[%s20620_s4 + $0xac] ss:$16 sps:$4 sm:$0xff]   ;;  %v14504_v42 = vld [vmem:[%s20620_s4 + $0xa0] ss:$16 sps:$4 sm:$0xff]   ;;  %v14513_v43 = vld [vmem:[%s20620_s4 + $0xc4] ss:$16 sps:$4 sm:$0xff]  }
  0x88   : > { %736 = vmatpush1.bf16.msra.mxu0 %v14469_v15  ;;  %849 = vmatpush1.bf16.msra.mxu1 %v14470_v16  ;;  %v14514_v44 = vld [vmem:[%s20620_s4 + $0xa8] ss:$16 sps:$4 sm:$0xff]   ;;  %v14511_v46 = vld [vmem:[%s20620_s4 + $0xc0] ss:$16 sps:$4 sm:$0xff]   ;;  %v14520_v47 = vld [vmem:[%s20620_s4 + $0xe4] ss:$16 sps:$4 sm:$0xff]   ;;  %s20669_s14 = smov %s20668_s16 }
  0x89   : > { %1236 = vmatprep.subr.bf16.mxu0 %v14474_v17  ;;  %1279 = vmatprep.subr.bf16.mxu1 %v14481_v20  ;;  %v14489_v45 = vld [vmem:[%s20616_s0 + $0x18] sm:$0xff]   ;;  %v14518_v51 = vld [vmem:[%s20620_s4 + $0xe0] ss:$16 sps:$4 sm:$0xff]   ;;  %v14529_v53 = vld [vmem:[%s20622_s6 + $0x4] ss:$16 sps:$4 sm:$0xff]   ;;  %s20673_s27 = sld [smem:[#allocation20_spill]] }
  0x8a   : > { %v14523_v48 = vld [vmem:[%s20620_s4 + $0xcc] ss:$16 sps:$4 sm:$0xff]   ;;  %v14521_v49 = vld [vmem:[%s20620_s4 + $0xc8] ss:$16 sps:$4 sm:$0xff]   ;;  %v14496_v54 = vld [vmem:[%s20616_s0 + $0x20] sm:$0xff]  }
  0x8b   : > { %12790 = vmatmul.mubr.msk.bf16.vlgmr.msra.gmra.mrb[0].mxu0 %vm704_vm0, %v14471_v18  ;;  %12798 = vmatmul.mubr.msk.bf16.vlgmr.msra.gmra.mrb[0].mxu1 %vm704_vm0, %v14471_v18  ;;  %v14526_v50 = vld [vmem:[%s20620_s4 + $0xec] ss:$16 sps:$4 sm:$0xff]   ;;  %v14524_v52 = vld [vmem:[%s20620_s4 + $0xe8] ss:$16 sps:$4 sm:$0xff]   ;;  %v14510_v57 = vld [vmem:[%s20616_s0 + $0x30] sm:$0xff]  }
  0x8c   : > { %1237 = vmatpush1.bf16.msra.mxu0 %v14472_v19  ;;  %771 = vmatprep.mubr.bf16.mxu0 %v17312_v2  ;;  %v14532_v55 = vld [vmem:[%s20622_s6 + $0xc] ss:$16 sps:$4 sm:$0xff]   ;;  %v1019_v59 = vld [vmem:[%s20617_s1] sm:$0xff]  ;;  %v14530_v62 = vld [vmem:[%s20622_s6 + $0x8] ss:$16 sps:$4 sm:$0xff]  }
  0x8d   : > { %884 = vmatprep.mubr.bf16.mxu1 %v17312_v2  ;;  %1238 = vmatprep.subr.bf16.mxu0 %v14478_v21  ;;  %v14503_v56 = vld [vmem:[%s20616_s0 + $0x28] sm:$0xff]   ;;  %v14517_v58 = vld [vmem:[%s20616_s0 + $0x38] sm:$0xff]   ;;  %v14527_v61 = vld [vmem:[%s20622_s6] ss:$16 sps:$4 sm:$0xff]  }
  0x8e   : > { %1280 = vmatpush1.bf16.msra.mxu1 %v14479_v22  ;;  %v1020_v60 = vld [vmem:[%s20617_s1 + $0x8] sm:$0xff]  ;;  %v14535_v0 = vld [vmem:[%s20622_s6 + $0x24] ss:$16 sps:$4 sm:$0xff]   ;;  %v14533_v3 = vld [vmem:[%s20622_s6 + $0x20] ss:$16 sps:$4 sm:$0xff]  }
  0x8f   : > { %1281 = vmatprep.subr.bf16.mxu1 %v14488_v24  ;;  %v1043_v63 = vpack.c.bf16 %v1020_v60, %v1019_v59  ;;  %v14538_v1 = vld [vmem:[%s20622_s6 + $0x2c] ss:$16 sps:$4 sm:$0xff]   ;;  %v14536_v4 = vld [vmem:[%s20622_s6 + $0x28] ss:$16 sps:$4 sm:$0xff]   ;;  %v14541_v5 = vld [vmem:[%s20622_s6 + $0x44] ss:$16 sps:$4 sm:$0xff]  }
  0x90   : > { %1239 = vmatpush1.bf16.msra.mxu0 %v14476_v23  ;;  %v14544_v6 = vld [vmem:[%s20622_s6 + $0x4c] ss:$16 sps:$4 sm:$0xff]   ;;  %v14539_v7 = vld [vmem:[%s20622_s6 + $0x40] ss:$16 sps:$4 sm:$0xff]   ;;  %v14542_v8 = vld [vmem:[%s20622_s6 + $0x48] ss:$16 sps:$4 sm:$0xff]  }
  0x91   : > { %1240 = vmatprep.subr.bf16.mxu0 %v14485_v25  ;;  %v14547_v9 = vld [vmem:[%s20622_s6 + $0x64] ss:$16 sps:$4 sm:$0xff]   ;;  %v14550_v10 = vld [vmem:[%s20622_s6 + $0x6c] ss:$16 sps:$4 sm:$0xff]   ;;  %v14545_v11 = vld [vmem:[%s20622_s6 + $0x60] ss:$16 sps:$4 sm:$0xff]  }
  0x92   : > { %1282 = vmatpush1.bf16.msra.mxu1 %v14486_v26  ;;  %v14548_v12 = vld [vmem:[%s20622_s6 + $0x68] ss:$16 sps:$4 sm:$0xff]   ;;  %v14553_v13 = vld [vmem:[%s20622_s6 + $0x84] ss:$16 sps:$4 sm:$0xff]   ;;  %v14556_v14 = vld [vmem:[%s20622_s6 + $0x8c] ss:$16 sps:$4 sm:$0xff]  }
  0x93   : > { %12791 = vmatmul.mubr.msk.bf16.gmra.mrb[4].mxu0 %vm704_vm0, %v14475_v27  ;;  %12799 = vmatmul.mubr.msk.bf16.gmra.mrb[4].mxu1 %vm704_vm0, %v14475_v27  ;;  %v14551_v15 = vld [vmem:[%s20622_s6 + $0x80] ss:$16 sps:$4 sm:$0xff]   ;;  %v14554_v16 = vld [vmem:[%s20622_s6 + $0x88] ss:$16 sps:$4 sm:$0xff]   ;;  %v14559_v17 = vld [vmem:[%s20622_s6 + $0xa4] ss:$16 sps:$4 sm:$0xff]  }
  0x94   : > { %781 = vmatprep.mubr.bf16.mxu0 %v17312_v2  ;;  %894 = vmatprep.mubr.bf16.mxu1 %v17312_v2  ;;  %v14562_v18 = vld [vmem:[%s20622_s6 + $0xac] ss:$16 sps:$4 sm:$0xff]   ;;  %v14557_v19 = vld [vmem:[%s20622_s6 + $0xa0] ss:$16 sps:$4 sm:$0xff]   ;;  %v14560_v20 = vld [vmem:[%s20622_s6 + $0xa8] ss:$16 sps:$4 sm:$0xff]  }
  0x95   : > { %1241 = vmatpush1.bf16.msra.mxu0 %v14483_v28  ;;  %1283 = vmatprep.subr.bf16.mxu1 %v14495_v30  ;;  %v14565_v21 = vld [vmem:[%s20622_s6 + $0xc4] ss:$16 sps:$4 sm:$0xff]   ;;  %v14568_v22 = vld [vmem:[%s20622_s6 + $0xcc] ss:$16 sps:$4 sm:$0xff]   ;;  %v14563_v23 = vld [vmem:[%s20622_s6 + $0xc0] ss:$16 sps:$4 sm:$0xff]  }
  0x96   : > { %1242 = vmatprep.subr.bf16.mxu0 %v14492_v29  ;;  %1284 = vmatpush1.bf16.msra.mxu1 %v14493_v31  ;;  %v14566_v24 = vld [vmem:[%s20622_s6 + $0xc8] ss:$16 sps:$4 sm:$0xff]   ;;  %v14571_v25 = vld [vmem:[%s20622_s6 + $0xe4] ss:$16 sps:$4 sm:$0xff]   ;;  %v14574_v26 = vld [vmem:[%s20622_s6 + $0xec] ss:$16 sps:$4 sm:$0xff]  }
  0x97   : > { %1285 = vmatprep.subr.bf16.mxu1 %v14502_v32  ;;  %v14569_v27 = vld [vmem:[%s20622_s6 + $0xe0] ss:$16 sps:$4 sm:$0xff]   ;;  %v14572_v28 = vld [vmem:[%s20622_s6 + $0xe8] ss:$16 sps:$4 sm:$0xff]   ;;  %v14577_v29 = vld [vmem:[%s20622_s6 + $0x104] ss:$16 sps:$4 sm:$0xff]  }
  0x98   : > { %v14580_v30 = vld [vmem:[%s20622_s6 + $0x10c] ss:$16 sps:$4 sm:$0xff]   ;;  %v14575_v31 = vld [vmem:[%s20622_s6 + $0x100] ss:$16 sps:$4 sm:$0xff]   ;;  %v14578_v32 = vld [vmem:[%s20622_s6 + $0x108] ss:$16 sps:$4 sm:$0xff]  }
  0x99   : > { %1243 = vmatpush1.bf16.msra.mxu0 %v14490_v33  ;;  %v14583_v33 = vld [vmem:[%s20622_s6 + $0x124] ss:$16 sps:$4 sm:$0xff]   ;;  %v14622_v59 = vld [vmem:[%s20622_s6 + $0x1ec] ss:$16 sps:$4 sm:$0xff]  }
  0x9a   : > { %1244 = vmatprep.subr.bf16.mxu0 %v14499_v34  ;;  %1286 = vmatpush1.bf16.msra.mxu1 %v14500_v35  ;;  %v14586_v34 = vld [vmem:[%s20622_s6 + $0x12c] ss:$16 sps:$4 sm:$0xff]   ;;  %v14581_v35 = vld [vmem:[%s20622_s6 + $0x120] ss:$16 sps:$4 sm:$0xff]  }
  0x9b   : > { %12792 = vmatmul.mubr.msk.bf16.gmra.mrb[8].mxu0 %vm704_vm0, %v14482_v36  ;;  %12800 = vmatmul.mubr.msk.bf16.gmra.mrb[8].mxu1 %vm704_vm0, %v14482_v36  ;;  %v14584_v36 = vld [vmem:[%s20622_s6 + $0x128] ss:$16 sps:$4 sm:$0xff]  }
  0x9c   : > { %791 = vmatprep.mubr.bf16.mxu0 %v17312_v2  ;;  %904 = vmatprep.mubr.bf16.mxu1 %v17312_v2  ;;  %v12807_v60 = vld [vmem:[%s20617_s1 + $0x18] sm:$0xff] }
  0x9d   : > { %1245 = vmatpush1.bf16.msra.mxu0 %v14497_v37  ;;  %1287 = vmatprep.subr.bf16.mxu1 %v14509_v38  ;;  %v14589_v37 = vld [vmem:[%s20622_s6 + $0x144] ss:$16 sps:$4 sm:$0xff]   ;;  %v14592_v38 = vld [vmem:[%s20622_s6 + $0x14c] ss:$16 sps:$4 sm:$0xff]  }
  0x9e   : > { %1246 = vmatprep.subr.bf16.mxu0 %v14506_v39  ;;  %1288 = vmatpush1.bf16.msra.mxu1 %v14507_v40  ;;  %v14587_v39 = vld [vmem:[%s20622_s6 + $0x140] ss:$16 sps:$4 sm:$0xff]   ;;  %v14590_v40 = vld [vmem:[%s20622_s6 + $0x148] ss:$16 sps:$4 sm:$0xff]  }
  0x9f   : > { %1289 = vmatprep.subr.bf16.mxu1 %v14516_v41  ;;  %v14595_v41 = vld [vmem:[%s20622_s6 + $0x164] ss:$16 sps:$4 sm:$0xff]  }
  0xa1   : > { %1247 = vmatpush1.bf16.msra.mxu0 %v14504_v42  ;;  %v14598_v42 = vld [vmem:[%s20622_s6 + $0x16c] ss:$16 sps:$4 sm:$0xff]  }
  0xa2   : > { %1248 = vmatprep.subr.bf16.mxu0 %v14513_v43  ;;  %1290 = vmatpush1.bf16.msra.mxu1 %v14514_v44  ;;  %v14593_v43 = vld [vmem:[%s20622_s6 + $0x160] ss:$16 sps:$4 sm:$0xff]   ;;  %v14596_v44 = vld [vmem:[%s20622_s6 + $0x168] ss:$16 sps:$4 sm:$0xff]  }
  0xa3   : > { %12793 = vmatmul.mubr.msk.bf16.gmra.mrb[12].mxu0 %vm704_vm0, %v14489_v45  ;;  %12801 = vmatmul.mubr.msk.bf16.gmra.mrb[12].mxu1 %vm704_vm0, %v14489_v45  ;;  %v14601_v45 = vld [vmem:[%s20622_s6 + $0x184] ss:$16 sps:$4 sm:$0xff]  }
  0xa4   : > { %801 = vmatprep.mubr.bf16.mxu0 %v17312_v2  ;;  %914 = vmatprep.mubr.bf16.mxu1 %v17312_v2 }
  0xa5   : > { %1249 = vmatpush1.bf16.msra.mxu0 %v14511_v46  ;;  %1291 = vmatprep.subr.bf16.mxu1 %v14523_v48  ;;  %v14604_v46 = vld [vmem:[%s20622_s6 + $0x18c] ss:$16 sps:$4 sm:$0xff]   ;;  %v14602_v48 = vld [vmem:[%s20622_s6 + $0x188] ss:$16 sps:$4 sm:$0xff]  }
  0xa6   : > { %1250 = vmatprep.subr.bf16.mxu0 %v14520_v47  ;;  %1292 = vmatpush1.bf16.msra.mxu1 %v14521_v49  ;;  %v14599_v47 = vld [vmem:[%s20622_s6 + $0x180] ss:$16 sps:$4 sm:$0xff]   ;;  %v14607_v49 = vld [vmem:[%s20622_s6 + $0x1a4] ss:$16 sps:$4 sm:$0xff]  }
  0xa7   : > { %1293 = vmatprep.subr.bf16.mxu1 %v14526_v50  ;;  %v14610_v50 = vld [vmem:[%s20622_s6 + $0x1ac] ss:$16 sps:$4 sm:$0xff]  }
  0xa9   : > { %1251 = vmatpush1.bf16.msra.mxu0 %v14518_v51  ;;  %v14605_v51 = vld [vmem:[%s20622_s6 + $0x1a0] ss:$16 sps:$4 sm:$0xff]  }
  0xaa   : > { %1294 = vmatpush1.bf16.msra.mxu1 %v14524_v52  ;;  %1786 = vmatprep.subr.bf16.mxu0 %v14529_v53  ;;  %v14608_v52 = vld [vmem:[%s20622_s6 + $0x1a8] ss:$16 sps:$4 sm:$0xff]   ;;  %v14613_v53 = vld [vmem:[%s20622_s6 + $0x1c4] ss:$16 sps:$4 sm:$0xff]  }
  0xab   : > { %12794 = vmatmul.mubr.msk.bf16.gmra.mrb[16].mxu0 %vm704_vm0, %v14496_v54  ;;  %12802 = vmatmul.mubr.msk.bf16.gmra.mrb[16].mxu1 %vm704_vm0, %v14496_v54  ;;  %v14616_v54 = vld [vmem:[%s20622_s6 + $0x1cc] ss:$16 sps:$4 sm:$0xff]  }
  0xac   : > { %811 = vmatprep.mubr.bf16.mxu0 %v17312_v2  ;;  %924 = vmatprep.mubr.bf16.mxu1 %v17312_v2 }
  0xad   : > { %1829 = vmatprep.subr.bf16.mxu1 %v14532_v55  ;;  %v14611_v55 = vld [vmem:[%s20622_s6 + $0x1c0] ss:$16 sps:$4 sm:$0xff]  }
  0xb3   : > { %12795 = vmatmul.mubr.msk.bf16.gmra.mrb[20].mxu0 %vm704_vm0, %v14503_v56  ;;  %12803 = vmatmul.mubr.msk.bf16.gmra.mrb[20].mxu1 %vm704_vm0, %v14503_v56  ;;  %v14614_v56 = vld [vmem:[%s20622_s6 + $0x1c8] ss:$16 sps:$4 sm:$0xff]  }
  0xb4   : > { %821 = vmatprep.mubr.bf16.mxu0 %v17312_v2  ;;  %934 = vmatprep.mubr.bf16.mxu1 %v17312_v2 }
  0xbb   : > { %12796 = vmatmul.mubr.msk.bf16.gmra.mrb[24].mxu0 %vm704_vm0, %v14510_v57  ;;  %12804 = vmatmul.mubr.msk.bf16.gmra.mrb[24].mxu1 %vm704_vm0, %v14510_v57  ;;  %v12806_v57 = vld [vmem:[%s20617_s1 + $0x10] sm:$0xff] }
  0xbc   : > { %831 = vmatprep.mubr.bf16.mxu0 %v17312_v2  ;;  %944 = vmatprep.mubr.bf16.mxu1 %v17312_v2 }
  0xc3   : > { %12797 = vmatmul.mubr.msk.bf16.gmra.mrb[28].mxu0 %vm704_vm0, %v14517_v58  ;;  %12805 = vmatmul.mubr.msk.bf16.gmra.mrb[28].mxu1 %vm704_vm0, %v14517_v58  ;;  %v14619_v58 = vld [vmem:[%s20622_s6 + $0x1e4] ss:$16 sps:$4 sm:$0xff]  }
  0xc4   : > { %1268 = vmatprep.mubr.bf16.mxu0 %v17312_v2  ;;  %1311 = vmatprep.mubr.bf16.mxu1 %v17312_v2 }
  0xcb   : > { %1269 = vmatmul.mubr.bf16.vlgmr.msra.gmra.mrb[0].mxu0 %v1043_v63  ;;  %1312 = vmatmul.mubr.bf16.vlgmr.msra.gmra.mrb[0].mxu1 %v1043_v63  ;;  %v14620_v63 = vld [vmem:[%s20622_s6 + $0x1e8] ss:$16 sps:$4 sm:$0xff]  }
  0xcc   : > { %1787 = vmatpush1.bf16.msra.mxu0 %v14527_v61  ;;  %1830 = vmatpush1.bf16.msra.mxu1 %v14530_v62  ;;  %v1379_v61 = vpack.c.bf16 %v12807_v60, %v12806_v57  ;;  %v14617_v62 = vld [vmem:[%s20622_s6 + $0x1e0] ss:$16 sps:$4 sm:$0xff]  }
  0xcd   : > { %1788 = vmatprep.subr.bf16.mxu0 %v14535_v0  ;;  %1831 = vmatprep.subr.bf16.mxu1 %v14538_v1  ;;  %v17119_v0 = vld [vmem:[%s20620_s4 + $0x4] ss:$16 sps:$4 sm:$0xff]   ;;  %v17120_v1 = vld [vmem:[%s20620_s4 + $0xc] ss:$16 sps:$4 sm:$0xff]  }
  0xce   : > { %1818 = vmatprep.mubr.bf16.mxu0 %v1379_v61  ;;  %1861 = vmatprep.mubr.bf16.mxu1 %v1379_v61 }
  0xd0   : > { %1789 = vmatpush1.bf16.msra.mxu0 %v14533_v3  ;;  %1832 = vmatpush1.bf16.msra.mxu1 %v14536_v4  ;;  %v564_v3 = vlaneseq }
  0xd1   : > { %1790 = vmatprep.subr.bf16.mxu0 %v14541_v5  ;;  %1833 = vmatprep.subr.bf16.mxu1 %v14544_v6  ;;  %v562_v5 = vld [vmem:[%s20621_s5] sm:$0xf] }
  0xd2   : > { %v565_v4 = vshrl.u32 %v564_v3, 7 }
  0xd4   : > { %1791 = vmatpush1.bf16.msra.mxu0 %v14539_v7  ;;  %1834 = vmatpush1.bf16.msra.mxu1 %v14542_v8  ;;  %v17944_v6 = vsub.s32 0, %v565_v4  ;;  %v17946_v7 = vsub.s32 1, %v565_v4 }
  0xd5   : > { %1792 = vmatprep.subr.bf16.mxu0 %v14547_v9  ;;  %1835 = vmatprep.subr.bf16.mxu1 %v14550_v10 }
  0xd6   : > { %v17949_v8 = vrot.slane %v562_v5, %v17944_v6  ;;  %v17952_v9 = vrot.slane %v562_v5, %v17946_v7 }
  0xd8   : > { %1793 = vmatpush1.bf16.msra.mxu0 %v14545_v11  ;;  %1836 = vmatpush1.bf16.msra.mxu1 %v14548_v12  ;;  %v17954_v11 = vsub.s32 2, %v565_v4 }
  0xd9   : > { %1794 = vmatprep.subr.bf16.mxu0 %v14553_v13  ;;  %1837 = vmatprep.subr.bf16.mxu1 %v14556_v14 }
  0xdc   : > { %1795 = vmatpush1.bf16.msra.mxu0 %v14551_v15  ;;  %1838 = vmatpush1.bf16.msra.mxu1 %v14554_v16 }
  0xdd   : > { %1796 = vmatprep.subr.bf16.mxu0 %v14559_v17  ;;  %1839 = vmatprep.subr.bf16.mxu1 %v14562_v18 }
  0xe0   : > { %1797 = vmatpush1.bf16.msra.mxu0 %v14557_v19  ;;  %1840 = vmatpush1.bf16.msra.mxu1 %v14560_v20  ;;  %v17958_v20 = vsub.s32 3, %v565_v4 }
  0xe1   : > { %1798 = vmatprep.subr.bf16.mxu0 %v14565_v21  ;;  %1841 = vmatprep.subr.bf16.mxu1 %v14568_v22 }
  0xe4   : > { %1799 = vmatpush1.bf16.msra.mxu0 %v14563_v23  ;;  %1842 = vmatpush1.bf16.msra.mxu1 %v14566_v24  ;;  %v17962_v24 = vrot.slane %v562_v5, %v17954_v11 }
  0xe5   : > { %1800 = vmatprep.subr.bf16.mxu0 %v14571_v25  ;;  %1843 = vmatprep.subr.bf16.mxu1 %v14574_v26 }
  0xe8   : > { %1801 = vmatpush1.bf16.msra.mxu0 %v14569_v27  ;;  %1844 = vmatpush1.bf16.msra.mxu1 %v14572_v28 }
  0xe9   : > { %1802 = vmatprep.subr.bf16.mxu0 %v14577_v29  ;;  %1845 = vmatprep.subr.bf16.mxu1 %v14580_v30  ;;  %v17966_v29 = vrot.slane %v562_v5, %v17958_v20 }
  0xec   : > { %1803 = vmatpush1.bf16.msra.mxu0 %v14575_v31  ;;  %1846 = vmatpush1.bf16.msra.mxu1 %v14578_v32 }
  0xed   : > { %1804 = vmatprep.subr.bf16.mxu0 %v14583_v33  ;;  %1847 = vmatprep.subr.bf16.mxu1 %v14586_v34 }
  0xf0   : > { %1805 = vmatpush1.bf16.msra.mxu0 %v14581_v35  ;;  %1848 = vmatpush1.bf16.msra.mxu1 %v14584_v36 }
  0xf1   : > { %1806 = vmatprep.subr.bf16.mxu0 %v14589_v37  ;;  %1849 = vmatprep.subr.bf16.mxu1 %v14592_v38 }
  0xf4   : > { %1807 = vmatpush1.bf16.msra.mxu0 %v14587_v39  ;;  %1850 = vmatpush1.bf16.msra.mxu1 %v14590_v40 }
  0xf5   : > { %1808 = vmatprep.subr.bf16.mxu0 %v14595_v41  ;;  %1851 = vmatprep.subr.bf16.mxu1 %v14598_v42 }
  0xf8   : > { %1809 = vmatpush1.bf16.msra.mxu0 %v14593_v43  ;;  %1852 = vmatpush1.bf16.msra.mxu1 %v14596_v44 }
  0xf9   : > { %1810 = vmatprep.subr.bf16.mxu0 %v14601_v45  ;;  %1853 = vmatprep.subr.bf16.mxu1 %v14604_v46  ;;  %v1021_v46 = vld [vmem:[%s20667_s2] sm:$0xff] }
  0xfc   : > { %1811 = vmatpush1.bf16.msra.mxu0 %v14599_v47  ;;  %1854 = vmatpush1.bf16.msra.mxu1 %v14602_v48 }
  0xfd   : > { %1812 = vmatprep.subr.bf16.mxu0 %v14607_v49  ;;  %1855 = vmatprep.subr.bf16.mxu1 %v14610_v50 }
 0x100   : > { %1813 = vmatpush1.bf16.msra.mxu0 %v14605_v51  ;;  %1856 = vmatpush1.bf16.msra.mxu1 %v14608_v52  ;;  %v1022_v51 = vld [vmem:[%s20667_s2 + $0x8] sm:$0xff] }
 0x101   : > { %1814 = vmatprep.subr.bf16.mxu0 %v14613_v53  ;;  %1857 = vmatprep.subr.bf16.mxu1 %v14616_v54 }
 0x104   : > { %1815 = vmatpush1.bf16.msra.mxu0 %v14611_v55  ;;  %1858 = vmatpush1.bf16.msra.mxu1 %v14614_v56 }
 0x105   : > { %1816 = vmatprep.subr.bf16.mxu0 %v14619_v58  ;;  %1859 = vmatprep.subr.bf16.mxu1 %v14622_v59 }
 0x108   : > { %1817 = vmatpush1.bf16.msra.mxu0 %v14617_v62  ;;  %1860 = vmatpush1.bf16.msra.mxu1 %v14620_v63 }
 0x109   : > { %1929 = vmatprep.subr.bf16.mxu0 %v17119_v0  ;;  %1972 = vmatprep.subr.bf16.mxu1 %v17120_v1 }
 0x19e   : > { %v1270_v10 = vpop.f32.mrb[0].mxu0  ;;  %v1313_v12 = vpop.f32.mrb[0].mxu1 }
 0x19f   : > { %v14237_v13 = vadd.f32 %v1270_v10, %v17949_v8  ;;  %v1272_v14 = vpop.f32.mrb[1].mxu0  ;;  %v1315_v15 = vpop.f32.mrb[1].mxu1  ;;  %v14269_v30 = vadd.f32 %v1313_v12, %v17962_v24  ;;  %v17121_v10 = vld [vmem:[%s20620_s4] ss:$16 sps:$4 sm:$0xff]   ;;  %v17122_v12 = vld [vmem:[%s20620_s4 + $0x8] ss:$16 sps:$4 sm:$0xff]  }
 0x1a0   : > { %v14238_v16 = vadd.f32 %v1272_v14, %v17952_v9  ;;  %v1274_v17 = vpop.f32.mrb[2].mxu0  ;;  %v1317_v18 = vpop.f32.mrb[2].mxu1  ;;  %v14270_v32 = vadd.f32 %v1315_v15, %v17966_v29  ;;  %v17124_v14 = vld [vmem:[%s20620_s4 + $0x2c] ss:$16 sps:$4 sm:$0xff]   ;;  %v17125_v15 = vld [vmem:[%s20620_s4 + $0x20] ss:$16 sps:$4 sm:$0xff]  }
 0x1a1   : > { %v12846_v19 = vmul.f32 -1.442695, %v14237_v13  ;;  %v14239_v21 = vadd.f32 %v1274_v17, %v17949_v8  ;;  %v1276_v22 = vpop.f32.mrb[3].mxu0  ;;  %v1319_v23 = vpop.f32.mrb[3].mxu1  ;;  %v14271_v31 = vadd.f32 %v1317_v18, %v17962_v24  ;;  %v12848_v33 = vmul.f32 -1.442695, %v14269_v30 }
 0x1a2   : > { %v12847_v25 = vmul.f32 -1.442695, %v14238_v16  ;;  %v14240_v26 = vadd.f32 %v1276_v22, %v17952_v9  ;;  %v14272_v36 = vadd.f32 %v1319_v23, %v17966_v29  ;;  %v17123_v13 = vld [vmem:[%s20620_s4 + $0x24] ss:$16 sps:$4 sm:$0xff]   ;;  %v17126_v16 = vld [vmem:[%s20620_s4 + $0x28] ss:$16 sps:$4 sm:$0xff]  }
 0x1a3   : > { %16351 = vpow2.f32 %v12846_v19  ;;  %v12849_v27 = vmul.f32 -1.442695, %v14239_v21  ;;  %v12851_v34 = vmul.f32 -1.442695, %v14271_v31  ;;  %v17127_v17 = vld [vmem:[%s20620_s4 + $0x44] ss:$16 sps:$4 sm:$0xff]  }
 0x1a4   : > { %v12850_v28 = vmul.f32 -1.442695, %v14240_v26  ;;  %16353 = vpow2.f32 %v12847_v25  ;;  %v17128_v18 = vld [vmem:[%s20620_s4 + $0x4c] ss:$16 sps:$4 sm:$0xff]   ;;  %v17129_v19 = vld [vmem:[%s20620_s4 + $0x40] ss:$16 sps:$4 sm:$0xff]  }
 0x1a5   : > { %16355 = vpow2.f32 %v12849_v27  ;;  %v17130_v21 = vld [vmem:[%s20620_s4 + $0x48] ss:$16 sps:$4 sm:$0xff]   ;;  %v17131_v22 = vld [vmem:[%s20620_s4 + $0x64] ss:$16 sps:$4 sm:$0xff]   ;;  %v17132_v23 = vld [vmem:[%s20620_s4 + $0x6c] ss:$16 sps:$4 sm:$0xff]  }
 0x1a6   : > { %16357 = vpow2.f32 %v12850_v28  ;;  %v17133_v25 = vld [vmem:[%s20620_s4 + $0x60] ss:$16 sps:$4 sm:$0xff]   ;;  %v17134_v26 = vld [vmem:[%s20620_s4 + $0x68] ss:$16 sps:$4 sm:$0xff]   ;;  %v17135_v27 = vld [vmem:[%s20620_s4 + $0x84] ss:$16 sps:$4 sm:$0xff]  }
 0x1a7   : > { %16359 = vtanh.f32 %v14270_v32  ;;  %v17136_v28 = vld [vmem:[%s20620_s4 + $0x8c] ss:$16 sps:$4 sm:$0xff]   ;;  %v17137_v30 = vld [vmem:[%s20620_s4 + $0x80] ss:$16 sps:$4 sm:$0xff]   ;;  %v17138_v31 = vld [vmem:[%s20620_s4 + $0x88] ss:$16 sps:$4 sm:$0xff]  }
 0x1a8   : > { %16361 = vpow2.f32 %v12848_v33  ;;  %v17139_v32 = vld [vmem:[%s20620_s4 + $0xa4] ss:$16 sps:$4 sm:$0xff]   ;;  %v17140_v33 = vld [vmem:[%s20620_s4 + $0xac] ss:$16 sps:$4 sm:$0xff]  }
 0x1a9   : > { %16363 = vpow2.f32 %v12851_v34  ;;  %v17141_v34 = vld [vmem:[%s20620_s4 + $0xa0] ss:$16 sps:$4 sm:$0xff]  }
 0x1ad   : > { %v16352_v35 = vpop.eup %16351 }
 0x1ae   : > { %v1348_v37 = vadd.f32 1.0, %v16352_v35  ;;  %v16354_v38 = vpop.eup %16353  ;;  %v17142_v35 = vld [vmem:[%s20620_s4 + $0xa8] ss:$16 sps:$4 sm:$0xff]  }
 0x1af   : > { %v16356_v39 = vpop.eup %16355  ;;  %v1349_v40 = vadd.f32 1.0, %v16354_v38  ;;  %v14625_v38 = vld [vmem:[#allocation6 + $0x4] ss:$16 sps:$4 sm:$0xff]  }
 0x1b0   : > { %16365 = vrcp.f32 %v1348_v37  ;;  %v1351_v41 = vadd.f32 1.0, %v16356_v39  ;;  %v16358_v42 = vpop.eup %16357  ;;  %v17144_v37 = vld [vmem:[%s20620_s4 + $0xcc] ss:$16 sps:$4 sm:$0xff]  }
 0x1b1   : > { %16367 = vtanh.f32 %v14272_v36  ;;  %v1352_v43 = vadd.f32 1.0, %v16358_v42  ;;  %v16360_v44 = vpop.eup %16359  ;;  %v17143_v36 = vld [vmem:[%s20620_s4 + $0xc4] ss:$16 sps:$4 sm:$0xff]   ;;  %v14628_v39 = vld [vmem:[#allocation6 + $0xc] ss:$16 sps:$4 sm:$0xff]  }
 0x1b2   : > { %16369 = vrcp.f32 %v1349_v40  ;;  %v16362_v45 = vpop.eup %16361  ;;  %v17145_v40 = vld [vmem:[%s20620_s4 + $0xc0] ss:$16 sps:$4 sm:$0xff]   ;;  %v17147_v42 = vld [vmem:[%s20620_s4 + $0xe4] ss:$16 sps:$4 sm:$0xff]  }
 0x1b3   : > { %16371 = vrcp.f32 %v1351_v41  ;;  %v16364_v47 = vpop.eup %16363  ;;  %v1350_v54 = vadd.f32 1.0, %v16362_v45  ;;  %v17146_v41 = vld [vmem:[%s20620_s4 + $0xc8] ss:$16 sps:$4 sm:$0xff]  }
 0x1b4   : > { %16373 = vrcp.f32 %v1352_v43  ;;  %v1353_v59 = vadd.f32 1.0, %v16364_v47  ;;  %v17148_v43 = vld [vmem:[%s20620_s4 + $0xec] ss:$16 sps:$4 sm:$0xff]   ;;  %v14626_v45 = vld [vmem:[#allocation6 + $0x8] ss:$16 sps:$4 sm:$0xff]  }
 0x1b5   : > { %16375 = vrcp.f32 %v1350_v54  ;;  %v14634_v47 = vld [vmem:[#allocation6 + $0x2c] ss:$16 sps:$4 sm:$0xff]   ;;  %v14635_v54 = vld [vmem:[#allocation6 + $0x40] ss:$16 sps:$4 sm:$0xff]  }
 0x1ba   : > { %v16366_v48 = vpop.eup %16365 }
 0x1bb   : > { %v16368_v49 = vpop.eup %16367  ;;  %v1370_v50 = vmul.f32 %v16366_v48, %v16360_v44  ;;  %v14623_v44 = vld [vmem:[#allocation6] ss:$16 sps:$4 sm:$0xff]  }
 0x1bc   : > { %v16370_v52 = vpop.eup %16369  ;;  %v17149_v48 = vld [vmem:[%s20620_s4 + $0xe0] ss:$16 sps:$4 sm:$0xff]  }
 0x1bd   : > { %v16372_v53 = vpop.eup %16371  ;;  %v1368_v55 = vmul.f32 %v16370_v52, %v1021_v46  ;;  %v14631_v46 = vld [vmem:[#allocation6 + $0x24] ss:$16 sps:$4 sm:$0xff]  }
 0x1be   : > { %v1371_v56 = vmul.f32 %v16372_v53, %v16368_v49  ;;  %v16374_v57 = vpop.eup %16373  ;;  %v17150_v49 = vld [vmem:[%s20620_s4 + $0xe8] ss:$16 sps:$4 sm:$0xff]   ;;  %v14637_v52 = vld [vmem:[#allocation6 + $0x44] ss:$16 sps:$4 sm:$0xff]   ;;  %v14640_v53 = vld [vmem:[#allocation6 + $0x4c] ss:$16 sps:$4 sm:$0xff]  }
 0x1bf   : > { %v17978_v58 = vadd.f32 %v1370_v50, %v1368_v55  ;;  %v1369_v60 = vmul.f32 %v16374_v57, %v1022_v51  ;;  %v16376_v62 = vpop.eup %16375  ;;  %v14629_v50 = vld [vmem:[#allocation6 + $0x20] ss:$16 sps:$4 sm:$0xff]   ;;  %v14632_v51 = vld [vmem:[#allocation6 + $0x28] ss:$16 sps:$4 sm:$0xff]   ;;  %v14646_v57 = vld [vmem:[#allocation6 + $0x6c] ss:$16 sps:$4 sm:$0xff]  }
 0x1c0   : > { %v14638_v55 = vld [vmem:[#allocation6 + $0x48] ss:$16 sps:$4 sm:$0xff]  }
 0x1c1   : > { %16377 = vtanh.f32 %v17978_v58  ;;  %v17981_v61 = vadd.f32 %v1371_v56, %v1369_v60  ;;  %v14643_v56 = vld [vmem:[#allocation6 + $0x64] ss:$16 sps:$4 sm:$0xff]   ;;  %v14644_v60 = vld [vmem:[#allocation6 + $0x68] ss:$16 sps:$4 sm:$0xff]  }
 0x1c2   : > { %16379 = vrcp.f32 %v1353_v59  ;;  %v14641_v59 = vld [vmem:[#allocation6 + $0x60] ss:$16 sps:$4 sm:$0xff]  }
 0x1c3   : > { %16381 = vtanh.f32 %v17981_v61 }
 0x1cb   : > { %v16378_v63 = vpop.eup %16377 }
 0x1cc   : > { %v16380_v0 = vpop.eup %16379  ;;  %v1376_v3 = vmul.f32 %v16378_v63, %v16376_v62  ;;  %v14649_v62 = vld [vmem:[#allocation6 + $0x84] ss:$16 sps:$4 sm:$0xff]   ;;  %v14652_v63 = vld [vmem:[#allocation6 + $0x8c] ss:$16 sps:$4 sm:$0xff]  }
 0x1cd   : > { %v16382_v1 = vpop.eup %16381 }
 0x1ce   : > { %v1377_v4 = vmul.f32 %v16382_v1, %v16380_v0  ;;  %v14647_v0 = vld [vmem:[#allocation6 + $0x80] ss:$16 sps:$4 sm:$0xff]   ;;  %v14650_v1 = vld [vmem:[#allocation6 + $0x88] ss:$16 sps:$4 sm:$0xff]  }
 0x1d0   : > { %v17984_v5 = vpack.c.bf16 %v1377_v4, %v1376_v3  ;;  %v14655_v3 = vld [vmem:[#allocation6 + $0xa4] ss:$16 sps:$4 sm:$0xff]   ;;  %v14658_v4 = vld [vmem:[#allocation6 + $0xac] ss:$16 sps:$4 sm:$0xff]  }
 0x1d2   : > { %1819 = vmatmul.mubr.bf16.vlgmr.msra.gmra.mrb[32].mxu0 %v17984_v5  ;;  %1862 = vmatmul.mubr.bf16.vlgmr.msra.gmra.mrb[32].mxu1 %v17984_v5 }
 0x1d3   : > { %1930 = vmatpush1.bf16.msra.mxu0 %v17121_v10  ;;  %1973 = vmatpush1.bf16.msra.mxu1 %v17122_v12  ;;  %v14656_v10 = vld [vmem:[#allocation6 + $0xa8] ss:$16 sps:$4 sm:$0xff]   ;;  %v14661_v12 = vld [vmem:[#allocation6 + $0xc4] ss:$16 sps:$4 sm:$0xff]  }
 0x1d4   : > { %1931 = vmatprep.subr.bf16.mxu0 %v17123_v13  ;;  %1974 = vmatprep.subr.bf16.mxu1 %v17124_v14  ;;  %v14664_v13 = vld [vmem:[#allocation6 + $0xcc] ss:$16 sps:$4 sm:$0xff]   ;;  %v14659_v14 = vld [vmem:[#allocation6 + $0xc0] ss:$16 sps:$4 sm:$0xff]  }
 0x1d5   : > { %1961 = vmatprep.mubr.bf16.mxu0 %v17312_v2  ;;  %2004 = vmatprep.mubr.bf16.mxu1 %v17312_v2 }
 0x1d7   : > { %1932 = vmatpush1.bf16.msra.mxu0 %v17125_v15  ;;  %1975 = vmatpush1.bf16.msra.mxu1 %v17126_v16  ;;  %v14662_v15 = vld [vmem:[#allocation6 + $0xc8] ss:$16 sps:$4 sm:$0xff]   ;;  %v14667_v16 = vld [vmem:[#allocation6 + $0xe4] ss:$16 sps:$4 sm:$0xff]  }
 0x1d8   : > { %1933 = vmatprep.subr.bf16.mxu0 %v17127_v17  ;;  %1976 = vmatprep.subr.bf16.mxu1 %v17128_v18  ;;  %v14670_v17 = vld [vmem:[#allocation6 + $0xec] ss:$16 sps:$4 sm:$0xff]   ;;  %v14665_v18 = vld [vmem:[#allocation6 + $0xe0] ss:$16 sps:$4 sm:$0xff]  }
 0x1db   : > { %1934 = vmatpush1.bf16.msra.mxu0 %v17129_v19  ;;  %1977 = vmatpush1.bf16.msra.mxu1 %v17130_v21  ;;  %v14668_v19 = vld [vmem:[#allocation6 + $0xe8] ss:$16 sps:$4 sm:$0xff]   ;;  %v14673_v21 = vld [vmem:[#allocation6 + $0x104] ss:$16 sps:$4 sm:$0xff]  }
 0x1dc   : > { %1935 = vmatprep.subr.bf16.mxu0 %v17131_v22  ;;  %1978 = vmatprep.subr.bf16.mxu1 %v17132_v23  ;;  %v14676_v22 = vld [vmem:[#allocation6 + $0x10c] ss:$16 sps:$4 sm:$0xff]   ;;  %v14671_v23 = vld [vmem:[#allocation6 + $0x100] ss:$16 sps:$4 sm:$0xff]  }
 0x1df   : > { %1936 = vmatpush1.bf16.msra.mxu0 %v17133_v25  ;;  %1979 = vmatpush1.bf16.msra.mxu1 %v17134_v26  ;;  %v14674_v25 = vld [vmem:[#allocation6 + $0x108] ss:$16 sps:$4 sm:$0xff]   ;;  %v14679_v26 = vld [vmem:[#allocation6 + $0x124] ss:$16 sps:$4 sm:$0xff]  }
 0x1e0   : > { %1937 = vmatprep.subr.bf16.mxu0 %v17135_v27  ;;  %1980 = vmatprep.subr.bf16.mxu1 %v17136_v28  ;;  %v14682_v27 = vld [vmem:[#allocation6 + $0x12c] ss:$16 sps:$4 sm:$0xff]   ;;  %v14677_v28 = vld [vmem:[#allocation6 + $0x120] ss:$16 sps:$4 sm:$0xff]  }
 0x1e3   : > { %1938 = vmatpush1.bf16.msra.mxu0 %v17137_v30  ;;  %1981 = vmatpush1.bf16.msra.mxu1 %v17138_v31  ;;  %v14680_v30 = vld [vmem:[#allocation6 + $0x128] ss:$16 sps:$4 sm:$0xff]   ;;  %v14685_v31 = vld [vmem:[#allocation6 + $0x144] ss:$16 sps:$4 sm:$0xff]  }
 0x1e4   : > { %1939 = vmatprep.subr.bf16.mxu0 %v17139_v32  ;;  %1982 = vmatprep.subr.bf16.mxu1 %v17140_v33  ;;  %v14688_v32 = vld [vmem:[#allocation6 + $0x14c] ss:$16 sps:$4 sm:$0xff]   ;;  %v14683_v33 = vld [vmem:[#allocation6 + $0x140] ss:$16 sps:$4 sm:$0xff]  }
 0x1e7   : > { %1940 = vmatpush1.bf16.msra.mxu0 %v17141_v34  ;;  %1983 = vmatpush1.bf16.msra.mxu1 %v17142_v35  ;;  %v14686_v34 = vld [vmem:[#allocation6 + $0x148] ss:$16 sps:$4 sm:$0xff]   ;;  %v14691_v35 = vld [vmem:[#allocation6 + $0x164] ss:$16 sps:$4 sm:$0xff]  }
 0x1e8   : > { %1941 = vmatprep.subr.bf16.mxu0 %v17143_v36  ;;  %1984 = vmatprep.subr.bf16.mxu1 %v17144_v37  ;;  %v14694_v36 = vld [vmem:[#allocation6 + $0x16c] ss:$16 sps:$4 sm:$0xff]   ;;  %v14689_v37 = vld [vmem:[#allocation6 + $0x160] ss:$16 sps:$4 sm:$0xff]  }
 0x1eb   : > { %1942 = vmatpush1.bf16.msra.mxu0 %v17145_v40  ;;  %1985 = vmatpush1.bf16.msra.mxu1 %v17146_v41  ;;  %v14700_v40 = vld [vmem:[#allocation6 + $0x18c] ss:$16 sps:$4 sm:$0xff]   ;;  %v14695_v41 = vld [vmem:[#allocation6 + $0x180] ss:$16 sps:$4 sm:$0xff]  }
 0x1ec   : > { %1943 = vmatprep.subr.bf16.mxu0 %v17147_v42  ;;  %1986 = vmatprep.subr.bf16.mxu1 %v17148_v43  ;;  %v14698_v42 = vld [vmem:[#allocation6 + $0x188] ss:$16 sps:$4 sm:$0xff]   ;;  %v14703_v43 = vld [vmem:[#allocation6 + $0x1a4] ss:$16 sps:$4 sm:$0xff]  }
 0x1ef   : > { %1944 = vmatpush1.bf16.msra.mxu0 %v17149_v48  ;;  %1987 = vmatpush1.bf16.msra.mxu1 %v17150_v49  ;;  %v14712_v48 = vld [vmem:[#allocation6 + $0x1cc] ss:$16 sps:$4 sm:$0xff]   ;;  %v14707_v49 = vld [vmem:[#allocation6 + $0x1c0] ss:$16 sps:$4 sm:$0xff]  }
 0x1f0   : > { %2479 = vmatprep.subr.bf16.mxu0 %v14625_v38  ;;  %2522 = vmatprep.subr.bf16.mxu1 %v14628_v39  ;;  %v14692_v38 = vld [vmem:[#allocation6 + $0x168] ss:$16 sps:$4 sm:$0xff]   ;;  %v14697_v39 = vld [vmem:[#allocation6 + $0x184] ss:$16 sps:$4 sm:$0xff]  }
 0x1f2   : > { %1962 = vmatmul.mubr.bf16.vlgmr.msra.gmra.mrb[4].mxu0 %v17984_v5  ;;  %2005 = vmatmul.mubr.bf16.vlgmr.msra.gmra.mrb[4].mxu1 %v17984_v5  ;;  %v14653_v5 = vld [vmem:[#allocation6 + $0xa0] ss:$16 sps:$4 sm:$0xff]  }
 0x1f3   : > { %2480 = vmatpush1.bf16.msra.mxu0 %v14623_v44  ;;  %2523 = vmatpush1.bf16.msra.mxu1 %v14626_v45  ;;  %v14706_v44 = vld [vmem:[#allocation6 + $0x1ac] ss:$16 sps:$4 sm:$0xff]   ;;  %v14701_v45 = vld [vmem:[#allocation6 + $0x1a0] ss:$16 sps:$4 sm:$0xff]  }
 0x1f4   : > { %2481 = vmatprep.subr.bf16.mxu0 %v14631_v46  ;;  %2524 = vmatprep.subr.bf16.mxu1 %v14634_v47  ;;  %v14704_v46 = vld [vmem:[#allocation6 + $0x1a8] ss:$16 sps:$4 sm:$0xff]   ;;  %v14709_v47 = vld [vmem:[#allocation6 + $0x1c4] ss:$16 sps:$4 sm:$0xff]  }
 0x1f7   : > { %2482 = vmatpush1.bf16.msra.mxu0 %v14629_v50  ;;  %2525 = vmatpush1.bf16.msra.mxu1 %v14632_v51  ;;  %v14710_v50 = vld [vmem:[#allocation6 + $0x1c8] ss:$16 sps:$4 sm:$0xff]   ;;  %v14715_v51 = vld [vmem:[#allocation6 + $0x1e4] ss:$16 sps:$4 sm:$0xff]  }
 0x1f8   : > { %2483 = vmatprep.subr.bf16.mxu0 %v14637_v52  ;;  %2526 = vmatprep.subr.bf16.mxu1 %v14640_v53  ;;  %v14718_v52 = vld [vmem:[#allocation6 + $0x1ec] ss:$16 sps:$4 sm:$0xff]   ;;  %v14713_v53 = vld [vmem:[#allocation6 + $0x1e0] ss:$16 sps:$4 sm:$0xff]  }
 0x1fb   : > { %2484 = vmatpush1.bf16.msra.mxu0 %v14635_v54  ;;  %2527 = vmatpush1.bf16.msra.mxu1 %v14638_v55  ;;  %v14716_v54 = vld [vmem:[#allocation6 + $0x1e8] ss:$16 sps:$4 sm:$0xff]   ;;  %v12810_v55 = vld [vmem:[%s20617_s1 + $0x20] sm:$0xff] }
 0x1fc   : > { %2485 = vmatprep.subr.bf16.mxu0 %v14643_v56  ;;  %2528 = vmatprep.subr.bf16.mxu1 %v14646_v57  ;;  %v12811_v56 = vld [vmem:[%s20617_s1 + $0x28] sm:$0xff] }
 0x1fd   : > { %v2072_v57 = vpack.c.bf16 %v12811_v56, %v12810_v55 }
 0x1ff   : > { %2486 = vmatpush1.bf16.msra.mxu0 %v14641_v59  ;;  %2529 = vmatpush1.bf16.msra.mxu1 %v14644_v60  ;;  %v14721_v59 = vld [vmem:[%s20622_s6 + $0x4] ss:$16 sps:$4 sm:$0xff]   ;;  %v14724_v60 = vld [vmem:[%s20622_s6 + $0xc] ss:$16 sps:$4 sm:$0xff]  }
 0x200   : > { %2487 = vmatprep.subr.bf16.mxu0 %v14649_v62  ;;  %2530 = vmatprep.subr.bf16.mxu1 %v14652_v63  ;;  %v1444_v62 = vld [vmem:[%s20668_s16] sm:$0xf]  ;;  %s20671_s16 = sld [smem:[#allocation21_spill]] }
 0x201   : > { %2511 = vmatprep.mubr.bf16.mxu0 %v2072_v57  ;;  %2554 = vmatprep.mubr.bf16.mxu1 %v2072_v57  ;;  %v1449_v63 = vrot.slane %v1444_v62, %v17944_v6 }
 0x203   : > { %2488 = vmatpush1.bf16.msra.mxu0 %v14647_v0  ;;  %2531 = vmatpush1.bf16.msra.mxu1 %v14650_v1  ;;  %v1453_v0 = vrot.slane %v1444_v62, %v17946_v7 }
 0x204   : > { %2489 = vmatprep.subr.bf16.mxu0 %v14655_v3  ;;  %2532 = vmatprep.subr.bf16.mxu1 %v14658_v4 }
 0x206   : > { %s20672_s21 = smov %s20671_s16 }
 0x207   : > { %2490 = vmatpush1.bf16.msra.mxu0 %v14653_v5  ;;  %2533 = vmatpush1.bf16.msra.mxu1 %v14656_v10 }
 0x208   : > { %2491 = vmatprep.subr.bf16.mxu0 %v14661_v12  ;;  %2534 = vmatprep.subr.bf16.mxu1 %v14664_v13 }
 0x20b   : > { %2492 = vmatpush1.bf16.msra.mxu0 %v14659_v14  ;;  %2535 = vmatpush1.bf16.msra.mxu1 %v14662_v15 }
 0x20c   : > { %2493 = vmatprep.subr.bf16.mxu0 %v14667_v16  ;;  %2536 = vmatprep.subr.bf16.mxu1 %v14670_v17 }
 0x20f   : > { %2494 = vmatpush1.bf16.msra.mxu0 %v14665_v18  ;;  %2537 = vmatpush1.bf16.msra.mxu1 %v14668_v19  ;;  %v1457_v19 = vrot.slane %v1444_v62, %v17954_v11 }
 0x210   : > { %2495 = vmatprep.subr.bf16.mxu0 %v14673_v21  ;;  %2538 = vmatprep.subr.bf16.mxu1 %v14676_v22 }
 0x213   : > { %2496 = vmatpush1.bf16.msra.mxu0 %v14671_v23  ;;  %2539 = vmatpush1.bf16.msra.mxu1 %v14674_v25 }
 0x214   : > { %2497 = vmatprep.subr.bf16.mxu0 %v14679_v26  ;;  %2540 = vmatprep.subr.bf16.mxu1 %v14682_v27  ;;  %v1461_v26 = vrot.slane %v1444_v62, %v17958_v20 }
 0x217   : > { %2498 = vmatpush1.bf16.msra.mxu0 %v14677_v28  ;;  %2541 = vmatpush1.bf16.msra.mxu1 %v14680_v30 }
 0x218   : > { %2499 = vmatprep.subr.bf16.mxu0 %v14685_v31  ;;  %2542 = vmatprep.subr.bf16.mxu1 %v14688_v32 }
 0x21b   : > { %2500 = vmatpush1.bf16.msra.mxu0 %v14683_v33  ;;  %2543 = vmatpush1.bf16.msra.mxu1 %v14686_v34 }
 0x21c   : > { %2501 = vmatprep.subr.bf16.mxu0 %v14691_v35  ;;  %2544 = vmatprep.subr.bf16.mxu1 %v14694_v36 }
 0x21f   : > { %2502 = vmatpush1.bf16.msra.mxu0 %v14689_v37  ;;  %2545 = vmatpush1.bf16.msra.mxu1 %v14692_v38 }
 0x220   : > { %2503 = vmatprep.subr.bf16.mxu0 %v14697_v39  ;;  %2546 = vmatprep.subr.bf16.mxu1 %v14700_v40 }
 0x223   : > { %2504 = vmatpush1.bf16.msra.mxu0 %v14695_v41  ;;  %2547 = vmatpush1.bf16.msra.mxu1 %v14698_v42 }
 0x224   : > { %2505 = vmatprep.subr.bf16.mxu0 %v14703_v43  ;;  %2548 = vmatprep.subr.bf16.mxu1 %v14706_v44 }
 0x227   : > { %2506 = vmatpush1.bf16.msra.mxu0 %v14701_v45  ;;  %2549 = vmatpush1.bf16.msra.mxu1 %v14704_v46  ;;  %v12808_v46 = vld [vmem:[%s20667_s2 + $0x10] sm:$0xff] }
 0x228   : > { %2507 = vmatprep.subr.bf16.mxu0 %v14709_v47  ;;  %2550 = vmatprep.subr.bf16.mxu1 %v14712_v48 }
 0x22b   : > { %2508 = vmatpush1.bf16.msra.mxu0 %v14707_v49  ;;  %2551 = vmatpush1.bf16.msra.mxu1 %v14710_v50 }
 0x22c   : > { %2509 = vmatprep.subr.bf16.mxu0 %v14715_v51  ;;  %2552 = vmatprep.subr.bf16.mxu1 %v14718_v52 }
 0x22f   : > { %2510 = vmatpush1.bf16.msra.mxu0 %v14713_v53  ;;  %2553 = vmatpush1.bf16.msra.mxu1 %v14716_v54  ;;  %v12809_v54 = vld [vmem:[%s20667_s2 + $0x18] sm:$0xff] }
 0x230   : > { %3021 = vmatprep.subr.bf16.mxu0 %v14721_v59  ;;  %3064 = vmatprep.subr.bf16.mxu1 %v14724_v60 }
 0x2a5   : > { %v1820_v1 = vpop.f32.mrb[32].mxu0  ;;  %v1863_v3 = vpop.f32.mrb[32].mxu1 }
 0x2a6   : > { %v1821_v4 = vadd.f32 %v1820_v1, %v1449_v63  ;;  %v1822_v5 = vpop.f32.mrb[33].mxu0  ;;  %v1865_v10 = vpop.f32.mrb[33].mxu1  ;;  %v1864_v27 = vadd.f32 %v1863_v3, %v1457_v19 }
 0x2a7   : > { %v1823_v12 = vadd.f32 %v1822_v5, %v1453_v0  ;;  %v1824_v13 = vpop.f32.mrb[34].mxu0  ;;  %v1867_v14 = vpop.f32.mrb[34].mxu1  ;;  %v1866_v30 = vadd.f32 %v1865_v10, %v1461_v26 }
 0x2a8   : > { %v12916_v15 = vmul.f32 -1.442695, %v1821_v4  ;;  %v1825_v16 = vadd.f32 %v1824_v13, %v1449_v63  ;;  %v1826_v17 = vpop.f32.mrb[35].mxu0  ;;  %v1869_v18 = vpop.f32.mrb[35].mxu1  ;;  %v1868_v28 = vadd.f32 %v1867_v14, %v1457_v19  ;;  %v12918_v31 = vmul.f32 -1.442695, %v1864_v27 }
 0x2a9   : > { %v12917_v21 = vmul.f32 -1.442695, %v1823_v12  ;;  %v1827_v22 = vadd.f32 %v1826_v17, %v1453_v0  ;;  %v1870_v34 = vadd.f32 %v1869_v18, %v1461_v26 }
 0x2aa   : > { %16383 = vpow2.f32 %v12916_v15  ;;  %v12919_v23 = vmul.f32 -1.442695, %v1825_v16  ;;  %v12921_v32 = vmul.f32 -1.442695, %v1868_v28 }
 0x2ab   : > { %v12920_v25 = vmul.f32 -1.442695, %v1827_v22  ;;  %16385 = vpow2.f32 %v12917_v21 }
 0x2ac   : > { %16387 = vpow2.f32 %v12919_v23 }
 0x2ad   : > { %16389 = vpow2.f32 %v12920_v25 }
 0x2ae   : > { %16391 = vtanh.f32 %v1866_v30 }
 0x2af   : > { %16393 = vpow2.f32 %v12918_v31 }
 0x2b0   : > { %16395 = vpow2.f32 %v12921_v32 }
 0x2b4   : > { %v16384_v33 = vpop.eup %16383 }
 0x2b5   : > { %v1890_v35 = vadd.f32 1.0, %v16384_v33  ;;  %v16386_v36 = vpop.eup %16385 }
 0x2b6   : > { %v16388_v37 = vpop.eup %16387  ;;  %v1891_v38 = vadd.f32 1.0, %v16386_v36 }
 0x2b7   : > { %16397 = vrcp.f32 %v1890_v35  ;;  %v1893_v39 = vadd.f32 1.0, %v16388_v37  ;;  %v16390_v40 = vpop.eup %16389 }
 0x2b8   : > { %16399 = vtanh.f32 %v1870_v34  ;;  %v1894_v41 = vadd.f32 1.0, %v16390_v40  ;;  %v16392_v42 = vpop.eup %16391 }
 0x2b9   : > { %16401 = vrcp.f32 %v1891_v38  ;;  %v16394_v43 = vpop.eup %16393  ;;  %v14719_v38 = vld [vmem:[%s20622_s6] ss:$16 sps:$4 sm:$0xff]  }
 0x2ba   : > { %16403 = vrcp.f32 %v1893_v39  ;;  %v16396_v44 = vpop.eup %16395  ;;  %v1892_v50 = vadd.f32 1.0, %v16394_v43  ;;  %v14722_v39 = vld [vmem:[%s20622_s6 + $0x8] ss:$16 sps:$4 sm:$0xff]  }
 0x2bb   : > { %16405 = vrcp.f32 %v1894_v41  ;;  %v1895_v53 = vadd.f32 1.0, %v16396_v44  ;;  %v14727_v44 = vld [vmem:[%s20622_s6 + $0x24] ss:$16 sps:$4 sm:$0xff]  }
 0x2bc   : > { %16407 = vrcp.f32 %v1892_v50  ;;  %v14733_v50 = vld [vmem:[%s20622_s6 + $0x44] ss:$16 sps:$4 sm:$0xff]  }
 0x2bd   : > { %16409 = vrcp.f32 %v1895_v53  ;;  %v14731_v53 = vld [vmem:[%s20622_s6 + $0x40] ss:$16 sps:$4 sm:$0xff]  }
 0x2c1   : > { %v16398_v45 = vpop.eup %16397 }
 0x2c2   : > { %v16400_v47 = vpop.eup %16399  ;;  %v1912_v48 = vmul.f32 %v16398_v45, %v16392_v42  ;;  %v14730_v45 = vld [vmem:[%s20622_s6 + $0x2c] ss:$16 sps:$4 sm:$0xff]  }
 0x2c3   : > { %v16402_v49 = vpop.eup %16401 }
 0x2c4   : > { %v16404_v51 = vpop.eup %16403  ;;  %v1910_v52 = vmul.f32 %v16402_v49, %v12808_v46  ;;  %v14728_v49 = vld [vmem:[%s20622_s6 + $0x28] ss:$16 sps:$4 sm:$0xff]  }
 0x2c5   : > { %v1913_v55 = vmul.f32 %v16404_v51, %v16400_v47  ;;  %v1963_v56 = vpop.f32.mrb[4].mxu0  ;;  %v2006_v57 = vpop.f32.mrb[4].mxu1  ;;  %v14736_v51 = vld [vmem:[%s20622_s6 + $0x4c] ss:$16 sps:$4 sm:$0xff]  }
 0x2c6   : > { %v16406_v59 = vpop.eup %16405  ;;  %v18107_v60 = vadd.f32 %v1912_v48, %v1910_v52  ;;  %v14241_v62 = vadd.f32 %v1963_v56, %v17949_v8  ;;  %v1965_v63 = vpop.f32.mrb[5].mxu0  ;;  %v14273_v21 = vadd.f32 %v2006_v57, %v17962_v24  ;;  %v14725_v48 = vld [vmem:[%s20622_s6 + $0x20] ss:$16 sps:$4 sm:$0xff]   ;;  %v14739_v56 = vld [vmem:[%s20622_s6 + $0x64] ss:$16 sps:$4 sm:$0xff]  }
 0x2c7   : > { %v2008_v0 = vpop.f32.mrb[5].mxu1  ;;  %v1911_v1 = vmul.f32 %v16406_v59, %v12809_v54  ;;  %v14242_v3 = vadd.f32 %v1965_v63, %v17952_v9  ;;  %v1967_v4 = vpop.f32.mrb[6].mxu0  ;;  %v14734_v54 = vld [vmem:[%s20622_s6 + $0x48] ss:$16 sps:$4 sm:$0xff]   ;;  %v14742_v57 = vld [vmem:[%s20622_s6 + $0x6c] ss:$16 sps:$4 sm:$0xff]  }
 0x2c8   : > { %v2010_v5 = vpop.f32.mrb[6].mxu1  ;;  %v12922_v10 = vmul.f32 -1.442695, %v14241_v62  ;;  %v14243_v12 = vadd.f32 %v1967_v4, %v17949_v8  ;;  %v1969_v13 = vpop.f32.mrb[7].mxu0  ;;  %16411 = vtanh.f32 %v18107_v60  ;;  %v14274_v25 = vadd.f32 %v2008_v0, %v17966_v29 }
 0x2c9   : > { %v2012_v14 = vpop.f32.mrb[7].mxu1  ;;  %v18113_v15 = vadd.f32 %v1913_v55, %v1911_v1  ;;  %v12923_v16 = vmul.f32 -1.442695, %v14242_v3  ;;  %v14244_v18 = vadd.f32 %v1969_v13, %v17952_v9  ;;  %v14275_v22 = vadd.f32 %v2010_v5, %v17962_v24  ;;  %v16408_v23 = vpop.eup %16407  ;;  %v14737_v1 = vld [vmem:[%s20622_s6 + $0x60] ss:$16 sps:$4 sm:$0xff]  }
 0x2ca   : > { %16413 = vpow2.f32 %v12922_v10  ;;  %v12925_v17 = vmul.f32 -1.442695, %v14243_v12  ;;  %v16410_v26 = vpop.eup %16409  ;;  %v12924_v27 = vmul.f32 -1.442695, %v14273_v21  ;;  %v14276_v34 = vadd.f32 %v2012_v14, %v17966_v29  ;;  %v14740_v3 = vld [vmem:[%s20622_s6 + $0x68] ss:$16 sps:$4 sm:$0xff]  }
 0x2cb   : > { %16415 = vtanh.f32 %v18113_v15  ;;  %v12926_v19 = vmul.f32 -1.442695, %v14244_v18  ;;  %v12927_v31 = vmul.f32 -1.442695, %v14275_v22  ;;  %v14745_v5 = vld [vmem:[%s20622_s6 + $0x84] ss:$16 sps:$4 sm:$0xff]  }
 0x2cc   : > { %16417 = vpow2.f32 %v12923_v16  ;;  %v14748_v10 = vld [vmem:[%s20622_s6 + $0x8c] ss:$16 sps:$4 sm:$0xff]   ;;  %v14743_v21 = vld [vmem:[%s20622_s6 + $0x80] ss:$16 sps:$4 sm:$0xff]   ;;  %v14746_v22 = vld [vmem:[%s20622_s6 + $0x88] ss:$16 sps:$4 sm:$0xff]  }
 0x2cd   : > { %16419 = vpow2.f32 %v12925_v17 }
 0x2ce   : > { %16421 = vpow2.f32 %v12926_v19 }
 0x2cf   : > { %16423 = vtanh.f32 %v14274_v25  ;;  %v14754_v25 = vld [vmem:[%s20622_s6 + $0xac] ss:$16 sps:$4 sm:$0xff]  }
 0x2d0   : > { %16425 = vpow2.f32 %v12924_v27  ;;  %v14752_v27 = vld [vmem:[%s20622_s6 + $0xa8] ss:$16 sps:$4 sm:$0xff]  }
 0x2d2   : > { %v16412_v28 = vpop.eup %16411 }
 0x2d3   : > { %v1918_v35 = vmul.f32 %v16412_v28, %v16408_v23  ;;  %v14757_v28 = vld [vmem:[%s20622_s6 + $0xc4] ss:$16 sps:$4 sm:$0xff]  }
 0x2d4   : > { %v16414_v30 = vpop.eup %16413 }
 0x2d5   : > { %v16416_v32 = vpop.eup %16415  ;;  %v2041_v33 = vadd.f32 1.0, %v16414_v30  ;;  %v14760_v30 = vld [vmem:[%s20622_s6 + $0xcc] ss:$16 sps:$4 sm:$0xff]  }
 0x2d6   : > { %v1919_v36 = vmul.f32 %v16416_v32, %v16410_v26  ;;  %v16418_v37 = vpop.eup %16417  ;;  %v14758_v32 = vld [vmem:[%s20622_s6 + $0xc8] ss:$16 sps:$4 sm:$0xff]  }
 0x2d7   : > { %16427 = vrcp.f32 %v2041_v33  ;;  %v16420_v40 = vpop.eup %16419  ;;  %v2042_v41 = vadd.f32 1.0, %v16418_v37  ;;  %v14763_v33 = vld [vmem:[%s20622_s6 + $0xe4] ss:$16 sps:$4 sm:$0xff]   ;;  %v14764_v37 = vld [vmem:[%s20622_s6 + $0xe8] ss:$16 sps:$4 sm:$0xff]  }
 0x2d8   : > { %16429 = vpow2.f32 %v12927_v31  ;;  %v1920_v42 = vpack.c.bf16 %v1919_v36, %v1918_v35  ;;  %v2044_v43 = vadd.f32 1.0, %v16420_v40  ;;  %v16422_v46 = vpop.eup %16421  ;;  %v14755_v31 = vld [vmem:[%s20622_s6 + $0xc0] ss:$16 sps:$4 sm:$0xff]   ;;  %v14772_v40 = vld [vmem:[%s20622_s6 + $0x10c] ss:$16 sps:$4 sm:$0xff]  }
 0x2d9   : > { %16431 = vtanh.f32 %v14276_v34  ;;  %v2045_v47 = vadd.f32 1.0, %v16422_v46  ;;  %v16424_v52 = vpop.eup %16423  ;;  %v14766_v34 = vld [vmem:[%s20622_s6 + $0xec] ss:$16 sps:$4 sm:$0xff]   ;;  %v14761_v36 = vld [vmem:[%s20622_s6 + $0xe0] ss:$16 sps:$4 sm:$0xff]  }
 0x2da   : > { %16433 = vrcp.f32 %v2042_v41  ;;  %2512 = vmatmul.mubr.bf16.vlgmr.msra.gmra.mrb[36].mxu0 %v1920_v42  ;;  %2555 = vmatmul.mubr.bf16.vlgmr.msra.gmra.mrb[36].mxu1 %v1920_v42  ;;  %v16426_v55 = vpop.eup %16425 }
 0x2db   : > { %16435 = vrcp.f32 %v2044_v43  ;;  %3022 = vmatpush1.bf16.msra.mxu0 %v14719_v38  ;;  %3065 = vmatpush1.bf16.msra.mxu1 %v14722_v39  ;;  %v2043_v13 = vadd.f32 1.0, %v16426_v55  ;;  %v14769_v39 = vld [vmem:[%s20622_s6 + $0x104] ss:$16 sps:$4 sm:$0xff]   ;;  %v14767_v43 = vld [vmem:[%s20622_s6 + $0x100] ss:$16 sps:$4 sm:$0xff]  }
 0x2dc   : > { %3053 = vmatprep.mubr.bf16.mxu0 %v1920_v42  ;;  %3096 = vmatprep.mubr.bf16.mxu1 %v1920_v42  ;;  %16437 = vrcp.f32 %v2045_v47  ;;  %v14775_v47 = vld [vmem:[%s20622_s6 + $0x124] ss:$16 sps:$4 sm:$0xff]   ;;  %v14782_v55 = vld [vmem:[%s20622_s6 + $0x148] ss:$16 sps:$4 sm:$0xff]  }
 0x2dd   : > { %3023 = vmatprep.subr.bf16.mxu0 %v14727_v44  ;;  %3066 = vmatprep.subr.bf16.mxu1 %v14730_v45  ;;  %16439 = vrcp.f32 %v2043_v13  ;;  %v14770_v44 = vld [vmem:[%s20622_s6 + $0x108] ss:$16 sps:$4 sm:$0xff]   ;;  %v14805_v13 = vld [vmem:[%s20622_s6 + $0x1c4] ss:$16 sps:$4 sm:$0xff]  }
 0x2df   : > { %3024 = vmatpush1.bf16.msra.mxu0 %v14725_v48  ;;  %3067 = vmatpush1.bf16.msra.mxu1 %v14728_v49  ;;  %v14778_v48 = vld [vmem:[%s20622_s6 + $0x12c] ss:$16 sps:$4 sm:$0xff]  }
 0x2e0   : > { %3025 = vmatprep.subr.bf16.mxu0 %v14733_v50  ;;  %3068 = vmatprep.subr.bf16.mxu1 %v14736_v51  ;;  %v14773_v50 = vld [vmem:[%s20622_s6 + $0x120] ss:$16 sps:$4 sm:$0xff]   ;;  %v14776_v51 = vld [vmem:[%s20622_s6 + $0x128] ss:$16 sps:$4 sm:$0xff]  }
 0x2e1   : > { %v16428_v59 = vpop.eup %16427 }
 0x2e2   : > { %v16430_v62 = vpop.eup %16429  ;;  %v2063_v63 = vmul.f32 %v16428_v59, %v16424_v52  ;;  %v14781_v52 = vld [vmem:[%s20622_s6 + $0x144] ss:$16 sps:$4 sm:$0xff]   ;;  %v14785_v59 = vld [vmem:[%s20622_s6 + $0x160] ss:$16 sps:$4 sm:$0xff]  }
 0x2e3   : > { %v16432_v0 = vpop.eup %16431  ;;  %3026 = vmatpush1.bf16.msra.mxu0 %v14731_v53  ;;  %3069 = vmatpush1.bf16.msra.mxu1 %v14734_v54  ;;  %v2046_v19 = vadd.f32 1.0, %v16430_v62  ;;  %v14784_v53 = vld [vmem:[%s20622_s6 + $0x14c] ss:$16 sps:$4 sm:$0xff]   ;;  %v14779_v54 = vld [vmem:[%s20622_s6 + $0x140] ss:$16 sps:$4 sm:$0xff]  }
 0x2e4   : > { %v16434_v4 = vpop.eup %16433  ;;  %3027 = vmatprep.subr.bf16.mxu0 %v14739_v56  ;;  %3070 = vmatprep.subr.bf16.mxu1 %v14742_v57  ;;  %v14787_v56 = vld [vmem:[%s20622_s6 + $0x164] ss:$16 sps:$4 sm:$0xff]   ;;  %v14790_v57 = vld [vmem:[%s20622_s6 + $0x16c] ss:$16 sps:$4 sm:$0xff]   ;;  %v14788_v62 = vld [vmem:[%s20622_s6 + $0x168] ss:$16 sps:$4 sm:$0xff]  }
 0x2e5   : > { %v16436_v12 = vpop.eup %16435  ;;  %v2061_v14 = vmul.f32 %v16434_v4, %v17978_v58  ;;  %v14751_v58 = vld [vmem:[%s20622_s6 + $0xa4] ss:$16 sps:$4 sm:$0xff]  }
 0x2e6   : > { %v2064_v16 = vmul.f32 %v16436_v12, %v16432_v0  ;;  %v16438_v17 = vpop.eup %16437  ;;  %v14796_v0 = vld [vmem:[%s20622_s6 + $0x18c] ss:$16 sps:$4 sm:$0xff]   ;;  %v14799_v4 = vld [vmem:[%s20622_s6 + $0x1a4] ss:$16 sps:$4 sm:$0xff]   ;;  %v14800_v12 = vld [vmem:[%s20622_s6 + $0x1a8] ss:$16 sps:$4 sm:$0xff]  }
 0x2e7   : > { %v18170_v18 = vadd.f32 %v2063_v63, %v2061_v14  ;;  %3028 = vmatpush1.bf16.msra.mxu0 %v14737_v1  ;;  %3071 = vmatpush1.bf16.msra.mxu1 %v14740_v3  ;;  %v2062_v23 = vmul.f32 %v16438_v17, %v17981_v61  ;;  %v14749_v61 = vld [vmem:[%s20622_s6 + $0xa0] ss:$16 sps:$4 sm:$0xff]   ;;  %v16440_v35 = vpop.eup %16439  ;;  %v14793_v63 = vld [vmem:[%s20622_s6 + $0x184] ss:$16 sps:$4 sm:$0xff]   ;;  %v14794_v3 = vld [vmem:[%s20622_s6 + $0x188] ss:$16 sps:$4 sm:$0xff]  }
 0x2e8   : > { %3029 = vmatprep.subr.bf16.mxu0 %v14745_v5  ;;  %3072 = vmatprep.subr.bf16.mxu1 %v14748_v10  ;;  %v14791_v1 = vld [vmem:[%s20622_s6 + $0x180] ss:$16 sps:$4 sm:$0xff]   ;;  %v14802_v5 = vld [vmem:[%s20622_s6 + $0x1ac] ss:$16 sps:$4 sm:$0xff]   ;;  %v14806_v17 = vld [vmem:[%s20622_s6 + $0x1c8] ss:$16 sps:$4 sm:$0xff]  }
 0x2e9   : > { %16441 = vtanh.f32 %v18170_v18  ;;  %v18186_v26 = vadd.f32 %v2064_v16, %v2062_v23  ;;  %v14797_v10 = vld [vmem:[%s20622_s6 + $0x1a0] ss:$16 sps:$4 sm:$0xff]   ;;  %v14808_v14 = vld [vmem:[%s20622_s6 + $0x1cc] ss:$16 sps:$4 sm:$0xff]   ;;  %v14812_v23 = vld [vmem:[%s20622_s6 + $0x1e8] ss:$16 sps:$4 sm:$0xff]  }
 0x2ea   : > { %16443 = vrcp.f32 %v2046_v19  ;;  %v14803_v16 = vld [vmem:[%s20622_s6 + $0x1c0] ss:$16 sps:$4 sm:$0xff]   ;;  %v14811_v19 = vld [vmem:[%s20622_s6 + $0x1e4] ss:$16 sps:$4 sm:$0xff]  }
 0x2eb   : > { %3030 = vmatpush1.bf16.msra.mxu0 %v14743_v21  ;;  %3073 = vmatpush1.bf16.msra.mxu1 %v14746_v22  ;;  %16445 = vtanh.f32 %v18186_v26  ;;  %v14814_v21 = vld [vmem:[%s20622_s6 + $0x1ec] ss:$16 sps:$4 sm:$0xff]   ;;  %v14809_v22 = vld [vmem:[%s20622_s6 + $0x1e0] ss:$16 sps:$4 sm:$0xff]  }
 0x2ec   : > { %3031 = vmatprep.subr.bf16.mxu0 %v14751_v58  ;;  %3074 = vmatprep.subr.bf16.mxu1 %v14754_v25  ;;  %v14817_v58 = vld [vmem:[%s20620_s4 + $0x4] ss:$16 sps:$4 sm:$0xff]   ;;  %v14820_v25 = vld [vmem:[%s20620_s4 + $0xc] ss:$16 sps:$4 sm:$0xff]  }
 0x2ef   : > { %3032 = vmatpush1.bf16.msra.mxu0 %v14749_v61  ;;  %3075 = vmatpush1.bf16.msra.mxu1 %v14752_v27  ;;  %v14815_v61 = vld [vmem:[%s20620_s4] ss:$16 sps:$4 sm:$0xff]   ;;  %v14818_v27 = vld [vmem:[%s20620_s4 + $0x8] ss:$16 sps:$4 sm:$0xff]  }
 0x2f0   : > { %3033 = vmatprep.subr.bf16.mxu0 %v14757_v28  ;;  %3076 = vmatprep.subr.bf16.mxu1 %v14760_v30  ;;  %v14823_v28 = vld [vmem:[%s20620_s4 + $0x24] ss:$16 sps:$4 sm:$0xff]   ;;  %v14826_v30 = vld [vmem:[%s20620_s4 + $0x2c] ss:$16 sps:$4 sm:$0xff]  }
 0x2f3   : > { %3034 = vmatpush1.bf16.msra.mxu0 %v14755_v31  ;;  %3077 = vmatpush1.bf16.msra.mxu1 %v14758_v32  ;;  %v16442_v38 = vpop.eup %16441  ;;  %v14821_v31 = vld [vmem:[%s20620_s4 + $0x20] ss:$16 sps:$4 sm:$0xff]   ;;  %v14824_v32 = vld [vmem:[%s20620_s4 + $0x28] ss:$16 sps:$4 sm:$0xff]  }
 0x2f4   : > { %3035 = vmatprep.subr.bf16.mxu0 %v14763_v33  ;;  %3078 = vmatprep.subr.bf16.mxu1 %v14766_v34  ;;  %v16444_v41 = vpop.eup %16443  ;;  %v2069_v45 = vmul.f32 %v16442_v38, %v16440_v35  ;;  %v14829_v33 = vld [vmem:[%s20620_s4 + $0x44] ss:$16 sps:$4 sm:$0xff]   ;;  %v14832_v34 = vld [vmem:[%s20620_s4 + $0x4c] ss:$16 sps:$4 sm:$0xff]   ;;  %v14827_v35 = vld [vmem:[%s20620_s4 + $0x40] ss:$16 sps:$4 sm:$0xff]  }
 0x2f5   : > { %v16446_v42 = vpop.eup %16445  ;;  %v14838_v38 = vld [vmem:[%s20620_s4 + $0x6c] ss:$16 sps:$4 sm:$0xff]  }
 0x2f6   : > { %v2070_v46 = vmul.f32 %v16446_v42, %v16444_v41  ;;  %v14841_v41 = vld [vmem:[%s20620_s4 + $0x84] ss:$16 sps:$4 sm:$0xff]   ;;  %v14844_v42 = vld [vmem:[%s20620_s4 + $0x8c] ss:$16 sps:$4 sm:$0xff]  }
 0x2f7   : > { %3036 = vmatpush1.bf16.msra.mxu0 %v14761_v36  ;;  %3079 = vmatpush1.bf16.msra.mxu1 %v14764_v37  ;;  %v14830_v36 = vld [vmem:[%s20620_s4 + $0x48] ss:$16 sps:$4 sm:$0xff]   ;;  %v14835_v37 = vld [vmem:[%s20620_s4 + $0x64] ss:$16 sps:$4 sm:$0xff]  }
 0x2f8   : > { %3037 = vmatprep.subr.bf16.mxu0 %v14769_v39  ;;  %3080 = vmatprep.subr.bf16.mxu1 %v14772_v40  ;;  %v18237_v49 = vpack.c.bf16 %v2070_v46, %v2069_v45  ;;  %v14833_v39 = vld [vmem:[%s20620_s4 + $0x60] ss:$16 sps:$4 sm:$0xff]   ;;  %v14836_v40 = vld [vmem:[%s20620_s4 + $0x68] ss:$16 sps:$4 sm:$0xff]   ;;  %v14847_v45 = vld [vmem:[%s20620_s4 + $0xa4] ss:$16 sps:$4 sm:$0xff]  }
 0x2f9   : > { %v14850_v46 = vld [vmem:[%s20620_s4 + $0xac] ss:$16 sps:$4 sm:$0xff]  }
 0x2fb   : > { %3038 = vmatpush1.bf16.msra.mxu0 %v14767_v43  ;;  %3081 = vmatpush1.bf16.msra.mxu1 %v14770_v44  ;;  %v14839_v43 = vld [vmem:[%s20620_s4 + $0x80] ss:$16 sps:$4 sm:$0xff]   ;;  %v14842_v44 = vld [vmem:[%s20620_s4 + $0x88] ss:$16 sps:$4 sm:$0xff]  }
 0x2fc   : > { %3039 = vmatprep.subr.bf16.mxu0 %v14775_v47  ;;  %3082 = vmatprep.subr.bf16.mxu1 %v14778_v48  ;;  %v14845_v47 = vld [vmem:[%s20620_s4 + $0xa0] ss:$16 sps:$4 sm:$0xff]   ;;  %v14848_v48 = vld [vmem:[%s20620_s4 + $0xa8] ss:$16 sps:$4 sm:$0xff]  }
 0x2ff   : > { %3040 = vmatpush1.bf16.msra.mxu0 %v14773_v50  ;;  %3083 = vmatpush1.bf16.msra.mxu1 %v14776_v51  ;;  %v14853_v50 = vld [vmem:[%s20620_s4 + $0xc4] ss:$16 sps:$4 sm:$0xff]   ;;  %v14856_v51 = vld [vmem:[%s20620_s4 + $0xcc] ss:$16 sps:$4 sm:$0xff]  }
 0x300   : > { %3041 = vmatprep.subr.bf16.mxu0 %v14781_v52  ;;  %3084 = vmatprep.subr.bf16.mxu1 %v14784_v53  ;;  %v14851_v52 = vld [vmem:[%s20620_s4 + $0xc0] ss:$16 sps:$4 sm:$0xff]   ;;  %v14854_v53 = vld [vmem:[%s20620_s4 + $0xc8] ss:$16 sps:$4 sm:$0xff]  }
 0x303   : > { %3042 = vmatpush1.bf16.msra.mxu0 %v14779_v54  ;;  %3085 = vmatpush1.bf16.msra.mxu1 %v14782_v55  ;;  %v14859_v54 = vld [vmem:[%s20620_s4 + $0xe4] ss:$16 sps:$4 sm:$0xff]   ;;  %v14862_v55 = vld [vmem:[%s20620_s4 + $0xec] ss:$16 sps:$4 sm:$0xff]  }
 0x304   : > { %3043 = vmatprep.subr.bf16.mxu0 %v14787_v56  ;;  %3086 = vmatprep.subr.bf16.mxu1 %v14790_v57  ;;  %v14857_v56 = vld [vmem:[%s20620_s4 + $0xe0] ss:$16 sps:$4 sm:$0xff]   ;;  %v14860_v57 = vld [vmem:[%s20620_s4 + $0xe8] ss:$16 sps:$4 sm:$0xff]  }
 0x307   : > { %3044 = vmatpush1.bf16.msra.mxu0 %v14785_v59  ;;  %3087 = vmatpush1.bf16.msra.mxu1 %v14788_v62  ;;  %v14863_v59 = vld [vmem:[#allocation6] ss:$16 sps:$4 sm:$0xff]   ;;  %v14865_v62 = vld [vmem:[#allocation6 + $0x4] ss:$16 sps:$4 sm:$0xff]  }
 0x308   : > { %3045 = vmatprep.subr.bf16.mxu0 %v14793_v63  ;;  %3088 = vmatprep.subr.bf16.mxu1 %v14796_v0  ;;  %v14866_v63 = vld [vmem:[#allocation6 + $0x8] ss:$16 sps:$4 sm:$0xff]   ;;  %v14868_v0 = vld [vmem:[#allocation6 + $0xc] ss:$16 sps:$4 sm:$0xff]  }
 0x30b   : > { %3046 = vmatpush1.bf16.msra.mxu0 %v14791_v1  ;;  %3089 = vmatpush1.bf16.msra.mxu1 %v14794_v3  ;;  %v14869_v1 = vld [vmem:[#allocation6 + $0x20] ss:$16 sps:$4 sm:$0xff]   ;;  %v14871_v3 = vld [vmem:[#allocation6 + $0x24] ss:$16 sps:$4 sm:$0xff]  }
 0x30c   : > { %3047 = vmatprep.subr.bf16.mxu0 %v14799_v4  ;;  %3090 = vmatprep.subr.bf16.mxu1 %v14802_v5  ;;  %v14872_v4 = vld [vmem:[#allocation6 + $0x28] ss:$16 sps:$4 sm:$0xff]   ;;  %v14874_v5 = vld [vmem:[#allocation6 + $0x2c] ss:$16 sps:$4 sm:$0xff]  }
 0x30f   : > { %3048 = vmatpush1.bf16.msra.mxu0 %v14797_v10  ;;  %3091 = vmatpush1.bf16.msra.mxu1 %v14800_v12  ;;  %v14877_v10 = vld [vmem:[#allocation6 + $0x44] ss:$16 sps:$4 sm:$0xff]   ;;  %v14880_v12 = vld [vmem:[#allocation6 + $0x4c] ss:$16 sps:$4 sm:$0xff]  }
 0x310   : > { %3049 = vmatprep.subr.bf16.mxu0 %v14805_v13  ;;  %3092 = vmatprep.subr.bf16.mxu1 %v14808_v14  ;;  %v14875_v13 = vld [vmem:[#allocation6 + $0x40] ss:$16 sps:$4 sm:$0xff]   ;;  %v14883_v14 = vld [vmem:[#allocation6 + $0x64] ss:$16 sps:$4 sm:$0xff]  }
 0x313   : > { %3050 = vmatpush1.bf16.msra.mxu0 %v14803_v16  ;;  %3093 = vmatpush1.bf16.msra.mxu1 %v14806_v17  ;;  %v14886_v16 = vld [vmem:[#allocation6 + $0x6c] ss:$16 sps:$4 sm:$0xff]   ;;  %v14881_v17 = vld [vmem:[#allocation6 + $0x60] ss:$16 sps:$4 sm:$0xff]  }
 0x314   : > { %3051 = vmatprep.subr.bf16.mxu0 %v14811_v19  ;;  %3094 = vmatprep.subr.bf16.mxu1 %v14814_v21  ;;  %v14884_v19 = vld [vmem:[#allocation6 + $0x68] ss:$16 sps:$4 sm:$0xff]   ;;  %v14889_v21 = vld [vmem:[#allocation6 + $0x84] ss:$16 sps:$4 sm:$0xff]  }
 0x317   : > { %3052 = vmatpush1.bf16.msra.mxu0 %v14809_v22  ;;  %3095 = vmatpush1.bf16.msra.mxu1 %v14812_v23  ;;  %v14892_v22 = vld [vmem:[#allocation6 + $0x8c] ss:$16 sps:$4 sm:$0xff]   ;;  %v14887_v23 = vld [vmem:[#allocation6 + $0x80] ss:$16 sps:$4 sm:$0xff]  }
 0x318   : > { %3358 = vmatprep.subr.bf16.mxu0 %v14817_v58  ;;  %3401 = vmatprep.subr.bf16.mxu1 %v14820_v25  ;;  %v14890_v58 = vld [vmem:[#allocation6 + $0x88] ss:$16 sps:$4 sm:$0xff]   ;;  %v14895_v25 = vld [vmem:[#allocation6 + $0xa4] ss:$16 sps:$4 sm:$0xff]  }
 0x31a   : > { %3054 = vmatmul.mubr.bf16.vlgmr.msra.gmra.mrb[40].mxu0 %v18237_v49  ;;  %3097 = vmatmul.mubr.bf16.vlgmr.msra.gmra.mrb[40].mxu1 %v18237_v49 }
 0x31b   : > { %3359 = vmatpush1.bf16.msra.mxu0 %v14815_v61  ;;  %3402 = vmatpush1.bf16.msra.mxu1 %v14818_v27  ;;  %v14898_v61 = vld [vmem:[#allocation6 + $0xac] ss:$16 sps:$4 sm:$0xff]   ;;  %v14893_v27 = vld [vmem:[#allocation6 + $0xa0] ss:$16 sps:$4 sm:$0xff]  }
 0x31c   : > { %3360 = vmatprep.subr.bf16.mxu0 %v14823_v28  ;;  %3403 = vmatprep.subr.bf16.mxu1 %v14826_v30  ;;  %v14896_v28 = vld [vmem:[#allocation6 + $0xa8] ss:$16 sps:$4 sm:$0xff]   ;;  %v14901_v30 = vld [vmem:[#allocation6 + $0xc4] ss:$16 sps:$4 sm:$0xff]  }
 0x31d   : > { %3390 = vmatprep.mubr.bf16.mxu0 %v17312_v2  ;;  %3433 = vmatprep.mubr.bf16.mxu1 %v17312_v2 }
 0x31f   : > { %3361 = vmatpush1.bf16.msra.mxu0 %v14821_v31  ;;  %3404 = vmatpush1.bf16.msra.mxu1 %v14824_v32  ;;  %v14904_v31 = vld [vmem:[#allocation6 + $0xcc] ss:$16 sps:$4 sm:$0xff]   ;;  %v14899_v32 = vld [vmem:[#allocation6 + $0xc0] ss:$16 sps:$4 sm:$0xff]  }
 0x320   : > { %3362 = vmatprep.subr.bf16.mxu0 %v14829_v33  ;;  %3405 = vmatprep.subr.bf16.mxu1 %v14832_v34  ;;  %v14902_v33 = vld [vmem:[#allocation6 + $0xc8] ss:$16 sps:$4 sm:$0xff]   ;;  %v14907_v34 = vld [vmem:[#allocation6 + $0xe4] ss:$16 sps:$4 sm:$0xff]  }
 0x323   : > { %3363 = vmatpush1.bf16.msra.mxu0 %v14827_v35  ;;  %3406 = vmatpush1.bf16.msra.mxu1 %v14830_v36  ;;  %v14910_v35 = vld [vmem:[#allocation6 + $0xec] ss:$16 sps:$4 sm:$0xff]   ;;  %v14905_v36 = vld [vmem:[#allocation6 + $0xe0] ss:$16 sps:$4 sm:$0xff]  }
 0x324   : > { %3364 = vmatprep.subr.bf16.mxu0 %v14835_v37  ;;  %3407 = vmatprep.subr.bf16.mxu1 %v14838_v38  ;;  %v14908_v37 = vld [vmem:[#allocation6 + $0xe8] ss:$16 sps:$4 sm:$0xff]   ;;  %v14913_v38 = vld [vmem:[#allocation6 + $0x104] ss:$16 sps:$4 sm:$0xff]  }
 0x327   : > { %3365 = vmatpush1.bf16.msra.mxu0 %v14833_v39  ;;  %3408 = vmatpush1.bf16.msra.mxu1 %v14836_v40  ;;  %v14916_v39 = vld [vmem:[#allocation6 + $0x10c] ss:$16 sps:$4 sm:$0xff]   ;;  %v14911_v40 = vld [vmem:[#allocation6 + $0x100] ss:$16 sps:$4 sm:$0xff]  }
 0x328   : > { %3366 = vmatprep.subr.bf16.mxu0 %v14841_v41  ;;  %3409 = vmatprep.subr.bf16.mxu1 %v14844_v42  ;;  %v14914_v41 = vld [vmem:[#allocation6 + $0x108] ss:$16 sps:$4 sm:$0xff]   ;;  %v14919_v42 = vld [vmem:[#allocation6 + $0x124] ss:$16 sps:$4 sm:$0xff]  }
 0x32b   : > { %3367 = vmatpush1.bf16.msra.mxu0 %v14839_v43  ;;  %3410 = vmatpush1.bf16.msra.mxu1 %v14842_v44  ;;  %v14922_v43 = vld [vmem:[#allocation6 + $0x12c] ss:$16 sps:$4 sm:$0xff]   ;;  %v14917_v44 = vld [vmem:[#allocation6 + $0x120] ss:$16 sps:$4 sm:$0xff]  }
 0x32c   : > { %3368 = vmatprep.subr.bf16.mxu0 %v14847_v45  ;;  %3411 = vmatprep.subr.bf16.mxu1 %v14850_v46  ;;  %v14920_v45 = vld [vmem:[#allocation6 + $0x128] ss:$16 sps:$4 sm:$0xff]   ;;  %v14925_v46 = vld [vmem:[#allocation6 + $0x144] ss:$16 sps:$4 sm:$0xff]  }
 0x32f   : > { %3369 = vmatpush1.bf16.msra.mxu0 %v14845_v47  ;;  %3412 = vmatpush1.bf16.msra.mxu1 %v14848_v48  ;;  %v14928_v47 = vld [vmem:[#allocation6 + $0x14c] ss:$16 sps:$4 sm:$0xff]   ;;  %v14923_v48 = vld [vmem:[#allocation6 + $0x140] ss:$16 sps:$4 sm:$0xff]  }
 0x330   : > { %3370 = vmatprep.subr.bf16.mxu0 %v14853_v50  ;;  %3413 = vmatprep.subr.bf16.mxu1 %v14856_v51  ;;  %v14926_v50 = vld [vmem:[#allocation6 + $0x148] ss:$16 sps:$4 sm:$0xff]   ;;  %v14931_v51 = vld [vmem:[#allocation6 + $0x164] ss:$16 sps:$4 sm:$0xff]  }
 0x333   : > { %3371 = vmatpush1.bf16.msra.mxu0 %v14851_v52  ;;  %3414 = vmatpush1.bf16.msra.mxu1 %v14854_v53  ;;  %v14934_v52 = vld [vmem:[#allocation6 + $0x16c] ss:$16 sps:$4 sm:$0xff]   ;;  %v14929_v53 = vld [vmem:[#allocation6 + $0x160] ss:$16 sps:$4 sm:$0xff]  }
 0x334   : > { %3372 = vmatprep.subr.bf16.mxu0 %v14859_v54  ;;  %3415 = vmatprep.subr.bf16.mxu1 %v14862_v55  ;;  %v14932_v54 = vld [vmem:[#allocation6 + $0x168] ss:$16 sps:$4 sm:$0xff]   ;;  %v14937_v55 = vld [vmem:[#allocation6 + $0x184] ss:$16 sps:$4 sm:$0xff]  }
 0x337   : > { %3373 = vmatpush1.bf16.msra.mxu0 %v14857_v56  ;;  %3416 = vmatpush1.bf16.msra.mxu1 %v14860_v57  ;;  %v14940_v56 = vld [vmem:[#allocation6 + $0x18c] ss:$16 sps:$4 sm:$0xff]   ;;  %v14935_v57 = vld [vmem:[#allocation6 + $0x180] ss:$16 sps:$4 sm:$0xff]  }
 0x338   : > { %3908 = vmatprep.subr.bf16.mxu0 %v14865_v62  ;;  %3951 = vmatprep.subr.bf16.mxu1 %v14868_v0  ;;  %v14943_v62 = vld [vmem:[#allocation6 + $0x1a4] ss:$16 sps:$4 sm:$0xff]   ;;  %v14941_v0 = vld [vmem:[#allocation6 + $0x1a0] ss:$16 sps:$4 sm:$0xff]  }
 0x33a   : > { %3391 = vmatmul.mubr.bf16.vlgmr.msra.gmra.mrb[8].mxu0 %v18237_v49  ;;  %3434 = vmatmul.mubr.bf16.vlgmr.msra.gmra.mrb[8].mxu1 %v18237_v49  ;;  %v14878_v49 = vld [vmem:[#allocation6 + $0x48] ss:$16 sps:$4 sm:$0xff]  }
 0x33b   : > { %3909 = vmatpush1.bf16.msra.mxu0 %v14863_v59  ;;  %3952 = vmatpush1.bf16.msra.mxu1 %v14866_v63  ;;  %v14938_v59 = vld [vmem:[#allocation6 + $0x188] ss:$16 sps:$4 sm:$0xff]   ;;  %v14946_v63 = vld [vmem:[#allocation6 + $0x1ac] ss:$16 sps:$4 sm:$0xff]  }
 0x33c   : > { %3910 = vmatprep.subr.bf16.mxu0 %v14871_v3  ;;  %3953 = vmatprep.subr.bf16.mxu1 %v14874_v5  ;;  %v14949_v3 = vld [vmem:[#allocation6 + $0x1c4] ss:$16 sps:$4 sm:$0xff]   ;;  %v14947_v5 = vld [vmem:[#allocation6 + $0x1c0] ss:$16 sps:$4 sm:$0xff]  }
 0x33f   : > { %3911 = vmatpush1.bf16.msra.mxu0 %v14869_v1  ;;  %3954 = vmatpush1.bf16.msra.mxu1 %v14872_v4  ;;  %v14944_v1 = vld [vmem:[#allocation6 + $0x1a8] ss:$16 sps:$4 sm:$0xff]   ;;  %v14952_v4 = vld [vmem:[#allocation6 + $0x1cc] ss:$16 sps:$4 sm:$0xff]  }
 0x340   : > { %3912 = vmatprep.subr.bf16.mxu0 %v14877_v10  ;;  %3955 = vmatprep.subr.bf16.mxu1 %v14880_v12  ;;  %v14950_v10 = vld [vmem:[#allocation6 + $0x1c8] ss:$16 sps:$4 sm:$0xff]   ;;  %v14955_v12 = vld [vmem:[#allocation6 + $0x1e4] ss:$16 sps:$4 sm:$0xff]  }
 0x343   : > { %3913 = vmatpush1.bf16.msra.mxu0 %v14875_v13  ;;  %3956 = vmatpush1.bf16.msra.mxu1 %v14878_v49  ;;  %v14958_v13 = vld [vmem:[#allocation6 + $0x1ec] ss:$16 sps:$4 sm:$0xff]   ;;  %v14953_v49 = vld [vmem:[#allocation6 + $0x1e0] ss:$16 sps:$4 sm:$0xff]  }
 0x344   : > { %3914 = vmatprep.subr.bf16.mxu0 %v14883_v14  ;;  %3957 = vmatprep.subr.bf16.mxu1 %v14886_v16  ;;  %v14956_v14 = vld [vmem:[#allocation6 + $0x1e8] ss:$16 sps:$4 sm:$0xff]   ;;  %v14961_v16 = vld [vmem:[%s20622_s6 + $0x4] ss:$16 sps:$4 sm:$0xff]  }
 0x347   : > { %3915 = vmatpush1.bf16.msra.mxu0 %v14881_v17  ;;  %3958 = vmatpush1.bf16.msra.mxu1 %v14884_v19  ;;  %v14964_v17 = vld [vmem:[%s20622_s6 + $0xc] ss:$16 sps:$4 sm:$0xff]   ;;  %v2137_v19 = vld [vmem:[%s20670_s24] sm:$0xf] }
 0x348   : > { %3916 = vmatprep.subr.bf16.mxu0 %v14889_v21  ;;  %3959 = vmatprep.subr.bf16.mxu1 %v14892_v22  ;;  %v2142_v21 = vrot.slane %v2137_v19, %v17944_v6  ;;  %v2146_v22 = vrot.slane %v2137_v19, %v17946_v7 }
 0x34b   : > { %3917 = vmatpush1.bf16.msra.mxu0 %v14887_v23  ;;  %3960 = vmatpush1.bf16.msra.mxu1 %v14890_v58 }
 0x34c   : > { %3918 = vmatprep.subr.bf16.mxu0 %v14895_v25  ;;  %3961 = vmatprep.subr.bf16.mxu1 %v14898_v61 }
 0x34f   : > { %3919 = vmatpush1.bf16.msra.mxu0 %v14893_v27  ;;  %3962 = vmatpush1.bf16.msra.mxu1 %v14896_v28 }
 0x350   : > { %3920 = vmatprep.subr.bf16.mxu0 %v14901_v30  ;;  %3963 = vmatprep.subr.bf16.mxu1 %v14904_v31 }
 0x353   : > { %3921 = vmatpush1.bf16.msra.mxu0 %v14899_v32  ;;  %3964 = vmatpush1.bf16.msra.mxu1 %v14902_v33 }
 0x354   : > { %3922 = vmatprep.subr.bf16.mxu0 %v14907_v34  ;;  %3965 = vmatprep.subr.bf16.mxu1 %v14910_v35 }
 0x357   : > { %3923 = vmatpush1.bf16.msra.mxu0 %v14905_v36  ;;  %3966 = vmatpush1.bf16.msra.mxu1 %v14908_v37  ;;  %v2150_v36 = vrot.slane %v2137_v19, %v17954_v11 }
 0x358   : > { %3924 = vmatprep.subr.bf16.mxu0 %v14913_v38  ;;  %3967 = vmatprep.subr.bf16.mxu1 %v14916_v39 }
 0x35b   : > { %3925 = vmatpush1.bf16.msra.mxu0 %v14911_v40  ;;  %3968 = vmatpush1.bf16.msra.mxu1 %v14914_v41  ;;  %v2154_v41 = vrot.slane %v2137_v19, %v17958_v20 }
 0x35c   : > { %3926 = vmatprep.subr.bf16.mxu0 %v14919_v42  ;;  %3969 = vmatprep.subr.bf16.mxu1 %v14922_v43 }
 0x35f   : > { %3927 = vmatpush1.bf16.msra.mxu0 %v14917_v44  ;;  %3970 = vmatpush1.bf16.msra.mxu1 %v14920_v45 }
 0x360   : > { %3928 = vmatprep.subr.bf16.mxu0 %v14925_v46  ;;  %3971 = vmatprep.subr.bf16.mxu1 %v14928_v47 }
 0x363   : > { %3929 = vmatpush1.bf16.msra.mxu0 %v14923_v48  ;;  %3972 = vmatpush1.bf16.msra.mxu1 %v14926_v50 }
 0x364   : > { %3930 = vmatprep.subr.bf16.mxu0 %v14931_v51  ;;  %3973 = vmatprep.subr.bf16.mxu1 %v14934_v52 }
 0x367   : > { %3931 = vmatpush1.bf16.msra.mxu0 %v14929_v53  ;;  %3974 = vmatpush1.bf16.msra.mxu1 %v14932_v54 }
 0x368   : > { %3932 = vmatprep.subr.bf16.mxu0 %v14937_v55  ;;  %3975 = vmatprep.subr.bf16.mxu1 %v14940_v56 }
 0x36b   : > { %3933 = vmatpush1.bf16.msra.mxu0 %v14935_v57  ;;  %3976 = vmatpush1.bf16.msra.mxu1 %v14938_v59 }
 0x36c   : > { %3934 = vmatprep.subr.bf16.mxu0 %v14943_v62  ;;  %3977 = vmatprep.subr.bf16.mxu1 %v14946_v63 }
 0x36f   : > { %3935 = vmatpush1.bf16.msra.mxu0 %v14941_v0  ;;  %3978 = vmatpush1.bf16.msra.mxu1 %v14944_v1  ;;  %v12812_v0 = vld [vmem:[%s20667_s2 + $0x20] sm:$0xff] }
 0x370   : > { %3936 = vmatprep.subr.bf16.mxu0 %v14949_v3  ;;  %3979 = vmatprep.subr.bf16.mxu1 %v14952_v4 }
 0x373   : > { %3937 = vmatpush1.bf16.msra.mxu0 %v14947_v5  ;;  %3980 = vmatpush1.bf16.msra.mxu1 %v14950_v10 }
 0x374   : > { %3938 = vmatprep.subr.bf16.mxu0 %v14955_v12  ;;  %3981 = vmatprep.subr.bf16.mxu1 %v14958_v13  ;;  %v12813_v13 = vld [vmem:[%s20667_s2 + $0x28] sm:$0xff] }
 0x377   : > { %3939 = vmatpush1.bf16.msra.mxu0 %v14953_v49  ;;  %3982 = vmatpush1.bf16.msra.mxu1 %v14956_v14 }
 0x378   : > { %4451 = vmatprep.subr.bf16.mxu0 %v14961_v16  ;;  %4494 = vmatprep.subr.bf16.mxu1 %v14964_v17 }
 0x3ad   : > { %v2513_v23 = vpop.f32.mrb[36].mxu0  ;;  %v2556_v58 = vpop.f32.mrb[36].mxu1 }
 0x3ae   : > { %v2514_v25 = vadd.f32 %v2513_v23, %v2142_v21  ;;  %v2515_v61 = vpop.f32.mrb[37].mxu0  ;;  %v2558_v27 = vpop.f32.mrb[37].mxu1  ;;  %v2557_v42 = vadd.f32 %v2556_v58, %v2150_v36 }
 0x3af   : > { %v2516_v28 = vadd.f32 %v2515_v61, %v2146_v22  ;;  %v2517_v30 = vpop.f32.mrb[38].mxu0  ;;  %v2560_v31 = vpop.f32.mrb[38].mxu1  ;;  %v2559_v44 = vadd.f32 %v2558_v27, %v2154_v41 }
 0x3b0   : > { %v12992_v32 = vmul.f32 -1.442695, %v2514_v25  ;;  %v2518_v33 = vadd.f32 %v2517_v30, %v2142_v21  ;;  %v2519_v34 = vpop.f32.mrb[39].mxu0  ;;  %v2562_v35 = vpop.f32.mrb[39].mxu1  ;;  %v2561_v43 = vadd.f32 %v2560_v31, %v2150_v36  ;;  %v12994_v45 = vmul.f32 -1.442695, %v2557_v42 }
 0x3b1   : > { %v12993_v37 = vmul.f32 -1.442695, %v2516_v28  ;;  %v2520_v38 = vadd.f32 %v2519_v34, %v2146_v22  ;;  %v2563_v48 = vadd.f32 %v2562_v35, %v2154_v41  ;;  %v2679_v30 = vld [vmem:[%s20669_s14] sm:$0xf] }
 0x3b2   : > { %16447 = vpow2.f32 %v12992_v32  ;;  %v12995_v39 = vmul.f32 -1.442695, %v2518_v33  ;;  %v12997_v46 = vmul.f32 -1.442695, %v2561_v43  ;;  %v2684_v31 = vrot.slane %v2679_v30, %v17944_v6 }
 0x3b3   : > { %v12996_v40 = vmul.f32 -1.442695, %v2520_v38  ;;  %16449 = vpow2.f32 %v12993_v37  ;;  %v2688_v32 = vrot.slane %v2679_v30, %v17946_v7 }
 0x3b4   : > { %16451 = vpow2.f32 %v12995_v39 }
 0x3b5   : > { %16453 = vpow2.f32 %v12996_v40 }
 0x3b6   : > { %16455 = vtanh.f32 %v2559_v44 }
 0x3b7   : > { %16457 = vpow2.f32 %v12994_v45  ;;  %v2692_v45 = vrot.slane %v2679_v30, %v17954_v11 }
 0x3b8   : > { %16459 = vpow2.f32 %v12997_v46 }
 0x3bc   : > { %v16448_v47 = vpop.eup %16447 }
 0x3bd   : > { %v2583_v50 = vadd.f32 1.0, %v16448_v47  ;;  %v16450_v51 = vpop.eup %16449 }
 0x3be   : > { %v16452_v52 = vpop.eup %16451  ;;  %v2584_v53 = vadd.f32 1.0, %v16450_v51  ;;  %v2696_v51 = vrot.slane %v2679_v30, %v17958_v20 }
 0x3bf   : > { %16461 = vrcp.f32 %v2583_v50  ;;  %v2586_v54 = vadd.f32 1.0, %v16452_v52  ;;  %v16454_v55 = vpop.eup %16453 }
 0x3c0   : > { %16463 = vtanh.f32 %v2563_v48  ;;  %v2587_v56 = vadd.f32 1.0, %v16454_v55  ;;  %v16456_v57 = vpop.eup %16455 }
 0x3c1   : > { %16465 = vrcp.f32 %v2584_v53  ;;  %v16458_v59 = vpop.eup %16457 }
 0x3c2   : > { %16467 = vrcp.f32 %v2586_v54  ;;  %v16460_v62 = vpop.eup %16459  ;;  %v2585_v10 = vadd.f32 1.0, %v16458_v59 }
 0x3c3   : > { %16469 = vrcp.f32 %v2587_v56  ;;  %v2588_v17 = vadd.f32 1.0, %v16460_v62 }
 0x3c4   : > { %16471 = vrcp.f32 %v2585_v10 }
 0x3c9   : > { %v16462_v63 = vpop.eup %16461 }
 0x3ca   : > { %v16464_v1 = vpop.eup %16463  ;;  %v2605_v3 = vmul.f32 %v16462_v63, %v16456_v57 }
 0x3cb   : > { %v16466_v4 = vpop.eup %16465 }
 0x3cc   : > { %v16468_v5 = vpop.eup %16467  ;;  %v2603_v12 = vmul.f32 %v16466_v4, %v12812_v0 }
 0x3cd   : > { %v2606_v49 = vmul.f32 %v16468_v5, %v16464_v1  ;;  %v16470_v14 = vpop.eup %16469 }
 0x3ce   : > { %v18438_v16 = vadd.f32 %v2605_v3, %v2603_v12  ;;  %v2604_v19 = vmul.f32 %v16470_v14, %v12813_v13  ;;  %v16472_v22 = vpop.eup %16471 }
 0x3d0   : > { %16473 = vtanh.f32 %v18438_v16  ;;  %v18441_v21 = vadd.f32 %v2606_v49, %v2604_v19 }
 0x3d1   : > { %16475 = vrcp.f32 %v2588_v17 }
 0x3d2   : > { %16477 = vtanh.f32 %v18441_v21 }
 0x3da   : > { %v16474_v23 = vpop.eup %16473 }
 0x3db   : > { %v16476_v58 = vpop.eup %16475  ;;  %v2611_v61 = vmul.f32 %v16474_v23, %v16472_v22 }
 0x3dc   : > { %v16478_v25 = vpop.eup %16477 }
 0x3dd   : > { %v2612_v27 = vmul.f32 %v16478_v25, %v16476_v58 }
 0x3df   : > { %v2613_v28 = vpack.c.bf16 %v2612_v27, %v2611_v61 }
 0x3e1   : > { %2614 = vst [vmem:[#allocation3] sm:$0xff] %v2613_v28  ;;  %3940 = vmatprep.mubr.bf16.mxu0 %v2613_v28  ;;  %3983 = vmatprep.mubr.bf16.mxu1 %v2613_v28 }
 0x3ed   : > { %v3055_v33 = vpop.f32.mrb[40].mxu0  ;;  %v3098_v34 = vpop.f32.mrb[40].mxu1 }
 0x3ee   : > { %v3056_v35 = vadd.f32 %v3055_v33, %v2684_v31  ;;  %v3057_v36 = vpop.f32.mrb[41].mxu0  ;;  %v3100_v37 = vpop.f32.mrb[41].mxu1  ;;  %v3099_v52 = vadd.f32 %v3098_v34, %v2692_v45 }
 0x3ef   : > { %v3058_v38 = vadd.f32 %v3057_v36, %v2688_v32  ;;  %v3059_v39 = vpop.f32.mrb[42].mxu0  ;;  %v3102_v40 = vpop.f32.mrb[42].mxu1  ;;  %v3101_v54 = vadd.f32 %v3100_v37, %v2696_v51 }
 0x3f0   : > { %v13062_v41 = vmul.f32 -1.442695, %v3056_v35  ;;  %v3060_v42 = vadd.f32 %v3059_v39, %v2684_v31  ;;  %v3061_v43 = vpop.f32.mrb[43].mxu0  ;;  %v3104_v44 = vpop.f32.mrb[43].mxu1  ;;  %v3103_v53 = vadd.f32 %v3102_v40, %v2692_v45  ;;  %v13064_v55 = vmul.f32 -1.442695, %v3099_v52 }
 0x3f1   : > { %v13063_v46 = vmul.f32 -1.442695, %v3058_v38  ;;  %v3062_v47 = vadd.f32 %v3061_v43, %v2688_v32  ;;  %v3105_v59 = vadd.f32 %v3104_v44, %v2696_v51 }
 0x3f2   : > { %16479 = vpow2.f32 %v13062_v41  ;;  %v13065_v48 = vmul.f32 -1.442695, %v3060_v42  ;;  %v13067_v56 = vmul.f32 -1.442695, %v3103_v53 }
 0x3f3   : > { %v13066_v50 = vmul.f32 -1.442695, %v3062_v47  ;;  %16481 = vpow2.f32 %v13063_v46 }
 0x3f4   : > { %16483 = vpow2.f32 %v13065_v48 }
 0x3f5   : > { %16485 = vpow2.f32 %v13066_v50 }
 0x3f6   : > { %16487 = vtanh.f32 %v3101_v54 }
 0x3f7   : > { %16489 = vpow2.f32 %v13064_v55 }
 0x3f8   : > { %16491 = vpow2.f32 %v13067_v56 }
 0x3fc   : > { %v16480_v57 = vpop.eup %16479 }
 0x3fd   : > { %v3125_v62 = vadd.f32 1.0, %v16480_v57  ;;  %v16482_v63 = vpop.eup %16481 }
 0x3fe   : > { %v16484_v0 = vpop.eup %16483  ;;  %v3126_v1 = vadd.f32 1.0, %v16482_v63 }
 0x3ff   : > { %16493 = vrcp.f32 %v3125_v62  ;;  %v3128_v3 = vadd.f32 1.0, %v16484_v0  ;;  %v16486_v4 = vpop.eup %16485 }
 0x400   : > { %16495 = vtanh.f32 %v3105_v59  ;;  %v3129_v5 = vadd.f32 1.0, %v16486_v4  ;;  %v16488_v10 = vpop.eup %16487 }
 0x401   : > { %16497 = vrcp.f32 %v3126_v1  ;;  %v16490_v12 = vpop.eup %16489  ;;  %v14959_v1 = vld [vmem:[%s20622_s6] ss:$16 sps:$4 sm:$0xff]  }
 0x402   : > { %16499 = vrcp.f32 %v3128_v3  ;;  %v16492_v13 = vpop.eup %16491  ;;  %v3127_v22 = vadd.f32 1.0, %v16490_v12  ;;  %v14962_v3 = vld [vmem:[%s20622_s6 + $0x8] ss:$16 sps:$4 sm:$0xff]  }
 0x403   : > { %16501 = vrcp.f32 %v3129_v5  ;;  %v3130_v25 = vadd.f32 1.0, %v16492_v13  ;;  %v14967_v13 = vld [vmem:[%s20622_s6 + $0x24] ss:$16 sps:$4 sm:$0xff]  }
 0x404   : > { %16503 = vrcp.f32 %v3127_v22  ;;  %v14968_v22 = vld [vmem:[%s20622_s6 + $0x28] ss:$16 sps:$4 sm:$0xff]  }
 0x405   : > { %16505 = vrcp.f32 %v3130_v25 }
 0x409   : > { %v16494_v49 = vpop.eup %16493 }
 0x40a   : > { %v16496_v14 = vpop.eup %16495  ;;  %v3147_v17 = vmul.f32 %v16494_v49, %v16488_v10  ;;  %v14970_v49 = vld [vmem:[%s20622_s6 + $0x2c] ss:$16 sps:$4 sm:$0xff]  }
 0x40b   : > { %v16498_v19 = vpop.eup %16497 }
 0x40c   : > { %v16500_v23 = vpop.eup %16499  ;;  %v3145_v58 = vmul.f32 %v16498_v19, %v18107_v60  ;;  %v14965_v19 = vld [vmem:[%s20622_s6 + $0x20] ss:$16 sps:$4 sm:$0xff]  }
 0x40d   : > { %v3148_v61 = vmul.f32 %v16500_v23, %v16496_v14  ;;  %v3392_v27 = vpop.f32.mrb[8].mxu0  ;;  %v3435_v28 = vpop.f32.mrb[8].mxu1  ;;  %v14973_v23 = vld [vmem:[%s20622_s6 + $0x44] ss:$16 sps:$4 sm:$0xff]  }
 0x40e   : > { %v16502_v30 = vpop.eup %16501  ;;  %v18452_v31 = vadd.f32 %v3147_v17, %v3145_v58  ;;  %v14245_v32 = vadd.f32 %v3392_v27, %v17949_v8  ;;  %v3394_v33 = vpop.f32.mrb[9].mxu0  ;;  %v14277_v46 = vadd.f32 %v3435_v28, %v17962_v24  ;;  %v14976_v58 = vld [vmem:[%s20622_s6 + $0x4c] ss:$16 sps:$4 sm:$0xff]   ;;  %v14974_v27 = vld [vmem:[%s20622_s6 + $0x48] ss:$16 sps:$4 sm:$0xff]  }
 0x40f   : > { %v3437_v34 = vpop.f32.mrb[9].mxu1  ;;  %v3146_v35 = vmul.f32 %v16502_v30, %v18113_v15  ;;  %v14246_v36 = vadd.f32 %v3394_v33, %v17952_v9  ;;  %v3396_v37 = vpop.f32.mrb[10].mxu0  ;;  %v14979_v30 = vld [vmem:[%s20622_s6 + $0x64] ss:$16 sps:$4 sm:$0xff]  }
 0x410   : > { %v3439_v38 = vpop.f32.mrb[10].mxu1  ;;  %v13100_v60 = vmul.f32 -1.442695, %v14245_v32  ;;  %v14247_v39 = vadd.f32 %v3396_v37, %v17949_v8  ;;  %v3398_v40 = vpop.f32.mrb[11].mxu0  ;;  %16507 = vtanh.f32 %v18452_v31  ;;  %v14278_v50 = vadd.f32 %v3437_v34, %v17966_v29  ;;  %v14982_v32 = vld [vmem:[%s20622_s6 + $0x6c] ss:$16 sps:$4 sm:$0xff]  }
 0x411   : > { %v3441_v41 = vpop.f32.mrb[11].mxu1  ;;  %v18459_v42 = vadd.f32 %v3148_v61, %v3146_v35  ;;  %v13101_v43 = vmul.f32 -1.442695, %v14246_v36  ;;  %v14248_v45 = vadd.f32 %v3398_v40, %v17952_v9  ;;  %v14279_v47 = vadd.f32 %v3439_v38, %v17962_v24  ;;  %v16504_v48 = vpop.eup %16503  ;;  %v14971_v61 = vld [vmem:[%s20622_s6 + $0x40] ss:$16 sps:$4 sm:$0xff]  }
 0x412   : > { %16509 = vpow2.f32 %v13100_v60  ;;  %v13103_v44 = vmul.f32 -1.442695, %v14247_v39  ;;  %v16506_v51 = vpop.eup %16505  ;;  %v13102_v52 = vmul.f32 -1.442695, %v14277_v46  ;;  %v14280_v59 = vadd.f32 %v3441_v41, %v17966_v29  ;;  %v14977_v37 = vld [vmem:[%s20622_s6 + $0x60] ss:$16 sps:$4 sm:$0xff]  }
 0x413   : > { %16511 = vtanh.f32 %v18459_v42  ;;  %v13104_v15 = vmul.f32 -1.442695, %v14248_v45  ;;  %v13105_v55 = vmul.f32 -1.442695, %v14279_v47  ;;  %v14980_v38 = vld [vmem:[%s20622_s6 + $0x68] ss:$16 sps:$4 sm:$0xff]  }
 0x414   : > { %16513 = vpow2.f32 %v13101_v43  ;;  %v14985_v39 = vld [vmem:[%s20622_s6 + $0x84] ss:$16 sps:$4 sm:$0xff]   ;;  %v14988_v40 = vld [vmem:[%s20622_s6 + $0x8c] ss:$16 sps:$4 sm:$0xff]  }
 0x415   : > { %16515 = vpow2.f32 %v13103_v44 }
 0x416   : > { %16517 = vpow2.f32 %v13104_v15 }
 0x417   : > { %16519 = vtanh.f32 %v14278_v50  ;;  %v14986_v50 = vld [vmem:[%s20622_s6 + $0x88] ss:$16 sps:$4 sm:$0xff]  }
 0x418   : > { %16521 = vpow2.f32 %v13102_v52  ;;  %v14994_v52 = vld [vmem:[%s20622_s6 + $0xac] ss:$16 sps:$4 sm:$0xff]  }
 0x41a   : > { %v16508_v53 = vpop.eup %16507 }
 0x41b   : > { %v3153_v62 = vmul.f32 %v16508_v53, %v16504_v48  ;;  %v14983_v48 = vld [vmem:[%s20622_s6 + $0x80] ss:$16 sps:$4 sm:$0xff]  }
 0x41c   : > { %v16510_v54 = vpop.eup %16509 }
 0x41d   : > { %v16512_v56 = vpop.eup %16511  ;;  %v3470_v57 = vadd.f32 1.0, %v16510_v54  ;;  %v14992_v54 = vld [vmem:[%s20622_s6 + $0xa8] ss:$16 sps:$4 sm:$0xff]  }
 0x41e   : > { %v3154_v63 = vmul.f32 %v16512_v56, %v16506_v51  ;;  %v16514_v0 = vpop.eup %16513  ;;  %v15000_v56 = vld [vmem:[%s20622_s6 + $0xcc] ss:$16 sps:$4 sm:$0xff]  }
 0x41f   : > { %16523 = vrcp.f32 %v3470_v57  ;;  %v16516_v4 = vpop.eup %16515  ;;  %v3471_v5 = vadd.f32 1.0, %v16514_v0  ;;  %v14995_v57 = vld [vmem:[%s20622_s6 + $0xc0] ss:$16 sps:$4 sm:$0xff]  }
 0x420   : > { %16525 = vpow2.f32 %v13105_v55  ;;  %v3501_v10 = vpack.c.bf16 %v3154_v63, %v3153_v62  ;;  %v3473_v12 = vadd.f32 1.0, %v16516_v4  ;;  %v16518_v14 = vpop.eup %16517  ;;  %v14997_v55 = vld [vmem:[%s20622_s6 + $0xc4] ss:$16 sps:$4 sm:$0xff]   ;;  %v15006_v63 = vld [vmem:[%s20622_s6 + $0xec] ss:$16 sps:$4 sm:$0xff]  }
 0x421   : > { %16527 = vtanh.f32 %v14280_v59  ;;  %v3474_v17 = vadd.f32 1.0, %v16518_v14  ;;  %v16520_v25 = vpop.eup %16519  ;;  %v14998_v59 = vld [vmem:[%s20622_s6 + $0xc8] ss:$16 sps:$4 sm:$0xff]   ;;  %v15003_v62 = vld [vmem:[%s20622_s6 + $0xe4] ss:$16 sps:$4 sm:$0xff]  }
 0x422   : > { %16529 = vrcp.f32 %v3471_v5  ;;  %3941 = vmatmul.mubr.bf16.vlgmr.msra.gmra.mrb[44].mxu0 %v3501_v10  ;;  %3984 = vmatmul.mubr.bf16.vlgmr.msra.gmra.mrb[44].mxu1 %v3501_v10  ;;  %v16522_v28 = vpop.eup %16521  ;;  %v15009_v5 = vld [vmem:[%s20622_s6 + $0x104] ss:$16 sps:$4 sm:$0xff]   ;;  %v15010_v14 = vld [vmem:[%s20622_s6 + $0x108] ss:$16 sps:$4 sm:$0xff]  }
 0x423   : > { %16531 = vrcp.f32 %v3473_v12  ;;  %4452 = vmatpush1.bf16.msra.mxu0 %v14959_v1  ;;  %4495 = vmatpush1.bf16.msra.mxu1 %v14962_v3  ;;  %v3472_v43 = vadd.f32 1.0, %v16522_v28  ;;  %v15001_v1 = vld [vmem:[%s20622_s6 + $0xe0] ss:$16 sps:$4 sm:$0xff]   ;;  %v15004_v3 = vld [vmem:[%s20622_s6 + $0xe8] ss:$16 sps:$4 sm:$0xff]  }
 0x424   : > { %4483 = vmatprep.mubr.bf16.mxu0 %v3501_v10  ;;  %4526 = vmatprep.mubr.bf16.mxu1 %v3501_v10  ;;  %16533 = vrcp.f32 %v3474_v17  ;;  %v15012_v10 = vld [vmem:[%s20622_s6 + $0x10c] ss:$16 sps:$4 sm:$0xff]  }
 0x425   : > { %4453 = vmatprep.subr.bf16.mxu0 %v14967_v13  ;;  %4496 = vmatprep.subr.bf16.mxu1 %v14970_v49  ;;  %16535 = vrcp.f32 %v3472_v43  ;;  %v15007_v49 = vld [vmem:[%s20622_s6 + $0x100] ss:$16 sps:$4 sm:$0xff]   ;;  %v15024_v28 = vld [vmem:[%s20622_s6 + $0x14c] ss:$16 sps:$4 sm:$0xff]  }
 0x426   : > { %v15037_v43 = vld [vmem:[%s20622_s6 + $0x1a0] ss:$16 sps:$4 sm:$0xff]  }
 0x427   : > { %4454 = vmatpush1.bf16.msra.mxu0 %v14965_v19  ;;  %4497 = vmatpush1.bf16.msra.mxu1 %v14968_v22  ;;  %v15015_v22 = vld [vmem:[%s20622_s6 + $0x124] ss:$16 sps:$4 sm:$0xff]  }
 0x428   : > { %4455 = vmatprep.subr.bf16.mxu0 %v14973_v23  ;;  %4498 = vmatprep.subr.bf16.mxu1 %v14976_v58  ;;  %v15018_v23 = vld [vmem:[%s20622_s6 + $0x12c] ss:$16 sps:$4 sm:$0xff]  }
 0x429   : > { %v16524_v33 = vpop.eup %16523 }
 0x42a   : > { %v16526_v34 = vpop.eup %16525  ;;  %v3492_v35 = vmul.f32 %v16524_v33, %v16520_v25  ;;  %v15013_v25 = vld [vmem:[%s20622_s6 + $0x120] ss:$16 sps:$4 sm:$0xff]   ;;  %v15027_v33 = vld [vmem:[%s20622_s6 + $0x164] ss:$16 sps:$4 sm:$0xff]  }
 0x42b   : > { %v16528_v36 = vpop.eup %16527  ;;  %4456 = vmatpush1.bf16.msra.mxu0 %v14971_v61  ;;  %4499 = vmatpush1.bf16.msra.mxu1 %v14974_v27  ;;  %v3475_v47 = vadd.f32 1.0, %v16526_v34  ;;  %v15016_v61 = vld [vmem:[%s20622_s6 + $0x128] ss:$16 sps:$4 sm:$0xff]   ;;  %v15021_v27 = vld [vmem:[%s20622_s6 + $0x144] ss:$16 sps:$4 sm:$0xff]  }
 0x42c   : > { %v16530_v60 = vpop.eup %16529  ;;  %4457 = vmatprep.subr.bf16.mxu0 %v14979_v30  ;;  %4500 = vmatprep.subr.bf16.mxu1 %v14982_v32  ;;  %v15019_v30 = vld [vmem:[%s20622_s6 + $0x140] ss:$16 sps:$4 sm:$0xff]   ;;  %v15022_v32 = vld [vmem:[%s20622_s6 + $0x148] ss:$16 sps:$4 sm:$0xff]   ;;  %v15030_v34 = vld [vmem:[%s20622_s6 + $0x16c] ss:$16 sps:$4 sm:$0xff]  }
 0x42d   : > { %v16532_v41 = vpop.eup %16531  ;;  %v3490_v44 = vmul.f32 %v16530_v60, %v18170_v18  ;;  %v14991_v18 = vld [vmem:[%s20622_s6 + $0xa4] ss:$16 sps:$4 sm:$0xff]   ;;  %v15031_v60 = vld [vmem:[%s20622_s6 + $0x180] ss:$16 sps:$4 sm:$0xff]  }
 0x42e   : > { %v3493_v45 = vmul.f32 %v16532_v41, %v16528_v36  ;;  %v16534_v15 = vpop.eup %16533  ;;  %v15028_v36 = vld [vmem:[%s20622_s6 + $0x168] ss:$16 sps:$4 sm:$0xff]   ;;  %v15042_v41 = vld [vmem:[%s20622_s6 + $0x1ac] ss:$16 sps:$4 sm:$0xff]  }
 0x42f   : > { %v18516_v46 = vadd.f32 %v3492_v35, %v3490_v44  ;;  %4458 = vmatpush1.bf16.msra.mxu0 %v14977_v37  ;;  %4501 = vmatpush1.bf16.msra.mxu1 %v14980_v38  ;;  %v3491_v51 = vmul.f32 %v16534_v15, %v18186_v26  ;;  %v14989_v26 = vld [vmem:[%s20622_s6 + $0xa0] ss:$16 sps:$4 sm:$0xff]   ;;  %v16536_v0 = vpop.eup %16535  ;;  %v15033_v37 = vld [vmem:[%s20622_s6 + $0x184] ss:$16 sps:$4 sm:$0xff]   ;;  %v15036_v38 = vld [vmem:[%s20622_s6 + $0x18c] ss:$16 sps:$4 sm:$0xff]  }
 0x430   : > { %4459 = vmatprep.subr.bf16.mxu0 %v14985_v39  ;;  %4502 = vmatprep.subr.bf16.mxu1 %v14988_v40  ;;  %v15025_v35 = vld [vmem:[%s20622_s6 + $0x160] ss:$16 sps:$4 sm:$0xff]   ;;  %v15034_v39 = vld [vmem:[%s20622_s6 + $0x188] ss:$16 sps:$4 sm:$0xff]   ;;  %v15039_v40 = vld [vmem:[%s20622_s6 + $0x1a4] ss:$16 sps:$4 sm:$0xff]  }
 0x431   : > { %16537 = vtanh.f32 %v18516_v46  ;;  %v18532_v53 = vadd.f32 %v3493_v45, %v3491_v51  ;;  %v15040_v44 = vld [vmem:[%s20622_s6 + $0x1a8] ss:$16 sps:$4 sm:$0xff]   ;;  %v15045_v45 = vld [vmem:[%s20622_s6 + $0x1c4] ss:$16 sps:$4 sm:$0xff]   ;;  %v15048_v15 = vld [vmem:[%s20622_s6 + $0x1cc] ss:$16 sps:$4 sm:$0xff]  }
 0x432   : > { %16539 = vrcp.f32 %v3475_v47  ;;  %v15043_v47 = vld [vmem:[%s20622_s6 + $0x1c0] ss:$16 sps:$4 sm:$0xff]   ;;  %v15054_v51 = vld [vmem:[%s20622_s6 + $0x1ec] ss:$16 sps:$4 sm:$0xff]  }
 0x433   : > { %4460 = vmatpush1.bf16.msra.mxu0 %v14983_v48  ;;  %4503 = vmatpush1.bf16.msra.mxu1 %v14986_v50  ;;  %16541 = vtanh.f32 %v18532_v53  ;;  %v15046_v48 = vld [vmem:[%s20622_s6 + $0x1c8] ss:$16 sps:$4 sm:$0xff]   ;;  %v15051_v50 = vld [vmem:[%s20622_s6 + $0x1e4] ss:$16 sps:$4 sm:$0xff]  }
 0x434   : > { %4461 = vmatprep.subr.bf16.mxu0 %v14991_v18  ;;  %4504 = vmatprep.subr.bf16.mxu1 %v14994_v52  ;;  %v15049_v18 = vld [vmem:[%s20622_s6 + $0x1e0] ss:$16 sps:$4 sm:$0xff]   ;;  %v15052_v52 = vld [vmem:[%s20622_s6 + $0x1e8] ss:$16 sps:$4 sm:$0xff]  }
 0x437   : > { %4462 = vmatpush1.bf16.msra.mxu0 %v14989_v26  ;;  %4505 = vmatpush1.bf16.msra.mxu1 %v14992_v54  ;;  %v15057_v26 = vld [vmem:[%s20620_s4 + $0x4] ss:$16 sps:$4 sm:$0xff]   ;;  %v15060_v54 = vld [vmem:[%s20620_s4 + $0xc] ss:$16 sps:$4 sm:$0xff]  }
 0x438   : > { %4463 = vmatprep.subr.bf16.mxu0 %v14997_v55  ;;  %4506 = vmatprep.subr.bf16.mxu1 %v15000_v56  ;;  %v15055_v55 = vld [vmem:[%s20620_s4] ss:$16 sps:$4 sm:$0xff]   ;;  %v15058_v56 = vld [vmem:[%s20620_s4 + $0x8] ss:$16 sps:$4 sm:$0xff]  }
 0x43b   : > { %4464 = vmatpush1.bf16.msra.mxu0 %v14995_v57  ;;  %4507 = vmatpush1.bf16.msra.mxu1 %v14998_v59  ;;  %v16538_v4 = vpop.eup %16537  ;;  %v15063_v57 = vld [vmem:[%s20620_s4 + $0x24] ss:$16 sps:$4 sm:$0xff]   ;;  %v15066_v59 = vld [vmem:[%s20620_s4 + $0x2c] ss:$16 sps:$4 sm:$0xff]  }
 0x43c   : > { %4465 = vmatprep.subr.bf16.mxu0 %v15003_v62  ;;  %4508 = vmatprep.subr.bf16.mxu1 %v15006_v63  ;;  %v16540_v12 = vpop.eup %16539  ;;  %v3498_v17 = vmul.f32 %v16538_v4, %v16536_v0  ;;  %v15061_v62 = vld [vmem:[%s20620_s4 + $0x20] ss:$16 sps:$4 sm:$0xff]   ;;  %v15064_v63 = vld [vmem:[%s20620_s4 + $0x28] ss:$16 sps:$4 sm:$0xff]   ;;  %v15069_v0 = vld [vmem:[%s20620_s4 + $0x44] ss:$16 sps:$4 sm:$0xff]  }
 0x43d   : > { %v16542_v13 = vpop.eup %16541  ;;  %v15070_v4 = vld [vmem:[%s20620_s4 + $0x48] ss:$16 sps:$4 sm:$0xff]  }
 0x43e   : > { %v3499_v19 = vmul.f32 %v16542_v13, %v16540_v12  ;;  %v15073_v12 = vld [vmem:[%s20620_s4 + $0x60] ss:$16 sps:$4 sm:$0xff]   ;;  %v15076_v13 = vld [vmem:[%s20620_s4 + $0x68] ss:$16 sps:$4 sm:$0xff]  }
 0x43f   : > { %4466 = vmatpush1.bf16.msra.mxu0 %v15001_v1  ;;  %4509 = vmatpush1.bf16.msra.mxu1 %v15004_v3  ;;  %v15072_v1 = vld [vmem:[%s20620_s4 + $0x4c] ss:$16 sps:$4 sm:$0xff]   ;;  %v15067_v3 = vld [vmem:[%s20620_s4 + $0x40] ss:$16 sps:$4 sm:$0xff]  }
 0x440   : > { %4467 = vmatprep.subr.bf16.mxu0 %v15009_v5  ;;  %4510 = vmatprep.subr.bf16.mxu1 %v15012_v10  ;;  %v18583_v58 = vpack.c.bf16 %v3499_v19, %v3498_v17  ;;  %v15075_v5 = vld [vmem:[%s20620_s4 + $0x64] ss:$16 sps:$4 sm:$0xff]   ;;  %v15078_v10 = vld [vmem:[%s20620_s4 + $0x6c] ss:$16 sps:$4 sm:$0xff]   ;;  %v15079_v17 = vld [vmem:[%s20620_s4 + $0x80] ss:$16 sps:$4 sm:$0xff]  }
 0x441   : > { %v15082_v19 = vld [vmem:[%s20620_s4 + $0x88] ss:$16 sps:$4 sm:$0xff]  }
 0x443   : > { %4468 = vmatpush1.bf16.msra.mxu0 %v15007_v49  ;;  %4511 = vmatpush1.bf16.msra.mxu1 %v15010_v14  ;;  %v15081_v49 = vld [vmem:[%s20620_s4 + $0x84] ss:$16 sps:$4 sm:$0xff]   ;;  %v15084_v14 = vld [vmem:[%s20620_s4 + $0x8c] ss:$16 sps:$4 sm:$0xff]  }
 0x444   : > { %4469 = vmatprep.subr.bf16.mxu0 %v15015_v22  ;;  %4512 = vmatprep.subr.bf16.mxu1 %v15018_v23  ;;  %v15087_v22 = vld [vmem:[%s20620_s4 + $0xa4] ss:$16 sps:$4 sm:$0xff]   ;;  %v15090_v23 = vld [vmem:[%s20620_s4 + $0xac] ss:$16 sps:$4 sm:$0xff]  }
 0x447   : > { %4470 = vmatpush1.bf16.msra.mxu0 %v15013_v25  ;;  %4513 = vmatpush1.bf16.msra.mxu1 %v15016_v61  ;;  %v15085_v25 = vld [vmem:[%s20620_s4 + $0xa0] ss:$16 sps:$4 sm:$0xff]   ;;  %v15088_v61 = vld [vmem:[%s20620_s4 + $0xa8] ss:$16 sps:$4 sm:$0xff]  }
 0x448   : > { %4471 = vmatprep.subr.bf16.mxu0 %v15021_v27  ;;  %4514 = vmatprep.subr.bf16.mxu1 %v15024_v28  ;;  %v15093_v27 = vld [vmem:[%s20620_s4 + $0xc4] ss:$16 sps:$4 sm:$0xff]   ;;  %v15096_v28 = vld [vmem:[%s20620_s4 + $0xcc] ss:$16 sps:$4 sm:$0xff]  }
 0x44b   : > { %4472 = vmatpush1.bf16.msra.mxu0 %v15019_v30  ;;  %4515 = vmatpush1.bf16.msra.mxu1 %v15022_v32  ;;  %v15091_v30 = vld [vmem:[%s20620_s4 + $0xc0] ss:$16 sps:$4 sm:$0xff]   ;;  %v15094_v32 = vld [vmem:[%s20620_s4 + $0xc8] ss:$16 sps:$4 sm:$0xff]  }
 0x44c   : > { %4473 = vmatprep.subr.bf16.mxu0 %v15027_v33  ;;  %4516 = vmatprep.subr.bf16.mxu1 %v15030_v34  ;;  %v15099_v33 = vld [vmem:[%s20620_s4 + $0xe4] ss:$16 sps:$4 sm:$0xff]   ;;  %v15102_v34 = vld [vmem:[%s20620_s4 + $0xec] ss:$16 sps:$4 sm:$0xff]  }
 0x44f   : > { %4474 = vmatpush1.bf16.msra.mxu0 %v15025_v35  ;;  %4517 = vmatpush1.bf16.msra.mxu1 %v15028_v36  ;;  %v15097_v35 = vld [vmem:[%s20620_s4 + $0xe0] ss:$16 sps:$4 sm:$0xff]   ;;  %v15100_v36 = vld [vmem:[%s20620_s4 + $0xe8] ss:$16 sps:$4 sm:$0xff]  }
 0x450   : > { %4475 = vmatprep.subr.bf16.mxu0 %v15033_v37  ;;  %4518 = vmatprep.subr.bf16.mxu1 %v15036_v38  ;;  %v15103_v37 = vld [vmem:[#allocation6] ss:$16 sps:$4 sm:$0xff]   ;;  %v15105_v38 = vld [vmem:[#allocation6 + $0x4] ss:$16 sps:$4 sm:$0xff]  }
 0x453   : > { %4476 = vmatpush1.bf16.msra.mxu0 %v15031_v60  ;;  %4519 = vmatpush1.bf16.msra.mxu1 %v15034_v39  ;;  %v15106_v60 = vld [vmem:[#allocation6 + $0x8] ss:$16 sps:$4 sm:$0xff]   ;;  %v15108_v39 = vld [vmem:[#allocation6 + $0xc] ss:$16 sps:$4 sm:$0xff]  }
 0x454   : > { %4477 = vmatprep.subr.bf16.mxu0 %v15039_v40  ;;  %4520 = vmatprep.subr.bf16.mxu1 %v15042_v41  ;;  %v15109_v40 = vld [vmem:[#allocation6 + $0x20] ss:$16 sps:$4 sm:$0xff]   ;;  %v15111_v41 = vld [vmem:[#allocation6 + $0x24] ss:$16 sps:$4 sm:$0xff]  }
 0x457   : > { %4478 = vmatpush1.bf16.msra.mxu0 %v15037_v43  ;;  %4521 = vmatpush1.bf16.msra.mxu1 %v15040_v44  ;;  %v15112_v43 = vld [vmem:[#allocation6 + $0x28] ss:$16 sps:$4 sm:$0xff]   ;;  %v15114_v44 = vld [vmem:[#allocation6 + $0x2c] ss:$16 sps:$4 sm:$0xff]  }
 0x458   : > { %4479 = vmatprep.subr.bf16.mxu0 %v15045_v45  ;;  %4522 = vmatprep.subr.bf16.mxu1 %v15048_v15  ;;  %v15117_v45 = vld [vmem:[#allocation6 + $0x44] ss:$16 sps:$4 sm:$0xff]   ;;  %v15120_v15 = vld [vmem:[#allocation6 + $0x4c] ss:$16 sps:$4 sm:$0xff]  }
 0x45b   : > { %4480 = vmatpush1.bf16.msra.mxu0 %v15043_v47  ;;  %4523 = vmatpush1.bf16.msra.mxu1 %v15046_v48  ;;  %v15115_v47 = vld [vmem:[#allocation6 + $0x40] ss:$16 sps:$4 sm:$0xff]   ;;  %v15123_v48 = vld [vmem:[#allocation6 + $0x64] ss:$16 sps:$4 sm:$0xff]  }
 0x45c   : > { %4481 = vmatprep.subr.bf16.mxu0 %v15051_v50  ;;  %4524 = vmatprep.subr.bf16.mxu1 %v15054_v51  ;;  %v15126_v50 = vld [vmem:[#allocation6 + $0x6c] ss:$16 sps:$4 sm:$0xff]   ;;  %v15121_v51 = vld [vmem:[#allocation6 + $0x60] ss:$16 sps:$4 sm:$0xff]  }
 0x45f   : > { %4482 = vmatpush1.bf16.msra.mxu0 %v15049_v18  ;;  %4525 = vmatpush1.bf16.msra.mxu1 %v15052_v52  ;;  %v15124_v18 = vld [vmem:[#allocation6 + $0x68] ss:$16 sps:$4 sm:$0xff]   ;;  %v15129_v52 = vld [vmem:[#allocation6 + $0x84] ss:$16 sps:$4 sm:$0xff]  }
 0x460   : > { %4788 = vmatprep.subr.bf16.mxu0 %v15057_v26  ;;  %4831 = vmatprep.subr.bf16.mxu1 %v15060_v54  ;;  %v15132_v26 = vld [vmem:[#allocation6 + $0x8c] ss:$16 sps:$4 sm:$0xff]   ;;  %v15127_v54 = vld [vmem:[#allocation6 + $0x80] ss:$16 sps:$4 sm:$0xff]  }
 0x462   : > { %4484 = vmatmul.mubr.bf16.vlgmr.msra.gmra.mrb[48].mxu0 %v18583_v58  ;;  %4527 = vmatmul.mubr.bf16.vlgmr.msra.gmra.mrb[48].mxu1 %v18583_v58 }
 0x463   : > { %4789 = vmatpush1.bf16.msra.mxu0 %v15055_v55  ;;  %4832 = vmatpush1.bf16.msra.mxu1 %v15058_v56  ;;  %v15130_v55 = vld [vmem:[#allocation6 + $0x88] ss:$16 sps:$4 sm:$0xff]   ;;  %v15135_v56 = vld [vmem:[#allocation6 + $0xa4] ss:$16 sps:$4 sm:$0xff]  }
 0x464   : > { %4790 = vmatprep.subr.bf16.mxu0 %v15063_v57  ;;  %4833 = vmatprep.subr.bf16.mxu1 %v15066_v59  ;;  %v15138_v57 = vld [vmem:[#allocation6 + $0xac] ss:$16 sps:$4 sm:$0xff]   ;;  %v15133_v59 = vld [vmem:[#allocation6 + $0xa0] ss:$16 sps:$4 sm:$0xff]  }
 0x465   : > { %4820 = vmatprep.mubr.bf16.mxu0 %v17312_v2  ;;  %4863 = vmatprep.mubr.bf16.mxu1 %v17312_v2 }
 0x467   : > { %4791 = vmatpush1.bf16.msra.mxu0 %v15061_v62  ;;  %4834 = vmatpush1.bf16.msra.mxu1 %v15064_v63  ;;  %v15136_v62 = vld [vmem:[#allocation6 + $0xa8] ss:$16 sps:$4 sm:$0xff]   ;;  %v15141_v63 = vld [vmem:[#allocation6 + $0xc4] ss:$16 sps:$4 sm:$0xff]  }
 0x468   : > { %4792 = vmatprep.subr.bf16.mxu0 %v15069_v0  ;;  %4835 = vmatprep.subr.bf16.mxu1 %v15072_v1  ;;  %v15144_v0 = vld [vmem:[#allocation6 + $0xcc] ss:$16 sps:$4 sm:$0xff]   ;;  %v15139_v1 = vld [vmem:[#allocation6 + $0xc0] ss:$16 sps:$4 sm:$0xff]  }
 0x46b   : > { %4793 = vmatpush1.bf16.msra.mxu0 %v15067_v3  ;;  %4836 = vmatpush1.bf16.msra.mxu1 %v15070_v4  ;;  %v15142_v3 = vld [vmem:[#allocation6 + $0xc8] ss:$16 sps:$4 sm:$0xff]   ;;  %v15147_v4 = vld [vmem:[#allocation6 + $0xe4] ss:$16 sps:$4 sm:$0xff]  }
 0x46c   : > { %4794 = vmatprep.subr.bf16.mxu0 %v15075_v5  ;;  %4837 = vmatprep.subr.bf16.mxu1 %v15078_v10  ;;  %v15150_v5 = vld [vmem:[#allocation6 + $0xec] ss:$16 sps:$4 sm:$0xff]   ;;  %v15145_v10 = vld [vmem:[#allocation6 + $0xe0] ss:$16 sps:$4 sm:$0xff]  }
 0x46f   : > { %4795 = vmatpush1.bf16.msra.mxu0 %v15073_v12  ;;  %4838 = vmatpush1.bf16.msra.mxu1 %v15076_v13  ;;  %v15148_v12 = vld [vmem:[#allocation6 + $0xe8] ss:$16 sps:$4 sm:$0xff]   ;;  %v15153_v13 = vld [vmem:[#allocation6 + $0x104] ss:$16 sps:$4 sm:$0xff]  }
 0x470   : > { %4796 = vmatprep.subr.bf16.mxu0 %v15081_v49  ;;  %4839 = vmatprep.subr.bf16.mxu1 %v15084_v14  ;;  %v15156_v49 = vld [vmem:[#allocation6 + $0x10c] ss:$16 sps:$4 sm:$0xff]   ;;  %v15151_v14 = vld [vmem:[#allocation6 + $0x100] ss:$16 sps:$4 sm:$0xff]  }
 0x473   : > { %4797 = vmatpush1.bf16.msra.mxu0 %v15079_v17  ;;  %4840 = vmatpush1.bf16.msra.mxu1 %v15082_v19  ;;  %v15154_v17 = vld [vmem:[#allocation6 + $0x108] ss:$16 sps:$4 sm:$0xff]   ;;  %v15159_v19 = vld [vmem:[#allocation6 + $0x124] ss:$16 sps:$4 sm:$0xff]  }
 0x474   : > { %4798 = vmatprep.subr.bf16.mxu0 %v15087_v22  ;;  %4841 = vmatprep.subr.bf16.mxu1 %v15090_v23  ;;  %v15162_v22 = vld [vmem:[#allocation6 + $0x12c] ss:$16 sps:$4 sm:$0xff]   ;;  %v15157_v23 = vld [vmem:[#allocation6 + $0x120] ss:$16 sps:$4 sm:$0xff]  }
 0x477   : > { %4799 = vmatpush1.bf16.msra.mxu0 %v15085_v25  ;;  %4842 = vmatpush1.bf16.msra.mxu1 %v15088_v61  ;;  %v15160_v25 = vld [vmem:[#allocation6 + $0x128] ss:$16 sps:$4 sm:$0xff]   ;;  %v15165_v61 = vld [vmem:[#allocation6 + $0x144] ss:$16 sps:$4 sm:$0xff]  }
 0x478   : > { %4800 = vmatprep.subr.bf16.mxu0 %v15093_v27  ;;  %4843 = vmatprep.subr.bf16.mxu1 %v15096_v28  ;;  %v15168_v27 = vld [vmem:[#allocation6 + $0x14c] ss:$16 sps:$4 sm:$0xff]   ;;  %v15163_v28 = vld [vmem:[#allocation6 + $0x140] ss:$16 sps:$4 sm:$0xff]  }
 0x47b   : > { %4801 = vmatpush1.bf16.msra.mxu0 %v15091_v30  ;;  %4844 = vmatpush1.bf16.msra.mxu1 %v15094_v32  ;;  %v15166_v30 = vld [vmem:[#allocation6 + $0x148] ss:$16 sps:$4 sm:$0xff]   ;;  %v15171_v32 = vld [vmem:[#allocation6 + $0x164] ss:$16 sps:$4 sm:$0xff]  }
 0x47c   : > { %4802 = vmatprep.subr.bf16.mxu0 %v15099_v33  ;;  %4845 = vmatprep.subr.bf16.mxu1 %v15102_v34  ;;  %v15174_v33 = vld [vmem:[#allocation6 + $0x16c] ss:$16 sps:$4 sm:$0xff]   ;;  %v15169_v34 = vld [vmem:[#allocation6 + $0x160] ss:$16 sps:$4 sm:$0xff]  }
 0x47f   : > { %4803 = vmatpush1.bf16.msra.mxu0 %v15097_v35  ;;  %4846 = vmatpush1.bf16.msra.mxu1 %v15100_v36  ;;  %v15172_v35 = vld [vmem:[#allocation6 + $0x168] ss:$16 sps:$4 sm:$0xff]   ;;  %v15177_v36 = vld [vmem:[#allocation6 + $0x184] ss:$16 sps:$4 sm:$0xff]  }
 0x480   : > { %5338 = vmatprep.subr.bf16.mxu0 %v15105_v38  ;;  %5381 = vmatprep.subr.bf16.mxu1 %v15108_v39  ;;  %v15175_v38 = vld [vmem:[#allocation6 + $0x180] ss:$16 sps:$4 sm:$0xff]   ;;  %v15183_v39 = vld [vmem:[#allocation6 + $0x1a4] ss:$16 sps:$4 sm:$0xff]  }
 0x482   : > { %4821 = vmatmul.mubr.bf16.vlgmr.msra.gmra.mrb[12].mxu0 %v18583_v58  ;;  %4864 = vmatmul.mubr.bf16.vlgmr.msra.gmra.mrb[12].mxu1 %v18583_v58  ;;  %v15118_v58 = vld [vmem:[#allocation6 + $0x48] ss:$16 sps:$4 sm:$0xff]  }
 0x483   : > { %5339 = vmatpush1.bf16.msra.mxu0 %v15103_v37  ;;  %5382 = vmatpush1.bf16.msra.mxu1 %v15106_v60  ;;  %v15180_v37 = vld [vmem:[#allocation6 + $0x18c] ss:$16 sps:$4 sm:$0xff]   ;;  %v15178_v60 = vld [vmem:[#allocation6 + $0x188] ss:$16 sps:$4 sm:$0xff]  }
 0x484   : > { %5340 = vmatprep.subr.bf16.mxu0 %v15111_v41  ;;  %5383 = vmatprep.subr.bf16.mxu1 %v15114_v44  ;;  %v15181_v41 = vld [vmem:[#allocation6 + $0x1a0] ss:$16 sps:$4 sm:$0xff]   ;;  %v15189_v44 = vld [vmem:[#allocation6 + $0x1c4] ss:$16 sps:$4 sm:$0xff]  }
 0x487   : > { %5341 = vmatpush1.bf16.msra.mxu0 %v15109_v40  ;;  %5384 = vmatpush1.bf16.msra.mxu1 %v15112_v43  ;;  %v15186_v40 = vld [vmem:[#allocation6 + $0x1ac] ss:$16 sps:$4 sm:$0xff]   ;;  %v15184_v43 = vld [vmem:[#allocation6 + $0x1a8] ss:$16 sps:$4 sm:$0xff]  }
 0x488   : > { %5342 = vmatprep.subr.bf16.mxu0 %v15117_v45  ;;  %5385 = vmatprep.subr.bf16.mxu1 %v15120_v15  ;;  %v15192_v45 = vld [vmem:[#allocation6 + $0x1cc] ss:$16 sps:$4 sm:$0xff]   ;;  %v15187_v15 = vld [vmem:[#allocation6 + $0x1c0] ss:$16 sps:$4 sm:$0xff]  }
 0x48b   : > { %5343 = vmatpush1.bf16.msra.mxu0 %v15115_v47  ;;  %5386 = vmatpush1.bf16.msra.mxu1 %v15118_v58  ;;  %v15190_v47 = vld [vmem:[#allocation6 + $0x1c8] ss:$16 sps:$4 sm:$0xff]   ;;  %v15195_v58 = vld [vmem:[#allocation6 + $0x1e4] ss:$16 sps:$4 sm:$0xff]  }
 0x48c   : > { %5344 = vmatprep.subr.bf16.mxu0 %v15123_v48  ;;  %5387 = vmatprep.subr.bf16.mxu1 %v15126_v50  ;;  %v15198_v48 = vld [vmem:[#allocation6 + $0x1ec] ss:$16 sps:$4 sm:$0xff]   ;;  %v15193_v50 = vld [vmem:[#allocation6 + $0x1e0] ss:$16 sps:$4 sm:$0xff]  }
 0x48f   : > { %5345 = vmatpush1.bf16.msra.mxu0 %v15121_v51  ;;  %5388 = vmatpush1.bf16.msra.mxu1 %v15124_v18  ;;  %v15196_v51 = vld [vmem:[#allocation6 + $0x1e8] ss:$16 sps:$4 sm:$0xff]   ;;  %v15201_v18 = vld [vmem:[%s20622_s6 + $0x4] ss:$16 sps:$4 sm:$0xff]  }
 0x490   : > { %5346 = vmatprep.subr.bf16.mxu0 %v15129_v52  ;;  %5389 = vmatprep.subr.bf16.mxu1 %v15132_v26  ;;  %v15204_v52 = vld [vmem:[%s20622_s6 + $0xc] ss:$16 sps:$4 sm:$0xff]   ;;  %v3566_v26 = vld [vmem:[%s20670_s24] sm:$0xf] }
 0x493   : > { %5347 = vmatpush1.bf16.msra.mxu0 %v15127_v54  ;;  %5390 = vmatpush1.bf16.msra.mxu1 %v15130_v55  ;;  %v3571_v54 = vrot.slane %v3566_v26, %v17944_v6  ;;  %v3575_v55 = vrot.slane %v3566_v26, %v17946_v7 }
 0x494   : > { %5348 = vmatprep.subr.bf16.mxu0 %v15135_v56  ;;  %5391 = vmatprep.subr.bf16.mxu1 %v15138_v57 }
 0x497   : > { %5349 = vmatpush1.bf16.msra.mxu0 %v15133_v59  ;;  %5392 = vmatpush1.bf16.msra.mxu1 %v15136_v62 }
 0x498   : > { %5350 = vmatprep.subr.bf16.mxu0 %v15141_v63  ;;  %5393 = vmatprep.subr.bf16.mxu1 %v15144_v0 }
 0x49b   : > { %5351 = vmatpush1.bf16.msra.mxu0 %v15139_v1  ;;  %5394 = vmatpush1.bf16.msra.mxu1 %v15142_v3 }
 0x49c   : > { %5352 = vmatprep.subr.bf16.mxu0 %v15147_v4  ;;  %5395 = vmatprep.subr.bf16.mxu1 %v15150_v5 }
 0x49f   : > { %5353 = vmatpush1.bf16.msra.mxu0 %v15145_v10  ;;  %5396 = vmatpush1.bf16.msra.mxu1 %v15148_v12 }
 0x4a0   : > { %5354 = vmatprep.subr.bf16.mxu0 %v15153_v13  ;;  %5397 = vmatprep.subr.bf16.mxu1 %v15156_v49  ;;  %v3579_v13 = vrot.slane %v3566_v26, %v17954_v11 }
 0x4a3   : > { %5355 = vmatpush1.bf16.msra.mxu0 %v15151_v14  ;;  %5398 = vmatpush1.bf16.msra.mxu1 %v15154_v17 }
 0x4a4   : > { %5356 = vmatprep.subr.bf16.mxu0 %v15159_v19  ;;  %5399 = vmatprep.subr.bf16.mxu1 %v15162_v22  ;;  %v3583_v22 = vrot.slane %v3566_v26, %v17958_v20 }
 0x4a7   : > { %5357 = vmatpush1.bf16.msra.mxu0 %v15157_v23  ;;  %5400 = vmatpush1.bf16.msra.mxu1 %v15160_v25 }
 0x4a8   : > { %5358 = vmatprep.subr.bf16.mxu0 %v15165_v61  ;;  %5401 = vmatprep.subr.bf16.mxu1 %v15168_v27 }
 0x4ab   : > { %5359 = vmatpush1.bf16.msra.mxu0 %v15163_v28  ;;  %5402 = vmatpush1.bf16.msra.mxu1 %v15166_v30 }
 0x4ac   : > { %5360 = vmatprep.subr.bf16.mxu0 %v15171_v32  ;;  %5403 = vmatprep.subr.bf16.mxu1 %v15174_v33 }
 0x4af   : > { %5361 = vmatpush1.bf16.msra.mxu0 %v15169_v34  ;;  %5404 = vmatpush1.bf16.msra.mxu1 %v15172_v35 }
 0x4b0   : > { %5362 = vmatprep.subr.bf16.mxu0 %v15177_v36  ;;  %5405 = vmatprep.subr.bf16.mxu1 %v15180_v37 }
 0x4b3   : > { %5363 = vmatpush1.bf16.msra.mxu0 %v15175_v38  ;;  %5406 = vmatpush1.bf16.msra.mxu1 %v15178_v60 }
 0x4b4   : > { %5364 = vmatprep.subr.bf16.mxu0 %v15183_v39  ;;  %5407 = vmatprep.subr.bf16.mxu1 %v15186_v40 }
 0x4b7   : > { %5365 = vmatpush1.bf16.msra.mxu0 %v15181_v41  ;;  %5408 = vmatpush1.bf16.msra.mxu1 %v15184_v43 }
 0x4b8   : > { %5366 = vmatprep.subr.bf16.mxu0 %v15189_v44  ;;  %5409 = vmatprep.subr.bf16.mxu1 %v15192_v45 }
 0x4bb   : > { %5367 = vmatpush1.bf16.msra.mxu0 %v15187_v15  ;;  %5410 = vmatpush1.bf16.msra.mxu1 %v15190_v47 }
 0x4bc   : > { %5368 = vmatprep.subr.bf16.mxu0 %v15195_v58  ;;  %5411 = vmatprep.subr.bf16.mxu1 %v15198_v48 }
 0x4bf   : > { %5369 = vmatpush1.bf16.msra.mxu0 %v15193_v50  ;;  %5412 = vmatpush1.bf16.msra.mxu1 %v15196_v51 }
 0x4c0   : > { %5881 = vmatprep.subr.bf16.mxu0 %v15201_v18  ;;  %5924 = vmatprep.subr.bf16.mxu1 %v15204_v52 }
 0x4f5   : > { %v3942_v56 = vpop.f32.mrb[44].mxu0  ;;  %v3985_v57 = vpop.f32.mrb[44].mxu1 }
 0x4f6   : > { %v3943_v59 = vadd.f32 %v3942_v56, %v3571_v54  ;;  %v3944_v62 = vpop.f32.mrb[45].mxu0  ;;  %v3987_v63 = vpop.f32.mrb[45].mxu1  ;;  %v3986_v23 = vadd.f32 %v3985_v57, %v3579_v13 }
 0x4f7   : > { %v3945_v0 = vadd.f32 %v3944_v62, %v3575_v55  ;;  %v3946_v1 = vpop.f32.mrb[46].mxu0  ;;  %v3989_v3 = vpop.f32.mrb[46].mxu1  ;;  %v3988_v61 = vadd.f32 %v3987_v63, %v3583_v22 }
 0x4f8   : > { %v13170_v4 = vmul.f32 -1.442695, %v3943_v59  ;;  %v3947_v5 = vadd.f32 %v3946_v1, %v3571_v54  ;;  %v3948_v10 = vpop.f32.mrb[47].mxu0  ;;  %v3991_v12 = vpop.f32.mrb[47].mxu1  ;;  %v3990_v25 = vadd.f32 %v3989_v3, %v3579_v13  ;;  %v13172_v27 = vmul.f32 -1.442695, %v3986_v23 }
 0x4f9   : > { %v13171_v49 = vmul.f32 -1.442695, %v3945_v0  ;;  %v3949_v14 = vadd.f32 %v3948_v10, %v3575_v55  ;;  %v3992_v32 = vadd.f32 %v3991_v12, %v3583_v22 }
 0x4fa   : > { %16543 = vpow2.f32 %v13170_v4  ;;  %v13173_v17 = vmul.f32 -1.442695, %v3947_v5  ;;  %v13175_v28 = vmul.f32 -1.442695, %v3990_v25 }
 0x4fb   : > { %v13174_v19 = vmul.f32 -1.442695, %v3949_v14  ;;  %16545 = vpow2.f32 %v13171_v49 }
 0x4fc   : > { %16547 = vpow2.f32 %v13173_v17 }
 0x4fd   : > { %16549 = vpow2.f32 %v13174_v19 }
 0x4fe   : > { %16551 = vtanh.f32 %v3988_v61 }
 0x4ff   : > { %16553 = vpow2.f32 %v13172_v27 }
 0x500   : > { %16555 = vpow2.f32 %v13175_v28 }
 0x504   : > { %v16544_v30 = vpop.eup %16543 }
 0x505   : > { %v4012_v33 = vadd.f32 1.0, %v16544_v30  ;;  %v16546_v34 = vpop.eup %16545 }
 0x506   : > { %v16548_v35 = vpop.eup %16547  ;;  %v4013_v36 = vadd.f32 1.0, %v16546_v34 }
 0x507   : > { %16557 = vrcp.f32 %v4012_v33  ;;  %v4015_v37 = vadd.f32 1.0, %v16548_v35  ;;  %v16550_v38 = vpop.eup %16549 }
 0x508   : > { %16559 = vtanh.f32 %v3992_v32  ;;  %v4016_v60 = vadd.f32 1.0, %v16550_v38  ;;  %v16552_v39 = vpop.eup %16551 }
 0x509   : > { %16561 = vrcp.f32 %v4013_v36  ;;  %v16554_v40 = vpop.eup %16553 }
 0x50a   : > { %16563 = vrcp.f32 %v4015_v37  ;;  %v16556_v41 = vpop.eup %16555  ;;  %v4014_v58 = vadd.f32 1.0, %v16554_v40 }
 0x50b   : > { %16565 = vrcp.f32 %v4016_v60  ;;  %v4017_v52 = vadd.f32 1.0, %v16556_v41 }
 0x50c   : > { %16567 = vrcp.f32 %v4014_v58 }
 0x511   : > { %v16558_v43 = vpop.eup %16557 }
 0x512   : > { %v16560_v44 = vpop.eup %16559  ;;  %v4034_v45 = vmul.f32 %v16558_v43, %v16552_v39 }
 0x513   : > { %v16562_v15 = vpop.eup %16561 }
 0x514   : > { %v16564_v47 = vpop.eup %16563  ;;  %v4032_v48 = vmul.f32 %v16562_v15, %v18438_v16 }
 0x515   : > { %v4035_v50 = vmul.f32 %v16564_v47, %v16560_v44  ;;  %v16566_v51 = vpop.eup %16565 }
 0x516   : > { %v18779_v18 = vadd.f32 %v4034_v45, %v4032_v48  ;;  %v4033_v26 = vmul.f32 %v16566_v51, %v18441_v21  ;;  %v16568_v55 = vpop.eup %16567  ;;  %v4109_v21 = vld [vmem:[%s20669_s14] sm:$0xf] }
 0x517   : > { %v4114_v0 = vrot.slane %v4109_v21, %v17944_v6  ;;  %v4118_v1 = vrot.slane %v4109_v21, %v17946_v7  ;;  %v4122_v25 = vrot.slane %v4109_v21, %v17954_v11  ;;  %v4126_v32 = vrot.slane %v4109_v21, %v17958_v20 }
 0x518   : > { %16569 = vtanh.f32 %v18779_v18  ;;  %v18783_v54 = vadd.f32 %v4035_v50, %v4033_v26 }
 0x519   : > { %16571 = vrcp.f32 %v4017_v52 }
 0x51a   : > { %16573 = vtanh.f32 %v18783_v54 }
 0x522   : > { %v16570_v56 = vpop.eup %16569 }
 0x523   : > { %v16572_v57 = vpop.eup %16571  ;;  %v4040_v16 = vmul.f32 %v16570_v56, %v16568_v55 }
 0x524   : > { %v16574_v59 = vpop.eup %16573 }
 0x525   : > { %v4041_v62 = vmul.f32 %v16574_v59, %v16572_v57 }
 0x527   : > { %v4042_v63 = vpack.c.bf16 %v4041_v62, %v4040_v16 }
 0x529   : > { %4044 = vst [vmem:[#allocation3 + $0x8] sm:$0xff] %v4042_v63  ;;  %5370 = vmatprep.mubr.bf16.mxu0 %v4042_v63  ;;  %5413 = vmatprep.mubr.bf16.mxu1 %v4042_v63 }
 0x535   : > { %v4485_v3 = vpop.f32.mrb[48].mxu0  ;;  %v4528_v4 = vpop.f32.mrb[48].mxu1 }
 0x536   : > { %v4486_v5 = vadd.f32 %v4485_v3, %v4114_v0  ;;  %v4487_v10 = vpop.f32.mrb[49].mxu0  ;;  %v4530_v12 = vpop.f32.mrb[49].mxu1  ;;  %v4529_v33 = vadd.f32 %v4528_v4, %v4122_v25 }
 0x537   : > { %v4488_v13 = vadd.f32 %v4487_v10, %v4118_v1  ;;  %v4489_v49 = vpop.f32.mrb[50].mxu0  ;;  %v4532_v14 = vpop.f32.mrb[50].mxu1  ;;  %v4531_v35 = vadd.f32 %v4530_v12, %v4126_v32 }
 0x538   : > { %v13240_v17 = vmul.f32 -1.442695, %v4486_v5  ;;  %v4490_v19 = vadd.f32 %v4489_v49, %v4114_v0  ;;  %v4491_v22 = vpop.f32.mrb[51].mxu0  ;;  %v4534_v23 = vpop.f32.mrb[51].mxu1  ;;  %v4533_v34 = vadd.f32 %v4532_v14, %v4122_v25  ;;  %v13242_v36 = vmul.f32 -1.442695, %v4529_v33 }
 0x539   : > { %v13241_v61 = vmul.f32 -1.442695, %v4488_v13  ;;  %v4492_v27 = vadd.f32 %v4491_v22, %v4118_v1  ;;  %v4535_v60 = vadd.f32 %v4534_v23, %v4126_v32 }
 0x53a   : > { %16575 = vpow2.f32 %v13240_v17  ;;  %v13243_v28 = vmul.f32 -1.442695, %v4490_v19  ;;  %v13245_v37 = vmul.f32 -1.442695, %v4533_v34 }
 0x53b   : > { %v13244_v30 = vmul.f32 -1.442695, %v4492_v27  ;;  %16577 = vpow2.f32 %v13241_v61 }
 0x53c   : > { %16579 = vpow2.f32 %v13243_v28 }
 0x53d   : > { %16581 = vpow2.f32 %v13244_v30 }
 0x53e   : > { %16583 = vtanh.f32 %v4531_v35 }
 0x53f   : > { %16585 = vpow2.f32 %v13242_v36 }
 0x540   : > { %16587 = vpow2.f32 %v13245_v37 }
 0x544   : > { %v16576_v38 = vpop.eup %16575 }
 0x545   : > { %v4555_v39 = vadd.f32 1.0, %v16576_v38  ;;  %v16578_v40 = vpop.eup %16577 }
 0x546   : > { %v16580_v41 = vpop.eup %16579  ;;  %v4556_v43 = vadd.f32 1.0, %v16578_v40 }
 0x547   : > { %16589 = vrcp.f32 %v4555_v39  ;;  %v4558_v44 = vadd.f32 1.0, %v16580_v41  ;;  %v16582_v45 = vpop.eup %16581 }
 0x548   : > { %16591 = vtanh.f32 %v4535_v60  ;;  %v4559_v15 = vadd.f32 1.0, %v16582_v45  ;;  %v16584_v47 = vpop.eup %16583 }
 0x549   : > { %16593 = vrcp.f32 %v4556_v43  ;;  %v16586_v58 = vpop.eup %16585  ;;  %v15199_v43 = vld [vmem:[%s20622_s6] ss:$16 sps:$4 sm:$0xff]  }
 0x54a   : > { %16595 = vrcp.f32 %v4558_v44  ;;  %v16588_v48 = vpop.eup %16587  ;;  %v4557_v55 = vadd.f32 1.0, %v16586_v58  ;;  %v15202_v44 = vld [vmem:[%s20622_s6 + $0x8] ss:$16 sps:$4 sm:$0xff]  }
 0x54b   : > { %16597 = vrcp.f32 %v4559_v15  ;;  %v4560_v59 = vadd.f32 1.0, %v16588_v48  ;;  %v15207_v48 = vld [vmem:[%s20622_s6 + $0x24] ss:$16 sps:$4 sm:$0xff]  }
 0x54c   : > { %16599 = vrcp.f32 %v4557_v55  ;;  %v15208_v55 = vld [vmem:[%s20622_s6 + $0x28] ss:$16 sps:$4 sm:$0xff]  }
 0x54d   : > { %16601 = vrcp.f32 %v4560_v59 }
 0x551   : > { %v16590_v50 = vpop.eup %16589 }
 0x552   : > { %v16592_v51 = vpop.eup %16591  ;;  %v4577_v52 = vmul.f32 %v16590_v50, %v16584_v47  ;;  %v15210_v50 = vld [vmem:[%s20622_s6 + $0x2c] ss:$16 sps:$4 sm:$0xff]  }
 0x553   : > { %v16594_v26 = vpop.eup %16593 }
 0x554   : > { %v16596_v56 = vpop.eup %16595  ;;  %v4575_v57 = vmul.f32 %v16594_v26, %v18452_v31  ;;  %v15205_v26 = vld [vmem:[%s20622_s6 + $0x20] ss:$16 sps:$4 sm:$0xff]  }
 0x555   : > { %v4578_v16 = vmul.f32 %v16596_v56, %v16592_v51  ;;  %v4822_v62 = vpop.f32.mrb[12].mxu0  ;;  %v4865_v63 = vpop.f32.mrb[12].mxu1  ;;  %v15213_v56 = vld [vmem:[%s20622_s6 + $0x44] ss:$16 sps:$4 sm:$0xff]  }
 0x556   : > { %v16598_v21 = vpop.eup %16597  ;;  %v18794_v0 = vadd.f32 %v4577_v52, %v4575_v57  ;;  %v14249_v1 = vadd.f32 %v4822_v62, %v17949_v8  ;;  %v4824_v3 = vpop.f32.mrb[13].mxu0  ;;  %v14281_v61 = vadd.f32 %v4865_v63, %v17962_v24  ;;  %v15216_v57 = vld [vmem:[%s20622_s6 + $0x4c] ss:$16 sps:$4 sm:$0xff]   ;;  %v15214_v62 = vld [vmem:[%s20622_s6 + $0x48] ss:$16 sps:$4 sm:$0xff]  }
 0x557   : > { %v4867_v4 = vpop.f32.mrb[13].mxu1  ;;  %v4576_v5 = vmul.f32 %v16598_v21, %v18459_v42  ;;  %v14250_v10 = vadd.f32 %v4824_v3, %v17952_v9  ;;  %v4826_v12 = vpop.f32.mrb[14].mxu0  ;;  %v15219_v21 = vld [vmem:[%s20622_s6 + $0x64] ss:$16 sps:$4 sm:$0xff]  }
 0x558   : > { %v4869_v13 = vpop.f32.mrb[14].mxu1  ;;  %v13278_v31 = vmul.f32 -1.442695, %v14249_v1  ;;  %v14251_v49 = vadd.f32 %v4826_v12, %v17949_v8  ;;  %v4828_v14 = vpop.f32.mrb[15].mxu0  ;;  %16603 = vtanh.f32 %v18794_v0  ;;  %v14282_v30 = vadd.f32 %v4867_v4, %v17966_v29  ;;  %v15222_v1 = vld [vmem:[%s20622_s6 + $0x6c] ss:$16 sps:$4 sm:$0xff]  }
 0x559   : > { %v4871_v17 = vpop.f32.mrb[15].mxu1  ;;  %v18801_v19 = vadd.f32 %v4578_v16, %v4576_v5  ;;  %v13279_v22 = vmul.f32 -1.442695, %v14250_v10  ;;  %v14252_v25 = vadd.f32 %v4828_v14, %v17952_v9  ;;  %v14283_v27 = vadd.f32 %v4869_v13, %v17962_v24  ;;  %v16600_v28 = vpop.eup %16599  ;;  %v15211_v16 = vld [vmem:[%s20622_s6 + $0x40] ss:$16 sps:$4 sm:$0xff]  }
 0x55a   : > { %16605 = vpow2.f32 %v13278_v31  ;;  %v13281_v23 = vmul.f32 -1.442695, %v14251_v49  ;;  %v16602_v32 = vpop.eup %16601  ;;  %v13280_v33 = vmul.f32 -1.442695, %v14281_v61  ;;  %v14284_v60 = vadd.f32 %v4871_v17, %v17966_v29  ;;  %v15217_v12 = vld [vmem:[%s20622_s6 + $0x60] ss:$16 sps:$4 sm:$0xff]  }
 0x55b   : > { %16607 = vtanh.f32 %v18801_v19  ;;  %v13282_v42 = vmul.f32 -1.442695, %v14252_v25  ;;  %v13283_v36 = vmul.f32 -1.442695, %v14283_v27  ;;  %v15220_v13 = vld [vmem:[%s20622_s6 + $0x68] ss:$16 sps:$4 sm:$0xff]  }
 0x55c   : > { %16609 = vpow2.f32 %v13279_v22  ;;  %v15225_v49 = vld [vmem:[%s20622_s6 + $0x84] ss:$16 sps:$4 sm:$0xff]   ;;  %v15228_v14 = vld [vmem:[%s20622_s6 + $0x8c] ss:$16 sps:$4 sm:$0xff]  }
 0x55d   : > { %16611 = vpow2.f32 %v13281_v23 }
 0x55e   : > { %16613 = vpow2.f32 %v13282_v42 }
 0x55f   : > { %16615 = vtanh.f32 %v14282_v30  ;;  %v15226_v30 = vld [vmem:[%s20622_s6 + $0x88] ss:$16 sps:$4 sm:$0xff]  }
 0x560   : > { %16617 = vpow2.f32 %v13280_v33  ;;  %v15234_v33 = vld [vmem:[%s20622_s6 + $0xac] ss:$16 sps:$4 sm:$0xff]  }
 0x562   : > { %v16604_v34 = vpop.eup %16603 }
 0x563   : > { %v4583_v39 = vmul.f32 %v16604_v34, %v16600_v28  ;;  %v15223_v28 = vld [vmem:[%s20622_s6 + $0x80] ss:$16 sps:$4 sm:$0xff]  }
 0x564   : > { %v16606_v35 = vpop.eup %16605 }
 0x565   : > { %v16608_v37 = vpop.eup %16607  ;;  %v4900_v38 = vadd.f32 1.0, %v16606_v35  ;;  %v15232_v35 = vld [vmem:[%s20622_s6 + $0xa8] ss:$16 sps:$4 sm:$0xff]  }
 0x566   : > { %v4584_v40 = vmul.f32 %v16608_v37, %v16602_v32  ;;  %v16610_v41 = vpop.eup %16609  ;;  %v15240_v37 = vld [vmem:[%s20622_s6 + $0xcc] ss:$16 sps:$4 sm:$0xff]  }
 0x567   : > { %16619 = vrcp.f32 %v4900_v38  ;;  %v16612_v45 = vpop.eup %16611  ;;  %v4901_v15 = vadd.f32 1.0, %v16610_v41  ;;  %v15235_v38 = vld [vmem:[%s20622_s6 + $0xc0] ss:$16 sps:$4 sm:$0xff]  }
 0x568   : > { %16621 = vpow2.f32 %v13283_v36  ;;  %v4931_v47 = vpack.c.bf16 %v4584_v40, %v4583_v39  ;;  %v4903_v58 = vadd.f32 1.0, %v16612_v45  ;;  %v16614_v51 = vpop.eup %16613  ;;  %v15237_v36 = vld [vmem:[%s20622_s6 + $0xc4] ss:$16 sps:$4 sm:$0xff]   ;;  %v15246_v40 = vld [vmem:[%s20622_s6 + $0xec] ss:$16 sps:$4 sm:$0xff]  }
 0x569   : > { %16623 = vtanh.f32 %v14284_v60  ;;  %v4904_v52 = vadd.f32 1.0, %v16614_v51  ;;  %v16616_v59 = vpop.eup %16615  ;;  %v15238_v60 = vld [vmem:[%s20622_s6 + $0xc8] ss:$16 sps:$4 sm:$0xff]   ;;  %v15243_v39 = vld [vmem:[%s20622_s6 + $0xe4] ss:$16 sps:$4 sm:$0xff]  }
 0x56a   : > { %16625 = vrcp.f32 %v4901_v15  ;;  %5371 = vmatmul.mubr.bf16.vlgmr.msra.gmra.mrb[52].mxu0 %v4931_v47  ;;  %5414 = vmatmul.mubr.bf16.vlgmr.msra.gmra.mrb[52].mxu1 %v4931_v47  ;;  %v16618_v63 = vpop.eup %16617  ;;  %v15249_v15 = vld [vmem:[%s20622_s6 + $0x104] ss:$16 sps:$4 sm:$0xff]   ;;  %v15250_v51 = vld [vmem:[%s20622_s6 + $0x108] ss:$16 sps:$4 sm:$0xff]  }
 0x56b   : > { %16627 = vrcp.f32 %v4903_v58  ;;  %5882 = vmatpush1.bf16.msra.mxu0 %v15199_v43  ;;  %5925 = vmatpush1.bf16.msra.mxu1 %v15202_v44  ;;  %v4902_v22 = vadd.f32 1.0, %v16618_v63  ;;  %v15241_v43 = vld [vmem:[%s20622_s6 + $0xe0] ss:$16 sps:$4 sm:$0xff]   ;;  %v15244_v44 = vld [vmem:[%s20622_s6 + $0xe8] ss:$16 sps:$4 sm:$0xff]  }
 0x56c   : > { %5913 = vmatprep.mubr.bf16.mxu0 %v4931_v47  ;;  %5956 = vmatprep.mubr.bf16.mxu1 %v4931_v47  ;;  %16629 = vrcp.f32 %v4904_v52  ;;  %v15252_v47 = vld [vmem:[%s20622_s6 + $0x10c] ss:$16 sps:$4 sm:$0xff]  }
 0x56d   : > { %5883 = vmatprep.subr.bf16.mxu0 %v15207_v48  ;;  %5926 = vmatprep.subr.bf16.mxu1 %v15210_v50  ;;  %16631 = vrcp.f32 %v4902_v22  ;;  %v15247_v50 = vld [vmem:[%s20622_s6 + $0x100] ss:$16 sps:$4 sm:$0xff]   ;;  %v15264_v63 = vld [vmem:[%s20622_s6 + $0x14c] ss:$16 sps:$4 sm:$0xff]  }
 0x56e   : > { %v15277_v22 = vld [vmem:[%s20622_s6 + $0x1a0] ss:$16 sps:$4 sm:$0xff]  }
 0x56f   : > { %5884 = vmatpush1.bf16.msra.mxu0 %v15205_v26  ;;  %5927 = vmatpush1.bf16.msra.mxu1 %v15208_v55  ;;  %v15255_v55 = vld [vmem:[%s20622_s6 + $0x124] ss:$16 sps:$4 sm:$0xff]  }
 0x570   : > { %5885 = vmatprep.subr.bf16.mxu0 %v15213_v56  ;;  %5928 = vmatprep.subr.bf16.mxu1 %v15216_v57  ;;  %v15258_v56 = vld [vmem:[%s20622_s6 + $0x12c] ss:$16 sps:$4 sm:$0xff]  }
 0x571   : > { %v16620_v3 = vpop.eup %16619 }
 0x572   : > { %v16622_v4 = vpop.eup %16621  ;;  %v4922_v5 = vmul.f32 %v16620_v3, %v16616_v59  ;;  %v15253_v59 = vld [vmem:[%s20622_s6 + $0x120] ss:$16 sps:$4 sm:$0xff]   ;;  %v15267_v3 = vld [vmem:[%s20622_s6 + $0x164] ss:$16 sps:$4 sm:$0xff]  }
 0x573   : > { %v16624_v10 = vpop.eup %16623  ;;  %5886 = vmatpush1.bf16.msra.mxu0 %v15211_v16  ;;  %5929 = vmatpush1.bf16.msra.mxu1 %v15214_v62  ;;  %v4905_v27 = vadd.f32 1.0, %v16622_v4  ;;  %v15256_v16 = vld [vmem:[%s20622_s6 + $0x128] ss:$16 sps:$4 sm:$0xff]   ;;  %v15261_v62 = vld [vmem:[%s20622_s6 + $0x144] ss:$16 sps:$4 sm:$0xff]  }
 0x574   : > { %v16626_v31 = vpop.eup %16625  ;;  %5887 = vmatprep.subr.bf16.mxu0 %v15219_v21  ;;  %5930 = vmatprep.subr.bf16.mxu1 %v15222_v1  ;;  %v15259_v21 = vld [vmem:[%s20622_s6 + $0x140] ss:$16 sps:$4 sm:$0xff]   ;;  %v15262_v1 = vld [vmem:[%s20622_s6 + $0x148] ss:$16 sps:$4 sm:$0xff]   ;;  %v15270_v4 = vld [vmem:[%s20622_s6 + $0x16c] ss:$16 sps:$4 sm:$0xff]  }
 0x575   : > { %v16628_v17 = vpop.eup %16627  ;;  %v4920_v23 = vmul.f32 %v16626_v31, %v18516_v46  ;;  %v15231_v46 = vld [vmem:[%s20622_s6 + $0xa4] ss:$16 sps:$4 sm:$0xff]   ;;  %v15271_v31 = vld [vmem:[%s20622_s6 + $0x180] ss:$16 sps:$4 sm:$0xff]  }
 0x576   : > { %v4923_v25 = vmul.f32 %v16628_v17, %v16624_v10  ;;  %v16630_v42 = vpop.eup %16629  ;;  %v15268_v10 = vld [vmem:[%s20622_s6 + $0x168] ss:$16 sps:$4 sm:$0xff]   ;;  %v15282_v17 = vld [vmem:[%s20622_s6 + $0x1ac] ss:$16 sps:$4 sm:$0xff]  }
 0x577   : > { %v18858_v61 = vadd.f32 %v4922_v5, %v4920_v23  ;;  %5888 = vmatpush1.bf16.msra.mxu0 %v15217_v12  ;;  %5931 = vmatpush1.bf16.msra.mxu1 %v15220_v13  ;;  %v4921_v32 = vmul.f32 %v16630_v42, %v18532_v53  ;;  %v15229_v53 = vld [vmem:[%s20622_s6 + $0xa0] ss:$16 sps:$4 sm:$0xff]   ;;  %v16632_v41 = vpop.eup %16631  ;;  %v15273_v12 = vld [vmem:[%s20622_s6 + $0x184] ss:$16 sps:$4 sm:$0xff]   ;;  %v15276_v13 = vld [vmem:[%s20622_s6 + $0x18c] ss:$16 sps:$4 sm:$0xff]  }
 0x578   : > { %5889 = vmatprep.subr.bf16.mxu0 %v15225_v49  ;;  %5932 = vmatprep.subr.bf16.mxu1 %v15228_v14  ;;  %v15265_v5 = vld [vmem:[%s20622_s6 + $0x160] ss:$16 sps:$4 sm:$0xff]   ;;  %v15274_v49 = vld [vmem:[%s20622_s6 + $0x188] ss:$16 sps:$4 sm:$0xff]   ;;  %v15279_v14 = vld [vmem:[%s20622_s6 + $0x1a4] ss:$16 sps:$4 sm:$0xff]  }
 0x579   : > { %16633 = vtanh.f32 %v18858_v61  ;;  %v18874_v34 = vadd.f32 %v4923_v25, %v4921_v32  ;;  %v15280_v23 = vld [vmem:[%s20622_s6 + $0x1a8] ss:$16 sps:$4 sm:$0xff]   ;;  %v15285_v25 = vld [vmem:[%s20622_s6 + $0x1c4] ss:$16 sps:$4 sm:$0xff]   ;;  %v15288_v42 = vld [vmem:[%s20622_s6 + $0x1cc] ss:$16 sps:$4 sm:$0xff]  }
 0x57a   : > { %16635 = vrcp.f32 %v4905_v27  ;;  %v15283_v27 = vld [vmem:[%s20622_s6 + $0x1c0] ss:$16 sps:$4 sm:$0xff]   ;;  %v15294_v32 = vld [vmem:[%s20622_s6 + $0x1ec] ss:$16 sps:$4 sm:$0xff]  }
 0x57b   : > { %5890 = vmatpush1.bf16.msra.mxu0 %v15223_v28  ;;  %5933 = vmatpush1.bf16.msra.mxu1 %v15226_v30  ;;  %16637 = vtanh.f32 %v18874_v34  ;;  %v15286_v28 = vld [vmem:[%s20622_s6 + $0x1c8] ss:$16 sps:$4 sm:$0xff]   ;;  %v15291_v30 = vld [vmem:[%s20622_s6 + $0x1e4] ss:$16 sps:$4 sm:$0xff]  }
 0x57c   : > { %5891 = vmatprep.subr.bf16.mxu0 %v15231_v46  ;;  %5934 = vmatprep.subr.bf16.mxu1 %v15234_v33  ;;  %v15289_v46 = vld [vmem:[%s20622_s6 + $0x1e0] ss:$16 sps:$4 sm:$0xff]   ;;  %v15292_v33 = vld [vmem:[%s20622_s6 + $0x1e8] ss:$16 sps:$4 sm:$0xff]  }
 0x57f   : > { %5892 = vmatpush1.bf16.msra.mxu0 %v15229_v53  ;;  %5935 = vmatpush1.bf16.msra.mxu1 %v15232_v35  ;;  %v15297_v53 = vld [vmem:[%s20620_s4 + $0x4] ss:$16 sps:$4 sm:$0xff]   ;;  %v15300_v35 = vld [vmem:[%s20620_s4 + $0xc] ss:$16 sps:$4 sm:$0xff]  }
 0x580   : > { %5893 = vmatprep.subr.bf16.mxu0 %v15237_v36  ;;  %5936 = vmatprep.subr.bf16.mxu1 %v15240_v37  ;;  %v15295_v36 = vld [vmem:[%s20620_s4] ss:$16 sps:$4 sm:$0xff]   ;;  %v15298_v37 = vld [vmem:[%s20620_s4 + $0x8] ss:$16 sps:$4 sm:$0xff]  }
 0x583   : > { %5894 = vmatpush1.bf16.msra.mxu0 %v15235_v38  ;;  %5937 = vmatpush1.bf16.msra.mxu1 %v15238_v60  ;;  %v16634_v45 = vpop.eup %16633  ;;  %v15303_v38 = vld [vmem:[%s20620_s4 + $0x24] ss:$16 sps:$4 sm:$0xff]   ;;  %v15306_v60 = vld [vmem:[%s20620_s4 + $0x2c] ss:$16 sps:$4 sm:$0xff]  }
 0x584   : > { %5895 = vmatprep.subr.bf16.mxu0 %v15243_v39  ;;  %5938 = vmatprep.subr.bf16.mxu1 %v15246_v40  ;;  %v16636_v58 = vpop.eup %16635  ;;  %v4928_v52 = vmul.f32 %v16634_v45, %v16632_v41  ;;  %v15301_v39 = vld [vmem:[%s20620_s4 + $0x20] ss:$16 sps:$4 sm:$0xff]   ;;  %v15304_v40 = vld [vmem:[%s20620_s4 + $0x28] ss:$16 sps:$4 sm:$0xff]   ;;  %v15309_v41 = vld [vmem:[%s20620_s4 + $0x44] ss:$16 sps:$4 sm:$0xff]  }
 0x585   : > { %v16638_v48 = vpop.eup %16637  ;;  %v15310_v45 = vld [vmem:[%s20620_s4 + $0x48] ss:$16 sps:$4 sm:$0xff]  }
 0x586   : > { %v4929_v26 = vmul.f32 %v16638_v48, %v16636_v58  ;;  %v15313_v58 = vld [vmem:[%s20620_s4 + $0x60] ss:$16 sps:$4 sm:$0xff]   ;;  %v15316_v48 = vld [vmem:[%s20620_s4 + $0x68] ss:$16 sps:$4 sm:$0xff]  }
 0x587   : > { %5896 = vmatpush1.bf16.msra.mxu0 %v15241_v43  ;;  %5939 = vmatpush1.bf16.msra.mxu1 %v15244_v44  ;;  %v15312_v43 = vld [vmem:[%s20620_s4 + $0x4c] ss:$16 sps:$4 sm:$0xff]   ;;  %v15307_v44 = vld [vmem:[%s20620_s4 + $0x40] ss:$16 sps:$4 sm:$0xff]  }
 0x588   : > { %5897 = vmatprep.subr.bf16.mxu0 %v15249_v15  ;;  %5940 = vmatprep.subr.bf16.mxu1 %v15252_v47  ;;  %v18925_v57 = vpack.c.bf16 %v4929_v26, %v4928_v52  ;;  %v15315_v15 = vld [vmem:[%s20620_s4 + $0x64] ss:$16 sps:$4 sm:$0xff]   ;;  %v15318_v47 = vld [vmem:[%s20620_s4 + $0x6c] ss:$16 sps:$4 sm:$0xff]   ;;  %v15319_v52 = vld [vmem:[%s20620_s4 + $0x80] ss:$16 sps:$4 sm:$0xff]  }
 0x589   : > { %v15322_v26 = vld [vmem:[%s20620_s4 + $0x88] ss:$16 sps:$4 sm:$0xff]  }
 0x58b   : > { %5898 = vmatpush1.bf16.msra.mxu0 %v15247_v50  ;;  %5941 = vmatpush1.bf16.msra.mxu1 %v15250_v51  ;;  %v15321_v50 = vld [vmem:[%s20620_s4 + $0x84] ss:$16 sps:$4 sm:$0xff]   ;;  %v15324_v51 = vld [vmem:[%s20620_s4 + $0x8c] ss:$16 sps:$4 sm:$0xff]  }
 0x58c   : > { %5899 = vmatprep.subr.bf16.mxu0 %v15255_v55  ;;  %5942 = vmatprep.subr.bf16.mxu1 %v15258_v56  ;;  %v15327_v55 = vld [vmem:[%s20620_s4 + $0xa4] ss:$16 sps:$4 sm:$0xff]   ;;  %v15330_v56 = vld [vmem:[%s20620_s4 + $0xac] ss:$16 sps:$4 sm:$0xff]  }
 0x58f   : > { %5900 = vmatpush1.bf16.msra.mxu0 %v15253_v59  ;;  %5943 = vmatpush1.bf16.msra.mxu1 %v15256_v16  ;;  %v15325_v59 = vld [vmem:[%s20620_s4 + $0xa0] ss:$16 sps:$4 sm:$0xff]   ;;  %v15328_v16 = vld [vmem:[%s20620_s4 + $0xa8] ss:$16 sps:$4 sm:$0xff]  }
 0x590   : > { %5901 = vmatprep.subr.bf16.mxu0 %v15261_v62  ;;  %5944 = vmatprep.subr.bf16.mxu1 %v15264_v63  ;;  %v15333_v62 = vld [vmem:[%s20620_s4 + $0xc4] ss:$16 sps:$4 sm:$0xff]   ;;  %v15336_v63 = vld [vmem:[%s20620_s4 + $0xcc] ss:$16 sps:$4 sm:$0xff]  }
 0x593   : > { %5902 = vmatpush1.bf16.msra.mxu0 %v15259_v21  ;;  %5945 = vmatpush1.bf16.msra.mxu1 %v15262_v1  ;;  %v15331_v21 = vld [vmem:[%s20620_s4 + $0xc0] ss:$16 sps:$4 sm:$0xff]   ;;  %v15334_v1 = vld [vmem:[%s20620_s4 + $0xc8] ss:$16 sps:$4 sm:$0xff]  }
 0x594   : > { %5903 = vmatprep.subr.bf16.mxu0 %v15267_v3  ;;  %5946 = vmatprep.subr.bf16.mxu1 %v15270_v4  ;;  %v15339_v3 = vld [vmem:[%s20620_s4 + $0xe4] ss:$16 sps:$4 sm:$0xff]   ;;  %v15342_v4 = vld [vmem:[%s20620_s4 + $0xec] ss:$16 sps:$4 sm:$0xff]  }
 0x597   : > { %5904 = vmatpush1.bf16.msra.mxu0 %v15265_v5  ;;  %5947 = vmatpush1.bf16.msra.mxu1 %v15268_v10  ;;  %v15337_v5 = vld [vmem:[%s20620_s4 + $0xe0] ss:$16 sps:$4 sm:$0xff]   ;;  %v15340_v10 = vld [vmem:[%s20620_s4 + $0xe8] ss:$16 sps:$4 sm:$0xff]  }
 0x598   : > { %5905 = vmatprep.subr.bf16.mxu0 %v15273_v12  ;;  %5948 = vmatprep.subr.bf16.mxu1 %v15276_v13  ;;  %v15343_v12 = vld [vmem:[#allocation6] ss:$16 sps:$4 sm:$0xff]   ;;  %v15345_v13 = vld [vmem:[#allocation6 + $0x4] ss:$16 sps:$4 sm:$0xff]  }
 0x59b   : > { %5906 = vmatpush1.bf16.msra.mxu0 %v15271_v31  ;;  %5949 = vmatpush1.bf16.msra.mxu1 %v15274_v49  ;;  %v15346_v31 = vld [vmem:[#allocation6 + $0x8] ss:$16 sps:$4 sm:$0xff]   ;;  %v15348_v49 = vld [vmem:[#allocation6 + $0xc] ss:$16 sps:$4 sm:$0xff]  }
 0x59c   : > { %5907 = vmatprep.subr.bf16.mxu0 %v15279_v14  ;;  %5950 = vmatprep.subr.bf16.mxu1 %v15282_v17  ;;  %v15349_v14 = vld [vmem:[#allocation6 + $0x20] ss:$16 sps:$4 sm:$0xff]   ;;  %v15351_v17 = vld [vmem:[#allocation6 + $0x24] ss:$16 sps:$4 sm:$0xff]  }
 0x59f   : > { %5908 = vmatpush1.bf16.msra.mxu0 %v15277_v22  ;;  %5951 = vmatpush1.bf16.msra.mxu1 %v15280_v23  ;;  %v15352_v22 = vld [vmem:[#allocation6 + $0x28] ss:$16 sps:$4 sm:$0xff]   ;;  %v15354_v23 = vld [vmem:[#allocation6 + $0x2c] ss:$16 sps:$4 sm:$0xff]  }
 0x5a0   : > { %5909 = vmatprep.subr.bf16.mxu0 %v15285_v25  ;;  %5952 = vmatprep.subr.bf16.mxu1 %v15288_v42  ;;  %v15357_v25 = vld [vmem:[#allocation6 + $0x44] ss:$16 sps:$4 sm:$0xff]   ;;  %v15360_v42 = vld [vmem:[#allocation6 + $0x4c] ss:$16 sps:$4 sm:$0xff]  }
 0x5a3   : > { %5910 = vmatpush1.bf16.msra.mxu0 %v15283_v27  ;;  %5953 = vmatpush1.bf16.msra.mxu1 %v15286_v28  ;;  %v15355_v27 = vld [vmem:[#allocation6 + $0x40] ss:$16 sps:$4 sm:$0xff]   ;;  %v15363_v28 = vld [vmem:[#allocation6 + $0x64] ss:$16 sps:$4 sm:$0xff]  }
 0x5a4   : > { %5911 = vmatprep.subr.bf16.mxu0 %v15291_v30  ;;  %5954 = vmatprep.subr.bf16.mxu1 %v15294_v32  ;;  %v15366_v30 = vld [vmem:[#allocation6 + $0x6c] ss:$16 sps:$4 sm:$0xff]   ;;  %v15361_v32 = vld [vmem:[#allocation6 + $0x60] ss:$16 sps:$4 sm:$0xff]  }
 0x5a7   : > { %5912 = vmatpush1.bf16.msra.mxu0 %v15289_v46  ;;  %5955 = vmatpush1.bf16.msra.mxu1 %v15292_v33  ;;  %v15364_v46 = vld [vmem:[#allocation6 + $0x68] ss:$16 sps:$4 sm:$0xff]   ;;  %v15369_v33 = vld [vmem:[#allocation6 + $0x84] ss:$16 sps:$4 sm:$0xff]  }
 0x5a8   : > { %6218 = vmatprep.subr.bf16.mxu0 %v15297_v53  ;;  %6261 = vmatprep.subr.bf16.mxu1 %v15300_v35  ;;  %v15372_v53 = vld [vmem:[#allocation6 + $0x8c] ss:$16 sps:$4 sm:$0xff]   ;;  %v15367_v35 = vld [vmem:[#allocation6 + $0x80] ss:$16 sps:$4 sm:$0xff]  }
 0x5aa   : > { %5914 = vmatmul.mubr.bf16.vlgmr.msra.gmra.mrb[56].mxu0 %v18925_v57  ;;  %5957 = vmatmul.mubr.bf16.vlgmr.msra.gmra.mrb[56].mxu1 %v18925_v57 }
 0x5ab   : > { %6219 = vmatpush1.bf16.msra.mxu0 %v15295_v36  ;;  %6262 = vmatpush1.bf16.msra.mxu1 %v15298_v37  ;;  %v15370_v36 = vld [vmem:[#allocation6 + $0x88] ss:$16 sps:$4 sm:$0xff]   ;;  %v15375_v37 = vld [vmem:[#allocation6 + $0xa4] ss:$16 sps:$4 sm:$0xff]  }
 0x5ac   : > { %6220 = vmatprep.subr.bf16.mxu0 %v15303_v38  ;;  %6263 = vmatprep.subr.bf16.mxu1 %v15306_v60  ;;  %v15378_v38 = vld [vmem:[#allocation6 + $0xac] ss:$16 sps:$4 sm:$0xff]   ;;  %v15373_v60 = vld [vmem:[#allocation6 + $0xa0] ss:$16 sps:$4 sm:$0xff]  }
 0x5ad   : > { %6250 = vmatprep.mubr.bf16.mxu0 %v17312_v2  ;;  %6293 = vmatprep.mubr.bf16.mxu1 %v17312_v2 }
 0x5af   : > { %6221 = vmatpush1.bf16.msra.mxu0 %v15301_v39  ;;  %6264 = vmatpush1.bf16.msra.mxu1 %v15304_v40  ;;  %v15376_v39 = vld [vmem:[#allocation6 + $0xa8] ss:$16 sps:$4 sm:$0xff]   ;;  %v15381_v40 = vld [vmem:[#allocation6 + $0xc4] ss:$16 sps:$4 sm:$0xff]  }
 0x5b0   : > { %6222 = vmatprep.subr.bf16.mxu0 %v15309_v41  ;;  %6265 = vmatprep.subr.bf16.mxu1 %v15312_v43  ;;  %v15384_v41 = vld [vmem:[#allocation6 + $0xcc] ss:$16 sps:$4 sm:$0xff]   ;;  %v15379_v43 = vld [vmem:[#allocation6 + $0xc0] ss:$16 sps:$4 sm:$0xff]  }
 0x5b3   : > { %6223 = vmatpush1.bf16.msra.mxu0 %v15307_v44  ;;  %6266 = vmatpush1.bf16.msra.mxu1 %v15310_v45  ;;  %v15382_v44 = vld [vmem:[#allocation6 + $0xc8] ss:$16 sps:$4 sm:$0xff]   ;;  %v15387_v45 = vld [vmem:[#allocation6 + $0xe4] ss:$16 sps:$4 sm:$0xff]  }
 0x5b4   : > { %6224 = vmatprep.subr.bf16.mxu0 %v15315_v15  ;;  %6267 = vmatprep.subr.bf16.mxu1 %v15318_v47  ;;  %v15390_v15 = vld [vmem:[#allocation6 + $0xec] ss:$16 sps:$4 sm:$0xff]   ;;  %v15385_v47 = vld [vmem:[#allocation6 + $0xe0] ss:$16 sps:$4 sm:$0xff]  }
 0x5b7   : > { %6225 = vmatpush1.bf16.msra.mxu0 %v15313_v58  ;;  %6268 = vmatpush1.bf16.msra.mxu1 %v15316_v48  ;;  %v15388_v58 = vld [vmem:[#allocation6 + $0xe8] ss:$16 sps:$4 sm:$0xff]   ;;  %v15393_v48 = vld [vmem:[#allocation6 + $0x104] ss:$16 sps:$4 sm:$0xff]  }
 0x5b8   : > { %6226 = vmatprep.subr.bf16.mxu0 %v15321_v50  ;;  %6269 = vmatprep.subr.bf16.mxu1 %v15324_v51  ;;  %v15396_v50 = vld [vmem:[#allocation6 + $0x10c] ss:$16 sps:$4 sm:$0xff]   ;;  %v15391_v51 = vld [vmem:[#allocation6 + $0x100] ss:$16 sps:$4 sm:$0xff]  }
 0x5bb   : > { %6227 = vmatpush1.bf16.msra.mxu0 %v15319_v52  ;;  %6270 = vmatpush1.bf16.msra.mxu1 %v15322_v26  ;;  %v15394_v52 = vld [vmem:[#allocation6 + $0x108] ss:$16 sps:$4 sm:$0xff]   ;;  %v15399_v26 = vld [vmem:[#allocation6 + $0x124] ss:$16 sps:$4 sm:$0xff]  }
 0x5bc   : > { %6228 = vmatprep.subr.bf16.mxu0 %v15327_v55  ;;  %6271 = vmatprep.subr.bf16.mxu1 %v15330_v56  ;;  %v15402_v55 = vld [vmem:[#allocation6 + $0x12c] ss:$16 sps:$4 sm:$0xff]   ;;  %v15397_v56 = vld [vmem:[#allocation6 + $0x120] ss:$16 sps:$4 sm:$0xff]  }
 0x5bf   : > { %6229 = vmatpush1.bf16.msra.mxu0 %v15325_v59  ;;  %6272 = vmatpush1.bf16.msra.mxu1 %v15328_v16  ;;  %v15400_v59 = vld [vmem:[#allocation6 + $0x128] ss:$16 sps:$4 sm:$0xff]   ;;  %v15405_v16 = vld [vmem:[#allocation6 + $0x144] ss:$16 sps:$4 sm:$0xff]  }
 0x5c0   : > { %6230 = vmatprep.subr.bf16.mxu0 %v15333_v62  ;;  %6273 = vmatprep.subr.bf16.mxu1 %v15336_v63  ;;  %v15408_v62 = vld [vmem:[#allocation6 + $0x14c] ss:$16 sps:$4 sm:$0xff]   ;;  %v15403_v63 = vld [vmem:[#allocation6 + $0x140] ss:$16 sps:$4 sm:$0xff]  }
 0x5c3   : > { %6231 = vmatpush1.bf16.msra.mxu0 %v15331_v21  ;;  %6274 = vmatpush1.bf16.msra.mxu1 %v15334_v1  ;;  %v15406_v21 = vld [vmem:[#allocation6 + $0x148] ss:$16 sps:$4 sm:$0xff]   ;;  %v15411_v1 = vld [vmem:[#allocation6 + $0x164] ss:$16 sps:$4 sm:$0xff]  }
 0x5c4   : > { %6232 = vmatprep.subr.bf16.mxu0 %v15339_v3  ;;  %6275 = vmatprep.subr.bf16.mxu1 %v15342_v4  ;;  %v15414_v3 = vld [vmem:[#allocation6 + $0x16c] ss:$16 sps:$4 sm:$0xff]   ;;  %v15409_v4 = vld [vmem:[#allocation6 + $0x160] ss:$16 sps:$4 sm:$0xff]  }
 0x5c7   : > { %6233 = vmatpush1.bf16.msra.mxu0 %v15337_v5  ;;  %6276 = vmatpush1.bf16.msra.mxu1 %v15340_v10  ;;  %v15412_v5 = vld [vmem:[#allocation6 + $0x168] ss:$16 sps:$4 sm:$0xff]   ;;  %v15417_v10 = vld [vmem:[#allocation6 + $0x184] ss:$16 sps:$4 sm:$0xff]  }
 0x5c8   : > { %6768 = vmatprep.subr.bf16.mxu0 %v15345_v13  ;;  %6811 = vmatprep.subr.bf16.mxu1 %v15348_v49  ;;  %v15415_v13 = vld [vmem:[#allocation6 + $0x180] ss:$16 sps:$4 sm:$0xff]   ;;  %v15423_v49 = vld [vmem:[#allocation6 + $0x1a4] ss:$16 sps:$4 sm:$0xff]  }
 0x5ca   : > { %6251 = vmatmul.mubr.bf16.vlgmr.msra.gmra.mrb[16].mxu0 %v18925_v57  ;;  %6294 = vmatmul.mubr.bf16.vlgmr.msra.gmra.mrb[16].mxu1 %v18925_v57  ;;  %v15358_v57 = vld [vmem:[#allocation6 + $0x48] ss:$16 sps:$4 sm:$0xff]  }
 0x5cb   : > { %6769 = vmatpush1.bf16.msra.mxu0 %v15343_v12  ;;  %6812 = vmatpush1.bf16.msra.mxu1 %v15346_v31  ;;  %v15420_v12 = vld [vmem:[#allocation6 + $0x18c] ss:$16 sps:$4 sm:$0xff]   ;;  %v15418_v31 = vld [vmem:[#allocation6 + $0x188] ss:$16 sps:$4 sm:$0xff]  }
 0x5cc   : > { %6770 = vmatprep.subr.bf16.mxu0 %v15351_v17  ;;  %6813 = vmatprep.subr.bf16.mxu1 %v15354_v23  ;;  %v15421_v17 = vld [vmem:[#allocation6 + $0x1a0] ss:$16 sps:$4 sm:$0xff]   ;;  %v15429_v23 = vld [vmem:[#allocation6 + $0x1c4] ss:$16 sps:$4 sm:$0xff]  }
 0x5cf   : > { %6771 = vmatpush1.bf16.msra.mxu0 %v15349_v14  ;;  %6814 = vmatpush1.bf16.msra.mxu1 %v15352_v22  ;;  %v15426_v14 = vld [vmem:[#allocation6 + $0x1ac] ss:$16 sps:$4 sm:$0xff]   ;;  %v15424_v22 = vld [vmem:[#allocation6 + $0x1a8] ss:$16 sps:$4 sm:$0xff]  }
 0x5d0   : > { %6772 = vmatprep.subr.bf16.mxu0 %v15357_v25  ;;  %6815 = vmatprep.subr.bf16.mxu1 %v15360_v42  ;;  %v15432_v25 = vld [vmem:[#allocation6 + $0x1cc] ss:$16 sps:$4 sm:$0xff]   ;;  %v15427_v42 = vld [vmem:[#allocation6 + $0x1c0] ss:$16 sps:$4 sm:$0xff]  }
 0x5d3   : > { %6773 = vmatpush1.bf16.msra.mxu0 %v15355_v27  ;;  %6816 = vmatpush1.bf16.msra.mxu1 %v15358_v57  ;;  %v15430_v27 = vld [vmem:[#allocation6 + $0x1c8] ss:$16 sps:$4 sm:$0xff]   ;;  %v15435_v57 = vld [vmem:[#allocation6 + $0x1e4] ss:$16 sps:$4 sm:$0xff]  }
 0x5d4   : > { %6774 = vmatprep.subr.bf16.mxu0 %v15363_v28  ;;  %6817 = vmatprep.subr.bf16.mxu1 %v15366_v30  ;;  %v15438_v28 = vld [vmem:[#allocation6 + $0x1ec] ss:$16 sps:$4 sm:$0xff]   ;;  %v15433_v30 = vld [vmem:[#allocation6 + $0x1e0] ss:$16 sps:$4 sm:$0xff]  }
 0x5d7   : > { %6775 = vmatpush1.bf16.msra.mxu0 %v15361_v32  ;;  %6818 = vmatpush1.bf16.msra.mxu1 %v15364_v46  ;;  %v15436_v32 = vld [vmem:[#allocation6 + $0x1e8] ss:$16 sps:$4 sm:$0xff]   ;;  %v15441_v46 = vld [vmem:[%s20622_s6 + $0x4] ss:$16 sps:$4 sm:$0xff]  }
 0x5d8   : > { %6776 = vmatprep.subr.bf16.mxu0 %v15369_v33  ;;  %6819 = vmatprep.subr.bf16.mxu1 %v15372_v53  ;;  %v15444_v33 = vld [vmem:[%s20622_s6 + $0xc] ss:$16 sps:$4 sm:$0xff]   ;;  %v4996_v53 = vld [vmem:[%s20670_s24] sm:$0xf] }
 0x5db   : > { %6777 = vmatpush1.bf16.msra.mxu0 %v15367_v35  ;;  %6820 = vmatpush1.bf16.msra.mxu1 %v15370_v36  ;;  %v5001_v35 = vrot.slane %v4996_v53, %v17944_v6  ;;  %v5005_v36 = vrot.slane %v4996_v53, %v17946_v7 }
 0x5dc   : > { %6778 = vmatprep.subr.bf16.mxu0 %v15375_v37  ;;  %6821 = vmatprep.subr.bf16.mxu1 %v15378_v38 }
 0x5df   : > { %6779 = vmatpush1.bf16.msra.mxu0 %v15373_v60  ;;  %6822 = vmatpush1.bf16.msra.mxu1 %v15376_v39 }
 0x5e0   : > { %6780 = vmatprep.subr.bf16.mxu0 %v15381_v40  ;;  %6823 = vmatprep.subr.bf16.mxu1 %v15384_v41 }
 0x5e3   : > { %6781 = vmatpush1.bf16.msra.mxu0 %v15379_v43  ;;  %6824 = vmatpush1.bf16.msra.mxu1 %v15382_v44 }
 0x5e4   : > { %6782 = vmatprep.subr.bf16.mxu0 %v15387_v45  ;;  %6825 = vmatprep.subr.bf16.mxu1 %v15390_v15 }
 0x5e7   : > { %6783 = vmatpush1.bf16.msra.mxu0 %v15385_v47  ;;  %6826 = vmatpush1.bf16.msra.mxu1 %v15388_v58 }
 0x5e8   : > { %6784 = vmatprep.subr.bf16.mxu0 %v15393_v48  ;;  %6827 = vmatprep.subr.bf16.mxu1 %v15396_v50  ;;  %v5009_v48 = vrot.slane %v4996_v53, %v17954_v11 }
 0x5eb   : > { %6785 = vmatpush1.bf16.msra.mxu0 %v15391_v51  ;;  %6828 = vmatpush1.bf16.msra.mxu1 %v15394_v52 }
 0x5ec   : > { %6786 = vmatprep.subr.bf16.mxu0 %v15399_v26  ;;  %6829 = vmatprep.subr.bf16.mxu1 %v15402_v55  ;;  %v5013_v55 = vrot.slane %v4996_v53, %v17958_v20 }
 0x5ef   : > { %6787 = vmatpush1.bf16.msra.mxu0 %v15397_v56  ;;  %6830 = vmatpush1.bf16.msra.mxu1 %v15400_v59 }
 0x5f0   : > { %6788 = vmatprep.subr.bf16.mxu0 %v15405_v16  ;;  %6831 = vmatprep.subr.bf16.mxu1 %v15408_v62 }
 0x5f3   : > { %6789 = vmatpush1.bf16.msra.mxu0 %v15403_v63  ;;  %6832 = vmatpush1.bf16.msra.mxu1 %v15406_v21 }
 0x5f4   : > { %6790 = vmatprep.subr.bf16.mxu0 %v15411_v1  ;;  %6833 = vmatprep.subr.bf16.mxu1 %v15414_v3 }
 0x5f7   : > { %6791 = vmatpush1.bf16.msra.mxu0 %v15409_v4  ;;  %6834 = vmatpush1.bf16.msra.mxu1 %v15412_v5 }
 0x5f8   : > { %6792 = vmatprep.subr.bf16.mxu0 %v15417_v10  ;;  %6835 = vmatprep.subr.bf16.mxu1 %v15420_v12 }
 0x5fb   : > { %6793 = vmatpush1.bf16.msra.mxu0 %v15415_v13  ;;  %6836 = vmatpush1.bf16.msra.mxu1 %v15418_v31 }
 0x5fc   : > { %6794 = vmatprep.subr.bf16.mxu0 %v15423_v49  ;;  %6837 = vmatprep.subr.bf16.mxu1 %v15426_v14 }
 0x5ff   : > { %6795 = vmatpush1.bf16.msra.mxu0 %v15421_v17  ;;  %6838 = vmatpush1.bf16.msra.mxu1 %v15424_v22 }
 0x600   : > { %6796 = vmatprep.subr.bf16.mxu0 %v15429_v23  ;;  %6839 = vmatprep.subr.bf16.mxu1 %v15432_v25 }
 0x603   : > { %6797 = vmatpush1.bf16.msra.mxu0 %v15427_v42  ;;  %6840 = vmatpush1.bf16.msra.mxu1 %v15430_v27 }
 0x604   : > { %6798 = vmatprep.subr.bf16.mxu0 %v15435_v57  ;;  %6841 = vmatprep.subr.bf16.mxu1 %v15438_v28 }
 0x607   : > { %6799 = vmatpush1.bf16.msra.mxu0 %v15433_v30  ;;  %6842 = vmatpush1.bf16.msra.mxu1 %v15436_v32 }
 0x608   : > { %7311 = vmatprep.subr.bf16.mxu0 %v15441_v46  ;;  %7354 = vmatprep.subr.bf16.mxu1 %v15444_v33 }
 0x63d   : > { %v5372_v37 = vpop.f32.mrb[52].mxu0  ;;  %v5415_v38 = vpop.f32.mrb[52].mxu1 }
 0x63e   : > { %v5373_v60 = vadd.f32 %v5372_v37, %v5001_v35  ;;  %v5374_v39 = vpop.f32.mrb[53].mxu0  ;;  %v5417_v40 = vpop.f32.mrb[53].mxu1  ;;  %v5416_v56 = vadd.f32 %v5415_v38, %v5009_v48 }
 0x63f   : > { %v5375_v41 = vadd.f32 %v5374_v39, %v5005_v36  ;;  %v5376_v43 = vpop.f32.mrb[54].mxu0  ;;  %v5419_v44 = vpop.f32.mrb[54].mxu1  ;;  %v5418_v16 = vadd.f32 %v5417_v40, %v5013_v55 }
 0x640   : > { %v13348_v45 = vmul.f32 -1.442695, %v5373_v60  ;;  %v5377_v15 = vadd.f32 %v5376_v43, %v5001_v35  ;;  %v5378_v47 = vpop.f32.mrb[55].mxu0  ;;  %v5421_v58 = vpop.f32.mrb[55].mxu1  ;;  %v5420_v59 = vadd.f32 %v5419_v44, %v5009_v48  ;;  %v13350_v62 = vmul.f32 -1.442695, %v5416_v56 }
 0x641   : > { %v13349_v50 = vmul.f32 -1.442695, %v5375_v41  ;;  %v5379_v51 = vadd.f32 %v5378_v47, %v5005_v36  ;;  %v5422_v1 = vadd.f32 %v5421_v58, %v5013_v55 }
 0x642   : > { %16639 = vpow2.f32 %v13348_v45  ;;  %v13351_v52 = vmul.f32 -1.442695, %v5377_v15  ;;  %v13353_v63 = vmul.f32 -1.442695, %v5420_v59 }
 0x643   : > { %v13352_v26 = vmul.f32 -1.442695, %v5379_v51  ;;  %16641 = vpow2.f32 %v13349_v50 }
 0x644   : > { %16643 = vpow2.f32 %v13351_v52 }
 0x645   : > { %16645 = vpow2.f32 %v13352_v26 }
 0x646   : > { %16647 = vtanh.f32 %v5418_v16 }
 0x647   : > { %16649 = vpow2.f32 %v13350_v62 }
 0x648   : > { %16651 = vpow2.f32 %v13353_v63 }
 0x64c   : > { %v16640_v21 = vpop.eup %16639 }
 0x64d   : > { %v5442_v3 = vadd.f32 1.0, %v16640_v21  ;;  %v16642_v4 = vpop.eup %16641 }
 0x64e   : > { %v16644_v5 = vpop.eup %16643  ;;  %v5443_v10 = vadd.f32 1.0, %v16642_v4 }
 0x64f   : > { %16653 = vrcp.f32 %v5442_v3  ;;  %v5445_v12 = vadd.f32 1.0, %v16644_v5  ;;  %v16646_v13 = vpop.eup %16645 }
 0x650   : > { %16655 = vtanh.f32 %v5422_v1  ;;  %v5446_v31 = vadd.f32 1.0, %v16646_v13  ;;  %v16648_v49 = vpop.eup %16647 }
 0x651   : > { %16657 = vrcp.f32 %v5443_v10  ;;  %v16650_v14 = vpop.eup %16649 }
 0x652   : > { %16659 = vrcp.f32 %v5445_v12  ;;  %v16652_v17 = vpop.eup %16651  ;;  %v5444_v57 = vadd.f32 1.0, %v16650_v14 }
 0x653   : > { %16661 = vrcp.f32 %v5446_v31  ;;  %v5447_v33 = vadd.f32 1.0, %v16652_v17 }
 0x654   : > { %16663 = vrcp.f32 %v5444_v57 }
 0x659   : > { %v16654_v22 = vpop.eup %16653 }
 0x65a   : > { %v16656_v23 = vpop.eup %16655  ;;  %v5464_v25 = vmul.f32 %v16654_v22, %v16648_v49 }
 0x65b   : > { %v16658_v42 = vpop.eup %16657 }
 0x65c   : > { %v16660_v27 = vpop.eup %16659  ;;  %v5462_v28 = vmul.f32 %v16658_v42, %v18779_v18 }
 0x65d   : > { %v5465_v30 = vmul.f32 %v16660_v27, %v16656_v23  ;;  %v16662_v32 = vpop.eup %16661 }
 0x65e   : > { %v19121_v46 = vadd.f32 %v5464_v25, %v5462_v28  ;;  %v5463_v53 = vmul.f32 %v16662_v32, %v18783_v54  ;;  %v16664_v36 = vpop.eup %16663  ;;  %v5539_v54 = vld [vmem:[%s20669_s14] sm:$0xf] }
 0x65f   : > { %v5544_v41 = vrot.slane %v5539_v54, %v17944_v6  ;;  %v5548_v43 = vrot.slane %v5539_v54, %v17946_v7  ;;  %v5552_v59 = vrot.slane %v5539_v54, %v17954_v11  ;;  %v5556_v1 = vrot.slane %v5539_v54, %v17958_v20 }
 0x660   : > { %16665 = vtanh.f32 %v19121_v46  ;;  %v19125_v35 = vadd.f32 %v5465_v30, %v5463_v53 }
 0x661   : > { %16667 = vrcp.f32 %v5447_v33 }
 0x662   : > { %16669 = vtanh.f32 %v19125_v35 }
 0x66a   : > { %v16666_v37 = vpop.eup %16665 }
 0x66b   : > { %v16668_v38 = vpop.eup %16667  ;;  %v5470_v18 = vmul.f32 %v16666_v37, %v16664_v36 }
 0x66c   : > { %v16670_v60 = vpop.eup %16669 }
 0x66d   : > { %v5471_v39 = vmul.f32 %v16670_v60, %v16668_v38 }
 0x66f   : > { %v5472_v40 = vpack.c.bf16 %v5471_v39, %v5470_v18 }
 0x671   : > { %5474 = vst [vmem:[#allocation3 + $0x10] sm:$0xff] %v5472_v40  ;;  %6800 = vmatprep.mubr.bf16.mxu0 %v5472_v40  ;;  %6843 = vmatprep.mubr.bf16.mxu1 %v5472_v40 }
 0x67d   : > { %v5915_v44 = vpop.f32.mrb[56].mxu0  ;;  %v5958_v45 = vpop.f32.mrb[56].mxu1 }
 0x67e   : > { %v5916_v15 = vadd.f32 %v5915_v44, %v5544_v41  ;;  %v5917_v47 = vpop.f32.mrb[57].mxu0  ;;  %v5960_v58 = vpop.f32.mrb[57].mxu1  ;;  %v5959_v3 = vadd.f32 %v5958_v45, %v5552_v59 }
 0x67f   : > { %v5918_v48 = vadd.f32 %v5917_v47, %v5548_v43  ;;  %v5919_v50 = vpop.f32.mrb[58].mxu0  ;;  %v5962_v51 = vpop.f32.mrb[58].mxu1  ;;  %v5961_v5 = vadd.f32 %v5960_v58, %v5556_v1 }
 0x680   : > { %v13418_v52 = vmul.f32 -1.442695, %v5916_v15  ;;  %v5920_v26 = vadd.f32 %v5919_v50, %v5544_v41  ;;  %v5921_v55 = vpop.f32.mrb[59].mxu0  ;;  %v5964_v56 = vpop.f32.mrb[59].mxu1  ;;  %v5963_v4 = vadd.f32 %v5962_v51, %v5552_v59  ;;  %v13420_v10 = vmul.f32 -1.442695, %v5959_v3 }
 0x681   : > { %v13419_v16 = vmul.f32 -1.442695, %v5918_v48  ;;  %v5922_v62 = vadd.f32 %v5921_v55, %v5548_v43  ;;  %v5965_v31 = vadd.f32 %v5964_v56, %v5556_v1 }
 0x682   : > { %16671 = vpow2.f32 %v13418_v52  ;;  %v13421_v63 = vmul.f32 -1.442695, %v5920_v26  ;;  %v13423_v12 = vmul.f32 -1.442695, %v5963_v4 }
 0x683   : > { %v13422_v21 = vmul.f32 -1.442695, %v5922_v62  ;;  %16673 = vpow2.f32 %v13419_v16 }
 0x684   : > { %16675 = vpow2.f32 %v13421_v63 }
 0x685   : > { %16677 = vpow2.f32 %v13422_v21 }
 0x686   : > { %16679 = vtanh.f32 %v5961_v5 }
 0x687   : > { %16681 = vpow2.f32 %v13420_v10 }
 0x688   : > { %16683 = vpow2.f32 %v13423_v12 }
 0x68c   : > { %v16672_v13 = vpop.eup %16671 }
 0x68d   : > { %v5985_v49 = vadd.f32 1.0, %v16672_v13  ;;  %v16674_v14 = vpop.eup %16673 }
 0x68e   : > { %v16676_v17 = vpop.eup %16675  ;;  %v5986_v22 = vadd.f32 1.0, %v16674_v14 }
 0x68f   : > { %16685 = vrcp.f32 %v5985_v49  ;;  %v5988_v23 = vadd.f32 1.0, %v16676_v17  ;;  %v16678_v25 = vpop.eup %16677 }
 0x690   : > { %16687 = vtanh.f32 %v5965_v31  ;;  %v5989_v42 = vadd.f32 1.0, %v16678_v25  ;;  %v16680_v27 = vpop.eup %16679 }
 0x691   : > { %16689 = vrcp.f32 %v5986_v22  ;;  %v16682_v57 = vpop.eup %16681  ;;  %v15439_v22 = vld [vmem:[%s20622_s6] ss:$16 sps:$4 sm:$0xff]  }
 0x692   : > { %16691 = vrcp.f32 %v5988_v23  ;;  %v16684_v28 = vpop.eup %16683  ;;  %v5987_v36 = vadd.f32 1.0, %v16682_v57  ;;  %v15442_v23 = vld [vmem:[%s20622_s6 + $0x8] ss:$16 sps:$4 sm:$0xff]  }
 0x693   : > { %16693 = vrcp.f32 %v5989_v42  ;;  %v5990_v60 = vadd.f32 1.0, %v16684_v28  ;;  %v15447_v28 = vld [vmem:[%s20622_s6 + $0x24] ss:$16 sps:$4 sm:$0xff]  }
 0x694   : > { %16695 = vrcp.f32 %v5987_v36  ;;  %v15448_v36 = vld [vmem:[%s20622_s6 + $0x28] ss:$16 sps:$4 sm:$0xff]  }
 0x695   : > { %16697 = vrcp.f32 %v5990_v60 }
 0x699   : > { %v16686_v30 = vpop.eup %16685 }
 0x69a   : > { %v16688_v32 = vpop.eup %16687  ;;  %v6007_v33 = vmul.f32 %v16686_v30, %v16680_v27  ;;  %v15450_v30 = vld [vmem:[%s20622_s6 + $0x2c] ss:$16 sps:$4 sm:$0xff]  }
 0x69b   : > { %v16690_v53 = vpop.eup %16689 }
 0x69c   : > { %v16692_v37 = vpop.eup %16691  ;;  %v6005_v38 = vmul.f32 %v16690_v53, %v18794_v0  ;;  %v15445_v53 = vld [vmem:[%s20622_s6 + $0x20] ss:$16 sps:$4 sm:$0xff]  }
 0x69d   : > { %v6008_v18 = vmul.f32 %v16692_v37, %v16688_v32  ;;  %v6252_v39 = vpop.f32.mrb[16].mxu0  ;;  %v6295_v40 = vpop.f32.mrb[16].mxu1  ;;  %v15453_v37 = vld [vmem:[%s20622_s6 + $0x44] ss:$16 sps:$4 sm:$0xff]  }
 0x69e   : > { %v16694_v54 = vpop.eup %16693  ;;  %v19136_v41 = vadd.f32 %v6007_v33, %v6005_v38  ;;  %v14253_v43 = vadd.f32 %v6252_v39, %v17949_v8  ;;  %v6254_v44 = vpop.f32.mrb[17].mxu0  ;;  %v14285_v16 = vadd.f32 %v6295_v40, %v17962_v24  ;;  %v15456_v38 = vld [vmem:[%s20622_s6 + $0x4c] ss:$16 sps:$4 sm:$0xff]   ;;  %v15454_v39 = vld [vmem:[%s20622_s6 + $0x48] ss:$16 sps:$4 sm:$0xff]  }
 0x69f   : > { %v6297_v45 = vpop.f32.mrb[17].mxu1  ;;  %v6006_v15 = vmul.f32 %v16694_v54, %v18801_v19  ;;  %v14254_v47 = vadd.f32 %v6254_v44, %v17952_v9  ;;  %v6256_v58 = vpop.f32.mrb[18].mxu0  ;;  %v15459_v54 = vld [vmem:[%s20622_s6 + $0x64] ss:$16 sps:$4 sm:$0xff]  }
 0x6a0   : > { %v6299_v48 = vpop.f32.mrb[18].mxu1  ;;  %v13456_v0 = vmul.f32 -1.442695, %v14253_v43  ;;  %v14255_v50 = vadd.f32 %v6256_v58, %v17949_v8  ;;  %v6258_v51 = vpop.f32.mrb[19].mxu0  ;;  %16699 = vtanh.f32 %v19136_v41  ;;  %v14286_v21 = vadd.f32 %v6297_v45, %v17966_v29  ;;  %v15462_v43 = vld [vmem:[%s20622_s6 + $0x6c] ss:$16 sps:$4 sm:$0xff]  }
 0x6a1   : > { %v6301_v52 = vpop.f32.mrb[19].mxu1  ;;  %v19143_v26 = vadd.f32 %v6008_v18, %v6006_v15  ;;  %v13457_v55 = vmul.f32 -1.442695, %v14254_v47  ;;  %v14256_v59 = vadd.f32 %v6258_v51, %v17952_v9  ;;  %v14287_v62 = vadd.f32 %v6299_v48, %v17962_v24  ;;  %v16696_v63 = vpop.eup %16695  ;;  %v15451_v18 = vld [vmem:[%s20622_s6 + $0x40] ss:$16 sps:$4 sm:$0xff]  }
 0x6a2   : > { %16701 = vpow2.f32 %v13456_v0  ;;  %v13459_v56 = vmul.f32 -1.442695, %v14255_v50  ;;  %v16698_v1 = vpop.eup %16697  ;;  %v13458_v3 = vmul.f32 -1.442695, %v14285_v16  ;;  %v14288_v31 = vadd.f32 %v6301_v52, %v17966_v29  ;;  %v15457_v58 = vld [vmem:[%s20622_s6 + $0x60] ss:$16 sps:$4 sm:$0xff]  }
 0x6a3   : > { %16703 = vtanh.f32 %v19143_v26  ;;  %v13460_v19 = vmul.f32 -1.442695, %v14256_v59  ;;  %v13461_v10 = vmul.f32 -1.442695, %v14287_v62  ;;  %v15460_v48 = vld [vmem:[%s20622_s6 + $0x68] ss:$16 sps:$4 sm:$0xff]  }
 0x6a4   : > { %16705 = vpow2.f32 %v13457_v55  ;;  %v15465_v50 = vld [vmem:[%s20622_s6 + $0x84] ss:$16 sps:$4 sm:$0xff]   ;;  %v15468_v51 = vld [vmem:[%s20622_s6 + $0x8c] ss:$16 sps:$4 sm:$0xff]  }
 0x6a5   : > { %16707 = vpow2.f32 %v13459_v56 }
 0x6a6   : > { %16709 = vpow2.f32 %v13460_v19 }
 0x6a7   : > { %16711 = vtanh.f32 %v14286_v21  ;;  %v15466_v21 = vld [vmem:[%s20622_s6 + $0x88] ss:$16 sps:$4 sm:$0xff]  }
 0x6a8   : > { %16713 = vpow2.f32 %v13458_v3  ;;  %v15474_v3 = vld [vmem:[%s20622_s6 + $0xac] ss:$16 sps:$4 sm:$0xff]  }
 0x6aa   : > { %v16700_v4 = vpop.eup %16699 }
 0x6ab   : > { %v6013_v49 = vmul.f32 %v16700_v4, %v16696_v63  ;;  %v15463_v63 = vld [vmem:[%s20622_s6 + $0x80] ss:$16 sps:$4 sm:$0xff]  }
 0x6ac   : > { %v16702_v5 = vpop.eup %16701 }
 0x6ad   : > { %v16704_v12 = vpop.eup %16703  ;;  %v6330_v13 = vadd.f32 1.0, %v16702_v5  ;;  %v15472_v5 = vld [vmem:[%s20622_s6 + $0xa8] ss:$16 sps:$4 sm:$0xff]  }
 0x6ae   : > { %v6014_v14 = vmul.f32 %v16704_v12, %v16698_v1  ;;  %v16706_v17 = vpop.eup %16705  ;;  %v15480_v12 = vld [vmem:[%s20622_s6 + $0xcc] ss:$16 sps:$4 sm:$0xff]  }
 0x6af   : > { %16715 = vrcp.f32 %v6330_v13  ;;  %v16708_v25 = vpop.eup %16707  ;;  %v6331_v42 = vadd.f32 1.0, %v16706_v17  ;;  %v15475_v13 = vld [vmem:[%s20622_s6 + $0xc0] ss:$16 sps:$4 sm:$0xff]  }
 0x6b0   : > { %16717 = vpow2.f32 %v13461_v10  ;;  %v6361_v27 = vpack.c.bf16 %v6014_v14, %v6013_v49  ;;  %v6333_v57 = vadd.f32 1.0, %v16708_v25  ;;  %v16710_v32 = vpop.eup %16709  ;;  %v15477_v10 = vld [vmem:[%s20622_s6 + $0xc4] ss:$16 sps:$4 sm:$0xff]   ;;  %v15486_v14 = vld [vmem:[%s20622_s6 + $0xec] ss:$16 sps:$4 sm:$0xff]  }
 0x6b1   : > { %16719 = vtanh.f32 %v14288_v31  ;;  %v6334_v33 = vadd.f32 1.0, %v16710_v32  ;;  %v16712_v60 = vpop.eup %16711  ;;  %v15478_v31 = vld [vmem:[%s20622_s6 + $0xc8] ss:$16 sps:$4 sm:$0xff]   ;;  %v15483_v49 = vld [vmem:[%s20622_s6 + $0xe4] ss:$16 sps:$4 sm:$0xff]  }
 0x6b2   : > { %16721 = vrcp.f32 %v6331_v42  ;;  %6801 = vmatmul.mubr.bf16.vlgmr.msra.gmra.mrb[60].mxu0 %v6361_v27  ;;  %6844 = vmatmul.mubr.bf16.vlgmr.msra.gmra.mrb[60].mxu1 %v6361_v27  ;;  %v16714_v40 = vpop.eup %16713  ;;  %v15489_v42 = vld [vmem:[%s20622_s6 + $0x104] ss:$16 sps:$4 sm:$0xff]   ;;  %v15490_v32 = vld [vmem:[%s20622_s6 + $0x108] ss:$16 sps:$4 sm:$0xff]  }
 0x6b3   : > { %16723 = vrcp.f32 %v6333_v57  ;;  %7312 = vmatpush1.bf16.msra.mxu0 %v15439_v22  ;;  %7355 = vmatpush1.bf16.msra.mxu1 %v15442_v23  ;;  %v6332_v55 = vadd.f32 1.0, %v16714_v40  ;;  %v15481_v22 = vld [vmem:[%s20622_s6 + $0xe0] ss:$16 sps:$4 sm:$0xff]   ;;  %v15484_v23 = vld [vmem:[%s20622_s6 + $0xe8] ss:$16 sps:$4 sm:$0xff]  }
 0x6b4   : > { %7343 = vmatprep.mubr.bf16.mxu0 %v6361_v27  ;;  %7386 = vmatprep.mubr.bf16.mxu1 %v6361_v27  ;;  %16725 = vrcp.f32 %v6334_v33  ;;  %v15492_v27 = vld [vmem:[%s20622_s6 + $0x10c] ss:$16 sps:$4 sm:$0xff]  }
 0x6b5   : > { %7313 = vmatprep.subr.bf16.mxu0 %v15447_v28  ;;  %7356 = vmatprep.subr.bf16.mxu1 %v15450_v30  ;;  %16727 = vrcp.f32 %v6332_v55  ;;  %v15487_v30 = vld [vmem:[%s20622_s6 + $0x100] ss:$16 sps:$4 sm:$0xff]   ;;  %v15504_v40 = vld [vmem:[%s20622_s6 + $0x14c] ss:$16 sps:$4 sm:$0xff]  }
 0x6b6   : > { %v15517_v55 = vld [vmem:[%s20622_s6 + $0x1a0] ss:$16 sps:$4 sm:$0xff]  }
 0x6b7   : > { %7314 = vmatpush1.bf16.msra.mxu0 %v15445_v53  ;;  %7357 = vmatpush1.bf16.msra.mxu1 %v15448_v36  ;;  %v15495_v36 = vld [vmem:[%s20622_s6 + $0x124] ss:$16 sps:$4 sm:$0xff]  }
 0x6b8   : > { %7315 = vmatprep.subr.bf16.mxu0 %v15453_v37  ;;  %7358 = vmatprep.subr.bf16.mxu1 %v15456_v38  ;;  %v15498_v37 = vld [vmem:[%s20622_s6 + $0x12c] ss:$16 sps:$4 sm:$0xff]  }
 0x6b9   : > { %v16716_v44 = vpop.eup %16715 }
 0x6ba   : > { %v16718_v45 = vpop.eup %16717  ;;  %v6352_v15 = vmul.f32 %v16716_v44, %v16712_v60  ;;  %v15493_v60 = vld [vmem:[%s20622_s6 + $0x120] ss:$16 sps:$4 sm:$0xff]   ;;  %v15507_v44 = vld [vmem:[%s20622_s6 + $0x164] ss:$16 sps:$4 sm:$0xff]  }
 0x6bb   : > { %v16720_v47 = vpop.eup %16719  ;;  %7316 = vmatpush1.bf16.msra.mxu0 %v15451_v18  ;;  %7359 = vmatpush1.bf16.msra.mxu1 %v15454_v39  ;;  %v6335_v62 = vadd.f32 1.0, %v16718_v45  ;;  %v15496_v18 = vld [vmem:[%s20622_s6 + $0x128] ss:$16 sps:$4 sm:$0xff]   ;;  %v15501_v39 = vld [vmem:[%s20622_s6 + $0x144] ss:$16 sps:$4 sm:$0xff]  }
 0x6bc   : > { %v16722_v0 = vpop.eup %16721  ;;  %7317 = vmatprep.subr.bf16.mxu0 %v15459_v54  ;;  %7360 = vmatprep.subr.bf16.mxu1 %v15462_v43  ;;  %v15499_v54 = vld [vmem:[%s20622_s6 + $0x140] ss:$16 sps:$4 sm:$0xff]   ;;  %v15502_v43 = vld [vmem:[%s20622_s6 + $0x148] ss:$16 sps:$4 sm:$0xff]   ;;  %v15510_v45 = vld [vmem:[%s20622_s6 + $0x16c] ss:$16 sps:$4 sm:$0xff]  }
 0x6bd   : > { %v16724_v52 = vpop.eup %16723  ;;  %v6350_v56 = vmul.f32 %v16722_v0, %v18858_v61  ;;  %v15471_v61 = vld [vmem:[%s20622_s6 + $0xa4] ss:$16 sps:$4 sm:$0xff]   ;;  %v15511_v0 = vld [vmem:[%s20622_s6 + $0x180] ss:$16 sps:$4 sm:$0xff]  }
 0x6be   : > { %v6353_v59 = vmul.f32 %v16724_v52, %v16720_v47  ;;  %v16726_v19 = vpop.eup %16725  ;;  %v15508_v47 = vld [vmem:[%s20622_s6 + $0x168] ss:$16 sps:$4 sm:$0xff]   ;;  %v15522_v52 = vld [vmem:[%s20622_s6 + $0x1ac] ss:$16 sps:$4 sm:$0xff]  }
 0x6bf   : > { %v19200_v16 = vadd.f32 %v6352_v15, %v6350_v56  ;;  %7318 = vmatpush1.bf16.msra.mxu0 %v15457_v58  ;;  %7361 = vmatpush1.bf16.msra.mxu1 %v15460_v48  ;;  %v6351_v1 = vmul.f32 %v16726_v19, %v18874_v34  ;;  %v15469_v34 = vld [vmem:[%s20622_s6 + $0xa0] ss:$16 sps:$4 sm:$0xff]   ;;  %v16728_v17 = vpop.eup %16727  ;;  %v15513_v58 = vld [vmem:[%s20622_s6 + $0x184] ss:$16 sps:$4 sm:$0xff]   ;;  %v15516_v48 = vld [vmem:[%s20622_s6 + $0x18c] ss:$16 sps:$4 sm:$0xff]  }
 0x6c0   : > { %7319 = vmatprep.subr.bf16.mxu0 %v15465_v50  ;;  %7362 = vmatprep.subr.bf16.mxu1 %v15468_v51  ;;  %v15505_v15 = vld [vmem:[%s20622_s6 + $0x160] ss:$16 sps:$4 sm:$0xff]   ;;  %v15514_v50 = vld [vmem:[%s20622_s6 + $0x188] ss:$16 sps:$4 sm:$0xff]   ;;  %v15519_v51 = vld [vmem:[%s20622_s6 + $0x1a4] ss:$16 sps:$4 sm:$0xff]  }
 0x6c1   : > { %16729 = vtanh.f32 %v19200_v16  ;;  %v19216_v4 = vadd.f32 %v6353_v59, %v6351_v1  ;;  %v15520_v56 = vld [vmem:[%s20622_s6 + $0x1a8] ss:$16 sps:$4 sm:$0xff]   ;;  %v15525_v59 = vld [vmem:[%s20622_s6 + $0x1c4] ss:$16 sps:$4 sm:$0xff]   ;;  %v15528_v19 = vld [vmem:[%s20622_s6 + $0x1cc] ss:$16 sps:$4 sm:$0xff]  }
 0x6c2   : > { %16731 = vrcp.f32 %v6335_v62  ;;  %v15523_v62 = vld [vmem:[%s20622_s6 + $0x1c0] ss:$16 sps:$4 sm:$0xff]   ;;  %v15534_v1 = vld [vmem:[%s20622_s6 + $0x1ec] ss:$16 sps:$4 sm:$0xff]  }
 0x6c3   : > { %7320 = vmatpush1.bf16.msra.mxu0 %v15463_v63  ;;  %7363 = vmatpush1.bf16.msra.mxu1 %v15466_v21  ;;  %16733 = vtanh.f32 %v19216_v4  ;;  %v15526_v63 = vld [vmem:[%s20622_s6 + $0x1c8] ss:$16 sps:$4 sm:$0xff]   ;;  %v15531_v21 = vld [vmem:[%s20622_s6 + $0x1e4] ss:$16 sps:$4 sm:$0xff]  }
 0x6c4   : > { %7321 = vmatprep.subr.bf16.mxu0 %v15471_v61  ;;  %7364 = vmatprep.subr.bf16.mxu1 %v15474_v3  ;;  %v15529_v61 = vld [vmem:[%s20622_s6 + $0x1e0] ss:$16 sps:$4 sm:$0xff]   ;;  %v15532_v3 = vld [vmem:[%s20622_s6 + $0x1e8] ss:$16 sps:$4 sm:$0xff]  }
 0x6c7   : > { %7322 = vmatpush1.bf16.msra.mxu0 %v15469_v34  ;;  %7365 = vmatpush1.bf16.msra.mxu1 %v15472_v5  ;;  %v15537_v34 = vld [vmem:[%s20620_s4 + $0x4] ss:$16 sps:$4 sm:$0xff]   ;;  %v15540_v5 = vld [vmem:[%s20620_s4 + $0xc] ss:$16 sps:$4 sm:$0xff]  }
 0x6c8   : > { %7323 = vmatprep.subr.bf16.mxu0 %v15477_v10  ;;  %7366 = vmatprep.subr.bf16.mxu1 %v15480_v12  ;;  %v15535_v10 = vld [vmem:[%s20620_s4] ss:$16 sps:$4 sm:$0xff]   ;;  %v15538_v12 = vld [vmem:[%s20620_s4 + $0x8] ss:$16 sps:$4 sm:$0xff]  }
 0x6cb   : > { %7324 = vmatpush1.bf16.msra.mxu0 %v15475_v13  ;;  %7367 = vmatpush1.bf16.msra.mxu1 %v15478_v31  ;;  %v16730_v25 = vpop.eup %16729  ;;  %v15543_v13 = vld [vmem:[%s20620_s4 + $0x24] ss:$16 sps:$4 sm:$0xff]   ;;  %v15546_v31 = vld [vmem:[%s20620_s4 + $0x2c] ss:$16 sps:$4 sm:$0xff]  }
 0x6cc   : > { %7325 = vmatprep.subr.bf16.mxu0 %v15483_v49  ;;  %7368 = vmatprep.subr.bf16.mxu1 %v15486_v14  ;;  %v16732_v57 = vpop.eup %16731  ;;  %v6358_v33 = vmul.f32 %v16730_v25, %v16728_v17  ;;  %v15541_v49 = vld [vmem:[%s20620_s4 + $0x20] ss:$16 sps:$4 sm:$0xff]   ;;  %v15544_v14 = vld [vmem:[%s20620_s4 + $0x28] ss:$16 sps:$4 sm:$0xff]   ;;  %v15549_v17 = vld [vmem:[%s20620_s4 + $0x44] ss:$16 sps:$4 sm:$0xff]  }
 0x6cd   : > { %v16734_v28 = vpop.eup %16733  ;;  %v15550_v25 = vld [vmem:[%s20620_s4 + $0x48] ss:$16 sps:$4 sm:$0xff]  }
 0x6ce   : > { %v6359_v53 = vmul.f32 %v16734_v28, %v16732_v57  ;;  %v15553_v57 = vld [vmem:[%s20620_s4 + $0x60] ss:$16 sps:$4 sm:$0xff]   ;;  %v15556_v28 = vld [vmem:[%s20620_s4 + $0x68] ss:$16 sps:$4 sm:$0xff]  }
 0x6cf   : > { %7326 = vmatpush1.bf16.msra.mxu0 %v15481_v22  ;;  %7369 = vmatpush1.bf16.msra.mxu1 %v15484_v23  ;;  %v15552_v22 = vld [vmem:[%s20620_s4 + $0x4c] ss:$16 sps:$4 sm:$0xff]   ;;  %v15547_v23 = vld [vmem:[%s20620_s4 + $0x40] ss:$16 sps:$4 sm:$0xff]  }
 0x6d0   : > { %7327 = vmatprep.subr.bf16.mxu0 %v15489_v42  ;;  %7370 = vmatprep.subr.bf16.mxu1 %v15492_v27  ;;  %v19267_v38 = vpack.c.bf16 %v6359_v53, %v6358_v33  ;;  %v15555_v42 = vld [vmem:[%s20620_s4 + $0x64] ss:$16 sps:$4 sm:$0xff]   ;;  %v15558_v27 = vld [vmem:[%s20620_s4 + $0x6c] ss:$16 sps:$4 sm:$0xff]   ;;  %v15559_v33 = vld [vmem:[%s20620_s4 + $0x80] ss:$16 sps:$4 sm:$0xff]  }
 0x6d1   : > { %v15562_v53 = vld [vmem:[%s20620_s4 + $0x88] ss:$16 sps:$4 sm:$0xff]  }
 0x6d3   : > { %7328 = vmatpush1.bf16.msra.mxu0 %v15487_v30  ;;  %7371 = vmatpush1.bf16.msra.mxu1 %v15490_v32  ;;  %v15561_v30 = vld [vmem:[%s20620_s4 + $0x84] ss:$16 sps:$4 sm:$0xff]   ;;  %v15564_v32 = vld [vmem:[%s20620_s4 + $0x8c] ss:$16 sps:$4 sm:$0xff]  }
 0x6d4   : > { %7329 = vmatprep.subr.bf16.mxu0 %v15495_v36  ;;  %7372 = vmatprep.subr.bf16.mxu1 %v15498_v37  ;;  %v15567_v36 = vld [vmem:[%s20620_s4 + $0xa4] ss:$16 sps:$4 sm:$0xff]   ;;  %v15570_v37 = vld [vmem:[%s20620_s4 + $0xac] ss:$16 sps:$4 sm:$0xff]  }
 0x6d7   : > { %7330 = vmatpush1.bf16.msra.mxu0 %v15493_v60  ;;  %7373 = vmatpush1.bf16.msra.mxu1 %v15496_v18  ;;  %v15565_v60 = vld [vmem:[%s20620_s4 + $0xa0] ss:$16 sps:$4 sm:$0xff]   ;;  %v15568_v18 = vld [vmem:[%s20620_s4 + $0xa8] ss:$16 sps:$4 sm:$0xff]  }
 0x6d8   : > { %7331 = vmatprep.subr.bf16.mxu0 %v15501_v39  ;;  %7374 = vmatprep.subr.bf16.mxu1 %v15504_v40  ;;  %v15573_v39 = vld [vmem:[%s20620_s4 + $0xc4] ss:$16 sps:$4 sm:$0xff]   ;;  %v15576_v40 = vld [vmem:[%s20620_s4 + $0xcc] ss:$16 sps:$4 sm:$0xff]  }
 0x6db   : > { %7332 = vmatpush1.bf16.msra.mxu0 %v15499_v54  ;;  %7375 = vmatpush1.bf16.msra.mxu1 %v15502_v43  ;;  %v15571_v54 = vld [vmem:[%s20620_s4 + $0xc0] ss:$16 sps:$4 sm:$0xff]   ;;  %v15574_v43 = vld [vmem:[%s20620_s4 + $0xc8] ss:$16 sps:$4 sm:$0xff]  }
 0x6dc   : > { %7333 = vmatprep.subr.bf16.mxu0 %v15507_v44  ;;  %7376 = vmatprep.subr.bf16.mxu1 %v15510_v45  ;;  %v15579_v44 = vld [vmem:[%s20620_s4 + $0xe4] ss:$16 sps:$4 sm:$0xff]   ;;  %v15582_v45 = vld [vmem:[%s20620_s4 + $0xec] ss:$16 sps:$4 sm:$0xff]  }
 0x6df   : > { %7334 = vmatpush1.bf16.msra.mxu0 %v15505_v15  ;;  %7377 = vmatpush1.bf16.msra.mxu1 %v15508_v47  ;;  %v15577_v15 = vld [vmem:[%s20620_s4 + $0xe0] ss:$16 sps:$4 sm:$0xff]   ;;  %v15580_v47 = vld [vmem:[%s20620_s4 + $0xe8] ss:$16 sps:$4 sm:$0xff]  }
 0x6e0   : > { %7335 = vmatprep.subr.bf16.mxu0 %v15513_v58  ;;  %7378 = vmatprep.subr.bf16.mxu1 %v15516_v48  ;;  %v15583_v58 = vld [vmem:[#allocation6] ss:$16 sps:$4 sm:$0xff]   ;;  %v15585_v48 = vld [vmem:[#allocation6 + $0x4] ss:$16 sps:$4 sm:$0xff]  }
 0x6e3   : > { %7336 = vmatpush1.bf16.msra.mxu0 %v15511_v0  ;;  %7379 = vmatpush1.bf16.msra.mxu1 %v15514_v50  ;;  %v15586_v0 = vld [vmem:[#allocation6 + $0x8] ss:$16 sps:$4 sm:$0xff]   ;;  %v15588_v50 = vld [vmem:[#allocation6 + $0xc] ss:$16 sps:$4 sm:$0xff]  }
 0x6e4   : > { %7337 = vmatprep.subr.bf16.mxu0 %v15519_v51  ;;  %7380 = vmatprep.subr.bf16.mxu1 %v15522_v52  ;;  %v15589_v51 = vld [vmem:[#allocation6 + $0x20] ss:$16 sps:$4 sm:$0xff]   ;;  %v15591_v52 = vld [vmem:[#allocation6 + $0x24] ss:$16 sps:$4 sm:$0xff]  }
 0x6e7   : > { %7338 = vmatpush1.bf16.msra.mxu0 %v15517_v55  ;;  %7381 = vmatpush1.bf16.msra.mxu1 %v15520_v56  ;;  %v15592_v55 = vld [vmem:[#allocation6 + $0x28] ss:$16 sps:$4 sm:$0xff]   ;;  %v15594_v56 = vld [vmem:[#allocation6 + $0x2c] ss:$16 sps:$4 sm:$0xff]  }
 0x6e8   : > { %7339 = vmatprep.subr.bf16.mxu0 %v15525_v59  ;;  %7382 = vmatprep.subr.bf16.mxu1 %v15528_v19  ;;  %v15597_v59 = vld [vmem:[#allocation6 + $0x44] ss:$16 sps:$4 sm:$0xff]   ;;  %v15600_v19 = vld [vmem:[#allocation6 + $0x4c] ss:$16 sps:$4 sm:$0xff]  }
 0x6eb   : > { %7340 = vmatpush1.bf16.msra.mxu0 %v15523_v62  ;;  %7383 = vmatpush1.bf16.msra.mxu1 %v15526_v63  ;;  %v15595_v62 = vld [vmem:[#allocation6 + $0x40] ss:$16 sps:$4 sm:$0xff]   ;;  %v15603_v63 = vld [vmem:[#allocation6 + $0x64] ss:$16 sps:$4 sm:$0xff]  }
 0x6ec   : > { %7341 = vmatprep.subr.bf16.mxu0 %v15531_v21  ;;  %7384 = vmatprep.subr.bf16.mxu1 %v15534_v1  ;;  %v15606_v21 = vld [vmem:[#allocation6 + $0x6c] ss:$16 sps:$4 sm:$0xff]   ;;  %v15601_v1 = vld [vmem:[#allocation6 + $0x60] ss:$16 sps:$4 sm:$0xff]  }
 0x6ef   : > { %7342 = vmatpush1.bf16.msra.mxu0 %v15529_v61  ;;  %7385 = vmatpush1.bf16.msra.mxu1 %v15532_v3  ;;  %v15604_v61 = vld [vmem:[#allocation6 + $0x68] ss:$16 sps:$4 sm:$0xff]   ;;  %v15609_v3 = vld [vmem:[#allocation6 + $0x84] ss:$16 sps:$4 sm:$0xff]  }
 0x6f0   : > { %7648 = vmatprep.subr.bf16.mxu0 %v15537_v34  ;;  %7691 = vmatprep.subr.bf16.mxu1 %v15540_v5  ;;  %v15612_v34 = vld [vmem:[#allocation6 + $0x8c] ss:$16 sps:$4 sm:$0xff]   ;;  %v15607_v5 = vld [vmem:[#allocation6 + $0x80] ss:$16 sps:$4 sm:$0xff]  }
 0x6f2   : > { %7344 = vmatmul.mubr.bf16.vlgmr.msra.gmra.mrb[64].mxu0 %v19267_v38  ;;  %7387 = vmatmul.mubr.bf16.vlgmr.msra.gmra.mrb[64].mxu1 %v19267_v38 }
 0x6f3   : > { %7649 = vmatpush1.bf16.msra.mxu0 %v15535_v10  ;;  %7692 = vmatpush1.bf16.msra.mxu1 %v15538_v12  ;;  %v15610_v10 = vld [vmem:[#allocation6 + $0x88] ss:$16 sps:$4 sm:$0xff]   ;;  %v15615_v12 = vld [vmem:[#allocation6 + $0xa4] ss:$16 sps:$4 sm:$0xff]  }
 0x6f4   : > { %7650 = vmatprep.subr.bf16.mxu0 %v15543_v13  ;;  %7693 = vmatprep.subr.bf16.mxu1 %v15546_v31  ;;  %v15618_v13 = vld [vmem:[#allocation6 + $0xac] ss:$16 sps:$4 sm:$0xff]   ;;  %v15613_v31 = vld [vmem:[#allocation6 + $0xa0] ss:$16 sps:$4 sm:$0xff]  }
 0x6f5   : > { %7680 = vmatprep.mubr.bf16.mxu0 %v17312_v2  ;;  %7723 = vmatprep.mubr.bf16.mxu1 %v17312_v2 }
 0x6f7   : > { %7651 = vmatpush1.bf16.msra.mxu0 %v15541_v49  ;;  %7694 = vmatpush1.bf16.msra.mxu1 %v15544_v14  ;;  %v15616_v49 = vld [vmem:[#allocation6 + $0xa8] ss:$16 sps:$4 sm:$0xff]   ;;  %v15621_v14 = vld [vmem:[#allocation6 + $0xc4] ss:$16 sps:$4 sm:$0xff]  }
 0x6f8   : > { %7652 = vmatprep.subr.bf16.mxu0 %v15549_v17  ;;  %7695 = vmatprep.subr.bf16.mxu1 %v15552_v22  ;;  %v15624_v17 = vld [vmem:[#allocation6 + $0xcc] ss:$16 sps:$4 sm:$0xff]   ;;  %v15619_v22 = vld [vmem:[#allocation6 + $0xc0] ss:$16 sps:$4 sm:$0xff]  }
 0x6fb   : > { %7653 = vmatpush1.bf16.msra.mxu0 %v15547_v23  ;;  %7696 = vmatpush1.bf16.msra.mxu1 %v15550_v25  ;;  %v15622_v23 = vld [vmem:[#allocation6 + $0xc8] ss:$16 sps:$4 sm:$0xff]   ;;  %v15627_v25 = vld [vmem:[#allocation6 + $0xe4] ss:$16 sps:$4 sm:$0xff]  }
 0x6fc   : > { %7654 = vmatprep.subr.bf16.mxu0 %v15555_v42  ;;  %7697 = vmatprep.subr.bf16.mxu1 %v15558_v27  ;;  %v15630_v42 = vld [vmem:[#allocation6 + $0xec] ss:$16 sps:$4 sm:$0xff]   ;;  %v15625_v27 = vld [vmem:[#allocation6 + $0xe0] ss:$16 sps:$4 sm:$0xff]  }
 0x6ff   : > { %7655 = vmatpush1.bf16.msra.mxu0 %v15553_v57  ;;  %7698 = vmatpush1.bf16.msra.mxu1 %v15556_v28  ;;  %v15628_v57 = vld [vmem:[#allocation6 + $0xe8] ss:$16 sps:$4 sm:$0xff]   ;;  %v15633_v28 = vld [vmem:[#allocation6 + $0x104] ss:$16 sps:$4 sm:$0xff]  }
 0x700   : > { %7656 = vmatprep.subr.bf16.mxu0 %v15561_v30  ;;  %7699 = vmatprep.subr.bf16.mxu1 %v15564_v32  ;;  %v15636_v30 = vld [vmem:[#allocation6 + $0x10c] ss:$16 sps:$4 sm:$0xff]   ;;  %v15631_v32 = vld [vmem:[#allocation6 + $0x100] ss:$16 sps:$4 sm:$0xff]  }
 0x703   : > { %7657 = vmatpush1.bf16.msra.mxu0 %v15559_v33  ;;  %7700 = vmatpush1.bf16.msra.mxu1 %v15562_v53  ;;  %v15634_v33 = vld [vmem:[#allocation6 + $0x108] ss:$16 sps:$4 sm:$0xff]   ;;  %v15639_v53 = vld [vmem:[#allocation6 + $0x124] ss:$16 sps:$4 sm:$0xff]  }
 0x704   : > { %7658 = vmatprep.subr.bf16.mxu0 %v15567_v36  ;;  %7701 = vmatprep.subr.bf16.mxu1 %v15570_v37  ;;  %v15642_v36 = vld [vmem:[#allocation6 + $0x12c] ss:$16 sps:$4 sm:$0xff]   ;;  %v15637_v37 = vld [vmem:[#allocation6 + $0x120] ss:$16 sps:$4 sm:$0xff]  }
 0x707   : > { %7659 = vmatpush1.bf16.msra.mxu0 %v15565_v60  ;;  %7702 = vmatpush1.bf16.msra.mxu1 %v15568_v18  ;;  %v15640_v60 = vld [vmem:[#allocation6 + $0x128] ss:$16 sps:$4 sm:$0xff]   ;;  %v15645_v18 = vld [vmem:[#allocation6 + $0x144] ss:$16 sps:$4 sm:$0xff]  }
 0x708   : > { %7660 = vmatprep.subr.bf16.mxu0 %v15573_v39  ;;  %7703 = vmatprep.subr.bf16.mxu1 %v15576_v40  ;;  %v15648_v39 = vld [vmem:[#allocation6 + $0x14c] ss:$16 sps:$4 sm:$0xff]   ;;  %v15643_v40 = vld [vmem:[#allocation6 + $0x140] ss:$16 sps:$4 sm:$0xff]  }
 0x70b   : > { %7661 = vmatpush1.bf16.msra.mxu0 %v15571_v54  ;;  %7704 = vmatpush1.bf16.msra.mxu1 %v15574_v43  ;;  %v15646_v54 = vld [vmem:[#allocation6 + $0x148] ss:$16 sps:$4 sm:$0xff]   ;;  %v15651_v43 = vld [vmem:[#allocation6 + $0x164] ss:$16 sps:$4 sm:$0xff]  }
 0x70c   : > { %7662 = vmatprep.subr.bf16.mxu0 %v15579_v44  ;;  %7705 = vmatprep.subr.bf16.mxu1 %v15582_v45  ;;  %v15654_v44 = vld [vmem:[#allocation6 + $0x16c] ss:$16 sps:$4 sm:$0xff]   ;;  %v15649_v45 = vld [vmem:[#allocation6 + $0x160] ss:$16 sps:$4 sm:$0xff]  }
 0x70f   : > { %7663 = vmatpush1.bf16.msra.mxu0 %v15577_v15  ;;  %7706 = vmatpush1.bf16.msra.mxu1 %v15580_v47  ;;  %v15652_v15 = vld [vmem:[#allocation6 + $0x168] ss:$16 sps:$4 sm:$0xff]   ;;  %v15657_v47 = vld [vmem:[#allocation6 + $0x184] ss:$16 sps:$4 sm:$0xff]  }
 0x710   : > { %8198 = vmatprep.subr.bf16.mxu0 %v15585_v48  ;;  %8241 = vmatprep.subr.bf16.mxu1 %v15588_v50  ;;  %v15655_v48 = vld [vmem:[#allocation6 + $0x180] ss:$16 sps:$4 sm:$0xff]   ;;  %v15663_v50 = vld [vmem:[#allocation6 + $0x1a4] ss:$16 sps:$4 sm:$0xff]  }
 0x712   : > { %7681 = vmatmul.mubr.bf16.vlgmr.msra.gmra.mrb[20].mxu0 %v19267_v38  ;;  %7724 = vmatmul.mubr.bf16.vlgmr.msra.gmra.mrb[20].mxu1 %v19267_v38  ;;  %v15598_v38 = vld [vmem:[#allocation6 + $0x48] ss:$16 sps:$4 sm:$0xff]  }
 0x713   : > { %8199 = vmatpush1.bf16.msra.mxu0 %v15583_v58  ;;  %8242 = vmatpush1.bf16.msra.mxu1 %v15586_v0  ;;  %v15660_v58 = vld [vmem:[#allocation6 + $0x18c] ss:$16 sps:$4 sm:$0xff]   ;;  %v15658_v0 = vld [vmem:[#allocation6 + $0x188] ss:$16 sps:$4 sm:$0xff]  }
 0x714   : > { %8200 = vmatprep.subr.bf16.mxu0 %v15591_v52  ;;  %8243 = vmatprep.subr.bf16.mxu1 %v15594_v56  ;;  %v15661_v52 = vld [vmem:[#allocation6 + $0x1a0] ss:$16 sps:$4 sm:$0xff]   ;;  %v15669_v56 = vld [vmem:[#allocation6 + $0x1c4] ss:$16 sps:$4 sm:$0xff]  }
 0x717   : > { %8201 = vmatpush1.bf16.msra.mxu0 %v15589_v51  ;;  %8244 = vmatpush1.bf16.msra.mxu1 %v15592_v55  ;;  %v15666_v51 = vld [vmem:[#allocation6 + $0x1ac] ss:$16 sps:$4 sm:$0xff]   ;;  %v15664_v55 = vld [vmem:[#allocation6 + $0x1a8] ss:$16 sps:$4 sm:$0xff]  }
 0x718   : > { %8202 = vmatprep.subr.bf16.mxu0 %v15597_v59  ;;  %8245 = vmatprep.subr.bf16.mxu1 %v15600_v19  ;;  %v15672_v59 = vld [vmem:[#allocation6 + $0x1cc] ss:$16 sps:$4 sm:$0xff]   ;;  %v15667_v19 = vld [vmem:[#allocation6 + $0x1c0] ss:$16 sps:$4 sm:$0xff]  }
 0x71b   : > { %8203 = vmatpush1.bf16.msra.mxu0 %v15595_v62  ;;  %8246 = vmatpush1.bf16.msra.mxu1 %v15598_v38  ;;  %v15670_v62 = vld [vmem:[#allocation6 + $0x1c8] ss:$16 sps:$4 sm:$0xff]   ;;  %v15675_v38 = vld [vmem:[#allocation6 + $0x1e4] ss:$16 sps:$4 sm:$0xff]  }
 0x71c   : > { %8204 = vmatprep.subr.bf16.mxu0 %v15603_v63  ;;  %8247 = vmatprep.subr.bf16.mxu1 %v15606_v21  ;;  %v15678_v63 = vld [vmem:[#allocation6 + $0x1ec] ss:$16 sps:$4 sm:$0xff]   ;;  %v15673_v21 = vld [vmem:[#allocation6 + $0x1e0] ss:$16 sps:$4 sm:$0xff]  }
 0x71f   : > { %8205 = vmatpush1.bf16.msra.mxu0 %v15601_v1  ;;  %8248 = vmatpush1.bf16.msra.mxu1 %v15604_v61  ;;  %v15676_v1 = vld [vmem:[#allocation6 + $0x1e8] ss:$16 sps:$4 sm:$0xff]   ;;  %v15681_v61 = vld [vmem:[%s20622_s6 + $0x4] ss:$16 sps:$4 sm:$0xff]  }
 0x720   : > { %8206 = vmatprep.subr.bf16.mxu0 %v15609_v3  ;;  %8249 = vmatprep.subr.bf16.mxu1 %v15612_v34  ;;  %v15684_v3 = vld [vmem:[%s20622_s6 + $0xc] ss:$16 sps:$4 sm:$0xff]   ;;  %v6426_v34 = vld [vmem:[%s20670_s24] sm:$0xf] }
 0x723   : > { %8207 = vmatpush1.bf16.msra.mxu0 %v15607_v5  ;;  %8250 = vmatpush1.bf16.msra.mxu1 %v15610_v10  ;;  %v6431_v5 = vrot.slane %v6426_v34, %v17944_v6  ;;  %v6435_v10 = vrot.slane %v6426_v34, %v17946_v7 }
 0x724   : > { %8208 = vmatprep.subr.bf16.mxu0 %v15615_v12  ;;  %8251 = vmatprep.subr.bf16.mxu1 %v15618_v13 }
 0x727   : > { %8209 = vmatpush1.bf16.msra.mxu0 %v15613_v31  ;;  %8252 = vmatpush1.bf16.msra.mxu1 %v15616_v49 }
 0x728   : > { %8210 = vmatprep.subr.bf16.mxu0 %v15621_v14  ;;  %8253 = vmatprep.subr.bf16.mxu1 %v15624_v17 }
 0x72b   : > { %8211 = vmatpush1.bf16.msra.mxu0 %v15619_v22  ;;  %8254 = vmatpush1.bf16.msra.mxu1 %v15622_v23 }
 0x72c   : > { %8212 = vmatprep.subr.bf16.mxu0 %v15627_v25  ;;  %8255 = vmatprep.subr.bf16.mxu1 %v15630_v42 }
 0x72f   : > { %8213 = vmatpush1.bf16.msra.mxu0 %v15625_v27  ;;  %8256 = vmatpush1.bf16.msra.mxu1 %v15628_v57 }
 0x730   : > { %8214 = vmatprep.subr.bf16.mxu0 %v15633_v28  ;;  %8257 = vmatprep.subr.bf16.mxu1 %v15636_v30  ;;  %v6439_v28 = vrot.slane %v6426_v34, %v17954_v11 }
 0x733   : > { %8215 = vmatpush1.bf16.msra.mxu0 %v15631_v32  ;;  %8258 = vmatpush1.bf16.msra.mxu1 %v15634_v33 }
 0x734   : > { %8216 = vmatprep.subr.bf16.mxu0 %v15639_v53  ;;  %8259 = vmatprep.subr.bf16.mxu1 %v15642_v36  ;;  %v6443_v36 = vrot.slane %v6426_v34, %v17958_v20 }
 0x737   : > { %8217 = vmatpush1.bf16.msra.mxu0 %v15637_v37  ;;  %8260 = vmatpush1.bf16.msra.mxu1 %v15640_v60 }
 0x738   : > { %8218 = vmatprep.subr.bf16.mxu0 %v15645_v18  ;;  %8261 = vmatprep.subr.bf16.mxu1 %v15648_v39 }
 0x73b   : > { %8219 = vmatpush1.bf16.msra.mxu0 %v15643_v40  ;;  %8262 = vmatpush1.bf16.msra.mxu1 %v15646_v54 }
 0x73c   : > { %8220 = vmatprep.subr.bf16.mxu0 %v15651_v43  ;;  %8263 = vmatprep.subr.bf16.mxu1 %v15654_v44 }
 0x73f   : > { %8221 = vmatpush1.bf16.msra.mxu0 %v15649_v45  ;;  %8264 = vmatpush1.bf16.msra.mxu1 %v15652_v15 }
 0x740   : > { %8222 = vmatprep.subr.bf16.mxu0 %v15657_v47  ;;  %8265 = vmatprep.subr.bf16.mxu1 %v15660_v58 }
 0x743   : > { %8223 = vmatpush1.bf16.msra.mxu0 %v15655_v48  ;;  %8266 = vmatpush1.bf16.msra.mxu1 %v15658_v0 }
 0x744   : > { %8224 = vmatprep.subr.bf16.mxu0 %v15663_v50  ;;  %8267 = vmatprep.subr.bf16.mxu1 %v15666_v51 }
 0x747   : > { %8225 = vmatpush1.bf16.msra.mxu0 %v15661_v52  ;;  %8268 = vmatpush1.bf16.msra.mxu1 %v15664_v55 }
 0x748   : > { %8226 = vmatprep.subr.bf16.mxu0 %v15669_v56  ;;  %8269 = vmatprep.subr.bf16.mxu1 %v15672_v59 }
 0x74b   : > { %8227 = vmatpush1.bf16.msra.mxu0 %v15667_v19  ;;  %8270 = vmatpush1.bf16.msra.mxu1 %v15670_v62 }
 0x74c   : > { %8228 = vmatprep.subr.bf16.mxu0 %v15675_v38  ;;  %8271 = vmatprep.subr.bf16.mxu1 %v15678_v63 }
 0x74f   : > { %8229 = vmatpush1.bf16.msra.mxu0 %v15673_v21  ;;  %8272 = vmatpush1.bf16.msra.mxu1 %v15676_v1 }
 0x750   : > { %8741 = vmatprep.subr.bf16.mxu0 %v15681_v61  ;;  %8784 = vmatprep.subr.bf16.mxu1 %v15684_v3 }
 0x785   : > { %v6802_v12 = vpop.f32.mrb[60].mxu0  ;;  %v6845_v13 = vpop.f32.mrb[60].mxu1 }
 0x786   : > { %v6803_v31 = vadd.f32 %v6802_v12, %v6431_v5  ;;  %v6804_v49 = vpop.f32.mrb[61].mxu0  ;;  %v6847_v14 = vpop.f32.mrb[61].mxu1  ;;  %v6846_v37 = vadd.f32 %v6845_v13, %v6439_v28 }
 0x787   : > { %v6805_v17 = vadd.f32 %v6804_v49, %v6435_v10  ;;  %v6806_v22 = vpop.f32.mrb[62].mxu0  ;;  %v6849_v23 = vpop.f32.mrb[62].mxu1  ;;  %v6848_v18 = vadd.f32 %v6847_v14, %v6443_v36 }
 0x788   : > { %v13526_v25 = vmul.f32 -1.442695, %v6803_v31  ;;  %v6807_v42 = vadd.f32 %v6806_v22, %v6431_v5  ;;  %v6808_v27 = vpop.f32.mrb[63].mxu0  ;;  %v6851_v57 = vpop.f32.mrb[63].mxu1  ;;  %v6850_v60 = vadd.f32 %v6849_v23, %v6439_v28  ;;  %v13528_v39 = vmul.f32 -1.442695, %v6846_v37 }
 0x789   : > { %v13527_v30 = vmul.f32 -1.442695, %v6805_v17  ;;  %v6809_v32 = vadd.f32 %v6808_v27, %v6435_v10  ;;  %v6852_v43 = vadd.f32 %v6851_v57, %v6443_v36 }
 0x78a   : > { %16735 = vpow2.f32 %v13526_v25  ;;  %v13529_v33 = vmul.f32 -1.442695, %v6807_v42  ;;  %v13531_v40 = vmul.f32 -1.442695, %v6850_v60 }
 0x78b   : > { %v13530_v53 = vmul.f32 -1.442695, %v6809_v32  ;;  %16737 = vpow2.f32 %v13527_v30 }
 0x78c   : > { %16739 = vpow2.f32 %v13529_v33 }
 0x78d   : > { %16741 = vpow2.f32 %v13530_v53 }
 0x78e   : > { %16743 = vtanh.f32 %v6848_v18 }
 0x78f   : > { %16745 = vpow2.f32 %v13528_v39 }
 0x790   : > { %16747 = vpow2.f32 %v13531_v40 }
 0x794   : > { %v16736_v54 = vpop.eup %16735 }
 0x795   : > { %v6872_v44 = vadd.f32 1.0, %v16736_v54  ;;  %v16738_v45 = vpop.eup %16737 }
 0x796   : > { %v16740_v15 = vpop.eup %16739  ;;  %v6873_v47 = vadd.f32 1.0, %v16738_v45 }
 0x797   : > { %16749 = vrcp.f32 %v6872_v44  ;;  %v6875_v58 = vadd.f32 1.0, %v16740_v15  ;;  %v16742_v48 = vpop.eup %16741 }
 0x798   : > { %16751 = vtanh.f32 %v6852_v43  ;;  %v6876_v0 = vadd.f32 1.0, %v16742_v48  ;;  %v16744_v50 = vpop.eup %16743 }
 0x799   : > { %16753 = vrcp.f32 %v6873_v47  ;;  %v16746_v51 = vpop.eup %16745 }
 0x79a   : > { %16755 = vrcp.f32 %v6875_v58  ;;  %v16748_v52 = vpop.eup %16747  ;;  %v6874_v38 = vadd.f32 1.0, %v16746_v51 }
 0x79b   : > { %16757 = vrcp.f32 %v6876_v0  ;;  %v6877_v3 = vadd.f32 1.0, %v16748_v52 }
 0x79c   : > { %16759 = vrcp.f32 %v6874_v38 }
 0x7a1   : > { %v16750_v55 = vpop.eup %16749 }
 0x7a2   : > { %v16752_v56 = vpop.eup %16751  ;;  %v6894_v59 = vmul.f32 %v16750_v55, %v16744_v50 }
 0x7a3   : > { %v16754_v19 = vpop.eup %16753 }
 0x7a4   : > { %v16756_v62 = vpop.eup %16755  ;;  %v6892_v63 = vmul.f32 %v16754_v19, %v19121_v46 }
 0x7a5   : > { %v6895_v21 = vmul.f32 %v16756_v62, %v16752_v56  ;;  %v16758_v1 = vpop.eup %16757 }
 0x7a6   : > { %v19463_v61 = vadd.f32 %v6894_v59, %v6892_v63  ;;  %v6893_v34 = vmul.f32 %v16758_v1, %v19125_v35  ;;  %v16760_v10 = vpop.eup %16759  ;;  %v6969_v35 = vld [vmem:[%s20669_s14] sm:$0xf] }
 0x7a7   : > { %v6974_v17 = vrot.slane %v6969_v35, %v17944_v6  ;;  %v6978_v22 = vrot.slane %v6969_v35, %v17946_v7  ;;  %v6982_v60 = vrot.slane %v6969_v35, %v17954_v11  ;;  %v6986_v43 = vrot.slane %v6969_v35, %v17958_v20 }
 0x7a8   : > { %16761 = vtanh.f32 %v19463_v61  ;;  %v19467_v5 = vadd.f32 %v6895_v21, %v6893_v34 }
 0x7a9   : > { %16763 = vrcp.f32 %v6877_v3 }
 0x7aa   : > { %16765 = vtanh.f32 %v19467_v5 }
 0x7b2   : > { %v16762_v12 = vpop.eup %16761 }
 0x7b3   : > { %v16764_v13 = vpop.eup %16763  ;;  %v6900_v46 = vmul.f32 %v16762_v12, %v16760_v10 }
 0x7b4   : > { %v16766_v31 = vpop.eup %16765 }
 0x7b5   : > { %v6901_v49 = vmul.f32 %v16766_v31, %v16764_v13 }
 0x7b7   : > { %v6902_v14 = vpack.c.bf16 %v6901_v49, %v6900_v46 }
 0x7b9   : > { %6904 = vst [vmem:[#allocation3 + $0x18] sm:$0xff] %v6902_v14  ;;  %8230 = vmatprep.mubr.bf16.mxu0 %v6902_v14  ;;  %8273 = vmatprep.mubr.bf16.mxu1 %v6902_v14 }
 0x7c5   : > { %v7345_v23 = vpop.f32.mrb[64].mxu0  ;;  %v7388_v25 = vpop.f32.mrb[64].mxu1 }
 0x7c6   : > { %v7346_v42 = vadd.f32 %v7345_v23, %v6974_v17  ;;  %v7347_v27 = vpop.f32.mrb[65].mxu0  ;;  %v7390_v57 = vpop.f32.mrb[65].mxu1  ;;  %v7389_v44 = vadd.f32 %v7388_v25, %v6982_v60 }
 0x7c7   : > { %v7348_v28 = vadd.f32 %v7347_v27, %v6978_v22  ;;  %v7349_v30 = vpop.f32.mrb[66].mxu0  ;;  %v7392_v32 = vpop.f32.mrb[66].mxu1  ;;  %v7391_v15 = vadd.f32 %v7390_v57, %v6986_v43 }
 0x7c8   : > { %v13596_v33 = vmul.f32 -1.442695, %v7346_v42  ;;  %v7350_v53 = vadd.f32 %v7349_v30, %v6974_v17  ;;  %v7351_v36 = vpop.f32.mrb[67].mxu0  ;;  %v7394_v37 = vpop.f32.mrb[67].mxu1  ;;  %v7393_v45 = vadd.f32 %v7392_v32, %v6982_v60  ;;  %v13598_v47 = vmul.f32 -1.442695, %v7389_v44 }
 0x7c9   : > { %v13597_v18 = vmul.f32 -1.442695, %v7348_v28  ;;  %v7352_v39 = vadd.f32 %v7351_v36, %v6978_v22  ;;  %v7395_v0 = vadd.f32 %v7394_v37, %v6986_v43 }
 0x7ca   : > { %16767 = vpow2.f32 %v13596_v33  ;;  %v13599_v40 = vmul.f32 -1.442695, %v7350_v53  ;;  %v13601_v58 = vmul.f32 -1.442695, %v7393_v45 }
 0x7cb   : > { %v13600_v54 = vmul.f32 -1.442695, %v7352_v39  ;;  %16769 = vpow2.f32 %v13597_v18 }
 0x7cc   : > { %16771 = vpow2.f32 %v13599_v40 }
 0x7cd   : > { %16773 = vpow2.f32 %v13600_v54 }
 0x7ce   : > { %16775 = vtanh.f32 %v7391_v15 }
 0x7cf   : > { %16777 = vpow2.f32 %v13598_v47 }
 0x7d0   : > { %16779 = vpow2.f32 %v13601_v58 }
 0x7d4   : > { %v16768_v48 = vpop.eup %16767 }
 0x7d5   : > { %v7415_v50 = vadd.f32 1.0, %v16768_v48  ;;  %v16770_v51 = vpop.eup %16769 }
 0x7d6   : > { %v16772_v52 = vpop.eup %16771  ;;  %v7416_v55 = vadd.f32 1.0, %v16770_v51 }
 0x7d7   : > { %16781 = vrcp.f32 %v7415_v50  ;;  %v7418_v56 = vadd.f32 1.0, %v16772_v52  ;;  %v16774_v59 = vpop.eup %16773 }
 0x7d8   : > { %16783 = vtanh.f32 %v7395_v0  ;;  %v7419_v19 = vadd.f32 1.0, %v16774_v59  ;;  %v16776_v62 = vpop.eup %16775 }
 0x7d9   : > { %16785 = vrcp.f32 %v7416_v55  ;;  %v16778_v38 = vpop.eup %16777  ;;  %v15679_v55 = vld [vmem:[%s20622_s6] ss:$16 sps:$4 sm:$0xff]  }
 0x7da   : > { %16787 = vrcp.f32 %v7418_v56  ;;  %v16780_v63 = vpop.eup %16779  ;;  %v7417_v10 = vadd.f32 1.0, %v16778_v38  ;;  %v15682_v56 = vld [vmem:[%s20622_s6 + $0x8] ss:$16 sps:$4 sm:$0xff]  }
 0x7db   : > { %16789 = vrcp.f32 %v7419_v19  ;;  %v7420_v31 = vadd.f32 1.0, %v16780_v63  ;;  %v15687_v63 = vld [vmem:[%s20622_s6 + $0x24] ss:$16 sps:$4 sm:$0xff]  }
 0x7dc   : > { %16791 = vrcp.f32 %v7417_v10  ;;  %v15688_v10 = vld [vmem:[%s20622_s6 + $0x28] ss:$16 sps:$4 sm:$0xff]  }
 0x7dd   : > { %16793 = vrcp.f32 %v7420_v31 }
 0x7e1   : > { %v16782_v21 = vpop.eup %16781 }
 0x7e2   : > { %v16784_v1 = vpop.eup %16783  ;;  %v7437_v3 = vmul.f32 %v16782_v21, %v16776_v62  ;;  %v15690_v21 = vld [vmem:[%s20622_s6 + $0x2c] ss:$16 sps:$4 sm:$0xff]  }
 0x7e3   : > { %v16786_v34 = vpop.eup %16785 }
 0x7e4   : > { %v16788_v12 = vpop.eup %16787  ;;  %v7435_v13 = vmul.f32 %v16786_v34, %v19136_v41  ;;  %v15685_v34 = vld [vmem:[%s20622_s6 + $0x20] ss:$16 sps:$4 sm:$0xff]  }
 0x7e5   : > { %v7438_v46 = vmul.f32 %v16788_v12, %v16784_v1  ;;  %v7682_v49 = vpop.f32.mrb[20].mxu0  ;;  %v7725_v14 = vpop.f32.mrb[20].mxu1  ;;  %v15693_v12 = vld [vmem:[%s20622_s6 + $0x44] ss:$16 sps:$4 sm:$0xff]  }
 0x7e6   : > { %v16790_v35 = vpop.eup %16789  ;;  %v19478_v17 = vadd.f32 %v7437_v3, %v7435_v13  ;;  %v14257_v22 = vadd.f32 %v7682_v49, %v17949_v8  ;;  %v7684_v23 = vpop.f32.mrb[21].mxu0  ;;  %v14289_v18 = vadd.f32 %v7725_v14, %v17962_v24  ;;  %v15696_v13 = vld [vmem:[%s20622_s6 + $0x4c] ss:$16 sps:$4 sm:$0xff]   ;;  %v15694_v49 = vld [vmem:[%s20622_s6 + $0x48] ss:$16 sps:$4 sm:$0xff]  }
 0x7e7   : > { %v7727_v25 = vpop.f32.mrb[21].mxu1  ;;  %v7436_v42 = vmul.f32 %v16790_v35, %v19143_v26  ;;  %v14258_v27 = vadd.f32 %v7684_v23, %v17952_v9  ;;  %v7686_v57 = vpop.f32.mrb[22].mxu0  ;;  %v15699_v35 = vld [vmem:[%s20622_s6 + $0x64] ss:$16 sps:$4 sm:$0xff]  }
 0x7e8   : > { %v7729_v28 = vpop.f32.mrb[22].mxu1  ;;  %v13634_v41 = vmul.f32 -1.442695, %v14257_v22  ;;  %v14259_v30 = vadd.f32 %v7686_v57, %v17949_v8  ;;  %v7688_v32 = vpop.f32.mrb[23].mxu0  ;;  %16795 = vtanh.f32 %v19478_v17  ;;  %v14290_v54 = vadd.f32 %v7727_v25, %v17966_v29  ;;  %v15702_v22 = vld [vmem:[%s20622_s6 + $0x6c] ss:$16 sps:$4 sm:$0xff]  }
 0x7e9   : > { %v7731_v33 = vpop.f32.mrb[23].mxu1  ;;  %v19485_v53 = vadd.f32 %v7438_v46, %v7436_v42  ;;  %v13635_v36 = vmul.f32 -1.442695, %v14258_v27  ;;  %v14260_v60 = vadd.f32 %v7688_v32, %v17952_v9  ;;  %v14291_v39 = vadd.f32 %v7729_v28, %v17962_v24  ;;  %v16792_v40 = vpop.eup %16791  ;;  %v15691_v46 = vld [vmem:[%s20622_s6 + $0x40] ss:$16 sps:$4 sm:$0xff]  }
 0x7ea   : > { %16797 = vpow2.f32 %v13634_v41  ;;  %v13637_v37 = vmul.f32 -1.442695, %v14259_v30  ;;  %v16794_v43 = vpop.eup %16793  ;;  %v13636_v44 = vmul.f32 -1.442695, %v14289_v18  ;;  %v14292_v0 = vadd.f32 %v7731_v33, %v17966_v29  ;;  %v15697_v57 = vld [vmem:[%s20622_s6 + $0x60] ss:$16 sps:$4 sm:$0xff]  }
 0x7eb   : > { %16799 = vtanh.f32 %v19485_v53  ;;  %v13638_v26 = vmul.f32 -1.442695, %v14260_v60  ;;  %v13639_v47 = vmul.f32 -1.442695, %v14291_v39  ;;  %v15700_v28 = vld [vmem:[%s20622_s6 + $0x68] ss:$16 sps:$4 sm:$0xff]  }
 0x7ec   : > { %16801 = vpow2.f32 %v13635_v36  ;;  %v15705_v30 = vld [vmem:[%s20622_s6 + $0x84] ss:$16 sps:$4 sm:$0xff]   ;;  %v15708_v32 = vld [vmem:[%s20622_s6 + $0x8c] ss:$16 sps:$4 sm:$0xff]  }
 0x7ed   : > { %16803 = vpow2.f32 %v13637_v37 }
 0x7ee   : > { %16805 = vpow2.f32 %v13638_v26 }
 0x7ef   : > { %16807 = vtanh.f32 %v14290_v54  ;;  %v15706_v54 = vld [vmem:[%s20622_s6 + $0x88] ss:$16 sps:$4 sm:$0xff]  }
 0x7f0   : > { %16809 = vpow2.f32 %v13636_v44  ;;  %v15714_v44 = vld [vmem:[%s20622_s6 + $0xac] ss:$16 sps:$4 sm:$0xff]  }
 0x7f2   : > { %v16796_v45 = vpop.eup %16795 }
 0x7f3   : > { %v7443_v50 = vmul.f32 %v16796_v45, %v16792_v40  ;;  %v15703_v40 = vld [vmem:[%s20622_s6 + $0x80] ss:$16 sps:$4 sm:$0xff]  }
 0x7f4   : > { %v16798_v15 = vpop.eup %16797 }
 0x7f5   : > { %v16800_v58 = vpop.eup %16799  ;;  %v7760_v48 = vadd.f32 1.0, %v16798_v15  ;;  %v15712_v15 = vld [vmem:[%s20622_s6 + $0xa8] ss:$16 sps:$4 sm:$0xff]  }
 0x7f6   : > { %v7444_v51 = vmul.f32 %v16800_v58, %v16794_v43  ;;  %v16802_v52 = vpop.eup %16801  ;;  %v15720_v58 = vld [vmem:[%s20622_s6 + $0xcc] ss:$16 sps:$4 sm:$0xff]  }
 0x7f7   : > { %16811 = vrcp.f32 %v7760_v48  ;;  %v16804_v59 = vpop.eup %16803  ;;  %v7761_v19 = vadd.f32 1.0, %v16802_v52  ;;  %v15715_v48 = vld [vmem:[%s20622_s6 + $0xc0] ss:$16 sps:$4 sm:$0xff]  }
 0x7f8   : > { %16813 = vpow2.f32 %v13639_v47  ;;  %v7791_v62 = vpack.c.bf16 %v7444_v51, %v7443_v50  ;;  %v7763_v38 = vadd.f32 1.0, %v16804_v59  ;;  %v16806_v1 = vpop.eup %16805  ;;  %v15717_v47 = vld [vmem:[%s20622_s6 + $0xc4] ss:$16 sps:$4 sm:$0xff]   ;;  %v15726_v51 = vld [vmem:[%s20622_s6 + $0xec] ss:$16 sps:$4 sm:$0xff]  }
 0x7f9   : > { %16815 = vtanh.f32 %v14292_v0  ;;  %v7764_v3 = vadd.f32 1.0, %v16806_v1  ;;  %v16808_v31 = vpop.eup %16807  ;;  %v15718_v0 = vld [vmem:[%s20622_s6 + $0xc8] ss:$16 sps:$4 sm:$0xff]   ;;  %v15723_v50 = vld [vmem:[%s20622_s6 + $0xe4] ss:$16 sps:$4 sm:$0xff]  }
 0x7fa   : > { %16817 = vrcp.f32 %v7761_v19  ;;  %8231 = vmatmul.mubr.bf16.vlgmr.msra.gmra.mrb[68].mxu0 %v7791_v62  ;;  %8274 = vmatmul.mubr.bf16.vlgmr.msra.gmra.mrb[68].mxu1 %v7791_v62  ;;  %v16810_v14 = vpop.eup %16809  ;;  %v15729_v19 = vld [vmem:[%s20622_s6 + $0x104] ss:$16 sps:$4 sm:$0xff]   ;;  %v15730_v1 = vld [vmem:[%s20622_s6 + $0x108] ss:$16 sps:$4 sm:$0xff]  }
 0x7fb   : > { %16819 = vrcp.f32 %v7763_v38  ;;  %8742 = vmatpush1.bf16.msra.mxu0 %v15679_v55  ;;  %8785 = vmatpush1.bf16.msra.mxu1 %v15682_v56  ;;  %v7762_v36 = vadd.f32 1.0, %v16810_v14  ;;  %v15721_v55 = vld [vmem:[%s20622_s6 + $0xe0] ss:$16 sps:$4 sm:$0xff]   ;;  %v15724_v56 = vld [vmem:[%s20622_s6 + $0xe8] ss:$16 sps:$4 sm:$0xff]  }
 0x7fc   : > { %8773 = vmatprep.mubr.bf16.mxu0 %v7791_v62  ;;  %8816 = vmatprep.mubr.bf16.mxu1 %v7791_v62  ;;  %16821 = vrcp.f32 %v7764_v3  ;;  %v15732_v62 = vld [vmem:[%s20622_s6 + $0x10c] ss:$16 sps:$4 sm:$0xff]  }
 0x7fd   : > { %8743 = vmatprep.subr.bf16.mxu0 %v15687_v63  ;;  %8786 = vmatprep.subr.bf16.mxu1 %v15690_v21  ;;  %16823 = vrcp.f32 %v7762_v36  ;;  %v15727_v21 = vld [vmem:[%s20622_s6 + $0x100] ss:$16 sps:$4 sm:$0xff]   ;;  %v15744_v14 = vld [vmem:[%s20622_s6 + $0x14c] ss:$16 sps:$4 sm:$0xff]  }
 0x7fe   : > { %v15757_v36 = vld [vmem:[%s20622_s6 + $0x1a0] ss:$16 sps:$4 sm:$0xff]  }
 0x7ff   : > { %8744 = vmatpush1.bf16.msra.mxu0 %v15685_v34  ;;  %8787 = vmatpush1.bf16.msra.mxu1 %v15688_v10  ;;  %v15735_v10 = vld [vmem:[%s20622_s6 + $0x124] ss:$16 sps:$4 sm:$0xff]  }
 0x800   : > { %8745 = vmatprep.subr.bf16.mxu0 %v15693_v12  ;;  %8788 = vmatprep.subr.bf16.mxu1 %v15696_v13  ;;  %v15738_v12 = vld [vmem:[%s20622_s6 + $0x12c] ss:$16 sps:$4 sm:$0xff]  }
 0x801   : > { %v16812_v23 = vpop.eup %16811 }
 0x802   : > { %v16814_v25 = vpop.eup %16813  ;;  %v7782_v42 = vmul.f32 %v16812_v23, %v16808_v31  ;;  %v15733_v31 = vld [vmem:[%s20622_s6 + $0x120] ss:$16 sps:$4 sm:$0xff]   ;;  %v15747_v23 = vld [vmem:[%s20622_s6 + $0x164] ss:$16 sps:$4 sm:$0xff]  }
 0x803   : > { %v16816_v27 = vpop.eup %16815  ;;  %8746 = vmatpush1.bf16.msra.mxu0 %v15691_v46  ;;  %8789 = vmatpush1.bf16.msra.mxu1 %v15694_v49  ;;  %v7765_v39 = vadd.f32 1.0, %v16814_v25  ;;  %v15736_v46 = vld [vmem:[%s20622_s6 + $0x128] ss:$16 sps:$4 sm:$0xff]   ;;  %v15741_v49 = vld [vmem:[%s20622_s6 + $0x144] ss:$16 sps:$4 sm:$0xff]  }
 0x804   : > { %v16818_v41 = vpop.eup %16817  ;;  %8747 = vmatprep.subr.bf16.mxu0 %v15699_v35  ;;  %8790 = vmatprep.subr.bf16.mxu1 %v15702_v22  ;;  %v15739_v35 = vld [vmem:[%s20622_s6 + $0x140] ss:$16 sps:$4 sm:$0xff]   ;;  %v15742_v22 = vld [vmem:[%s20622_s6 + $0x148] ss:$16 sps:$4 sm:$0xff]   ;;  %v15750_v25 = vld [vmem:[%s20622_s6 + $0x16c] ss:$16 sps:$4 sm:$0xff]  }
 0x805   : > { %v16820_v33 = vpop.eup %16819  ;;  %v7780_v37 = vmul.f32 %v16818_v41, %v19200_v16  ;;  %v15711_v16 = vld [vmem:[%s20622_s6 + $0xa4] ss:$16 sps:$4 sm:$0xff]   ;;  %v15751_v41 = vld [vmem:[%s20622_s6 + $0x180] ss:$16 sps:$4 sm:$0xff]  }
 0x806   : > { %v7783_v60 = vmul.f32 %v16820_v33, %v16816_v27  ;;  %v16822_v26 = vpop.eup %16821  ;;  %v15748_v27 = vld [vmem:[%s20622_s6 + $0x168] ss:$16 sps:$4 sm:$0xff]   ;;  %v15762_v33 = vld [vmem:[%s20622_s6 + $0x1ac] ss:$16 sps:$4 sm:$0xff]  }
 0x807   : > { %v19542_v18 = vadd.f32 %v7782_v42, %v7780_v37  ;;  %8748 = vmatpush1.bf16.msra.mxu0 %v15697_v57  ;;  %8791 = vmatpush1.bf16.msra.mxu1 %v15700_v28  ;;  %v7781_v43 = vmul.f32 %v16822_v26, %v19216_v4  ;;  %v15709_v4 = vld [vmem:[%s20622_s6 + $0xa0] ss:$16 sps:$4 sm:$0xff]   ;;  %v16824_v52 = vpop.eup %16823  ;;  %v15753_v57 = vld [vmem:[%s20622_s6 + $0x184] ss:$16 sps:$4 sm:$0xff]   ;;  %v15756_v28 = vld [vmem:[%s20622_s6 + $0x18c] ss:$16 sps:$4 sm:$0xff]  }
 0x808   : > { %8749 = vmatprep.subr.bf16.mxu0 %v15705_v30  ;;  %8792 = vmatprep.subr.bf16.mxu1 %v15708_v32  ;;  %v15745_v42 = vld [vmem:[%s20622_s6 + $0x160] ss:$16 sps:$4 sm:$0xff]   ;;  %v15754_v30 = vld [vmem:[%s20622_s6 + $0x188] ss:$16 sps:$4 sm:$0xff]   ;;  %v15759_v32 = vld [vmem:[%s20622_s6 + $0x1a4] ss:$16 sps:$4 sm:$0xff]  }
 0x809   : > { %16825 = vtanh.f32 %v19542_v18  ;;  %v19558_v45 = vadd.f32 %v7783_v60, %v7781_v43  ;;  %v15760_v37 = vld [vmem:[%s20622_s6 + $0x1a8] ss:$16 sps:$4 sm:$0xff]   ;;  %v15765_v60 = vld [vmem:[%s20622_s6 + $0x1c4] ss:$16 sps:$4 sm:$0xff]   ;;  %v15768_v26 = vld [vmem:[%s20622_s6 + $0x1cc] ss:$16 sps:$4 sm:$0xff]  }
 0x80a   : > { %16827 = vrcp.f32 %v7765_v39  ;;  %v15763_v39 = vld [vmem:[%s20622_s6 + $0x1c0] ss:$16 sps:$4 sm:$0xff]   ;;  %v15774_v43 = vld [vmem:[%s20622_s6 + $0x1ec] ss:$16 sps:$4 sm:$0xff]  }
 0x80b   : > { %8750 = vmatpush1.bf16.msra.mxu0 %v15703_v40  ;;  %8793 = vmatpush1.bf16.msra.mxu1 %v15706_v54  ;;  %16829 = vtanh.f32 %v19558_v45  ;;  %v15766_v40 = vld [vmem:[%s20622_s6 + $0x1c8] ss:$16 sps:$4 sm:$0xff]   ;;  %v15771_v54 = vld [vmem:[%s20622_s6 + $0x1e4] ss:$16 sps:$4 sm:$0xff]  }
 0x80c   : > { %8751 = vmatprep.subr.bf16.mxu0 %v15711_v16  ;;  %8794 = vmatprep.subr.bf16.mxu1 %v15714_v44  ;;  %v15769_v16 = vld [vmem:[%s20622_s6 + $0x1e0] ss:$16 sps:$4 sm:$0xff]   ;;  %v15772_v44 = vld [vmem:[%s20622_s6 + $0x1e8] ss:$16 sps:$4 sm:$0xff]  }
 0x80f   : > { %8752 = vmatpush1.bf16.msra.mxu0 %v15709_v4  ;;  %8795 = vmatpush1.bf16.msra.mxu1 %v15712_v15  ;;  %v15777_v4 = vld [vmem:[%s20620_s4 + $0x4] ss:$16 sps:$4 sm:$0xff]   ;;  %v15780_v15 = vld [vmem:[%s20620_s4 + $0xc] ss:$16 sps:$4 sm:$0xff]  }
 0x810   : > { %8753 = vmatprep.subr.bf16.mxu0 %v15717_v47  ;;  %8796 = vmatprep.subr.bf16.mxu1 %v15720_v58  ;;  %v15775_v47 = vld [vmem:[%s20620_s4] ss:$16 sps:$4 sm:$0xff]   ;;  %v15778_v58 = vld [vmem:[%s20620_s4 + $0x8] ss:$16 sps:$4 sm:$0xff]  }
 0x813   : > { %8754 = vmatpush1.bf16.msra.mxu0 %v15715_v48  ;;  %8797 = vmatpush1.bf16.msra.mxu1 %v15718_v0  ;;  %v16826_v59 = vpop.eup %16825  ;;  %v15783_v48 = vld [vmem:[%s20620_s4 + $0x24] ss:$16 sps:$4 sm:$0xff]   ;;  %v15786_v0 = vld [vmem:[%s20620_s4 + $0x2c] ss:$16 sps:$4 sm:$0xff]  }
 0x814   : > { %8755 = vmatprep.subr.bf16.mxu0 %v15723_v50  ;;  %8798 = vmatprep.subr.bf16.mxu1 %v15726_v51  ;;  %v16828_v38 = vpop.eup %16827  ;;  %v7788_v3 = vmul.f32 %v16826_v59, %v16824_v52  ;;  %v15781_v50 = vld [vmem:[%s20620_s4 + $0x20] ss:$16 sps:$4 sm:$0xff]   ;;  %v15784_v51 = vld [vmem:[%s20620_s4 + $0x28] ss:$16 sps:$4 sm:$0xff]   ;;  %v15789_v52 = vld [vmem:[%s20620_s4 + $0x44] ss:$16 sps:$4 sm:$0xff]  }
 0x815   : > { %v16830_v63 = vpop.eup %16829  ;;  %v15790_v59 = vld [vmem:[%s20620_s4 + $0x48] ss:$16 sps:$4 sm:$0xff]  }
 0x816   : > { %v7789_v34 = vmul.f32 %v16830_v63, %v16828_v38  ;;  %v15793_v38 = vld [vmem:[%s20620_s4 + $0x60] ss:$16 sps:$4 sm:$0xff]   ;;  %v15796_v63 = vld [vmem:[%s20620_s4 + $0x68] ss:$16 sps:$4 sm:$0xff]  }
 0x817   : > { %8756 = vmatpush1.bf16.msra.mxu0 %v15721_v55  ;;  %8799 = vmatpush1.bf16.msra.mxu1 %v15724_v56  ;;  %v15792_v55 = vld [vmem:[%s20620_s4 + $0x4c] ss:$16 sps:$4 sm:$0xff]   ;;  %v15787_v56 = vld [vmem:[%s20620_s4 + $0x40] ss:$16 sps:$4 sm:$0xff]  }
 0x818   : > { %8757 = vmatprep.subr.bf16.mxu0 %v15729_v19  ;;  %8800 = vmatprep.subr.bf16.mxu1 %v15732_v62  ;;  %v19609_v13 = vpack.c.bf16 %v7789_v34, %v7788_v3  ;;  %v15795_v19 = vld [vmem:[%s20620_s4 + $0x64] ss:$16 sps:$4 sm:$0xff]   ;;  %v15798_v62 = vld [vmem:[%s20620_s4 + $0x6c] ss:$16 sps:$4 sm:$0xff]   ;;  %v15799_v3 = vld [vmem:[%s20620_s4 + $0x80] ss:$16 sps:$4 sm:$0xff]  }
 0x819   : > { %v15802_v34 = vld [vmem:[%s20620_s4 + $0x88] ss:$16 sps:$4 sm:$0xff]  }
 0x81b   : > { %8758 = vmatpush1.bf16.msra.mxu0 %v15727_v21  ;;  %8801 = vmatpush1.bf16.msra.mxu1 %v15730_v1  ;;  %v15801_v21 = vld [vmem:[%s20620_s4 + $0x84] ss:$16 sps:$4 sm:$0xff]   ;;  %v15804_v1 = vld [vmem:[%s20620_s4 + $0x8c] ss:$16 sps:$4 sm:$0xff]  }
 0x81c   : > { %8759 = vmatprep.subr.bf16.mxu0 %v15735_v10  ;;  %8802 = vmatprep.subr.bf16.mxu1 %v15738_v12  ;;  %v15807_v10 = vld [vmem:[%s20620_s4 + $0xa4] ss:$16 sps:$4 sm:$0xff]   ;;  %v15810_v12 = vld [vmem:[%s20620_s4 + $0xac] ss:$16 sps:$4 sm:$0xff]  }
 0x81f   : > { %8760 = vmatpush1.bf16.msra.mxu0 %v15733_v31  ;;  %8803 = vmatpush1.bf16.msra.mxu1 %v15736_v46  ;;  %v15805_v31 = vld [vmem:[%s20620_s4 + $0xa0] ss:$16 sps:$4 sm:$0xff]   ;;  %v15808_v46 = vld [vmem:[%s20620_s4 + $0xa8] ss:$16 sps:$4 sm:$0xff]  }
 0x820   : > { %8761 = vmatprep.subr.bf16.mxu0 %v15741_v49  ;;  %8804 = vmatprep.subr.bf16.mxu1 %v15744_v14  ;;  %v15813_v49 = vld [vmem:[%s20620_s4 + $0xc4] ss:$16 sps:$4 sm:$0xff]   ;;  %v15816_v14 = vld [vmem:[%s20620_s4 + $0xcc] ss:$16 sps:$4 sm:$0xff]  }
 0x823   : > { %8762 = vmatpush1.bf16.msra.mxu0 %v15739_v35  ;;  %8805 = vmatpush1.bf16.msra.mxu1 %v15742_v22  ;;  %v15811_v35 = vld [vmem:[%s20620_s4 + $0xc0] ss:$16 sps:$4 sm:$0xff]   ;;  %v15814_v22 = vld [vmem:[%s20620_s4 + $0xc8] ss:$16 sps:$4 sm:$0xff]  }
 0x824   : > { %8763 = vmatprep.subr.bf16.mxu0 %v15747_v23  ;;  %8806 = vmatprep.subr.bf16.mxu1 %v15750_v25  ;;  %v15819_v23 = vld [vmem:[%s20620_s4 + $0xe4] ss:$16 sps:$4 sm:$0xff]   ;;  %v15822_v25 = vld [vmem:[%s20620_s4 + $0xec] ss:$16 sps:$4 sm:$0xff]  }
 0x827   : > { %8764 = vmatpush1.bf16.msra.mxu0 %v15745_v42  ;;  %8807 = vmatpush1.bf16.msra.mxu1 %v15748_v27  ;;  %v15817_v42 = vld [vmem:[%s20620_s4 + $0xe0] ss:$16 sps:$4 sm:$0xff]   ;;  %v15820_v27 = vld [vmem:[%s20620_s4 + $0xe8] ss:$16 sps:$4 sm:$0xff]  }
 0x828   : > { %8765 = vmatprep.subr.bf16.mxu0 %v15753_v57  ;;  %8808 = vmatprep.subr.bf16.mxu1 %v15756_v28  ;;  %v15823_v57 = vld [vmem:[#allocation6] ss:$16 sps:$4 sm:$0xff]   ;;  %v15825_v28 = vld [vmem:[#allocation6 + $0x4] ss:$16 sps:$4 sm:$0xff]  }
 0x82b   : > { %8766 = vmatpush1.bf16.msra.mxu0 %v15751_v41  ;;  %8809 = vmatpush1.bf16.msra.mxu1 %v15754_v30  ;;  %v15826_v41 = vld [vmem:[#allocation6 + $0x8] ss:$16 sps:$4 sm:$0xff]   ;;  %v15828_v30 = vld [vmem:[#allocation6 + $0xc] ss:$16 sps:$4 sm:$0xff]  }
 0x82c   : > { %8767 = vmatprep.subr.bf16.mxu0 %v15759_v32  ;;  %8810 = vmatprep.subr.bf16.mxu1 %v15762_v33  ;;  %v15829_v32 = vld [vmem:[#allocation6 + $0x20] ss:$16 sps:$4 sm:$0xff]   ;;  %v15831_v33 = vld [vmem:[#allocation6 + $0x24] ss:$16 sps:$4 sm:$0xff]  }
 0x82f   : > { %8768 = vmatpush1.bf16.msra.mxu0 %v15757_v36  ;;  %8811 = vmatpush1.bf16.msra.mxu1 %v15760_v37  ;;  %v15832_v36 = vld [vmem:[#allocation6 + $0x28] ss:$16 sps:$4 sm:$0xff]   ;;  %v15834_v37 = vld [vmem:[#allocation6 + $0x2c] ss:$16 sps:$4 sm:$0xff]  }
 0x830   : > { %8769 = vmatprep.subr.bf16.mxu0 %v15765_v60  ;;  %8812 = vmatprep.subr.bf16.mxu1 %v15768_v26  ;;  %v15837_v60 = vld [vmem:[#allocation6 + $0x44] ss:$16 sps:$4 sm:$0xff]   ;;  %v15840_v26 = vld [vmem:[#allocation6 + $0x4c] ss:$16 sps:$4 sm:$0xff]  }
 0x833   : > { %8770 = vmatpush1.bf16.msra.mxu0 %v15763_v39  ;;  %8813 = vmatpush1.bf16.msra.mxu1 %v15766_v40  ;;  %v15835_v39 = vld [vmem:[#allocation6 + $0x40] ss:$16 sps:$4 sm:$0xff]   ;;  %v15843_v40 = vld [vmem:[#allocation6 + $0x64] ss:$16 sps:$4 sm:$0xff]  }
 0x834   : > { %8771 = vmatprep.subr.bf16.mxu0 %v15771_v54  ;;  %8814 = vmatprep.subr.bf16.mxu1 %v15774_v43  ;;  %v15846_v54 = vld [vmem:[#allocation6 + $0x6c] ss:$16 sps:$4 sm:$0xff]   ;;  %v15841_v43 = vld [vmem:[#allocation6 + $0x60] ss:$16 sps:$4 sm:$0xff]  }
 0x837   : > { %8772 = vmatpush1.bf16.msra.mxu0 %v15769_v16  ;;  %8815 = vmatpush1.bf16.msra.mxu1 %v15772_v44  ;;  %v15844_v16 = vld [vmem:[#allocation6 + $0x68] ss:$16 sps:$4 sm:$0xff]   ;;  %v15849_v44 = vld [vmem:[#allocation6 + $0x84] ss:$16 sps:$4 sm:$0xff]  }
 0x838   : > { %9078 = vmatprep.subr.bf16.mxu0 %v15777_v4  ;;  %9121 = vmatprep.subr.bf16.mxu1 %v15780_v15  ;;  %v15852_v4 = vld [vmem:[#allocation6 + $0x8c] ss:$16 sps:$4 sm:$0xff]   ;;  %v15847_v15 = vld [vmem:[#allocation6 + $0x80] ss:$16 sps:$4 sm:$0xff]  }
 0x83a   : > { %8774 = vmatmul.mubr.bf16.vlgmr.msra.gmra.mrb[72].mxu0 %v19609_v13  ;;  %8817 = vmatmul.mubr.bf16.vlgmr.msra.gmra.mrb[72].mxu1 %v19609_v13 }
 0x83b   : > { %9079 = vmatpush1.bf16.msra.mxu0 %v15775_v47  ;;  %9122 = vmatpush1.bf16.msra.mxu1 %v15778_v58  ;;  %v15850_v47 = vld [vmem:[#allocation6 + $0x88] ss:$16 sps:$4 sm:$0xff]   ;;  %v15855_v58 = vld [vmem:[#allocation6 + $0xa4] ss:$16 sps:$4 sm:$0xff]  }
 0x83c   : > { %9080 = vmatprep.subr.bf16.mxu0 %v15783_v48  ;;  %9123 = vmatprep.subr.bf16.mxu1 %v15786_v0  ;;  %v15858_v48 = vld [vmem:[#allocation6 + $0xac] ss:$16 sps:$4 sm:$0xff]   ;;  %v15853_v0 = vld [vmem:[#allocation6 + $0xa0] ss:$16 sps:$4 sm:$0xff]  }
 0x83d   : > { %9110 = vmatprep.mubr.bf16.mxu0 %v17312_v2  ;;  %9153 = vmatprep.mubr.bf16.mxu1 %v17312_v2 }
 0x83f   : > { %9081 = vmatpush1.bf16.msra.mxu0 %v15781_v50  ;;  %9124 = vmatpush1.bf16.msra.mxu1 %v15784_v51  ;;  %v15856_v50 = vld [vmem:[#allocation6 + $0xa8] ss:$16 sps:$4 sm:$0xff]   ;;  %v15861_v51 = vld [vmem:[#allocation6 + $0xc4] ss:$16 sps:$4 sm:$0xff]  }
 0x840   : > { %9082 = vmatprep.subr.bf16.mxu0 %v15789_v52  ;;  %9125 = vmatprep.subr.bf16.mxu1 %v15792_v55  ;;  %v15864_v52 = vld [vmem:[#allocation6 + $0xcc] ss:$16 sps:$4 sm:$0xff]   ;;  %v15859_v55 = vld [vmem:[#allocation6 + $0xc0] ss:$16 sps:$4 sm:$0xff]  }
 0x843   : > { %9083 = vmatpush1.bf16.msra.mxu0 %v15787_v56  ;;  %9126 = vmatpush1.bf16.msra.mxu1 %v15790_v59  ;;  %v15862_v56 = vld [vmem:[#allocation6 + $0xc8] ss:$16 sps:$4 sm:$0xff]   ;;  %v15867_v59 = vld [vmem:[#allocation6 + $0xe4] ss:$16 sps:$4 sm:$0xff]  }
 0x844   : > { %9084 = vmatprep.subr.bf16.mxu0 %v15795_v19  ;;  %9127 = vmatprep.subr.bf16.mxu1 %v15798_v62  ;;  %v15870_v19 = vld [vmem:[#allocation6 + $0xec] ss:$16 sps:$4 sm:$0xff]   ;;  %v15865_v62 = vld [vmem:[#allocation6 + $0xe0] ss:$16 sps:$4 sm:$0xff]  }
 0x847   : > { %9085 = vmatpush1.bf16.msra.mxu0 %v15793_v38  ;;  %9128 = vmatpush1.bf16.msra.mxu1 %v15796_v63  ;;  %v15868_v38 = vld [vmem:[#allocation6 + $0xe8] ss:$16 sps:$4 sm:$0xff]   ;;  %v15873_v63 = vld [vmem:[#allocation6 + $0x104] ss:$16 sps:$4 sm:$0xff]  }
 0x848   : > { %9086 = vmatprep.subr.bf16.mxu0 %v15801_v21  ;;  %9129 = vmatprep.subr.bf16.mxu1 %v15804_v1  ;;  %v15876_v21 = vld [vmem:[#allocation6 + $0x10c] ss:$16 sps:$4 sm:$0xff]   ;;  %v15871_v1 = vld [vmem:[#allocation6 + $0x100] ss:$16 sps:$4 sm:$0xff]  }
 0x84b   : > { %9087 = vmatpush1.bf16.msra.mxu0 %v15799_v3  ;;  %9130 = vmatpush1.bf16.msra.mxu1 %v15802_v34  ;;  %v15874_v3 = vld [vmem:[#allocation6 + $0x108] ss:$16 sps:$4 sm:$0xff]   ;;  %v15879_v34 = vld [vmem:[#allocation6 + $0x124] ss:$16 sps:$4 sm:$0xff]  }
 0x84c   : > { %9088 = vmatprep.subr.bf16.mxu0 %v15807_v10  ;;  %9131 = vmatprep.subr.bf16.mxu1 %v15810_v12  ;;  %v15882_v10 = vld [vmem:[#allocation6 + $0x12c] ss:$16 sps:$4 sm:$0xff]   ;;  %v15877_v12 = vld [vmem:[#allocation6 + $0x120] ss:$16 sps:$4 sm:$0xff]  }
 0x84f   : > { %9089 = vmatpush1.bf16.msra.mxu0 %v15805_v31  ;;  %9132 = vmatpush1.bf16.msra.mxu1 %v15808_v46  ;;  %v15880_v31 = vld [vmem:[#allocation6 + $0x128] ss:$16 sps:$4 sm:$0xff]   ;;  %v15885_v46 = vld [vmem:[#allocation6 + $0x144] ss:$16 sps:$4 sm:$0xff]  }
 0x850   : > { %9090 = vmatprep.subr.bf16.mxu0 %v15813_v49  ;;  %9133 = vmatprep.subr.bf16.mxu1 %v15816_v14  ;;  %v15888_v49 = vld [vmem:[#allocation6 + $0x14c] ss:$16 sps:$4 sm:$0xff]   ;;  %v15883_v14 = vld [vmem:[#allocation6 + $0x140] ss:$16 sps:$4 sm:$0xff]  }
 0x853   : > { %9091 = vmatpush1.bf16.msra.mxu0 %v15811_v35  ;;  %9134 = vmatpush1.bf16.msra.mxu1 %v15814_v22  ;;  %v15886_v35 = vld [vmem:[#allocation6 + $0x148] ss:$16 sps:$4 sm:$0xff]   ;;  %v15891_v22 = vld [vmem:[#allocation6 + $0x164] ss:$16 sps:$4 sm:$0xff]  }
 0x854   : > { %9092 = vmatprep.subr.bf16.mxu0 %v15819_v23  ;;  %9135 = vmatprep.subr.bf16.mxu1 %v15822_v25  ;;  %v15894_v23 = vld [vmem:[#allocation6 + $0x16c] ss:$16 sps:$4 sm:$0xff]   ;;  %v15889_v25 = vld [vmem:[#allocation6 + $0x160] ss:$16 sps:$4 sm:$0xff]  }
 0x857   : > { %9093 = vmatpush1.bf16.msra.mxu0 %v15817_v42  ;;  %9136 = vmatpush1.bf16.msra.mxu1 %v15820_v27  ;;  %v15892_v42 = vld [vmem:[#allocation6 + $0x168] ss:$16 sps:$4 sm:$0xff]   ;;  %v15897_v27 = vld [vmem:[#allocation6 + $0x184] ss:$16 sps:$4 sm:$0xff]  }
 0x858   : > { %9628 = vmatprep.subr.bf16.mxu0 %v15825_v28  ;;  %9671 = vmatprep.subr.bf16.mxu1 %v15828_v30  ;;  %v15895_v28 = vld [vmem:[#allocation6 + $0x180] ss:$16 sps:$4 sm:$0xff]   ;;  %v15903_v30 = vld [vmem:[#allocation6 + $0x1a4] ss:$16 sps:$4 sm:$0xff]  }
 0x85a   : > { %9111 = vmatmul.mubr.bf16.vlgmr.msra.gmra.mrb[24].mxu0 %v19609_v13  ;;  %9154 = vmatmul.mubr.bf16.vlgmr.msra.gmra.mrb[24].mxu1 %v19609_v13  ;;  %v15838_v13 = vld [vmem:[#allocation6 + $0x48] ss:$16 sps:$4 sm:$0xff]  }
 0x85b   : > { %9629 = vmatpush1.bf16.msra.mxu0 %v15823_v57  ;;  %9672 = vmatpush1.bf16.msra.mxu1 %v15826_v41  ;;  %v15900_v57 = vld [vmem:[#allocation6 + $0x18c] ss:$16 sps:$4 sm:$0xff]   ;;  %v15898_v41 = vld [vmem:[#allocation6 + $0x188] ss:$16 sps:$4 sm:$0xff]  }
 0x85c   : > { %9630 = vmatprep.subr.bf16.mxu0 %v15831_v33  ;;  %9673 = vmatprep.subr.bf16.mxu1 %v15834_v37  ;;  %v15901_v33 = vld [vmem:[#allocation6 + $0x1a0] ss:$16 sps:$4 sm:$0xff]   ;;  %v15909_v37 = vld [vmem:[#allocation6 + $0x1c4] ss:$16 sps:$4 sm:$0xff]  }
 0x85f   : > { %9631 = vmatpush1.bf16.msra.mxu0 %v15829_v32  ;;  %9674 = vmatpush1.bf16.msra.mxu1 %v15832_v36  ;;  %v15906_v32 = vld [vmem:[#allocation6 + $0x1ac] ss:$16 sps:$4 sm:$0xff]   ;;  %v15904_v36 = vld [vmem:[#allocation6 + $0x1a8] ss:$16 sps:$4 sm:$0xff]  }
 0x860   : > { %9632 = vmatprep.subr.bf16.mxu0 %v15837_v60  ;;  %9675 = vmatprep.subr.bf16.mxu1 %v15840_v26  ;;  %v15912_v60 = vld [vmem:[#allocation6 + $0x1cc] ss:$16 sps:$4 sm:$0xff]   ;;  %v15907_v26 = vld [vmem:[#allocation6 + $0x1c0] ss:$16 sps:$4 sm:$0xff]  }
 0x863   : > { %9633 = vmatpush1.bf16.msra.mxu0 %v15835_v39  ;;  %9676 = vmatpush1.bf16.msra.mxu1 %v15838_v13  ;;  %v15910_v39 = vld [vmem:[#allocation6 + $0x1c8] ss:$16 sps:$4 sm:$0xff]   ;;  %v15915_v13 = vld [vmem:[#allocation6 + $0x1e4] ss:$16 sps:$4 sm:$0xff]  }
 0x864   : > { %9634 = vmatprep.subr.bf16.mxu0 %v15843_v40  ;;  %9677 = vmatprep.subr.bf16.mxu1 %v15846_v54  ;;  %v15918_v40 = vld [vmem:[#allocation6 + $0x1ec] ss:$16 sps:$4 sm:$0xff]   ;;  %v15913_v54 = vld [vmem:[#allocation6 + $0x1e0] ss:$16 sps:$4 sm:$0xff]  }
 0x867   : > { %9635 = vmatpush1.bf16.msra.mxu0 %v15841_v43  ;;  %9678 = vmatpush1.bf16.msra.mxu1 %v15844_v16  ;;  %v15916_v43 = vld [vmem:[#allocation6 + $0x1e8] ss:$16 sps:$4 sm:$0xff]   ;;  %v15921_v16 = vld [vmem:[%s20622_s6 + $0x4] ss:$16 sps:$4 sm:$0xff]  }
 0x868   : > { %9636 = vmatprep.subr.bf16.mxu0 %v15849_v44  ;;  %9679 = vmatprep.subr.bf16.mxu1 %v15852_v4  ;;  %v15924_v44 = vld [vmem:[%s20622_s6 + $0xc] ss:$16 sps:$4 sm:$0xff]   ;;  %v7856_v4 = vld [vmem:[%s20670_s24] sm:$0xf] }
 0x86b   : > { %9637 = vmatpush1.bf16.msra.mxu0 %v15847_v15  ;;  %9680 = vmatpush1.bf16.msra.mxu1 %v15850_v47  ;;  %v7861_v15 = vrot.slane %v7856_v4, %v17944_v6  ;;  %v7865_v47 = vrot.slane %v7856_v4, %v17946_v7 }
 0x86c   : > { %9638 = vmatprep.subr.bf16.mxu0 %v15855_v58  ;;  %9681 = vmatprep.subr.bf16.mxu1 %v15858_v48 }
 0x86f   : > { %9639 = vmatpush1.bf16.msra.mxu0 %v15853_v0  ;;  %9682 = vmatpush1.bf16.msra.mxu1 %v15856_v50 }
 0x870   : > { %9640 = vmatprep.subr.bf16.mxu0 %v15861_v51  ;;  %9683 = vmatprep.subr.bf16.mxu1 %v15864_v52 }
 0x873   : > { %9641 = vmatpush1.bf16.msra.mxu0 %v15859_v55  ;;  %9684 = vmatpush1.bf16.msra.mxu1 %v15862_v56 }
 0x874   : > { %9642 = vmatprep.subr.bf16.mxu0 %v15867_v59  ;;  %9685 = vmatprep.subr.bf16.mxu1 %v15870_v19 }
 0x877   : > { %9643 = vmatpush1.bf16.msra.mxu0 %v15865_v62  ;;  %9686 = vmatpush1.bf16.msra.mxu1 %v15868_v38 }
 0x878   : > { %9644 = vmatprep.subr.bf16.mxu0 %v15873_v63  ;;  %9687 = vmatprep.subr.bf16.mxu1 %v15876_v21  ;;  %v7869_v63 = vrot.slane %v7856_v4, %v17954_v11 }
 0x87b   : > { %9645 = vmatpush1.bf16.msra.mxu0 %v15871_v1  ;;  %9688 = vmatpush1.bf16.msra.mxu1 %v15874_v3 }
 0x87c   : > { %9646 = vmatprep.subr.bf16.mxu0 %v15879_v34  ;;  %9689 = vmatprep.subr.bf16.mxu1 %v15882_v10  ;;  %v7873_v10 = vrot.slane %v7856_v4, %v17958_v20 }
 0x87f   : > { %9647 = vmatpush1.bf16.msra.mxu0 %v15877_v12  ;;  %9690 = vmatpush1.bf16.msra.mxu1 %v15880_v31 }
 0x880   : > { %9648 = vmatprep.subr.bf16.mxu0 %v15885_v46  ;;  %9691 = vmatprep.subr.bf16.mxu1 %v15888_v49 }
 0x883   : > { %9649 = vmatpush1.bf16.msra.mxu0 %v15883_v14  ;;  %9692 = vmatpush1.bf16.msra.mxu1 %v15886_v35 }
 0x884   : > { %9650 = vmatprep.subr.bf16.mxu0 %v15891_v22  ;;  %9693 = vmatprep.subr.bf16.mxu1 %v15894_v23 }
 0x887   : > { %9651 = vmatpush1.bf16.msra.mxu0 %v15889_v25  ;;  %9694 = vmatpush1.bf16.msra.mxu1 %v15892_v42 }
 0x888   : > { %9652 = vmatprep.subr.bf16.mxu0 %v15897_v27  ;;  %9695 = vmatprep.subr.bf16.mxu1 %v15900_v57 }
 0x88b   : > { %9653 = vmatpush1.bf16.msra.mxu0 %v15895_v28  ;;  %9696 = vmatpush1.bf16.msra.mxu1 %v15898_v41 }
 0x88c   : > { %9654 = vmatprep.subr.bf16.mxu0 %v15903_v30  ;;  %9697 = vmatprep.subr.bf16.mxu1 %v15906_v32 }
 0x88f   : > { %9655 = vmatpush1.bf16.msra.mxu0 %v15901_v33  ;;  %9698 = vmatpush1.bf16.msra.mxu1 %v15904_v36 }
 0x890   : > { %9656 = vmatprep.subr.bf16.mxu0 %v15909_v37  ;;  %9699 = vmatprep.subr.bf16.mxu1 %v15912_v60 }
 0x893   : > { %9657 = vmatpush1.bf16.msra.mxu0 %v15907_v26  ;;  %9700 = vmatpush1.bf16.msra.mxu1 %v15910_v39 }
 0x894   : > { %9658 = vmatprep.subr.bf16.mxu0 %v15915_v13  ;;  %9701 = vmatprep.subr.bf16.mxu1 %v15918_v40 }
 0x897   : > { %9659 = vmatpush1.bf16.msra.mxu0 %v15913_v54  ;;  %9702 = vmatpush1.bf16.msra.mxu1 %v15916_v43 }
 0x898   : > { %10171 = vmatprep.subr.bf16.mxu0 %v15921_v16  ;;  %10214 = vmatprep.subr.bf16.mxu1 %v15924_v44 }
 0x8cd   : > { %v8232_v58 = vpop.f32.mrb[68].mxu0  ;;  %v8275_v48 = vpop.f32.mrb[68].mxu1 }
 0x8ce   : > { %v8233_v0 = vadd.f32 %v8232_v58, %v7861_v15  ;;  %v8234_v50 = vpop.f32.mrb[69].mxu0  ;;  %v8277_v51 = vpop.f32.mrb[69].mxu1  ;;  %v8276_v12 = vadd.f32 %v8275_v48, %v7869_v63 }
 0x8cf   : > { %v8235_v52 = vadd.f32 %v8234_v50, %v7865_v47  ;;  %v8236_v55 = vpop.f32.mrb[70].mxu0  ;;  %v8279_v56 = vpop.f32.mrb[70].mxu1  ;;  %v8278_v46 = vadd.f32 %v8277_v51, %v7873_v10 }
 0x8d0   : > { %v13704_v59 = vmul.f32 -1.442695, %v8233_v0  ;;  %v8237_v19 = vadd.f32 %v8236_v55, %v7861_v15  ;;  %v8238_v62 = vpop.f32.mrb[71].mxu0  ;;  %v8281_v38 = vpop.f32.mrb[71].mxu1  ;;  %v8280_v31 = vadd.f32 %v8279_v56, %v7869_v63  ;;  %v13706_v49 = vmul.f32 -1.442695, %v8276_v12 }
 0x8d1   : > { %v13705_v21 = vmul.f32 -1.442695, %v8235_v52  ;;  %v8239_v1 = vadd.f32 %v8238_v62, %v7865_v47  ;;  %v8282_v22 = vadd.f32 %v8281_v38, %v7873_v10 }
 0x8d2   : > { %16831 = vpow2.f32 %v13704_v59  ;;  %v13707_v3 = vmul.f32 -1.442695, %v8237_v19  ;;  %v13709_v14 = vmul.f32 -1.442695, %v8280_v31 }
 0x8d3   : > { %v13708_v34 = vmul.f32 -1.442695, %v8239_v1  ;;  %16833 = vpow2.f32 %v13705_v21 }
 0x8d4   : > { %16835 = vpow2.f32 %v13707_v3 }
 0x8d5   : > { %16837 = vpow2.f32 %v13708_v34 }
 0x8d6   : > { %16839 = vtanh.f32 %v8278_v46 }
 0x8d7   : > { %16841 = vpow2.f32 %v13706_v49 }
 0x8d8   : > { %16843 = vpow2.f32 %v13709_v14 }
 0x8dc   : > { %v16832_v35 = vpop.eup %16831 }
 0x8dd   : > { %v8302_v23 = vadd.f32 1.0, %v16832_v35  ;;  %v16834_v25 = vpop.eup %16833 }
 0x8de   : > { %v16836_v42 = vpop.eup %16835  ;;  %v8303_v27 = vadd.f32 1.0, %v16834_v25 }
 0x8df   : > { %16845 = vrcp.f32 %v8302_v23  ;;  %v8305_v57 = vadd.f32 1.0, %v16836_v42  ;;  %v16838_v28 = vpop.eup %16837 }
 0x8e0   : > { %16847 = vtanh.f32 %v8282_v22  ;;  %v8306_v41 = vadd.f32 1.0, %v16838_v28  ;;  %v16840_v30 = vpop.eup %16839 }
 0x8e1   : > { %16849 = vrcp.f32 %v8303_v27  ;;  %v16842_v32 = vpop.eup %16841 }
 0x8e2   : > { %16851 = vrcp.f32 %v8305_v57  ;;  %v16844_v33 = vpop.eup %16843  ;;  %v8304_v13 = vadd.f32 1.0, %v16842_v32 }
 0x8e3   : > { %16853 = vrcp.f32 %v8306_v41  ;;  %v8307_v44 = vadd.f32 1.0, %v16844_v33 }
 0x8e4   : > { %16855 = vrcp.f32 %v8304_v13 }
 0x8e9   : > { %v16846_v36 = vpop.eup %16845 }
 0x8ea   : > { %v16848_v37 = vpop.eup %16847  ;;  %v8324_v60 = vmul.f32 %v16846_v36, %v16840_v30 }
 0x8eb   : > { %v16850_v26 = vpop.eup %16849 }
 0x8ec   : > { %v16852_v39 = vpop.eup %16851  ;;  %v8322_v40 = vmul.f32 %v16850_v26, %v19463_v61 }
 0x8ed   : > { %v8325_v54 = vmul.f32 %v16852_v39, %v16848_v37  ;;  %v16854_v43 = vpop.eup %16853 }
 0x8ee   : > { %v19805_v16 = vadd.f32 %v8324_v60, %v8322_v40  ;;  %v8323_v4 = vmul.f32 %v16854_v43, %v19467_v5  ;;  %v16856_v47 = vpop.eup %16855  ;;  %v8399_v5 = vld [vmem:[%s20669_s14] sm:$0xf] }
 0x8ef   : > { %v8404_v52 = vrot.slane %v8399_v5, %v17944_v6  ;;  %v8408_v55 = vrot.slane %v8399_v5, %v17946_v7  ;;  %v8412_v31 = vrot.slane %v8399_v5, %v17954_v11  ;;  %v8416_v22 = vrot.slane %v8399_v5, %v17958_v20 }
 0x8f0   : > { %16857 = vtanh.f32 %v19805_v16  ;;  %v19809_v15 = vadd.f32 %v8325_v54, %v8323_v4 }
 0x8f1   : > { %16859 = vrcp.f32 %v8307_v44 }
 0x8f2   : > { %16861 = vtanh.f32 %v19809_v15 }
 0x8fa   : > { %v16858_v58 = vpop.eup %16857 }
 0x8fb   : > { %v16860_v48 = vpop.eup %16859  ;;  %v8330_v61 = vmul.f32 %v16858_v58, %v16856_v47 }
 0x8fc   : > { %v16862_v0 = vpop.eup %16861 }
 0x8fd   : > { %v8331_v50 = vmul.f32 %v16862_v0, %v16860_v48 }
 0x8ff   : > { %v8332_v51 = vpack.c.bf16 %v8331_v50, %v8330_v61 }
 0x901   : > { %8334 = vst [vmem:[#allocation3 + $0x20] sm:$0xff] %v8332_v51  ;;  %9660 = vmatprep.mubr.bf16.mxu0 %v8332_v51  ;;  %9703 = vmatprep.mubr.bf16.mxu1 %v8332_v51 }
 0x90d   : > { %v8775_v56 = vpop.f32.mrb[72].mxu0  ;;  %v8818_v59 = vpop.f32.mrb[72].mxu1 }
 0x90e   : > { %v8776_v19 = vadd.f32 %v8775_v56, %v8404_v52  ;;  %v8777_v62 = vpop.f32.mrb[73].mxu0  ;;  %v8820_v38 = vpop.f32.mrb[73].mxu1  ;;  %v8819_v23 = vadd.f32 %v8818_v59, %v8412_v31 }
 0x90f   : > { %v8778_v63 = vadd.f32 %v8777_v62, %v8408_v55  ;;  %v8779_v21 = vpop.f32.mrb[74].mxu0  ;;  %v8822_v1 = vpop.f32.mrb[74].mxu1  ;;  %v8821_v42 = vadd.f32 %v8820_v38, %v8416_v22 }
 0x910   : > { %v13774_v3 = vmul.f32 -1.442695, %v8776_v19  ;;  %v8780_v34 = vadd.f32 %v8779_v21, %v8404_v52  ;;  %v8781_v10 = vpop.f32.mrb[75].mxu0  ;;  %v8824_v12 = vpop.f32.mrb[75].mxu1  ;;  %v8823_v25 = vadd.f32 %v8822_v1, %v8412_v31  ;;  %v13776_v27 = vmul.f32 -1.442695, %v8819_v23 }
 0x911   : > { %v13775_v46 = vmul.f32 -1.442695, %v8778_v63  ;;  %v8782_v49 = vadd.f32 %v8781_v10, %v8408_v55  ;;  %v8825_v41 = vadd.f32 %v8824_v12, %v8416_v22 }
 0x912   : > { %16863 = vpow2.f32 %v13774_v3  ;;  %v13777_v14 = vmul.f32 -1.442695, %v8780_v34  ;;  %v13779_v57 = vmul.f32 -1.442695, %v8823_v25 }
 0x913   : > { %v13778_v35 = vmul.f32 -1.442695, %v8782_v49  ;;  %16865 = vpow2.f32 %v13775_v46 }
 0x914   : > { %16867 = vpow2.f32 %v13777_v14 }
 0x915   : > { %16869 = vpow2.f32 %v13778_v35 }
 0x916   : > { %16871 = vtanh.f32 %v8821_v42 }
 0x917   : > { %16873 = vpow2.f32 %v13776_v27 }
 0x918   : > { %16875 = vpow2.f32 %v13779_v57 }
 0x91c   : > { %v16864_v28 = vpop.eup %16863 }
 0x91d   : > { %v8845_v30 = vadd.f32 1.0, %v16864_v28  ;;  %v16866_v32 = vpop.eup %16865 }
 0x91e   : > { %v16868_v33 = vpop.eup %16867  ;;  %v8846_v36 = vadd.f32 1.0, %v16866_v32 }
 0x91f   : > { %16877 = vrcp.f32 %v8845_v30  ;;  %v8848_v37 = vadd.f32 1.0, %v16868_v33  ;;  %v16870_v60 = vpop.eup %16869 }
 0x920   : > { %16879 = vtanh.f32 %v8825_v41  ;;  %v8849_v26 = vadd.f32 1.0, %v16870_v60  ;;  %v16872_v39 = vpop.eup %16871 }
 0x921   : > { %16881 = vrcp.f32 %v8846_v36  ;;  %v16874_v13 = vpop.eup %16873  ;;  %v15919_v36 = vld [vmem:[%s20622_s6] ss:$16 sps:$4 sm:$0xff]  }
 0x922   : > { %16883 = vrcp.f32 %v8848_v37  ;;  %v16876_v40 = vpop.eup %16875  ;;  %v8847_v47 = vadd.f32 1.0, %v16874_v13  ;;  %v15922_v37 = vld [vmem:[%s20622_s6 + $0x8] ss:$16 sps:$4 sm:$0xff]  }
 0x923   : > { %16885 = vrcp.f32 %v8849_v26  ;;  %v8850_v0 = vadd.f32 1.0, %v16876_v40  ;;  %v15927_v40 = vld [vmem:[%s20622_s6 + $0x24] ss:$16 sps:$4 sm:$0xff]  }
 0x924   : > { %16887 = vrcp.f32 %v8847_v47  ;;  %v15928_v47 = vld [vmem:[%s20622_s6 + $0x28] ss:$16 sps:$4 sm:$0xff]  }
 0x925   : > { %16889 = vrcp.f32 %v8850_v0 }
 0x929   : > { %v16878_v54 = vpop.eup %16877 }
 0x92a   : > { %v16880_v43 = vpop.eup %16879  ;;  %v8867_v44 = vmul.f32 %v16878_v54, %v16872_v39  ;;  %v15930_v54 = vld [vmem:[%s20622_s6 + $0x2c] ss:$16 sps:$4 sm:$0xff]  }
 0x92b   : > { %v16882_v4 = vpop.eup %16881 }
 0x92c   : > { %v16884_v58 = vpop.eup %16883  ;;  %v8865_v48 = vmul.f32 %v16882_v4, %v19478_v17  ;;  %v15925_v4 = vld [vmem:[%s20622_s6 + $0x20] ss:$16 sps:$4 sm:$0xff]  }
 0x92d   : > { %v8868_v61 = vmul.f32 %v16884_v58, %v16880_v43  ;;  %v9112_v50 = vpop.f32.mrb[24].mxu0  ;;  %v9155_v51 = vpop.f32.mrb[24].mxu1  ;;  %v15933_v58 = vld [vmem:[%s20622_s6 + $0x44] ss:$16 sps:$4 sm:$0xff]  }
 0x92e   : > { %v16886_v5 = vpop.eup %16885  ;;  %v19820_v52 = vadd.f32 %v8867_v44, %v8865_v48  ;;  %v14261_v55 = vadd.f32 %v9112_v50, %v17949_v8  ;;  %v9114_v56 = vpop.f32.mrb[25].mxu0  ;;  %v14293_v46 = vadd.f32 %v9155_v51, %v17962_v24  ;;  %v15936_v48 = vld [vmem:[%s20622_s6 + $0x4c] ss:$16 sps:$4 sm:$0xff]   ;;  %v15934_v50 = vld [vmem:[%s20622_s6 + $0x48] ss:$16 sps:$4 sm:$0xff]  }
 0x92f   : > { %v9157_v59 = vpop.f32.mrb[25].mxu1  ;;  %v8866_v19 = vmul.f32 %v16886_v5, %v19485_v53  ;;  %v14262_v62 = vadd.f32 %v9114_v56, %v17952_v9  ;;  %v9116_v38 = vpop.f32.mrb[26].mxu0  ;;  %v15939_v5 = vld [vmem:[%s20622_s6 + $0x64] ss:$16 sps:$4 sm:$0xff]  }
 0x930   : > { %v9159_v63 = vpop.f32.mrb[26].mxu1  ;;  %v13812_v17 = vmul.f32 -1.442695, %v14261_v55  ;;  %v14263_v21 = vadd.f32 %v9116_v38, %v17949_v8  ;;  %v9118_v1 = vpop.f32.mrb[27].mxu0  ;;  %16891 = vtanh.f32 %v19820_v52  ;;  %v14294_v35 = vadd.f32 %v9157_v59, %v17966_v29  ;;  %v15942_v55 = vld [vmem:[%s20622_s6 + $0x6c] ss:$16 sps:$4 sm:$0xff]  }
 0x931   : > { %v9161_v3 = vpop.f32.mrb[27].mxu1  ;;  %v19827_v34 = vadd.f32 %v8868_v61, %v8866_v19  ;;  %v13813_v10 = vmul.f32 -1.442695, %v14262_v62  ;;  %v14264_v31 = vadd.f32 %v9118_v1, %v17952_v9  ;;  %v14295_v49 = vadd.f32 %v9159_v63, %v17962_v24  ;;  %v16888_v14 = vpop.eup %16887  ;;  %v15931_v61 = vld [vmem:[%s20622_s6 + $0x40] ss:$16 sps:$4 sm:$0xff]  }
 0x932   : > { %16893 = vpow2.f32 %v13812_v17  ;;  %v13815_v12 = vmul.f32 -1.442695, %v14263_v21  ;;  %v16890_v22 = vpop.eup %16889  ;;  %v13814_v23 = vmul.f32 -1.442695, %v14293_v46  ;;  %v14296_v41 = vadd.f32 %v9161_v3, %v17966_v29  ;;  %v15937_v38 = vld [vmem:[%s20622_s6 + $0x60] ss:$16 sps:$4 sm:$0xff]  }
 0x933   : > { %16895 = vtanh.f32 %v19827_v34  ;;  %v13816_v53 = vmul.f32 -1.442695, %v14264_v31  ;;  %v13817_v27 = vmul.f32 -1.442695, %v14295_v49  ;;  %v15940_v63 = vld [vmem:[%s20622_s6 + $0x68] ss:$16 sps:$4 sm:$0xff]  }
 0x934   : > { %16897 = vpow2.f32 %v13813_v10  ;;  %v15945_v21 = vld [vmem:[%s20622_s6 + $0x84] ss:$16 sps:$4 sm:$0xff]   ;;  %v15948_v1 = vld [vmem:[%s20622_s6 + $0x8c] ss:$16 sps:$4 sm:$0xff]  }
 0x935   : > { %16899 = vpow2.f32 %v13815_v12 }
 0x936   : > { %16901 = vpow2.f32 %v13816_v53 }
 0x937   : > { %16903 = vtanh.f32 %v14294_v35  ;;  %v15946_v35 = vld [vmem:[%s20622_s6 + $0x88] ss:$16 sps:$4 sm:$0xff]  }
 0x938   : > { %16905 = vpow2.f32 %v13814_v23  ;;  %v15954_v23 = vld [vmem:[%s20622_s6 + $0xac] ss:$16 sps:$4 sm:$0xff]  }
 0x93a   : > { %v16892_v25 = vpop.eup %16891 }
 0x93b   : > { %v8873_v30 = vmul.f32 %v16892_v25, %v16888_v14  ;;  %v15943_v14 = vld [vmem:[%s20622_s6 + $0x80] ss:$16 sps:$4 sm:$0xff]  }
 0x93c   : > { %v16894_v42 = vpop.eup %16893 }
 0x93d   : > { %v16896_v57 = vpop.eup %16895  ;;  %v9190_v28 = vadd.f32 1.0, %v16894_v42  ;;  %v15952_v42 = vld [vmem:[%s20622_s6 + $0xa8] ss:$16 sps:$4 sm:$0xff]  }
 0x93e   : > { %v8874_v32 = vmul.f32 %v16896_v57, %v16890_v22  ;;  %v16898_v33 = vpop.eup %16897  ;;  %v15960_v57 = vld [vmem:[%s20622_s6 + $0xcc] ss:$16 sps:$4 sm:$0xff]  }
 0x93f   : > { %16907 = vrcp.f32 %v9190_v28  ;;  %v16900_v60 = vpop.eup %16899  ;;  %v9191_v26 = vadd.f32 1.0, %v16898_v33  ;;  %v15955_v28 = vld [vmem:[%s20622_s6 + $0xc0] ss:$16 sps:$4 sm:$0xff]  }
 0x940   : > { %16909 = vpow2.f32 %v13817_v27  ;;  %v9221_v39 = vpack.c.bf16 %v8874_v32, %v8873_v30  ;;  %v9193_v13 = vadd.f32 1.0, %v16900_v60  ;;  %v16902_v43 = vpop.eup %16901  ;;  %v15957_v27 = vld [vmem:[%s20622_s6 + $0xc4] ss:$16 sps:$4 sm:$0xff]   ;;  %v15966_v32 = vld [vmem:[%s20622_s6 + $0xec] ss:$16 sps:$4 sm:$0xff]  }
 0x941   : > { %16911 = vtanh.f32 %v14296_v41  ;;  %v9194_v44 = vadd.f32 1.0, %v16902_v43  ;;  %v16904_v0 = vpop.eup %16903  ;;  %v15958_v41 = vld [vmem:[%s20622_s6 + $0xc8] ss:$16 sps:$4 sm:$0xff]   ;;  %v15963_v30 = vld [vmem:[%s20622_s6 + $0xe4] ss:$16 sps:$4 sm:$0xff]  }
 0x942   : > { %16913 = vrcp.f32 %v9191_v26  ;;  %9661 = vmatmul.mubr.bf16.vlgmr.msra.gmra.mrb[76].mxu0 %v9221_v39  ;;  %9704 = vmatmul.mubr.bf16.vlgmr.msra.gmra.mrb[76].mxu1 %v9221_v39  ;;  %v16906_v51 = vpop.eup %16905  ;;  %v15969_v26 = vld [vmem:[%s20622_s6 + $0x104] ss:$16 sps:$4 sm:$0xff]   ;;  %v15970_v43 = vld [vmem:[%s20622_s6 + $0x108] ss:$16 sps:$4 sm:$0xff]  }
 0x943   : > { %16915 = vrcp.f32 %v9193_v13  ;;  %10172 = vmatpush1.bf16.msra.mxu0 %v15919_v36  ;;  %10215 = vmatpush1.bf16.msra.mxu1 %v15922_v37  ;;  %v9192_v10 = vadd.f32 1.0, %v16906_v51  ;;  %v15961_v36 = vld [vmem:[%s20622_s6 + $0xe0] ss:$16 sps:$4 sm:$0xff]   ;;  %v15964_v37 = vld [vmem:[%s20622_s6 + $0xe8] ss:$16 sps:$4 sm:$0xff]  }
 0x944   : > { %10203 = vmatprep.mubr.bf16.mxu0 %v9221_v39  ;;  %10246 = vmatprep.mubr.bf16.mxu1 %v9221_v39  ;;  %16917 = vrcp.f32 %v9194_v44  ;;  %v15972_v39 = vld [vmem:[%s20622_s6 + $0x10c] ss:$16 sps:$4 sm:$0xff]  }
 0x945   : > { %10173 = vmatprep.subr.bf16.mxu0 %v15927_v40  ;;  %10216 = vmatprep.subr.bf16.mxu1 %v15930_v54  ;;  %16919 = vrcp.f32 %v9192_v10  ;;  %v15967_v54 = vld [vmem:[%s20622_s6 + $0x100] ss:$16 sps:$4 sm:$0xff]   ;;  %v15984_v51 = vld [vmem:[%s20622_s6 + $0x14c] ss:$16 sps:$4 sm:$0xff]  }
 0x946   : > { %v15997_v10 = vld [vmem:[%s20622_s6 + $0x1a0] ss:$16 sps:$4 sm:$0xff]  }
 0x947   : > { %10174 = vmatpush1.bf16.msra.mxu0 %v15925_v4  ;;  %10217 = vmatpush1.bf16.msra.mxu1 %v15928_v47  ;;  %v15975_v47 = vld [vmem:[%s20622_s6 + $0x124] ss:$16 sps:$4 sm:$0xff]  }
 0x948   : > { %10175 = vmatprep.subr.bf16.mxu0 %v15933_v58  ;;  %10218 = vmatprep.subr.bf16.mxu1 %v15936_v48  ;;  %v15978_v58 = vld [vmem:[%s20622_s6 + $0x12c] ss:$16 sps:$4 sm:$0xff]  }
 0x949   : > { %v16908_v56 = vpop.eup %16907 }
 0x94a   : > { %v16910_v59 = vpop.eup %16909  ;;  %v9212_v19 = vmul.f32 %v16908_v56, %v16904_v0  ;;  %v15973_v0 = vld [vmem:[%s20622_s6 + $0x120] ss:$16 sps:$4 sm:$0xff]   ;;  %v15987_v56 = vld [vmem:[%s20622_s6 + $0x164] ss:$16 sps:$4 sm:$0xff]  }
 0x94b   : > { %v16912_v62 = vpop.eup %16911  ;;  %10176 = vmatpush1.bf16.msra.mxu0 %v15931_v61  ;;  %10219 = vmatpush1.bf16.msra.mxu1 %v15934_v50  ;;  %v9195_v49 = vadd.f32 1.0, %v16910_v59  ;;  %v15976_v61 = vld [vmem:[%s20622_s6 + $0x128] ss:$16 sps:$4 sm:$0xff]   ;;  %v15981_v50 = vld [vmem:[%s20622_s6 + $0x144] ss:$16 sps:$4 sm:$0xff]  }
 0x94c   : > { %v16914_v17 = vpop.eup %16913  ;;  %10177 = vmatprep.subr.bf16.mxu0 %v15939_v5  ;;  %10220 = vmatprep.subr.bf16.mxu1 %v15942_v55  ;;  %v15979_v5 = vld [vmem:[%s20622_s6 + $0x140] ss:$16 sps:$4 sm:$0xff]   ;;  %v15982_v55 = vld [vmem:[%s20622_s6 + $0x148] ss:$16 sps:$4 sm:$0xff]   ;;  %v15990_v59 = vld [vmem:[%s20622_s6 + $0x16c] ss:$16 sps:$4 sm:$0xff]  }
 0x94d   : > { %v16916_v3 = vpop.eup %16915  ;;  %v9210_v12 = vmul.f32 %v16914_v17, %v19542_v18  ;;  %v15951_v18 = vld [vmem:[%s20622_s6 + $0xa4] ss:$16 sps:$4 sm:$0xff]   ;;  %v15991_v17 = vld [vmem:[%s20622_s6 + $0x180] ss:$16 sps:$4 sm:$0xff]  }
 0x94e   : > { %v9213_v31 = vmul.f32 %v16916_v3, %v16912_v62  ;;  %v16918_v53 = vpop.eup %16917  ;;  %v15988_v62 = vld [vmem:[%s20622_s6 + $0x168] ss:$16 sps:$4 sm:$0xff]   ;;  %v16002_v3 = vld [vmem:[%s20622_s6 + $0x1ac] ss:$16 sps:$4 sm:$0xff]  }
 0x94f   : > { %v19884_v46 = vadd.f32 %v9212_v19, %v9210_v12  ;;  %10178 = vmatpush1.bf16.msra.mxu0 %v15937_v38  ;;  %10221 = vmatpush1.bf16.msra.mxu1 %v15940_v63  ;;  %v9211_v22 = vmul.f32 %v16918_v53, %v19558_v45  ;;  %v15949_v45 = vld [vmem:[%s20622_s6 + $0xa0] ss:$16 sps:$4 sm:$0xff]   ;;  %v16920_v33 = vpop.eup %16919  ;;  %v15993_v38 = vld [vmem:[%s20622_s6 + $0x184] ss:$16 sps:$4 sm:$0xff]   ;;  %v15996_v63 = vld [vmem:[%s20622_s6 + $0x18c] ss:$16 sps:$4 sm:$0xff]  }
 0x950   : > { %10179 = vmatprep.subr.bf16.mxu0 %v15945_v21  ;;  %10222 = vmatprep.subr.bf16.mxu1 %v15948_v1  ;;  %v15985_v19 = vld [vmem:[%s20622_s6 + $0x160] ss:$16 sps:$4 sm:$0xff]   ;;  %v15994_v21 = vld [vmem:[%s20622_s6 + $0x188] ss:$16 sps:$4 sm:$0xff]   ;;  %v15999_v1 = vld [vmem:[%s20622_s6 + $0x1a4] ss:$16 sps:$4 sm:$0xff]  }
 0x951   : > { %16921 = vtanh.f32 %v19884_v46  ;;  %v19900_v25 = vadd.f32 %v9213_v31, %v9211_v22  ;;  %v16000_v12 = vld [vmem:[%s20622_s6 + $0x1a8] ss:$16 sps:$4 sm:$0xff]   ;;  %v16005_v31 = vld [vmem:[%s20622_s6 + $0x1c4] ss:$16 sps:$4 sm:$0xff]   ;;  %v16008_v53 = vld [vmem:[%s20622_s6 + $0x1cc] ss:$16 sps:$4 sm:$0xff]  }
 0x952   : > { %16923 = vrcp.f32 %v9195_v49  ;;  %v16003_v49 = vld [vmem:[%s20622_s6 + $0x1c0] ss:$16 sps:$4 sm:$0xff]   ;;  %v16014_v22 = vld [vmem:[%s20622_s6 + $0x1ec] ss:$16 sps:$4 sm:$0xff]  }
 0x953   : > { %10180 = vmatpush1.bf16.msra.mxu0 %v15943_v14  ;;  %10223 = vmatpush1.bf16.msra.mxu1 %v15946_v35  ;;  %16925 = vtanh.f32 %v19900_v25  ;;  %v16006_v14 = vld [vmem:[%s20622_s6 + $0x1c8] ss:$16 sps:$4 sm:$0xff]   ;;  %v16011_v35 = vld [vmem:[%s20622_s6 + $0x1e4] ss:$16 sps:$4 sm:$0xff]  }
 0x954   : > { %10181 = vmatprep.subr.bf16.mxu0 %v15951_v18  ;;  %10224 = vmatprep.subr.bf16.mxu1 %v15954_v23  ;;  %v16009_v18 = vld [vmem:[%s20622_s6 + $0x1e0] ss:$16 sps:$4 sm:$0xff]   ;;  %v16012_v23 = vld [vmem:[%s20622_s6 + $0x1e8] ss:$16 sps:$4 sm:$0xff]  }
 0x957   : > { %10182 = vmatpush1.bf16.msra.mxu0 %v15949_v45  ;;  %10225 = vmatpush1.bf16.msra.mxu1 %v15952_v42  ;;  %v16017_v45 = vld [vmem:[%s20620_s4 + $0x4] ss:$16 sps:$4 sm:$0xff]   ;;  %v16020_v42 = vld [vmem:[%s20620_s4 + $0xc] ss:$16 sps:$4 sm:$0xff]  }
 0x958   : > { %10183 = vmatprep.subr.bf16.mxu0 %v15957_v27  ;;  %10226 = vmatprep.subr.bf16.mxu1 %v15960_v57  ;;  %v16015_v27 = vld [vmem:[%s20620_s4] ss:$16 sps:$4 sm:$0xff]   ;;  %v16018_v57 = vld [vmem:[%s20620_s4 + $0x8] ss:$16 sps:$4 sm:$0xff]  }
 0x95b   : > { %10184 = vmatpush1.bf16.msra.mxu0 %v15955_v28  ;;  %10227 = vmatpush1.bf16.msra.mxu1 %v15958_v41  ;;  %v16922_v60 = vpop.eup %16921  ;;  %v16023_v28 = vld [vmem:[%s20620_s4 + $0x24] ss:$16 sps:$4 sm:$0xff]   ;;  %v16026_v41 = vld [vmem:[%s20620_s4 + $0x2c] ss:$16 sps:$4 sm:$0xff]  }
 0x95c   : > { %10185 = vmatprep.subr.bf16.mxu0 %v15963_v30  ;;  %10228 = vmatprep.subr.bf16.mxu1 %v15966_v32  ;;  %v16924_v13 = vpop.eup %16923  ;;  %v9218_v44 = vmul.f32 %v16922_v60, %v16920_v33  ;;  %v16021_v30 = vld [vmem:[%s20620_s4 + $0x20] ss:$16 sps:$4 sm:$0xff]   ;;  %v16024_v32 = vld [vmem:[%s20620_s4 + $0x28] ss:$16 sps:$4 sm:$0xff]   ;;  %v16029_v33 = vld [vmem:[%s20620_s4 + $0x44] ss:$16 sps:$4 sm:$0xff]  }
 0x95d   : > { %v16926_v40 = vpop.eup %16925  ;;  %v16030_v60 = vld [vmem:[%s20620_s4 + $0x48] ss:$16 sps:$4 sm:$0xff]  }
 0x95e   : > { %v9219_v4 = vmul.f32 %v16926_v40, %v16924_v13  ;;  %v16036_v13 = vld [vmem:[%s20620_s4 + $0x68] ss:$16 sps:$4 sm:$0xff]   ;;  %v16041_v40 = vld [vmem:[%s20620_s4 + $0x84] ss:$16 sps:$4 sm:$0xff]  }
 0x95f   : > { %10186 = vmatpush1.bf16.msra.mxu0 %v15961_v36  ;;  %10229 = vmatpush1.bf16.msra.mxu1 %v15964_v37  ;;  %v16032_v36 = vld [vmem:[%s20620_s4 + $0x4c] ss:$16 sps:$4 sm:$0xff]   ;;  %v16027_v37 = vld [vmem:[%s20620_s4 + $0x40] ss:$16 sps:$4 sm:$0xff]  }
 0x960   : > { %10187 = vmatprep.subr.bf16.mxu0 %v15969_v26  ;;  %10230 = vmatprep.subr.bf16.mxu1 %v15972_v39  ;;  %v19951_v48 = vpack.c.bf16 %v9219_v4, %v9218_v44  ;;  %v16035_v26 = vld [vmem:[%s20620_s4 + $0x64] ss:$16 sps:$4 sm:$0xff]   ;;  %v16033_v39 = vld [vmem:[%s20620_s4 + $0x60] ss:$16 sps:$4 sm:$0xff]   ;;  %v16042_v44 = vld [vmem:[%s20620_s4 + $0x88] ss:$16 sps:$4 sm:$0xff]  }
 0x961   : > { %v16047_v4 = vld [vmem:[%s20620_s4 + $0xa4] ss:$16 sps:$4 sm:$0xff]  }
 0x963   : > { %10188 = vmatpush1.bf16.msra.mxu0 %v15967_v54  ;;  %10231 = vmatpush1.bf16.msra.mxu1 %v15970_v43  ;;  %v16044_v54 = vld [vmem:[%s20620_s4 + $0x8c] ss:$16 sps:$4 sm:$0xff]   ;;  %v16039_v43 = vld [vmem:[%s20620_s4 + $0x80] ss:$16 sps:$4 sm:$0xff]  }
 0x964   : > { %10189 = vmatprep.subr.bf16.mxu0 %v15975_v47  ;;  %10232 = vmatprep.subr.bf16.mxu1 %v15978_v58  ;;  %v16050_v47 = vld [vmem:[%s20620_s4 + $0xac] ss:$16 sps:$4 sm:$0xff]   ;;  %v16045_v58 = vld [vmem:[%s20620_s4 + $0xa0] ss:$16 sps:$4 sm:$0xff]  }
 0x967   : > { %10190 = vmatpush1.bf16.msra.mxu0 %v15973_v0  ;;  %10233 = vmatpush1.bf16.msra.mxu1 %v15976_v61  ;;  %v16048_v0 = vld [vmem:[%s20620_s4 + $0xa8] ss:$16 sps:$4 sm:$0xff]   ;;  %v16053_v61 = vld [vmem:[%s20620_s4 + $0xc4] ss:$16 sps:$4 sm:$0xff]  }
 0x968   : > { %10191 = vmatprep.subr.bf16.mxu0 %v15981_v50  ;;  %10234 = vmatprep.subr.bf16.mxu1 %v15984_v51  ;;  %v16056_v50 = vld [vmem:[%s20620_s4 + $0xcc] ss:$16 sps:$4 sm:$0xff]   ;;  %v16051_v51 = vld [vmem:[%s20620_s4 + $0xc0] ss:$16 sps:$4 sm:$0xff]  }
 0x96b   : > { %10192 = vmatpush1.bf16.msra.mxu0 %v15979_v5  ;;  %10235 = vmatpush1.bf16.msra.mxu1 %v15982_v55  ;;  %v16054_v5 = vld [vmem:[%s20620_s4 + $0xc8] ss:$16 sps:$4 sm:$0xff]   ;;  %v16059_v55 = vld [vmem:[%s20620_s4 + $0xe4] ss:$16 sps:$4 sm:$0xff]  }
 0x96c   : > { %10193 = vmatprep.subr.bf16.mxu0 %v15987_v56  ;;  %10236 = vmatprep.subr.bf16.mxu1 %v15990_v59  ;;  %v16062_v56 = vld [vmem:[%s20620_s4 + $0xec] ss:$16 sps:$4 sm:$0xff]   ;;  %v16057_v59 = vld [vmem:[%s20620_s4 + $0xe0] ss:$16 sps:$4 sm:$0xff]  }
 0x96f   : > { %10194 = vmatpush1.bf16.msra.mxu0 %v15985_v19  ;;  %10237 = vmatpush1.bf16.msra.mxu1 %v15988_v62  ;;  %v16060_v19 = vld [vmem:[%s20620_s4 + $0xe8] ss:$16 sps:$4 sm:$0xff]   ;;  %v16063_v62 = vld [vmem:[#allocation6] ss:$16 sps:$4 sm:$0xff]  }
 0x970   : > { %10195 = vmatprep.subr.bf16.mxu0 %v15993_v38  ;;  %10238 = vmatprep.subr.bf16.mxu1 %v15996_v63  ;;  %v16065_v38 = vld [vmem:[#allocation6 + $0x4] ss:$16 sps:$4 sm:$0xff]   ;;  %v16066_v63 = vld [vmem:[#allocation6 + $0x8] ss:$16 sps:$4 sm:$0xff]  }
 0x973   : > { %10196 = vmatpush1.bf16.msra.mxu0 %v15991_v17  ;;  %10239 = vmatpush1.bf16.msra.mxu1 %v15994_v21  ;;  %v16068_v17 = vld [vmem:[#allocation6 + $0xc] ss:$16 sps:$4 sm:$0xff]   ;;  %v16069_v21 = vld [vmem:[#allocation6 + $0x20] ss:$16 sps:$4 sm:$0xff]  }
 0x974   : > { %10197 = vmatprep.subr.bf16.mxu0 %v15999_v1  ;;  %10240 = vmatprep.subr.bf16.mxu1 %v16002_v3  ;;  %v16071_v1 = vld [vmem:[#allocation6 + $0x24] ss:$16 sps:$4 sm:$0xff]   ;;  %v16072_v3 = vld [vmem:[#allocation6 + $0x28] ss:$16 sps:$4 sm:$0xff]  }
 0x977   : > { %10198 = vmatpush1.bf16.msra.mxu0 %v15997_v10  ;;  %10241 = vmatpush1.bf16.msra.mxu1 %v16000_v12  ;;  %v16074_v10 = vld [vmem:[#allocation6 + $0x2c] ss:$16 sps:$4 sm:$0xff]   ;;  %v16077_v12 = vld [vmem:[#allocation6 + $0x44] ss:$16 sps:$4 sm:$0xff]  }
 0x978   : > { %10199 = vmatprep.subr.bf16.mxu0 %v16005_v31  ;;  %10242 = vmatprep.subr.bf16.mxu1 %v16008_v53  ;;  %v16080_v31 = vld [vmem:[#allocation6 + $0x4c] ss:$16 sps:$4 sm:$0xff]   ;;  %v16075_v53 = vld [vmem:[#allocation6 + $0x40] ss:$16 sps:$4 sm:$0xff]  }
 0x97b   : > { %10200 = vmatpush1.bf16.msra.mxu0 %v16003_v49  ;;  %10243 = vmatpush1.bf16.msra.mxu1 %v16006_v14  ;;  %v16083_v49 = vld [vmem:[#allocation6 + $0x64] ss:$16 sps:$4 sm:$0xff]   ;;  %v16086_v14 = vld [vmem:[#allocation6 + $0x6c] ss:$16 sps:$4 sm:$0xff]  }
 0x97c   : > { %10201 = vmatprep.subr.bf16.mxu0 %v16011_v35  ;;  %10244 = vmatprep.subr.bf16.mxu1 %v16014_v22  ;;  %v16081_v35 = vld [vmem:[#allocation6 + $0x60] ss:$16 sps:$4 sm:$0xff]   ;;  %v16084_v22 = vld [vmem:[#allocation6 + $0x68] ss:$16 sps:$4 sm:$0xff]  }
 0x97f   : > { %10202 = vmatpush1.bf16.msra.mxu0 %v16009_v18  ;;  %10245 = vmatpush1.bf16.msra.mxu1 %v16012_v23  ;;  %v16089_v18 = vld [vmem:[#allocation6 + $0x84] ss:$16 sps:$4 sm:$0xff]   ;;  %v16092_v23 = vld [vmem:[#allocation6 + $0x8c] ss:$16 sps:$4 sm:$0xff]  }
 0x980   : > { %10508 = vmatprep.subr.bf16.mxu0 %v16017_v45  ;;  %10551 = vmatprep.subr.bf16.mxu1 %v16020_v42  ;;  %v16087_v45 = vld [vmem:[#allocation6 + $0x80] ss:$16 sps:$4 sm:$0xff]   ;;  %v16090_v42 = vld [vmem:[#allocation6 + $0x88] ss:$16 sps:$4 sm:$0xff]  }
 0x982   : > { %10204 = vmatmul.mubr.bf16.vlgmr.msra.gmra.mrb[80].mxu0 %v19951_v48  ;;  %10247 = vmatmul.mubr.bf16.vlgmr.msra.gmra.mrb[80].mxu1 %v19951_v48 }
 0x983   : > { %10509 = vmatpush1.bf16.msra.mxu0 %v16015_v27  ;;  %10552 = vmatpush1.bf16.msra.mxu1 %v16018_v57  ;;  %v16095_v27 = vld [vmem:[#allocation6 + $0xa4] ss:$16 sps:$4 sm:$0xff]   ;;  %v16098_v57 = vld [vmem:[#allocation6 + $0xac] ss:$16 sps:$4 sm:$0xff]  }
 0x984   : > { %10510 = vmatprep.subr.bf16.mxu0 %v16023_v28  ;;  %10553 = vmatprep.subr.bf16.mxu1 %v16026_v41  ;;  %v16093_v28 = vld [vmem:[#allocation6 + $0xa0] ss:$16 sps:$4 sm:$0xff]   ;;  %v16096_v41 = vld [vmem:[#allocation6 + $0xa8] ss:$16 sps:$4 sm:$0xff]  }
 0x985   : > { %10540 = vmatprep.mubr.bf16.mxu0 %v17312_v2  ;;  %10583 = vmatprep.mubr.bf16.mxu1 %v17312_v2  ;;  %v16038_v2 = vld [vmem:[%s20620_s4 + $0x6c] ss:$16 sps:$4 sm:$0xff]  }
 0x987   : > { %10511 = vmatpush1.bf16.msra.mxu0 %v16021_v30  ;;  %10554 = vmatpush1.bf16.msra.mxu1 %v16024_v32  ;;  %v16101_v30 = vld [vmem:[#allocation6 + $0xc4] ss:$16 sps:$4 sm:$0xff]   ;;  %v16104_v32 = vld [vmem:[#allocation6 + $0xcc] ss:$16 sps:$4 sm:$0xff]  }
 0x988   : > { %10512 = vmatprep.subr.bf16.mxu0 %v16029_v33  ;;  %10555 = vmatprep.subr.bf16.mxu1 %v16032_v36  ;;  %v16099_v33 = vld [vmem:[#allocation6 + $0xc0] ss:$16 sps:$4 sm:$0xff]   ;;  %v16102_v36 = vld [vmem:[#allocation6 + $0xc8] ss:$16 sps:$4 sm:$0xff]  }
 0x98b   : > { %10513 = vmatpush1.bf16.msra.mxu0 %v16027_v37  ;;  %10556 = vmatpush1.bf16.msra.mxu1 %v16030_v60  ;;  %v16107_v37 = vld [vmem:[#allocation6 + $0xe4] ss:$16 sps:$4 sm:$0xff]   ;;  %v16110_v60 = vld [vmem:[#allocation6 + $0xec] ss:$16 sps:$4 sm:$0xff]  }
 0x98c   : > { %10514 = vmatprep.subr.bf16.mxu0 %v16035_v26  ;;  %10557 = vmatprep.subr.bf16.mxu1 %v16038_v2  ;;  %v16105_v26 = vld [vmem:[#allocation6 + $0xe0] ss:$16 sps:$4 sm:$0xff]   ;;  %v16108_v2 = vld [vmem:[#allocation6 + $0xe8] ss:$16 sps:$4 sm:$0xff]  }
 0x98f   : > { %10515 = vmatpush1.bf16.msra.mxu0 %v16033_v39  ;;  %10558 = vmatpush1.bf16.msra.mxu1 %v16036_v13  ;;  %v16113_v39 = vld [vmem:[#allocation6 + $0x104] ss:$16 sps:$4 sm:$0xff]   ;;  %v16116_v13 = vld [vmem:[#allocation6 + $0x10c] ss:$16 sps:$4 sm:$0xff]  }
 0x990   : > { %10516 = vmatprep.subr.bf16.mxu0 %v16041_v40  ;;  %10559 = vmatprep.subr.bf16.mxu1 %v16044_v54  ;;  %v16111_v40 = vld [vmem:[#allocation6 + $0x100] ss:$16 sps:$4 sm:$0xff]   ;;  %v16114_v54 = vld [vmem:[#allocation6 + $0x108] ss:$16 sps:$4 sm:$0xff]  }
 0x993   : > { %10517 = vmatpush1.bf16.msra.mxu0 %v16039_v43  ;;  %10560 = vmatpush1.bf16.msra.mxu1 %v16042_v44  ;;  %v16119_v43 = vld [vmem:[#allocation6 + $0x124] ss:$16 sps:$4 sm:$0xff]   ;;  %v16122_v44 = vld [vmem:[#allocation6 + $0x12c] ss:$16 sps:$4 sm:$0xff]  }
 0x994   : > { %10518 = vmatprep.subr.bf16.mxu0 %v16047_v4  ;;  %10561 = vmatprep.subr.bf16.mxu1 %v16050_v47  ;;  %v16117_v4 = vld [vmem:[#allocation6 + $0x120] ss:$16 sps:$4 sm:$0xff]   ;;  %v16120_v47 = vld [vmem:[#allocation6 + $0x128] ss:$16 sps:$4 sm:$0xff]  }
 0x997   : > { %10519 = vmatpush1.bf16.msra.mxu0 %v16045_v58  ;;  %10562 = vmatpush1.bf16.msra.mxu1 %v16048_v0  ;;  %v16125_v58 = vld [vmem:[#allocation6 + $0x144] ss:$16 sps:$4 sm:$0xff]   ;;  %v16128_v0 = vld [vmem:[#allocation6 + $0x14c] ss:$16 sps:$4 sm:$0xff]  }
 0x998   : > { %10520 = vmatprep.subr.bf16.mxu0 %v16053_v61  ;;  %10563 = vmatprep.subr.bf16.mxu1 %v16056_v50  ;;  %v16123_v61 = vld [vmem:[#allocation6 + $0x140] ss:$16 sps:$4 sm:$0xff]   ;;  %v16126_v50 = vld [vmem:[#allocation6 + $0x148] ss:$16 sps:$4 sm:$0xff]  }
 0x99b   : > { %10521 = vmatpush1.bf16.msra.mxu0 %v16051_v51  ;;  %10564 = vmatpush1.bf16.msra.mxu1 %v16054_v5  ;;  %v16131_v51 = vld [vmem:[#allocation6 + $0x164] ss:$16 sps:$4 sm:$0xff]   ;;  %v16134_v5 = vld [vmem:[#allocation6 + $0x16c] ss:$16 sps:$4 sm:$0xff]  }
 0x99c   : > { %10522 = vmatprep.subr.bf16.mxu0 %v16059_v55  ;;  %10565 = vmatprep.subr.bf16.mxu1 %v16062_v56  ;;  %v16129_v55 = vld [vmem:[#allocation6 + $0x160] ss:$16 sps:$4 sm:$0xff]   ;;  %v16132_v56 = vld [vmem:[#allocation6 + $0x168] ss:$16 sps:$4 sm:$0xff]  }
 0x99f   : > { %10523 = vmatpush1.bf16.msra.mxu0 %v16057_v59  ;;  %10566 = vmatpush1.bf16.msra.mxu1 %v16060_v19  ;;  %v16137_v59 = vld [vmem:[#allocation6 + $0x184] ss:$16 sps:$4 sm:$0xff]   ;;  %v16140_v19 = vld [vmem:[#allocation6 + $0x18c] ss:$16 sps:$4 sm:$0xff]  }
 0x9a0   : > { %11058 = vmatprep.subr.bf16.mxu0 %v16065_v38  ;;  %11101 = vmatprep.subr.bf16.mxu1 %v16068_v17  ;;  %v16138_v38 = vld [vmem:[#allocation6 + $0x188] ss:$16 sps:$4 sm:$0xff]   ;;  %v16146_v17 = vld [vmem:[#allocation6 + $0x1ac] ss:$16 sps:$4 sm:$0xff]  }
 0x9a2   : > { %10541 = vmatmul.mubr.bf16.vlgmr.msra.gmra.mrb[28].mxu0 %v19951_v48  ;;  %10584 = vmatmul.mubr.bf16.vlgmr.msra.gmra.mrb[28].mxu1 %v19951_v48  ;;  %v16078_v48 = vld [vmem:[#allocation6 + $0x48] ss:$16 sps:$4 sm:$0xff]  }
 0x9a3   : > { %11059 = vmatpush1.bf16.msra.mxu0 %v16063_v62  ;;  %11102 = vmatpush1.bf16.msra.mxu1 %v16066_v63  ;;  %v16135_v62 = vld [vmem:[#allocation6 + $0x180] ss:$16 sps:$4 sm:$0xff]   ;;  %v16143_v63 = vld [vmem:[#allocation6 + $0x1a4] ss:$16 sps:$4 sm:$0xff]  }
 0x9a4   : > { %11060 = vmatprep.subr.bf16.mxu0 %v16071_v1  ;;  %11103 = vmatprep.subr.bf16.mxu1 %v16074_v10  ;;  %v16144_v1 = vld [vmem:[#allocation6 + $0x1a8] ss:$16 sps:$4 sm:$0xff]   ;;  %v16152_v10 = vld [vmem:[#allocation6 + $0x1cc] ss:$16 sps:$4 sm:$0xff]  }
 0x9a7   : > { %11061 = vmatpush1.bf16.msra.mxu0 %v16069_v21  ;;  %11104 = vmatpush1.bf16.msra.mxu1 %v16072_v3  ;;  %v16141_v21 = vld [vmem:[#allocation6 + $0x1a0] ss:$16 sps:$4 sm:$0xff]   ;;  %v16149_v3 = vld [vmem:[#allocation6 + $0x1c4] ss:$16 sps:$4 sm:$0xff]  }
 0x9a8   : > { %11062 = vmatprep.subr.bf16.mxu0 %v16077_v12  ;;  %11105 = vmatprep.subr.bf16.mxu1 %v16080_v31  ;;  %v16147_v12 = vld [vmem:[#allocation6 + $0x1c0] ss:$16 sps:$4 sm:$0xff]   ;;  %v16150_v31 = vld [vmem:[#allocation6 + $0x1c8] ss:$16 sps:$4 sm:$0xff]  }
 0x9ab   : > { %11063 = vmatpush1.bf16.msra.mxu0 %v16075_v53  ;;  %11106 = vmatpush1.bf16.msra.mxu1 %v16078_v48  ;;  %v16155_v53 = vld [vmem:[#allocation6 + $0x1e4] ss:$16 sps:$4 sm:$0xff]   ;;  %v16158_v48 = vld [vmem:[#allocation6 + $0x1ec] ss:$16 sps:$4 sm:$0xff]  }
 0x9ac   : > { %11064 = vmatprep.subr.bf16.mxu0 %v16083_v49  ;;  %11107 = vmatprep.subr.bf16.mxu1 %v16086_v14  ;;  %v16153_v49 = vld [vmem:[#allocation6 + $0x1e0] ss:$16 sps:$4 sm:$0xff]   ;;  %v16156_v14 = vld [vmem:[#allocation6 + $0x1e8] ss:$16 sps:$4 sm:$0xff]  }
 0x9af   : > { %11065 = vmatpush1.bf16.msra.mxu0 %v16081_v35  ;;  %11108 = vmatpush1.bf16.msra.mxu1 %v16084_v22  ;;  %v16161_v35 = vld [vmem:[%s20622_s6 + $0x4] ss:$16 sps:$4 sm:$0xff]   ;;  %v16164_v22 = vld [vmem:[%s20622_s6 + $0xc] ss:$16 sps:$4 sm:$0xff]  }
 0x9b0   : > { %11066 = vmatprep.subr.bf16.mxu0 %v16089_v18  ;;  %11109 = vmatprep.subr.bf16.mxu1 %v16092_v23  ;;  %v9286_v18 = vld [vmem:[%s20670_s24] sm:$0xf] }
 0x9b1   : > { %v9291_v23 = vrot.slane %v9286_v18, %v17944_v6 }
 0x9b3   : > { %11067 = vmatpush1.bf16.msra.mxu0 %v16087_v45  ;;  %11110 = vmatpush1.bf16.msra.mxu1 %v16090_v42  ;;  %v9295_v45 = vrot.slane %v9286_v18, %v17946_v7 }
 0x9b4   : > { %11068 = vmatprep.subr.bf16.mxu0 %v16095_v27  ;;  %11111 = vmatprep.subr.bf16.mxu1 %v16098_v57 }
 0x9b7   : > { %11069 = vmatpush1.bf16.msra.mxu0 %v16093_v28  ;;  %11112 = vmatpush1.bf16.msra.mxu1 %v16096_v41 }
 0x9b8   : > { %11070 = vmatprep.subr.bf16.mxu0 %v16101_v30  ;;  %11113 = vmatprep.subr.bf16.mxu1 %v16104_v32 }
 0x9bb   : > { %11071 = vmatpush1.bf16.msra.mxu0 %v16099_v33  ;;  %11114 = vmatpush1.bf16.msra.mxu1 %v16102_v36 }
 0x9bc   : > { %11072 = vmatprep.subr.bf16.mxu0 %v16107_v37  ;;  %11115 = vmatprep.subr.bf16.mxu1 %v16110_v60 }
 0x9bf   : > { %11073 = vmatpush1.bf16.msra.mxu0 %v16105_v26  ;;  %11116 = vmatpush1.bf16.msra.mxu1 %v16108_v2  ;;  %v9299_v2 = vrot.slane %v9286_v18, %v17954_v11 }
 0x9c0   : > { %11074 = vmatprep.subr.bf16.mxu0 %v16113_v39  ;;  %11117 = vmatprep.subr.bf16.mxu1 %v16116_v13 }
 0x9c3   : > { %11075 = vmatpush1.bf16.msra.mxu0 %v16111_v40  ;;  %11118 = vmatpush1.bf16.msra.mxu1 %v16114_v54 }
 0x9c4   : > { %11076 = vmatprep.subr.bf16.mxu0 %v16119_v43  ;;  %11119 = vmatprep.subr.bf16.mxu1 %v16122_v44  ;;  %v9303_v43 = vrot.slane %v9286_v18, %v17958_v20 }
 0x9c7   : > { %11077 = vmatpush1.bf16.msra.mxu0 %v16117_v4  ;;  %11120 = vmatpush1.bf16.msra.mxu1 %v16120_v47 }
 0x9c8   : > { %11078 = vmatprep.subr.bf16.mxu0 %v16125_v58  ;;  %11121 = vmatprep.subr.bf16.mxu1 %v16128_v0 }
 0x9cb   : > { %11079 = vmatpush1.bf16.msra.mxu0 %v16123_v61  ;;  %11122 = vmatpush1.bf16.msra.mxu1 %v16126_v50 }
 0x9cc   : > { %11080 = vmatprep.subr.bf16.mxu0 %v16131_v51  ;;  %11123 = vmatprep.subr.bf16.mxu1 %v16134_v5 }
 0x9cf   : > { %11081 = vmatpush1.bf16.msra.mxu0 %v16129_v55  ;;  %11124 = vmatpush1.bf16.msra.mxu1 %v16132_v56 }
 0x9d0   : > { %11082 = vmatprep.subr.bf16.mxu0 %v16137_v59  ;;  %11125 = vmatprep.subr.bf16.mxu1 %v16140_v19 }
 0x9d3   : > { %11083 = vmatpush1.bf16.msra.mxu0 %v16135_v62  ;;  %11126 = vmatpush1.bf16.msra.mxu1 %v16138_v38 }
 0x9d4   : > { %11084 = vmatprep.subr.bf16.mxu0 %v16143_v63  ;;  %11127 = vmatprep.subr.bf16.mxu1 %v16146_v17 }
 0x9d7   : > { %11085 = vmatpush1.bf16.msra.mxu0 %v16141_v21  ;;  %11128 = vmatpush1.bf16.msra.mxu1 %v16144_v1 }
 0x9d8   : > { %11086 = vmatprep.subr.bf16.mxu0 %v16149_v3  ;;  %11129 = vmatprep.subr.bf16.mxu1 %v16152_v10 }
 0x9db   : > { %11087 = vmatpush1.bf16.msra.mxu0 %v16147_v12  ;;  %11130 = vmatpush1.bf16.msra.mxu1 %v16150_v31 }
 0x9dc   : > { %11088 = vmatprep.subr.bf16.mxu0 %v16155_v53  ;;  %11131 = vmatprep.subr.bf16.mxu1 %v16158_v48 }
 0x9df   : > { %11089 = vmatpush1.bf16.msra.mxu0 %v16153_v49  ;;  %11132 = vmatpush1.bf16.msra.mxu1 %v16156_v14 }
 0x9e0   : > { %11600 = vmatprep.subr.bf16.mxu0 %v16161_v35  ;;  %11643 = vmatprep.subr.bf16.mxu1 %v16164_v22 }
 0xa15   : > { %v9662_v42 = vpop.f32.mrb[76].mxu0  ;;  %v9705_v27 = vpop.f32.mrb[76].mxu1 }
 0xa16   : > { %v9663_v57 = vadd.f32 %v9662_v42, %v9291_v23  ;;  %v9664_v28 = vpop.f32.mrb[77].mxu0  ;;  %v9707_v41 = vpop.f32.mrb[77].mxu1  ;;  %v9706_v44 = vadd.f32 %v9705_v27, %v9299_v2 }
 0xa17   : > { %v9665_v30 = vadd.f32 %v9664_v28, %v9295_v45  ;;  %v9666_v32 = vpop.f32.mrb[78].mxu0  ;;  %v9709_v33 = vpop.f32.mrb[78].mxu1  ;;  %v9708_v47 = vadd.f32 %v9707_v41, %v9303_v43 }
 0xa18   : > { %v13882_v36 = vmul.f32 -1.442695, %v9663_v57  ;;  %v9667_v37 = vadd.f32 %v9666_v32, %v9291_v23  ;;  %v9668_v60 = vpop.f32.mrb[79].mxu0  ;;  %v9711_v26 = vpop.f32.mrb[79].mxu1  ;;  %v9710_v4 = vadd.f32 %v9709_v33, %v9299_v2  ;;  %v13884_v58 = vmul.f32 -1.442695, %v9706_v44 }
 0xa19   : > { %v13883_v39 = vmul.f32 -1.442695, %v9665_v30  ;;  %v9669_v13 = vadd.f32 %v9668_v60, %v9295_v45  ;;  %v9712_v50 = vadd.f32 %v9711_v26, %v9303_v43 }
 0xa1a   : > { %16927 = vpow2.f32 %v13882_v36  ;;  %v13885_v40 = vmul.f32 -1.442695, %v9667_v37  ;;  %v13887_v0 = vmul.f32 -1.442695, %v9710_v4 }
 0xa1b   : > { %v13886_v54 = vmul.f32 -1.442695, %v9669_v13  ;;  %16929 = vpow2.f32 %v13883_v39 }
 0xa1c   : > { %16931 = vpow2.f32 %v13885_v40 }
 0xa1d   : > { %16933 = vpow2.f32 %v13886_v54 }
 0xa1e   : > { %16935 = vtanh.f32 %v9708_v47 }
 0xa1f   : > { %16937 = vpow2.f32 %v13884_v58 }
 0xa20   : > { %16939 = vpow2.f32 %v13887_v0 }
 0xa24   : > { %v16928_v61 = vpop.eup %16927 }
 0xa25   : > { %v9732_v51 = vadd.f32 1.0, %v16928_v61  ;;  %v16930_v5 = vpop.eup %16929 }
 0xa26   : > { %v16932_v55 = vpop.eup %16931  ;;  %v9733_v56 = vadd.f32 1.0, %v16930_v5 }
 0xa27   : > { %16941 = vrcp.f32 %v9732_v51  ;;  %v9735_v59 = vadd.f32 1.0, %v16932_v55  ;;  %v16934_v19 = vpop.eup %16933 }
 0xa28   : > { %16943 = vtanh.f32 %v9712_v50  ;;  %v9736_v62 = vadd.f32 1.0, %v16934_v19  ;;  %v16936_v38 = vpop.eup %16935 }
 0xa29   : > { %16945 = vrcp.f32 %v9733_v56  ;;  %v16938_v63 = vpop.eup %16937 }
 0xa2a   : > { %16947 = vrcp.f32 %v9735_v59  ;;  %v16940_v17 = vpop.eup %16939  ;;  %v9734_v31 = vadd.f32 1.0, %v16938_v63 }
 0xa2b   : > { %16949 = vrcp.f32 %v9736_v62  ;;  %v9737_v35 = vadd.f32 1.0, %v16940_v17 }
 0xa2c   : > { %16951 = vrcp.f32 %v9734_v31 }
 0xa31   : > { %v16942_v21 = vpop.eup %16941 }
 0xa32   : > { %v16944_v1 = vpop.eup %16943  ;;  %v9754_v3 = vmul.f32 %v16942_v21, %v16936_v38 }
 0xa33   : > { %v16946_v10 = vpop.eup %16945 }
 0xa34   : > { %v16948_v12 = vpop.eup %16947  ;;  %v9752_v53 = vmul.f32 %v16946_v10, %v19805_v16 }
 0xa35   : > { %v9755_v48 = vmul.f32 %v16948_v12, %v16944_v1  ;;  %v16950_v49 = vpop.eup %16949 }
 0xa36   : > { %v20147_v14 = vadd.f32 %v9754_v3, %v9752_v53  ;;  %v9753_v22 = vmul.f32 %v16950_v49, %v19809_v15  ;;  %v16952_v23 = vpop.eup %16951  ;;  %v9829_v15 = vld [vmem:[%s20669_s14] sm:$0xf] }
 0xa37   : > { %v9834_v41 = vrot.slane %v9829_v15, %v17944_v6  ;;  %v9838_v30 = vrot.slane %v9829_v15, %v17946_v7  ;;  %v9842_v44 = vrot.slane %v9829_v15, %v17954_v11  ;;  %v9846_v61 = vrot.slane %v9829_v15, %v17958_v20 }
 0xa38   : > { %16953 = vtanh.f32 %v20147_v14  ;;  %v20151_v18 = vadd.f32 %v9755_v48, %v9753_v22 }
 0xa39   : > { %16955 = vrcp.f32 %v9737_v35 }
 0xa3a   : > { %16957 = vtanh.f32 %v20151_v18 }
 0xa42   : > { %v16954_v45 = vpop.eup %16953 }
 0xa43   : > { %v16956_v42 = vpop.eup %16955  ;;  %v9760_v16 = vmul.f32 %v16954_v45, %v16952_v23 }
 0xa44   : > { %v16958_v27 = vpop.eup %16957 }
 0xa45   : > { %v9761_v57 = vmul.f32 %v16958_v27, %v16956_v42 }
 0xa47   : > { %v9762_v28 = vpack.c.bf16 %v9761_v57, %v9760_v16 }
 0xa49   : > { %9764 = vst [vmem:[#allocation3 + $0x28] sm:$0xff] %v9762_v28  ;;  %11090 = vmatprep.mubr.bf16.mxu0 %v9762_v28  ;;  %11133 = vmatprep.mubr.bf16.mxu1 %v9762_v28 }
 0xa55   : > { %v10205_v32 = vpop.f32.mrb[80].mxu0  ;;  %v10248_v33 = vpop.f32.mrb[80].mxu1 }
 0xa56   : > { %v10206_v36 = vadd.f32 %v10205_v32, %v9834_v41  ;;  %v10207_v37 = vpop.f32.mrb[81].mxu0  ;;  %v10250_v60 = vpop.f32.mrb[81].mxu1  ;;  %v10249_v50 = vadd.f32 %v10248_v33, %v9842_v44 }
 0xa57   : > { %v10208_v26 = vadd.f32 %v10207_v37, %v9838_v30  ;;  %v10209_v2 = vpop.f32.mrb[82].mxu0  ;;  %v10252_v39 = vpop.f32.mrb[82].mxu1  ;;  %v10251_v5 = vadd.f32 %v10250_v60, %v9846_v61 }
 0xa58   : > { %v13952_v13 = vmul.f32 -1.442695, %v10206_v36  ;;  %v10210_v40 = vadd.f32 %v10209_v2, %v9834_v41  ;;  %v10211_v54 = vpop.f32.mrb[83].mxu0  ;;  %v10254_v43 = vpop.f32.mrb[83].mxu1  ;;  %v10253_v51 = vadd.f32 %v10252_v39, %v9842_v44  ;;  %v13954_v55 = vmul.f32 -1.442695, %v10249_v50 }
 0xa59   : > { %v13953_v4 = vmul.f32 -1.442695, %v10208_v26  ;;  %v10212_v47 = vadd.f32 %v10211_v54, %v9838_v30  ;;  %v10255_v19 = vadd.f32 %v10254_v43, %v9846_v61 }
 0xa5a   : > { %16959 = vpow2.f32 %v13952_v13  ;;  %v13955_v58 = vmul.f32 -1.442695, %v10210_v40  ;;  %v13957_v56 = vmul.f32 -1.442695, %v10253_v51 }
 0xa5b   : > { %v13956_v0 = vmul.f32 -1.442695, %v10212_v47  ;;  %16961 = vpow2.f32 %v13953_v4 }
 0xa5c   : > { %16963 = vpow2.f32 %v13955_v58 }
 0xa5d   : > { %16965 = vpow2.f32 %v13956_v0 }
 0xa5e   : > { %16967 = vtanh.f32 %v10251_v5 }
 0xa5f   : > { %16969 = vpow2.f32 %v13954_v55 }
 0xa60   : > { %16971 = vpow2.f32 %v13957_v56 }
 0xa64   : > { %v16960_v59 = vpop.eup %16959 }
 0xa65   : > { %v10275_v62 = vadd.f32 1.0, %v16960_v59  ;;  %v16962_v38 = vpop.eup %16961 }
 0xa66   : > { %v16964_v63 = vpop.eup %16963  ;;  %v10276_v17 = vadd.f32 1.0, %v16962_v38 }
 0xa67   : > { %16973 = vrcp.f32 %v10275_v62  ;;  %v10278_v21 = vadd.f32 1.0, %v16964_v63  ;;  %v16966_v1 = vpop.eup %16965  ;;  %v16162_v62 = vld [vmem:[%s20622_s6 + $0x8] ss:$16 sps:$4 sm:$0xff]  }
 0xa68   : > { %16975 = vtanh.f32 %v10255_v19  ;;  %v10279_v3 = vadd.f32 1.0, %v16966_v1  ;;  %v16968_v10 = vpop.eup %16967  ;;  %v16170_v1 = vld [vmem:[%s20622_s6 + $0x2c] ss:$16 sps:$4 sm:$0xff]  }
 0xa69   : > { %16977 = vrcp.f32 %v10276_v17  ;;  %v16970_v12 = vpop.eup %16969 }
 0xa6a   : > { %16979 = vrcp.f32 %v10278_v21  ;;  %v16972_v31 = vpop.eup %16971  ;;  %v10277_v22 = vadd.f32 1.0, %v16970_v12  ;;  %v16165_v12 = vld [vmem:[%s20622_s6 + $0x20] ss:$16 sps:$4 sm:$0xff]  }
 0xa6b   : > { %16981 = vrcp.f32 %v10279_v3  ;;  %v10280_v42 = vadd.f32 1.0, %v16972_v31  ;;  %v16168_v31 = vld [vmem:[%s20622_s6 + $0x28] ss:$16 sps:$4 sm:$0xff]  }
 0xa6c   : > { %16983 = vrcp.f32 %v10277_v22  ;;  %v16174_v22 = vld [vmem:[%s20622_s6 + $0x48] ss:$16 sps:$4 sm:$0xff]  }
 0xa6d   : > { %16985 = vrcp.f32 %v10280_v42  ;;  %v16182_v42 = vld [vmem:[%s20622_s6 + $0x6c] ss:$16 sps:$4 sm:$0xff]  }
 0xa71   : > { %v16974_v53 = vpop.eup %16973 }
 0xa72   : > { %v16976_v48 = vpop.eup %16975  ;;  %v10297_v49 = vmul.f32 %v16974_v53, %v16968_v10  ;;  %v16173_v53 = vld [vmem:[%s20622_s6 + $0x44] ss:$16 sps:$4 sm:$0xff]  }
 0xa73   : > { %v16978_v35 = vpop.eup %16977 }
 0xa74   : > { %v16980_v23 = vpop.eup %16979  ;;  %v10295_v45 = vmul.f32 %v16978_v35, %v19820_v52  ;;  %v16171_v35 = vld [vmem:[%s20622_s6 + $0x40] ss:$16 sps:$4 sm:$0xff]  }
 0xa75   : > { %v10298_v27 = vmul.f32 %v16980_v23, %v16976_v48  ;;  %v10542_v16 = vpop.f32.mrb[28].mxu0  ;;  %v10585_v57 = vpop.f32.mrb[28].mxu1  ;;  %v16176_v48 = vld [vmem:[%s20622_s6 + $0x4c] ss:$16 sps:$4 sm:$0xff]  }
 0xa76   : > { %v16982_v28 = vpop.eup %16981  ;;  %v20162_v15 = vadd.f32 %v10297_v49, %v10295_v45  ;;  %v14265_v41 = vadd.f32 %v10542_v16, %v17949_v8  ;;  %v10544_v30 = vpop.f32.mrb[29].mxu0  ;;  %v14297_v44 = vadd.f32 %v10585_v57, %v17962_v24  ;;  %v16179_v45 = vld [vmem:[%s20622_s6 + $0x64] ss:$16 sps:$4 sm:$0xff]  }
 0xa77   : > { %v10587_v32 = vpop.f32.mrb[29].mxu1  ;;  %v10296_v33 = vmul.f32 %v16982_v28, %v19827_v34  ;;  %v14266_v36 = vadd.f32 %v10544_v30, %v17952_v9  ;;  %v10546_v37 = vpop.f32.mrb[30].mxu0  ;;  %v16180_v30 = vld [vmem:[%s20622_s6 + $0x68] ss:$16 sps:$4 sm:$0xff]  }
 0xa78   : > { %v10589_v60 = vpop.f32.mrb[30].mxu1  ;;  %v13990_v52 = vmul.f32 -1.442695, %v14265_v41  ;;  %v14267_v26 = vadd.f32 %v10546_v37, %v17949_v8  ;;  %v10548_v2 = vpop.f32.mrb[31].mxu0  ;;  %16987 = vtanh.f32 %v20162_v15  ;;  %v14298_v47 = vadd.f32 %v10587_v32, %v17966_v29  ;;  %v16177_v41 = vld [vmem:[%s20622_s6 + $0x60] ss:$16 sps:$4 sm:$0xff]  }
 0xa79   : > { %v10591_v39 = vpop.f32.mrb[31].mxu1  ;;  %v20169_v13 = vadd.f32 %v10298_v27, %v10296_v33  ;;  %v13991_v40 = vmul.f32 -1.442695, %v14266_v36  ;;  %v14268_v43 = vadd.f32 %v10548_v2, %v17952_v9  ;;  %v14299_v8 = vadd.f32 %v10589_v60, %v17962_v24  ;;  %v16984_v4 = vpop.eup %16983  ;;  %v16159_v24 = vld [vmem:[%s20622_s6] ss:$16 sps:$4 sm:$0xff]  }
 0xa7a   : > { %16989 = vpow2.f32 %v13990_v52  ;;  %v13993_v54 = vmul.f32 -1.442695, %v14267_v26  ;;  %v16986_v58 = vpop.eup %16985  ;;  %v13992_v0 = vmul.f32 -1.442695, %v14297_v44  ;;  %v14300_v55 = vadd.f32 %v10591_v39, %v17966_v29  ;;  %v16167_v29 = vld [vmem:[%s20622_s6 + $0x24] ss:$16 sps:$4 sm:$0xff]  }
 0xa7b   : > { %16991 = vtanh.f32 %v20169_v13  ;;  %v13994_v34 = vmul.f32 -1.442695, %v14268_v43  ;;  %v13995_v51 = vmul.f32 -1.442695, %v14299_v8  ;;  %v16185_v36 = vld [vmem:[%s20622_s6 + $0x84] ss:$16 sps:$4 sm:$0xff]  }
 0xa7c   : > { %16993 = vpow2.f32 %v13991_v40  ;;  %v16188_v37 = vld [vmem:[%s20622_s6 + $0x8c] ss:$16 sps:$4 sm:$0xff]   ;;  %v16186_v43 = vld [vmem:[%s20622_s6 + $0x88] ss:$16 sps:$4 sm:$0xff]  }
 0xa7d   : > { %16995 = vpow2.f32 %v13993_v54  ;;  %v16183_v54 = vld [vmem:[%s20622_s6 + $0x80] ss:$16 sps:$4 sm:$0xff]   ;;  %v16194_v44 = vld [vmem:[%s20622_s6 + $0xac] ss:$16 sps:$4 sm:$0xff]  }
 0xa7e   : > { %16997 = vpow2.f32 %v13994_v34 }
 0xa7f   : > { %16999 = vtanh.f32 %v14298_v47  ;;  %v16197_v47 = vld [vmem:[%s20622_s6 + $0xc4] ss:$16 sps:$4 sm:$0xff]  }
 0xa80   : > { %17001 = vpow2.f32 %v13992_v0  ;;  %v16195_v0 = vld [vmem:[%s20622_s6 + $0xc0] ss:$16 sps:$4 sm:$0xff]  }
 0xa82   : > { %v16988_v61 = vpop.eup %16987 }
 0xa83   : > { %v10303_v56 = vmul.f32 %v16988_v61, %v16984_v4  ;;  %v16192_v4 = vld [vmem:[%s20622_s6 + $0xa8] ss:$16 sps:$4 sm:$0xff]  }
 0xa84   : > { %v16990_v50 = vpop.eup %16989  ;;  %v16198_v61 = vld [vmem:[%s20622_s6 + $0xc8] ss:$16 sps:$4 sm:$0xff]  }
 0xa85   : > { %v16992_v5 = vpop.eup %16991  ;;  %v10620_v9 = vadd.f32 1.0, %v16990_v50  ;;  %v16203_v50 = vld [vmem:[%s20622_s6 + $0xe4] ss:$16 sps:$4 sm:$0xff]  }
 0xa86   : > { %v10304_v59 = vmul.f32 %v16992_v5, %v16986_v58  ;;  %v16994_v19 = vpop.eup %16993  ;;  %v16200_v58 = vld [vmem:[%s20622_s6 + $0xcc] ss:$16 sps:$4 sm:$0xff]  }
 0xa87   : > { %17003 = vrcp.f32 %v10620_v9  ;;  %v16996_v38 = vpop.eup %16995  ;;  %v10621_v63 = vadd.f32 1.0, %v16994_v19  ;;  %v16212_v19 = vld [vmem:[%s20622_s6 + $0x10c] ss:$16 sps:$4 sm:$0xff]  }
 0xa88   : > { %17005 = vpow2.f32 %v13995_v51  ;;  %v10651_v17 = vpack.c.bf16 %v10304_v59, %v10303_v56  ;;  %v10623_v21 = vadd.f32 1.0, %v16996_v38  ;;  %v16998_v3 = vpop.eup %16997  ;;  %v16206_v51 = vld [vmem:[%s20622_s6 + $0xec] ss:$16 sps:$4 sm:$0xff]   ;;  %v16204_v56 = vld [vmem:[%s20622_s6 + $0xe8] ss:$16 sps:$4 sm:$0xff]  }
 0xa89   : > { %17007 = vtanh.f32 %v14300_v55  ;;  %v10624_v10 = vadd.f32 1.0, %v16998_v3  ;;  %v17000_v49 = vpop.eup %16999  ;;  %v16201_v55 = vld [vmem:[%s20622_s6 + $0xe0] ss:$16 sps:$4 sm:$0xff]   ;;  %v16209_v59 = vld [vmem:[%s20622_s6 + $0x104] ss:$16 sps:$4 sm:$0xff]  }
 0xa8a   : > { %17009 = vrcp.f32 %v10621_v63  ;;  %11091 = vmatmul.mubr.bf16.vlgmr.msra.gmra.mrb[84].mxu0 %v10651_v17  ;;  %11134 = vmatmul.mubr.bf16.vlgmr.msra.gmra.mrb[84].mxu1 %v10651_v17  ;;  %v17002_v23 = vpop.eup %17001  ;;  %v16207_v63 = vld [vmem:[%s20622_s6 + $0x100] ss:$16 sps:$4 sm:$0xff]  }
 0xa8b   : > { %17011 = vrcp.f32 %v10623_v21  ;;  %11601 = vmatpush1.bf16.msra.mxu0 %v16159_v24  ;;  %11644 = vmatpush1.bf16.msra.mxu1 %v16162_v62  ;;  %v10622_v33 = vadd.f32 1.0, %v17002_v23  ;;  %v16225_v23 = vld [vmem:[%s20622_s6 + $0x160] ss:$16 sps:$4 sm:$0xff]  }
 0xa8c   : > { %11632 = vmatprep.mubr.bf16.mxu0 %v10651_v17  ;;  %11675 = vmatprep.mubr.bf16.mxu1 %v10651_v17  ;;  %17013 = vrcp.f32 %v10624_v10  ;;  %v16210_v17 = vld [vmem:[%s20622_s6 + $0x108] ss:$16 sps:$4 sm:$0xff]   ;;  %v16213_v10 = vld [vmem:[%s20622_s6 + $0x120] ss:$16 sps:$4 sm:$0xff]  }
 0xa8d   : > { %11602 = vmatprep.subr.bf16.mxu0 %v16167_v29  ;;  %11645 = vmatprep.subr.bf16.mxu1 %v16170_v1  ;;  %17015 = vrcp.f32 %v10622_v33  ;;  %v16215_v29 = vld [vmem:[%s20622_s6 + $0x124] ss:$16 sps:$4 sm:$0xff]   ;;  %v16218_v1 = vld [vmem:[%s20622_s6 + $0x12c] ss:$16 sps:$4 sm:$0xff]  }
 0xa8e   : > { %v16245_v33 = vld [vmem:[%s20622_s6 + $0x1c4] ss:$16 sps:$4 sm:$0xff]  }
 0xa8f   : > { %11603 = vmatpush1.bf16.msra.mxu0 %v16165_v12  ;;  %11646 = vmatpush1.bf16.msra.mxu1 %v16168_v31  ;;  %v16216_v12 = vld [vmem:[%s20622_s6 + $0x128] ss:$16 sps:$4 sm:$0xff]   ;;  %v16221_v31 = vld [vmem:[%s20622_s6 + $0x144] ss:$16 sps:$4 sm:$0xff]  }
 0xa90   : > { %11604 = vmatprep.subr.bf16.mxu0 %v16173_v53  ;;  %11647 = vmatprep.subr.bf16.mxu1 %v16176_v48  ;;  %v16224_v53 = vld [vmem:[%s20622_s6 + $0x14c] ss:$16 sps:$4 sm:$0xff]   ;;  %v16219_v48 = vld [vmem:[%s20622_s6 + $0x140] ss:$16 sps:$4 sm:$0xff]  }
 0xa91   : > { %v17004_v27 = vpop.eup %17003 }
 0xa92   : > { %v17006_v16 = vpop.eup %17005  ;;  %v10642_v57 = vmul.f32 %v17004_v27, %v17000_v49  ;;  %v16222_v49 = vld [vmem:[%s20622_s6 + $0x148] ss:$16 sps:$4 sm:$0xff]   ;;  %v16236_v27 = vld [vmem:[%s20622_s6 + $0x18c] ss:$16 sps:$4 sm:$0xff]  }
 0xa93   : > { %v17008_v28 = vpop.eup %17007  ;;  %11605 = vmatpush1.bf16.msra.mxu0 %v16171_v35  ;;  %11648 = vmatpush1.bf16.msra.mxu1 %v16174_v22  ;;  %v10625_v40 = vadd.f32 1.0, %v17006_v16  ;;  %v16227_v35 = vld [vmem:[%s20622_s6 + $0x164] ss:$16 sps:$4 sm:$0xff]   ;;  %v16230_v22 = vld [vmem:[%s20622_s6 + $0x16c] ss:$16 sps:$4 sm:$0xff]  }
 0xa94   : > { %v17010_v32 = vpop.eup %17009  ;;  %11606 = vmatprep.subr.bf16.mxu0 %v16179_v45  ;;  %11649 = vmatprep.subr.bf16.mxu1 %v16182_v42  ;;  %v16228_v45 = vld [vmem:[%s20622_s6 + $0x168] ss:$16 sps:$4 sm:$0xff]   ;;  %v16233_v42 = vld [vmem:[%s20622_s6 + $0x184] ss:$16 sps:$4 sm:$0xff]   ;;  %v16231_v16 = vld [vmem:[%s20622_s6 + $0x180] ss:$16 sps:$4 sm:$0xff]  }
 0xa95   : > { %v17012_v60 = vpop.eup %17011  ;;  %v10640_v52 = vmul.f32 %v17010_v32, %v19884_v46  ;;  %v16191_v46 = vld [vmem:[%s20622_s6 + $0xa4] ss:$16 sps:$4 sm:$0xff]   ;;  %v16240_v32 = vld [vmem:[%s20622_s6 + $0x1a8] ss:$16 sps:$4 sm:$0xff]  }
 0xa96   : > { %v10643_v26 = vmul.f32 %v17012_v60, %v17008_v28  ;;  %v17014_v2 = vpop.eup %17013  ;;  %v16239_v28 = vld [vmem:[%s20622_s6 + $0x1a4] ss:$16 sps:$4 sm:$0xff]   ;;  %v16246_v60 = vld [vmem:[%s20622_s6 + $0x1c8] ss:$16 sps:$4 sm:$0xff]  }
 0xa97   : > { %v10644_v39 = vadd.f32 %v10642_v57, %v10640_v52  ;;  %11607 = vmatpush1.bf16.msra.mxu0 %v16177_v41  ;;  %11650 = vmatpush1.bf16.msra.mxu1 %v16180_v30  ;;  %v10641_v34 = vmul.f32 %v17014_v2, %v19900_v25  ;;  %v16189_v25 = vld [vmem:[%s20622_s6 + $0xa0] ss:$16 sps:$4 sm:$0xff]   ;;  %v17016_v5 = vpop.eup %17015  ;;  %v16234_v57 = vld [vmem:[%s20622_s6 + $0x188] ss:$16 sps:$4 sm:$0xff]   ;;  %v16242_v41 = vld [vmem:[%s20622_s6 + $0x1ac] ss:$16 sps:$4 sm:$0xff]  }
 0xa98   : > { %11608 = vmatprep.subr.bf16.mxu0 %v16185_v36  ;;  %11651 = vmatprep.subr.bf16.mxu1 %v16188_v37  ;;  %v16237_v30 = vld [vmem:[%s20622_s6 + $0x1a0] ss:$16 sps:$4 sm:$0xff]   ;;  %v16248_v36 = vld [vmem:[%s20622_s6 + $0x1cc] ss:$16 sps:$4 sm:$0xff]   ;;  %v16251_v52 = vld [vmem:[%s20622_s6 + $0x1e4] ss:$16 sps:$4 sm:$0xff]  }
 0xa99   : > { %17017 = vtanh.f32 %v10644_v39  ;;  %12279 = vst [vmem:[%s20671_s16] sm:$0xff] %v10644_v39  ;;  %v10645_v8 = vadd.f32 %v10643_v26, %v10641_v34  ;;  %v16243_v37 = vld [vmem:[%s20622_s6 + $0x1c0] ss:$16 sps:$4 sm:$0xff]   ;;  %v16254_v26 = vld [vmem:[%s20622_s6 + $0x1ec] ss:$16 sps:$4 sm:$0xff]   ;;  %v16252_v39 = vld [vmem:[%s20622_s6 + $0x1e8] ss:$16 sps:$4 sm:$0xff]  }
 0xa9a   : > { %17019 = vrcp.f32 %v10625_v40  ;;  %v16249_v2 = vld [vmem:[%s20622_s6 + $0x1e0] ss:$16 sps:$4 sm:$0xff]   ;;  %v16260_v34 = vld [vmem:[#allocation6 + $0xc] ss:$16 sps:$4 sm:$0xff]  }
 0xa9b   : > { %11609 = vmatpush1.bf16.msra.mxu0 %v16183_v54  ;;  %11652 = vmatpush1.bf16.msra.mxu1 %v16186_v43  ;;  %17021 = vtanh.f32 %v10645_v8  ;;  %12280 = vst [vmem:[%s20672_s21 + $0x8] sm:$0xff] %v10645_v8  ;;  %v16255_v40 = vld [vmem:[#allocation6] ss:$16 sps:$4 sm:$0xff]   ;;  %v16257_v54 = vld [vmem:[#allocation6 + $0x4] ss:$16 sps:$4 sm:$0xff]  }
 0xa9c   : > { %11610 = vmatprep.subr.bf16.mxu0 %v16191_v46  ;;  %11653 = vmatprep.subr.bf16.mxu1 %v16194_v44  ;;  %v16258_v43 = vld [vmem:[#allocation6 + $0x8] ss:$16 sps:$4 sm:$0xff]   ;;  %v16261_v46 = vld [vmem:[#allocation6 + $0x20] ss:$16 sps:$4 sm:$0xff]   ;;  %v16263_v44 = vld [vmem:[#allocation6 + $0x24] ss:$16 sps:$4 sm:$0xff]  }
 0xa9d   : > { %v16264_v8 = vld [vmem:[#allocation6 + $0x28] ss:$16 sps:$4 sm:$0xff]  }
 0xa9f   : > { %11611 = vmatpush1.bf16.msra.mxu0 %v16189_v25  ;;  %11654 = vmatpush1.bf16.msra.mxu1 %v16192_v4  ;;  %v16266_v25 = vld [vmem:[#allocation6 + $0x2c] ss:$16 sps:$4 sm:$0xff]   ;;  %v16269_v4 = vld [vmem:[#allocation6 + $0x44] ss:$16 sps:$4 sm:$0xff]  }
 0xaa0   : > { %11612 = vmatprep.subr.bf16.mxu0 %v16197_v47  ;;  %11655 = vmatprep.subr.bf16.mxu1 %v16200_v58  ;;  %v16272_v47 = vld [vmem:[#allocation6 + $0x4c] ss:$16 sps:$4 sm:$0xff]   ;;  %v16267_v58 = vld [vmem:[#allocation6 + $0x40] ss:$16 sps:$4 sm:$0xff]  }
 0xaa3   : > { %v17018_v9 = vpop.eup %17017  ;;  %11613 = vmatpush1.bf16.msra.mxu0 %v16195_v0  ;;  %11656 = vmatpush1.bf16.msra.mxu1 %v16198_v61  ;;  %v16270_v0 = vld [vmem:[#allocation6 + $0x48] ss:$16 sps:$4 sm:$0xff]   ;;  %v16275_v61 = vld [vmem:[#allocation6 + $0x64] ss:$16 sps:$4 sm:$0xff]  }
 0xaa4   : > { %11614 = vmatprep.subr.bf16.mxu0 %v16203_v50  ;;  %11657 = vmatprep.subr.bf16.mxu1 %v16206_v51  ;;  %v10648_v24 = vmul.f32 %v17018_v9, %v17016_v5  ;;  %v17020_v62 = vpop.eup %17019  ;;  %v16278_v50 = vld [vmem:[#allocation6 + $0x6c] ss:$16 sps:$4 sm:$0xff]   ;;  %v16273_v51 = vld [vmem:[#allocation6 + $0x60] ss:$16 sps:$4 sm:$0xff]   ;;  %v16276_v5 = vld [vmem:[#allocation6 + $0x68] ss:$16 sps:$4 sm:$0xff]  }
 0xaa5   : > { %v17022_v38 = vpop.eup %17021  ;;  %v16281_v9 = vld [vmem:[#allocation6 + $0x84] ss:$16 sps:$4 sm:$0xff]  }
 0xaa6   : > { %12277 = vst [vmem:[%s20673_s27] sm:$0xff] %v10648_v24  ;;  %v10649_v21 = vmul.f32 %v17022_v38, %v17020_v62  ;;  %v16285_v62 = vld [vmem:[#allocation6 + $0xa0] ss:$16 sps:$4 sm:$0xff]   ;;  %v16288_v38 = vld [vmem:[#allocation6 + $0xa8] ss:$16 sps:$4 sm:$0xff]  }
 0xaa7   : > { %11615 = vmatpush1.bf16.msra.mxu0 %v16201_v55  ;;  %11658 = vmatpush1.bf16.msra.mxu1 %v16204_v56  ;;  %v16284_v55 = vld [vmem:[#allocation6 + $0x8c] ss:$16 sps:$4 sm:$0xff]   ;;  %v16279_v56 = vld [vmem:[#allocation6 + $0x80] ss:$16 sps:$4 sm:$0xff]  }
 0xaa8   : > { %11616 = vmatprep.subr.bf16.mxu0 %v16209_v59  ;;  %11659 = vmatprep.subr.bf16.mxu1 %v16212_v19  ;;  %v10650_v3 = vpack.c.bf16 %v10649_v21, %v10648_v24  ;;  %12278 = vst [vmem:[%s20673_s27 + $0x8] sm:$0xff] %v10649_v21  ;;  %v16282_v59 = vld [vmem:[#allocation6 + $0x88] ss:$16 sps:$4 sm:$0xff]   ;;  %v16287_v19 = vld [vmem:[#allocation6 + $0xa4] ss:$16 sps:$4 sm:$0xff]  }
 0xaa9   : > { %v16290_v24 = vld [vmem:[#allocation6 + $0xac] ss:$16 sps:$4 sm:$0xff]   ;;  %v16291_v21 = vld [vmem:[#allocation6 + $0xc0] ss:$16 sps:$4 sm:$0xff]  }
 0xaab   : > { %11617 = vmatpush1.bf16.msra.mxu0 %v16207_v63  ;;  %11660 = vmatpush1.bf16.msra.mxu1 %v16210_v17  ;;  %v16293_v63 = vld [vmem:[#allocation6 + $0xc4] ss:$16 sps:$4 sm:$0xff]   ;;  %v16296_v17 = vld [vmem:[#allocation6 + $0xcc] ss:$16 sps:$4 sm:$0xff]  }
 0xaac   : > { %11618 = vmatprep.subr.bf16.mxu0 %v16215_v29  ;;  %11661 = vmatprep.subr.bf16.mxu1 %v16218_v1  ;;  %v16294_v29 = vld [vmem:[#allocation6 + $0xc8] ss:$16 sps:$4 sm:$0xff]   ;;  %v16299_v1 = vld [vmem:[#allocation6 + $0xe4] ss:$16 sps:$4 sm:$0xff]  }
 0xaaf   : > { %11619 = vmatpush1.bf16.msra.mxu0 %v16213_v10  ;;  %11662 = vmatpush1.bf16.msra.mxu1 %v16216_v12  ;;  %v16297_v10 = vld [vmem:[#allocation6 + $0xe0] ss:$16 sps:$4 sm:$0xff]   ;;  %v16300_v12 = vld [vmem:[#allocation6 + $0xe8] ss:$16 sps:$4 sm:$0xff]  }
 0xab0   : > { %11620 = vmatprep.subr.bf16.mxu0 %v16221_v31  ;;  %11663 = vmatprep.subr.bf16.mxu1 %v16224_v53  ;;  %v16305_v31 = vld [vmem:[#allocation6 + $0x104] ss:$16 sps:$4 sm:$0xff]   ;;  %v16308_v53 = vld [vmem:[#allocation6 + $0x10c] ss:$16 sps:$4 sm:$0xff]  }
 0xab3   : > { %11621 = vmatpush1.bf16.msra.mxu0 %v16219_v48  ;;  %11664 = vmatpush1.bf16.msra.mxu1 %v16222_v49  ;;  %v16303_v48 = vld [vmem:[#allocation6 + $0x100] ss:$16 sps:$4 sm:$0xff]   ;;  %v16306_v49 = vld [vmem:[#allocation6 + $0x108] ss:$16 sps:$4 sm:$0xff]  }
 0xab4   : > { %11622 = vmatprep.subr.bf16.mxu0 %v16227_v35  ;;  %11665 = vmatprep.subr.bf16.mxu1 %v16230_v22  ;;  %v16311_v35 = vld [vmem:[#allocation6 + $0x124] ss:$16 sps:$4 sm:$0xff]   ;;  %v16314_v22 = vld [vmem:[#allocation6 + $0x12c] ss:$16 sps:$4 sm:$0xff]  }
 0xab7   : > { %11623 = vmatpush1.bf16.msra.mxu0 %v16225_v23  ;;  %11666 = vmatpush1.bf16.msra.mxu1 %v16228_v45  ;;  %v16309_v23 = vld [vmem:[#allocation6 + $0x120] ss:$16 sps:$4 sm:$0xff]   ;;  %v16312_v45 = vld [vmem:[#allocation6 + $0x128] ss:$16 sps:$4 sm:$0xff]  }
 0xab8   : > { %11624 = vmatprep.subr.bf16.mxu0 %v16233_v42  ;;  %11667 = vmatprep.subr.bf16.mxu1 %v16236_v27  ;;  %v16317_v42 = vld [vmem:[#allocation6 + $0x144] ss:$16 sps:$4 sm:$0xff]   ;;  %v16320_v27 = vld [vmem:[#allocation6 + $0x14c] ss:$16 sps:$4 sm:$0xff]  }
 0xabb   : > { %11625 = vmatpush1.bf16.msra.mxu0 %v16231_v16  ;;  %11668 = vmatpush1.bf16.msra.mxu1 %v16234_v57  ;;  %v16315_v16 = vld [vmem:[#allocation6 + $0x140] ss:$16 sps:$4 sm:$0xff]   ;;  %v16318_v57 = vld [vmem:[#allocation6 + $0x148] ss:$16 sps:$4 sm:$0xff]  }
 0xabc   : > { %11626 = vmatprep.subr.bf16.mxu0 %v16239_v28  ;;  %11669 = vmatprep.subr.bf16.mxu1 %v16242_v41  ;;  %v16323_v28 = vld [vmem:[#allocation6 + $0x164] ss:$16 sps:$4 sm:$0xff]   ;;  %v16326_v41 = vld [vmem:[#allocation6 + $0x16c] ss:$16 sps:$4 sm:$0xff]  }
 0xabf   : > { %11627 = vmatpush1.bf16.msra.mxu0 %v16237_v30  ;;  %11670 = vmatpush1.bf16.msra.mxu1 %v16240_v32  ;;  %v16321_v30 = vld [vmem:[#allocation6 + $0x160] ss:$16 sps:$4 sm:$0xff]   ;;  %v16324_v32 = vld [vmem:[#allocation6 + $0x168] ss:$16 sps:$4 sm:$0xff]  }
 0xac0   : > { %11628 = vmatprep.subr.bf16.mxu0 %v16245_v33  ;;  %11671 = vmatprep.subr.bf16.mxu1 %v16248_v36  ;;  %v16327_v33 = vld [vmem:[#allocation6 + $0x180] ss:$16 sps:$4 sm:$0xff]   ;;  %v16329_v36 = vld [vmem:[#allocation6 + $0x184] ss:$16 sps:$4 sm:$0xff]  }
 0xac3   : > { %11629 = vmatpush1.bf16.msra.mxu0 %v16243_v37  ;;  %11672 = vmatpush1.bf16.msra.mxu1 %v16246_v60  ;;  %v16330_v37 = vld [vmem:[#allocation6 + $0x188] ss:$16 sps:$4 sm:$0xff]   ;;  %v16332_v60 = vld [vmem:[#allocation6 + $0x18c] ss:$16 sps:$4 sm:$0xff]  }
 0xac4   : > { %11630 = vmatprep.subr.bf16.mxu0 %v16251_v52  ;;  %11673 = vmatprep.subr.bf16.mxu1 %v16254_v26  ;;  %v16335_v52 = vld [vmem:[#allocation6 + $0x1a4] ss:$16 sps:$4 sm:$0xff]   ;;  %v16338_v26 = vld [vmem:[#allocation6 + $0x1ac] ss:$16 sps:$4 sm:$0xff]  }
 0xac7   : > { %11631 = vmatpush1.bf16.msra.mxu0 %v16249_v2  ;;  %11674 = vmatpush1.bf16.msra.mxu1 %v16252_v39  ;;  %v16333_v2 = vld [vmem:[#allocation6 + $0x1a0] ss:$16 sps:$4 sm:$0xff]   ;;  %v16336_v39 = vld [vmem:[#allocation6 + $0x1a8] ss:$16 sps:$4 sm:$0xff]  }
 0xac8   : > { %12141 = vmatprep.subr.bf16.mxu0 %v16257_v54  ;;  %12184 = vmatprep.subr.bf16.mxu1 %v16260_v34  ;;  %v16344_v54 = vld [vmem:[#allocation6 + $0x1cc] ss:$16 sps:$4 sm:$0xff]   ;;  %v16342_v34 = vld [vmem:[#allocation6 + $0x1c8] ss:$16 sps:$4 sm:$0xff]  }
 0xaca   : > { %11633 = vmatmul.mubr.bf16.vlgmr.msra.gmra.mrb[88].mxu0 %v10650_v3  ;;  %11676 = vmatmul.mubr.bf16.vlgmr.msra.gmra.mrb[88].mxu1 %v10650_v3  ;;  %v16302_v3 = vld [vmem:[#allocation6 + $0xec] ss:$16 sps:$4 sm:$0xff]  }
 0xacb   : > { %12142 = vmatpush1.bf16.msra.mxu0 %v16255_v40  ;;  %12185 = vmatpush1.bf16.msra.mxu1 %v16258_v43  ;;  %v16341_v40 = vld [vmem:[#allocation6 + $0x1c4] ss:$16 sps:$4 sm:$0xff]   ;;  %v16339_v43 = vld [vmem:[#allocation6 + $0x1c0] ss:$16 sps:$4 sm:$0xff]  }
 0xacc   : > { %12143 = vmatprep.subr.bf16.mxu0 %v16263_v44  ;;  %12186 = vmatprep.subr.bf16.mxu1 %v16266_v25  ;;  %v16350_v44 = vld [vmem:[#allocation6 + $0x1ec] ss:$16 sps:$4 sm:$0xff]   ;;  %v16348_v25 = vld [vmem:[#allocation6 + $0x1e8] ss:$16 sps:$4 sm:$0xff]  }
 0xacf   : > { %12144 = vmatpush1.bf16.msra.mxu0 %v16261_v46  ;;  %12187 = vmatpush1.bf16.msra.mxu1 %v16264_v8  ;;  %v16347_v46 = vld [vmem:[#allocation6 + $0x1e4] ss:$16 sps:$4 sm:$0xff]   ;;  %v16345_v8 = vld [vmem:[#allocation6 + $0x1e0] ss:$16 sps:$4 sm:$0xff]  }
 0xad0   : > { %12145 = vmatprep.subr.bf16.mxu0 %v16269_v4  ;;  %12188 = vmatprep.subr.bf16.mxu1 %v16272_v47  ;;  %v10716_v4 = vld [vmem:[%s20670_s24] sm:$0xf] }
 0xad1   : > { %v10721_v47 = vrot.slane %v10716_v4, %v17944_v6 }
 0xad3   : > { %12146 = vmatpush1.bf16.msra.mxu0 %v16267_v58  ;;  %12189 = vmatpush1.bf16.msra.mxu1 %v16270_v0  ;;  %v10725_v58 = vrot.slane %v10716_v4, %v17946_v7 }
 0xad4   : > { %12147 = vmatprep.subr.bf16.mxu0 %v16275_v61  ;;  %12190 = vmatprep.subr.bf16.mxu1 %v16278_v50 }
 0xad7   : > { %12148 = vmatpush1.bf16.msra.mxu0 %v16273_v51  ;;  %12191 = vmatpush1.bf16.msra.mxu1 %v16276_v5 }
 0xad8   : > { %12149 = vmatprep.subr.bf16.mxu0 %v16281_v9  ;;  %12192 = vmatprep.subr.bf16.mxu1 %v16284_v55 }
 0xadb   : > { %12150 = vmatpush1.bf16.msra.mxu0 %v16279_v56  ;;  %12193 = vmatpush1.bf16.msra.mxu1 %v16282_v59 }
 0xadc   : > { %12151 = vmatprep.subr.bf16.mxu0 %v16287_v19  ;;  %12194 = vmatprep.subr.bf16.mxu1 %v16290_v24 }
 0xadf   : > { %12152 = vmatpush1.bf16.msra.mxu0 %v16285_v62  ;;  %12195 = vmatpush1.bf16.msra.mxu1 %v16288_v38  ;;  %v10729_v38 = vrot.slane %v10716_v4, %v17954_v11 }
 0xae0   : > { %12153 = vmatprep.subr.bf16.mxu0 %v16293_v63  ;;  %12196 = vmatprep.subr.bf16.mxu1 %v16296_v17 }
 0xae3   : > { %12154 = vmatpush1.bf16.msra.mxu0 %v16291_v21  ;;  %12197 = vmatpush1.bf16.msra.mxu1 %v16294_v29 }
 0xae4   : > { %12155 = vmatprep.subr.bf16.mxu0 %v16299_v1  ;;  %12198 = vmatprep.subr.bf16.mxu1 %v16302_v3  ;;  %v10733_v1 = vrot.slane %v10716_v4, %v17958_v20 }
 0xae7   : > { %12156 = vmatpush1.bf16.msra.mxu0 %v16297_v10  ;;  %12199 = vmatpush1.bf16.msra.mxu1 %v16300_v12 }
 0xae8   : > { %12157 = vmatprep.subr.bf16.mxu0 %v16305_v31  ;;  %12200 = vmatprep.subr.bf16.mxu1 %v16308_v53 }
 0xaeb   : > { %12158 = vmatpush1.bf16.msra.mxu0 %v16303_v48  ;;  %12201 = vmatpush1.bf16.msra.mxu1 %v16306_v49 }
 0xaec   : > { %12159 = vmatprep.subr.bf16.mxu0 %v16311_v35  ;;  %12202 = vmatprep.subr.bf16.mxu1 %v16314_v22 }
 0xaef   : > { %12160 = vmatpush1.bf16.msra.mxu0 %v16309_v23  ;;  %12203 = vmatpush1.bf16.msra.mxu1 %v16312_v45 }
 0xaf0   : > { %12161 = vmatprep.subr.bf16.mxu0 %v16317_v42  ;;  %12204 = vmatprep.subr.bf16.mxu1 %v16320_v27 }
 0xaf3   : > { %12162 = vmatpush1.bf16.msra.mxu0 %v16315_v16  ;;  %12205 = vmatpush1.bf16.msra.mxu1 %v16318_v57 }
 0xaf4   : > { %12163 = vmatprep.subr.bf16.mxu0 %v16323_v28  ;;  %12206 = vmatprep.subr.bf16.mxu1 %v16326_v41 }
 0xaf7   : > { %12164 = vmatpush1.bf16.msra.mxu0 %v16321_v30  ;;  %12207 = vmatpush1.bf16.msra.mxu1 %v16324_v32 }
 0xaf8   : > { %12165 = vmatprep.subr.bf16.mxu0 %v16329_v36  ;;  %12208 = vmatprep.subr.bf16.mxu1 %v16332_v60 }
 0xafb   : > { %12166 = vmatpush1.bf16.msra.mxu0 %v16327_v33  ;;  %12209 = vmatpush1.bf16.msra.mxu1 %v16330_v37 }
 0xafc   : > { %12167 = vmatprep.subr.bf16.mxu0 %v16335_v52  ;;  %12210 = vmatprep.subr.bf16.mxu1 %v16338_v26 }
 0xaff   : > { %12168 = vmatpush1.bf16.msra.mxu0 %v16333_v2  ;;  %12211 = vmatpush1.bf16.msra.mxu1 %v16336_v39 }
 0xb00   : > { %12169 = vmatprep.subr.bf16.mxu0 %v16341_v40  ;;  %12212 = vmatprep.subr.bf16.mxu1 %v16344_v54 }
 0xb03   : > { %12170 = vmatpush1.bf16.msra.mxu0 %v16339_v43  ;;  %12213 = vmatpush1.bf16.msra.mxu1 %v16342_v34 }
 0xb04   : > { %12171 = vmatprep.subr.bf16.mxu0 %v16347_v46  ;;  %12214 = vmatprep.subr.bf16.mxu1 %v16350_v44 }
 0xb07   : > { %12172 = vmatpush1.bf16.msra.mxu0 %v16345_v8  ;;  %12215 = vmatpush1.bf16.msra.mxu1 %v16348_v25 }
 0xb5d   : > { %v11092_v0 = vpop.f32.mrb[84].mxu0  ;;  %v11135_v61 = vpop.f32.mrb[84].mxu1 }
 0xb5e   : > { %v11093_v50 = vadd.f32 %v11092_v0, %v10721_v47  ;;  %v11094_v51 = vpop.f32.mrb[85].mxu0  ;;  %v11137_v5 = vpop.f32.mrb[85].mxu1  ;;  %v11136_v3 = vadd.f32 %v11135_v61, %v10729_v38 }
 0xb5f   : > { %v11095_v9 = vadd.f32 %v11094_v51, %v10725_v58  ;;  %v11096_v55 = vpop.f32.mrb[86].mxu0  ;;  %v11139_v56 = vpop.f32.mrb[86].mxu1  ;;  %v11138_v12 = vadd.f32 %v11137_v5, %v10733_v1 }
 0xb60   : > { %v14060_v59 = vmul.f32 -1.442695, %v11093_v50  ;;  %v11097_v19 = vadd.f32 %v11096_v55, %v10721_v47  ;;  %v11098_v24 = vpop.f32.mrb[87].mxu0  ;;  %v11141_v62 = vpop.f32.mrb[87].mxu1  ;;  %v11140_v10 = vadd.f32 %v11139_v56, %v10729_v38  ;;  %v14062_v31 = vmul.f32 -1.442695, %v11136_v3 }
 0xb61   : > { %v14061_v63 = vmul.f32 -1.442695, %v11095_v9  ;;  %v11099_v17 = vadd.f32 %v11098_v24, %v10725_v58  ;;  %v11142_v49 = vadd.f32 %v11141_v62, %v10733_v1 }
 0xb62   : > { %17023 = vpow2.f32 %v14060_v59  ;;  %v14063_v21 = vmul.f32 -1.442695, %v11097_v19  ;;  %v14065_v53 = vmul.f32 -1.442695, %v11140_v10 }
 0xb63   : > { %v14064_v29 = vmul.f32 -1.442695, %v11099_v17  ;;  %17025 = vpow2.f32 %v14061_v63 }
 0xb64   : > { %17027 = vpow2.f32 %v14063_v21 }
 0xb65   : > { %17029 = vpow2.f32 %v14064_v29 }
 0xb66   : > { %17031 = vtanh.f32 %v11138_v12 }
 0xb67   : > { %17033 = vpow2.f32 %v14062_v31 }
 0xb68   : > { %17035 = vpow2.f32 %v14065_v53 }
 0xb6c   : > { %v17024_v48 = vpop.eup %17023 }
 0xb6d   : > { %v11162_v35 = vadd.f32 1.0, %v17024_v48  ;;  %v17026_v22 = vpop.eup %17025 }
 0xb6e   : > { %v17028_v23 = vpop.eup %17027  ;;  %v11163_v45 = vadd.f32 1.0, %v17026_v22 }
 0xb6f   : > { %17037 = vrcp.f32 %v11162_v35  ;;  %v11165_v42 = vadd.f32 1.0, %v17028_v23  ;;  %v17030_v27 = vpop.eup %17029 }
 0xb70   : > { %17039 = vtanh.f32 %v11142_v49  ;;  %v11166_v16 = vadd.f32 1.0, %v17030_v27  ;;  %v17032_v57 = vpop.eup %17031 }
 0xb71   : > { %17041 = vrcp.f32 %v11163_v45  ;;  %v17034_v28 = vpop.eup %17033 }
 0xb72   : > { %17043 = vrcp.f32 %v11165_v42  ;;  %v17036_v41 = vpop.eup %17035  ;;  %v11164_v60 = vadd.f32 1.0, %v17034_v28 }
 0xb73   : > { %17045 = vrcp.f32 %v11166_v16  ;;  %v11167_v40 = vadd.f32 1.0, %v17036_v41 }
 0xb74   : > { %17047 = vrcp.f32 %v11164_v60 }
 0xb79   : > { %v17038_v30 = vpop.eup %17037 }
 0xb7a   : > { %v17040_v32 = vpop.eup %17039  ;;  %v11184_v33 = vmul.f32 %v17038_v30, %v17032_v57 }
 0xb7b   : > { %v17042_v36 = vpop.eup %17041 }
 0xb7c   : > { %v17044_v37 = vpop.eup %17043  ;;  %v11182_v52 = vmul.f32 %v17042_v36, %v20147_v14 }
 0xb7d   : > { %v11185_v26 = vmul.f32 %v17044_v37, %v17040_v32  ;;  %v17046_v2 = vpop.eup %17045 }
 0xb7e   : > { %v20385_v39 = vadd.f32 %v11184_v33, %v11182_v52  ;;  %v11183_v54 = vmul.f32 %v17046_v2, %v20151_v18  ;;  %v17048_v34 = vpop.eup %17047  ;;  %v11258_v18 = vld [vmem:[%s20669_s14] sm:$0xf] }
 0xb7f   : > { %v11263_v47 = vrot.slane %v11258_v18, %v17944_v6  ;;  %v11267_v58 = vrot.slane %v11258_v18, %v17946_v7  ;;  %v11271_v38 = vrot.slane %v11258_v18, %v17954_v11  ;;  %v11275_v1 = vrot.slane %v11258_v18, %v17958_v20  ;;  %v11799_v18 = vld [vmem:[%s20670_s24] sm:$0xf] }
 0xb80   : > { %17049 = vtanh.f32 %v20385_v39  ;;  %v20389_v43 = vadd.f32 %v11185_v26, %v11183_v54 }
 0xb81   : > { %17051 = vrcp.f32 %v11167_v40 }
 0xb82   : > { %17053 = vtanh.f32 %v20389_v43 }
 0xb8a   : > { %v17050_v46 = vpop.eup %17049 }
 0xb8b   : > { %v17052_v44 = vpop.eup %17051  ;;  %v11190_v14 = vmul.f32 %v17050_v46, %v17048_v34 }
 0xb8c   : > { %v17054_v8 = vpop.eup %17053 }
 0xb8d   : > { %v11191_v25 = vmul.f32 %v17054_v8, %v17052_v44 }
 0xb8f   : > { %v11192_v4 = vpack.c.bf16 %v11191_v25, %v11190_v14 }
 0xb91   : > { %11193 = vst [vmem:[#allocation3 + $0x30] sm:$0xff] %v11192_v4  ;;  %12173 = vmatprep.mubr.bf16.mxu0 %v11192_v4  ;;  %12216 = vmatprep.mubr.bf16.mxu1 %v11192_v4 }
 0xb9d   : > { %v11634_v0 = vpop.f32.mrb[88].mxu0  ;;  %v11677_v61 = vpop.f32.mrb[88].mxu1 }
 0xb9e   : > { %v11635_v50 = vadd.f32 %v11634_v0, %v11263_v47  ;;  %v11636_v51 = vpop.f32.mrb[89].mxu0  ;;  %v11679_v5 = vpop.f32.mrb[89].mxu1  ;;  %v11678_v3 = vadd.f32 %v11677_v61, %v11271_v38 }
 0xb9f   : > { %v11637_v9 = vadd.f32 %v11636_v51, %v11267_v58  ;;  %v11638_v55 = vpop.f32.mrb[90].mxu0  ;;  %v11681_v56 = vpop.f32.mrb[90].mxu1  ;;  %v11680_v12 = vadd.f32 %v11679_v5, %v11275_v1 }
 0xba0   : > { %v14130_v59 = vmul.f32 -1.442695, %v11635_v50  ;;  %v11639_v19 = vadd.f32 %v11638_v55, %v11263_v47  ;;  %v11640_v24 = vpop.f32.mrb[91].mxu0  ;;  %v11683_v62 = vpop.f32.mrb[91].mxu1  ;;  %v11682_v10 = vadd.f32 %v11681_v56, %v11271_v38  ;;  %v14132_v31 = vmul.f32 -1.442695, %v11678_v3 }
 0xba1   : > { %v14131_v63 = vmul.f32 -1.442695, %v11637_v9  ;;  %v11641_v17 = vadd.f32 %v11640_v24, %v11267_v58  ;;  %v11684_v49 = vadd.f32 %v11683_v62, %v11275_v1  ;;  %v11804_v47 = vrot.slane %v11799_v18, %v17944_v6 }
 0xba2   : > { %17055 = vpow2.f32 %v14130_v59  ;;  %v14133_v21 = vmul.f32 -1.442695, %v11639_v19  ;;  %v14135_v53 = vmul.f32 -1.442695, %v11682_v10  ;;  %v11808_v58 = vrot.slane %v11799_v18, %v17946_v7 }
 0xba3   : > { %v14134_v29 = vmul.f32 -1.442695, %v11641_v17  ;;  %17057 = vpow2.f32 %v14131_v63  ;;  %v11812_v38 = vrot.slane %v11799_v18, %v17954_v11  ;;  %v11816_v7 = vrot.slane %v11799_v18, %v17958_v20 }
 0xba4   : > { %17059 = vpow2.f32 %v14133_v21 }
 0xba5   : > { %17061 = vpow2.f32 %v14134_v29 }
 0xba6   : > { %17063 = vtanh.f32 %v11680_v12 }
 0xba7   : > { %17065 = vpow2.f32 %v14132_v31 }
 0xba8   : > { %17067 = vpow2.f32 %v14135_v53 }
 0xbac   : > { %v17056_v48 = vpop.eup %17055 }
 0xbad   : > { %v11704_v35 = vadd.f32 1.0, %v17056_v48  ;;  %v17058_v22 = vpop.eup %17057 }
 0xbae   : > { %v17060_v23 = vpop.eup %17059  ;;  %v11705_v45 = vadd.f32 1.0, %v17058_v22 }
 0xbaf   : > { %17069 = vrcp.f32 %v11704_v35  ;;  %v11707_v42 = vadd.f32 1.0, %v17060_v23  ;;  %v17062_v27 = vpop.eup %17061 }
 0xbb0   : > { %17071 = vtanh.f32 %v11684_v49  ;;  %v11708_v16 = vadd.f32 1.0, %v17062_v27  ;;  %v17064_v57 = vpop.eup %17063 }
 0xbb1   : > { %17073 = vrcp.f32 %v11705_v45  ;;  %v17066_v28 = vpop.eup %17065 }
 0xbb2   : > { %17075 = vrcp.f32 %v11707_v42  ;;  %v17068_v41 = vpop.eup %17067  ;;  %v11706_v37 = vadd.f32 1.0, %v17066_v28 }
 0xbb3   : > { %17077 = vrcp.f32 %v11708_v16  ;;  %v11709_v54 = vadd.f32 1.0, %v17068_v41 }
 0xbb4   : > { %17079 = vrcp.f32 %v11706_v37 }
 0xbb9   : > { %v17070_v30 = vpop.eup %17069 }
 0xbba   : > { %v17072_v32 = vpop.eup %17071  ;;  %v11726_v33 = vmul.f32 %v17070_v30, %v17064_v57 }
 0xbbb   : > { %v17074_v36 = vpop.eup %17073 }
 0xbbc   : > { %v17076_v60 = vpop.eup %17075  ;;  %v11724_v52 = vmul.f32 %v17074_v36, %v20162_v15 }
 0xbbd   : > { %v11727_v26 = vmul.f32 %v17076_v60, %v17072_v32  ;;  %v17078_v2 = vpop.eup %17077 }
 0xbbe   : > { %v11728_v40 = vadd.f32 %v11726_v33, %v11724_v52  ;;  %v11725_v34 = vmul.f32 %v17078_v2, %v20169_v13  ;;  %v17080_v15 = vpop.eup %17079 }
 0xbc0   : > { %17081 = vtanh.f32 %v11728_v40  ;;  %14208 = vst [vmem:[%s20672_s21 + $0x10] sm:$0xff] %v11728_v40  ;;  %v11729_v46 = vadd.f32 %v11727_v26, %v11725_v34 }
 0xbc1   : > { %17083 = vrcp.f32 %v11709_v54 }
 0xbc2   : > { %17085 = vtanh.f32 %v11729_v46  ;;  %14209 = vst [vmem:[%s20672_s21 + $0x18] sm:$0xff] %v11729_v46 }
 0xbca   : > { %v17082_v44 = vpop.eup %17081 }
 0xbcb   : > { %v11732_v8 = vmul.f32 %v17082_v44, %v17080_v15  ;;  %v17084_v14 = vpop.eup %17083 }
 0xbcc   : > { %v17086_v25 = vpop.eup %17085 }
 0xbcd   : > { %14206 = vst [vmem:[%s20673_s27 + $0x10] sm:$0xff] %v11732_v8  ;;  %v11733_v13 = vmul.f32 %v17086_v25, %v17084_v14 }
 0xbcf   : > { %v11734_v4 = vpack.c.bf16 %v11733_v13, %v11732_v8  ;;  %14207 = vst [vmem:[%s20673_s27 + $0x18] sm:$0xff] %v11733_v13 }
 0xbd1   : > { %12174 = vmatmul.mubr.bf16.vlgmr.msra.gmra.mrb[92].mxu0 %v11734_v4  ;;  %12217 = vmatmul.mubr.bf16.vlgmr.msra.gmra.mrb[92].mxu1 %v11734_v4 }
 0xca4   : > { %v12175_v0 = vpop.f32.mrb[92].mxu0  ;;  %v12218_v61 = vpop.f32.mrb[92].mxu1 }
 0xca5   : > { %v12176_v50 = vadd.f32 %v12175_v0, %v11804_v47  ;;  %v12177_v51 = vpop.f32.mrb[93].mxu0  ;;  %v12220_v5 = vpop.f32.mrb[93].mxu1  ;;  %v12219_v29 = vadd.f32 %v12218_v61, %v11812_v38 }
 0xca6   : > { %v12178_v9 = vadd.f32 %v12177_v51, %v11808_v58  ;;  %v12179_v55 = vpop.f32.mrb[94].mxu0  ;;  %v12222_v56 = vpop.f32.mrb[94].mxu1  ;;  %v12221_v3 = vadd.f32 %v12220_v5, %v11816_v7 }
 0xca7   : > { %v14200_v59 = vmul.f32 -1.442695, %v12176_v50  ;;  %v12180_v19 = vadd.f32 %v12179_v55, %v11804_v47  ;;  %v12181_v24 = vpop.f32.mrb[95].mxu0  ;;  %v12224_v62 = vpop.f32.mrb[95].mxu1  ;;  %v12223_v1 = vadd.f32 %v12222_v56, %v11812_v38  ;;  %v14202_v10 = vmul.f32 -1.442695, %v12219_v29 }
 0xca8   : > { %v14201_v63 = vmul.f32 -1.442695, %v12178_v9  ;;  %v12182_v17 = vadd.f32 %v12181_v24, %v11808_v58  ;;  %v12225_v53 = vadd.f32 %v12224_v62, %v11816_v7 }
 0xca9   : > { %17087 = vpow2.f32 %v14200_v59  ;;  %v14203_v6 = vmul.f32 -1.442695, %v12180_v19  ;;  %v14205_v12 = vmul.f32 -1.442695, %v12223_v1 }
 0xcaa   : > { %v14204_v21 = vmul.f32 -1.442695, %v12182_v17  ;;  %17089 = vpow2.f32 %v14201_v63 }
 0xcab   : > { %17091 = vpow2.f32 %v14203_v6 }
 0xcac   : > { %17093 = vpow2.f32 %v14204_v21 }
 0xcad   : > { %17095 = vtanh.f32 %v12221_v3 }
 0xcae   : > { %17097 = vpow2.f32 %v14202_v10 }
 0xcaf   : > { %17099 = vpow2.f32 %v14205_v12 }
 0xcb3   : > { %v17088_v31 = vpop.eup %17087 }
 0xcb4   : > { %v12245_v48 = vadd.f32 1.0, %v17088_v31  ;;  %v17090_v11 = vpop.eup %17089 }
 0xcb5   : > { %v17092_v49 = vpop.eup %17091  ;;  %v12246_v35 = vadd.f32 1.0, %v17090_v11 }
 0xcb6   : > { %17101 = vrcp.f32 %v12245_v48  ;;  %v12248_v22 = vadd.f32 1.0, %v17092_v49  ;;  %v17094_v20 = vpop.eup %17093 }
 0xcb7   : > { %17103 = vtanh.f32 %v12225_v53  ;;  %v12249_v23 = vadd.f32 1.0, %v17094_v20  ;;  %v17096_v45 = vpop.eup %17095 }
 0xcb8   : > { %17105 = vrcp.f32 %v12246_v35  ;;  %v17098_v42 = vpop.eup %17097 }
 0xcb9   : > { %17107 = vrcp.f32 %v12248_v22  ;;  %v17100_v27 = vpop.eup %17099  ;;  %v12247_v30 = vadd.f32 1.0, %v17098_v42 }
 0xcba   : > { %17109 = vrcp.f32 %v12249_v23  ;;  %v12250_v52 = vadd.f32 1.0, %v17100_v27 }
 0xcbb   : > { %17111 = vrcp.f32 %v12247_v30 }
 0xcc0   : > { %v17102_v16 = vpop.eup %17101 }
 0xcc1   : > { %v17104_v57 = vpop.eup %17103  ;;  %v12267_v28 = vmul.f32 %v17102_v16, %v17096_v45 }
 0xcc2   : > { %v17106_v41 = vpop.eup %17105 }
 0xcc3   : > { %v17108_v32 = vpop.eup %17107  ;;  %v12265_v33 = vmul.f32 %v17106_v41, %v20385_v39 }
 0xcc4   : > { %v12268_v36 = vmul.f32 %v17108_v32, %v17104_v57  ;;  %v17110_v37 = vpop.eup %17109 }
 0xcc5   : > { %v12269_v60 = vadd.f32 %v12267_v28, %v12265_v33  ;;  %v12266_v26 = vmul.f32 %v17110_v37, %v20389_v43  ;;  %v17112_v39 = vpop.eup %17111 }
 0xcc7   : > { %17113 = vtanh.f32 %v12269_v60  ;;  %14212 = vst [vmem:[%s20672_s21 + $0x20] sm:$0xff] %v12269_v60  ;;  %v12270_v2 = vadd.f32 %v12268_v36, %v12266_v26 }
 0xcc8   : > { %17115 = vrcp.f32 %v12250_v52 }
 0xcc9   : > { %17117 = vtanh.f32 %v12270_v2  ;;  %14213 = vst [vmem:[%s20672_s21 + $0x28] sm:$0xff] %v12270_v2 }
 0xcd1   : > { %v17114_v40 = vpop.eup %17113 }
 0xcd2   : > { %v12273_v54 = vmul.f32 %v17114_v40, %v17112_v39  ;;  %v17116_v34 = vpop.eup %17115 }
 0xcd3   : > { %v17118_v46 = vpop.eup %17117 }
 0xcd4   : > { %14210 = vst [vmem:[%s20673_s27 + $0x20] sm:$0xff] %v12273_v54  ;;  %v12274_v43 = vmul.f32 %v17118_v46, %v17116_v34 }
 0xcd6   : > { %v12275_v15 = vpack.c.bf16 %v12274_v43, %v12273_v54  ;;  %14211 = vst [vmem:[%s20673_s27 + $0x28] sm:$0xff] %v12274_v43 }
 0xcd8   : > { %12276 = vst [vmem:[#allocation3 + $0x38] sm:$0xff] %v12275_v15 }
 0xcd9 PF: > { %v17151_v44 = vld [vmem:[%s17560_s22 + $0x4] ss:$8 sps:$4 sm:$0xff]   ;;  %v17153_v8 = vld [vmem:[%s17560_s22] ss:$8 sps:$4 sm:$0xff]   ;;  %v17313_v14 = vmov 0   ;;  %v12295_v38 = vld [vmem:[#allocation3 + $0x10] sm:$0xff]  ;;  %v12319_v21 = vlaneseq }
 0xcda   : > { %12441 = vmatprep.mubr.bf16.mxu0 %v17313_v14  ;;  %12481 = vmatprep.mubr.bf16.mxu1 %v17313_v14  ;;  %v17154_v25 = vld [vmem:[%s17560_s22 + $0x14] ss:$8 sps:$4 sm:$0xff]   ;;  %v17156_v13 = vld [vmem:[%s17560_s22 + $0x10] ss:$8 sps:$4 sm:$0xff]   ;;  %v17157_v4 = vld [vmem:[%s17560_s22 + $0x24] ss:$8 sps:$4 sm:$0xff]  }
 0xcdb   : > { %12409 = vmatprep.subr.bf16.mxu0 %v17151_v44  ;;  %14365 = vmatprep.subr.bf16.mxu1 %v17151_v44  ;;  %v17159_v18 = vld [vmem:[%s17560_s22 + $0x20] ss:$8 sps:$4 sm:$0xff]   ;;  %v17160_v47 = vld [vmem:[%s17560_s22 + $0x34] ss:$8 sps:$4 sm:$0xff]   ;;  %v17162_v58 = vld [vmem:[%s17560_s22 + $0x30] ss:$8 sps:$4 sm:$0xff]  }
 0xcdc   : > { %12410 = vmatpush1.bf16.msra.mxu0 %v17153_v8  ;;  %14373 = vmatpush1.bf16.msra.mxu1 %v17153_v8  ;;  %v17163_v0 = vld [vmem:[%s17560_s22 + $0x44] ss:$8 sps:$4 sm:$0xff]   ;;  %v17165_v61 = vld [vmem:[%s17560_s22 + $0x40] ss:$8 sps:$4 sm:$0xff]   ;;  %v17166_v50 = vld [vmem:[%s17560_s22 + $0x54] ss:$8 sps:$4 sm:$0xff]  }
 0xcdd   : > { %12411 = vmatprep.subr.bf16.mxu0 %v17154_v25  ;;  %14366 = vmatprep.subr.bf16.mxu1 %v17154_v25  ;;  %v17168_v51 = vld [vmem:[%s17560_s22 + $0x50] ss:$8 sps:$4 sm:$0xff]   ;;  %v17169_v5 = vld [vmem:[%s17560_s22 + $0x64] ss:$8 sps:$4 sm:$0xff]   ;;  %v17171_v9 = vld [vmem:[%s17560_s22 + $0x60] ss:$8 sps:$4 sm:$0xff]  }
 0xcde   : > { %v17172_v55 = vld [vmem:[%s17560_s22 + $0x74] ss:$8 sps:$4 sm:$0xff]   ;;  %v17174_v56 = vld [vmem:[%s17560_s22 + $0x70] ss:$8 sps:$4 sm:$0xff]   ;;  %v12293_v59 = vld [vmem:[#allocation3] sm:$0xff]  ;;  %v12320_v7 = vshrl.u32 %v12319_v21, 7 }
 0xcdf   : > { %v12297_v19 = vld [vmem:[#allocation3 + $0x20] sm:$0xff]  ;;  %v12294_v24 = vld [vmem:[#allocation3 + $0x8] sm:$0xff]  ;;  %v12299_v63 = vld [vmem:[#allocation3 + $0x30] sm:$0xff]  ;;  %s20674_s18 = sld [smem:[#allocation15_spill]] }
 0xce0   : > { %12412 = vmatpush1.bf16.msra.mxu0 %v17156_v13  ;;  %14374 = vmatpush1.bf16.msra.mxu1 %v17156_v13  ;;  %v12298_v62 = vld [vmem:[#allocation3 + $0x28] sm:$0xff]  ;;  %v12296_v17 = vld [vmem:[#allocation3 + $0x18] sm:$0xff]  ;;  %v12321_v29 = vsub.s32 0, %v12320_v7  ;;  %v12317_v1 = vld [vmem:[%s522_s7] sm:$0x3]  ;;  %v12325_v3 = vsub.s32 1, %v12320_v7 }
 0xce1   : > { %12413 = vmatprep.subr.bf16.mxu0 %v17157_v4  ;;  %14367 = vmatprep.subr.bf16.mxu1 %v17157_v4  ;;  %v12300_v6 = vld [vmem:[#allocation3 + $0x38] sm:$0xff] }
 0xce2   : > { %v20463_v10 = vrot.slane %v12317_v1, %v12321_v29  ;;  %v20465_v12 = vrot.slane %v12317_v1, %v12325_v3 }
 0xce4   : > { %12414 = vmatpush1.bf16.msra.mxu0 %v17159_v18  ;;  %14375 = vmatpush1.bf16.msra.mxu1 %v17159_v18 }
 0xce5   : > { %12415 = vmatprep.subr.bf16.mxu0 %v17160_v47  ;;  %14368 = vmatprep.subr.bf16.mxu1 %v17160_v47  ;;  %p20675_p13 = scmp.ne.s32.totalorder %s20674_s18, 0 }
 0xce6   : > { %s14236_s7 = sshll.u32 (%p20675_p13), %s17408_s17, 4  ;;  %s20676_s12 = sld [smem:[#allocation19_spill]] (%p20675_p13) }
 0xce8   : > { %12416 = vmatpush1.bf16.msra.mxu0 %v17162_v58  ;;  %14376 = vmatpush1.bf16.msra.mxu1 %v17162_v58 }
 0xce9   : > { %12417 = vmatprep.subr.bf16.mxu0 %v17163_v0  ;;  %14369 = vmatprep.subr.bf16.mxu1 %v17163_v0 }
 0xcec   : > { %12418 = vmatpush1.bf16.msra.mxu0 %v17165_v61  ;;  %14377 = vmatpush1.bf16.msra.mxu1 %v17165_v61  ;;  %s20540_s20 = scalar_lea.vmem (%p20675_p13), %s20676_s12, %s14236_s7 }
 0xced   : > { %12419 = vmatprep.subr.bf16.mxu0 %v17166_v50  ;;  %14370 = vmatprep.subr.bf16.mxu1 %v17166_v50 }
 0xcf0   : > { %12420 = vmatpush1.bf16.msra.mxu0 %v17168_v51  ;;  %14378 = vmatpush1.bf16.msra.mxu1 %v17168_v51 }
 0xcf1   : > { %12421 = vmatprep.subr.bf16.mxu0 %v17169_v5  ;;  %14371 = vmatprep.subr.bf16.mxu1 %v17169_v5 }
 0xcf4   : > { %12422 = vmatpush1.bf16.msra.mxu0 %v17171_v9  ;;  %14379 = vmatpush1.bf16.msra.mxu1 %v17171_v9 }
 0xcf5   : > { %12423 = vmatprep.subr.bf16.mxu0 %v17172_v55  ;;  %14372 = vmatprep.subr.bf16.mxu1 %v17172_v55 }
 0xcf8   : > { %12424 = vmatpush1.bf16.msra.mxu0 %v17174_v56  ;;  %14380 = vmatpush1.bf16.msra.mxu1 %v17174_v56 }
 0xcfb   : > { %12442 = vmatmul.mubr.bf16.vlgmr.msra.gmra.mrb[0].mxu0 %v12293_v59  ;;  %12482 = vmatmul.mubr.bf16.vlgmr.msra.gmra.mrb[0].mxu1 %v12297_v19 }
 0xcfc   : > { %12451 = vmatprep.mubr.bf16.mxu0 %v17313_v14  ;;  %12491 = vmatprep.mubr.bf16.mxu1 %v17313_v14 }
 0xd03   : > { %12452 = vmatmul.mubr.bf16.gmra.mrb[4].mxu0 %v12294_v24  ;;  %12492 = vmatmul.mubr.bf16.gmra.mrb[4].mxu1 %v12298_v62 }
 0xd04   : > { %12461 = vmatprep.mubr.bf16.mxu0 %v17313_v14  ;;  %12501 = vmatprep.mubr.bf16.mxu1 %v17313_v14 }
 0xd0b   : > { %12462 = vmatmul.mubr.bf16.gmra.mrb[8].mxu0 %v12295_v38  ;;  %12502 = vmatmul.mubr.bf16.gmra.mrb[8].mxu1 %v12299_v63 }
 0xd0c   : > { %12471 = vmatprep.mubr.bf16.mxu0 %v17313_v14  ;;  %12511 = vmatprep.mubr.bf16.mxu1 %v17313_v14 }
 0xd13   : > { %12472 = vmatmul.mubr.bf16.gmra.mrb[12].mxu0 %v12296_v17  ;;  %12512 = vmatmul.mubr.bf16.gmra.mrb[12].mxu1 %v12300_v6 }
 0xdce   : > { %v12443_v31 = vpop.f32.mrb[0].mxu0  ;;  %v12483_v53 = vpop.f32.mrb[0].mxu1 }
 0xdcf   : > { %v12444_v48 = vadd.f32 %v12443_v31, %v20463_v10  ;;  %v12484_v11 = vadd.f32 %v12483_v53, %v20463_v10  ;;  %v12445_v49 = vpop.f32.mrb[1].mxu0  ;;  %v12485_v35 = vpop.f32.mrb[1].mxu1 }
 0xdd0   : > { %v12446_v22 = vadd.f32 %v12445_v49, %v20465_v12  ;;  %v12486_v20 = vadd.f32 %v12485_v35, %v20465_v12  ;;  %v12447_v23 = vpop.f32.mrb[2].mxu0  ;;  %v12487_v45 = vpop.f32.mrb[2].mxu1 }
 0xdd1   : > { %12522 = vst [vmem:[%s17573_s9] sm:$0xff] %v12444_v48  ;;  %12538 = vst [vmem:[%s17573_s9 + $0x80] sm:$0xff] %v12484_v11  ;;  %v12448_v42 = vadd.f32 %v12447_v23, %v20463_v10  ;;  %v12488_v27 = vadd.f32 %v12487_v45, %v20463_v10  ;;  %v12449_v16 = vpop.f32.mrb[3].mxu0  ;;  %v12489_v57 = vpop.f32.mrb[3].mxu1 }
 0xdd2   : > { %12523 = vst [vmem:[%s17573_s9 + $0x8] sm:$0xff] %v12446_v22  ;;  %12539 = vst [vmem:[%s17573_s9 + $0x88] sm:$0xff] %v12486_v20  ;;  %v12450_v28 = vadd.f32 %v12449_v16, %v20465_v12  ;;  %v12490_v41 = vadd.f32 %v12489_v57, %v20465_v12 }
 0xdd3   : > { %12524 = vst [vmem:[%s17573_s9 + $0x10] sm:$0xff] %v12448_v42  ;;  %12540 = vst [vmem:[%s17573_s9 + $0x90] sm:$0xff] %v12488_v27 }
 0xdd4   : > { %12525 = vst [vmem:[%s17573_s9 + $0x18] sm:$0xff] %v12450_v28  ;;  %12541 = vst [vmem:[%s17573_s9 + $0x98] sm:$0xff] %v12490_v41 }
 0xdd6   : > { %v12453_v30 = vpop.f32.mrb[4].mxu0  ;;  %v12493_v32 = vpop.f32.mrb[4].mxu1 }
 0xdd7   : > { %v12454_v33 = vadd.f32 %v12453_v30, %v20463_v10  ;;  %v12494_v36 = vadd.f32 %v12493_v32, %v20463_v10  ;;  %v12455_v37 = vpop.f32.mrb[5].mxu0  ;;  %v12495_v60 = vpop.f32.mrb[5].mxu1 }
 0xdd8   : > { %v12456_v52 = vadd.f32 %v12455_v37, %v20465_v12  ;;  %v12496_v26 = vadd.f32 %v12495_v60, %v20465_v12  ;;  %v12457_v2 = vpop.f32.mrb[6].mxu0  ;;  %v12497_v39 = vpop.f32.mrb[6].mxu1  ;;  %v12608_v30 = vld [vmem:[%s17573_s9 + $0x80] sm:$0xff] (%p20675_p13) }
 0xdd9   : > { %12526 = vst [vmem:[%s17573_s9 + $0x20] sm:$0xff] %v12454_v33  ;;  %12542 = vst [vmem:[%s17573_s9 + $0xa0] sm:$0xff] %v12494_v36  ;;  %v12458_v40 = vadd.f32 %v12457_v2, %v20463_v10  ;;  %v12498_v54 = vadd.f32 %v12497_v39, %v20463_v10  ;;  %v12459_v34 = vpop.f32.mrb[7].mxu0  ;;  %v12499_v46 = vpop.f32.mrb[7].mxu1  ;;  %v12610_v32 = vld [vmem:[%s17573_s9 + $0x88] sm:$0xff] (%p20675_p13) }
 0xdda   : > { %12527 = vst [vmem:[%s17573_s9 + $0x28] sm:$0xff] %v12456_v52  ;;  %12543 = vst [vmem:[%s17573_s9 + $0xa8] sm:$0xff] %v12496_v26  ;;  %v12460_v43 = vadd.f32 %v12459_v34, %v20465_v12  ;;  %v12500_v15 = vadd.f32 %v12499_v46, %v20465_v12  ;;  %v12580_v48 = vld [vmem:[%s17573_s9 + $0x10] sm:$0xff] (%p20675_p13) }
 0xddb   : > { %12528 = vst [vmem:[%s17573_s9 + $0x30] sm:$0xff] %v12458_v40  ;;  %12544 = vst [vmem:[%s17573_s9 + $0xb0] sm:$0xff] %v12498_v54  ;;  %v12582_v11 = vld [vmem:[%s17573_s9 + $0x18] sm:$0xff] (%p20675_p13)  ;;  %v12612_v33 = vld [vmem:[%s17573_s9 + $0x90] sm:$0xff] (%p20675_p13) }
 0xddc   : > { %12529 = vst [vmem:[%s17573_s9 + $0x38] sm:$0xff] %v12460_v43  ;;  %12545 = vst [vmem:[%s17573_s9 + $0xb8] sm:$0xff] %v12500_v15  ;;  %v12614_v36 = vld [vmem:[%s17573_s9 + $0x98] sm:$0xff] (%p20675_p13) }
 0xddd   : > { %12581 = vst [vmem:[%s20540_s20 + $0x20] sm:$0xff] (%p20675_p13), %v12580_v48  ;;  %12583 = vst [vmem:[%s20540_s20 + $0x28] sm:$0xff] (%p20675_p13), %v12582_v11 }
 0xdde   : > { %v12463_v44 = vpop.f32.mrb[8].mxu0  ;;  %v12503_v8 = vpop.f32.mrb[8].mxu1  ;;  %12609 = vst [vmem:[%s20540_s20 + $0x100] sm:$0xff] (%p20675_p13), %v12608_v30  ;;  %12611 = vst [vmem:[%s20540_s20 + $0x108] sm:$0xff] (%p20675_p13), %v12610_v32 }
 0xddf   : > { %v12464_v14 = vadd.f32 %v12463_v44, %v20463_v10  ;;  %v12504_v25 = vadd.f32 %v12503_v8, %v20463_v10  ;;  %v12465_v13 = vpop.f32.mrb[9].mxu0  ;;  %v12505_v4 = vpop.f32.mrb[9].mxu1  ;;  %12613 = vst [vmem:[%s20540_s20 + $0x120] sm:$0xff] (%p20675_p13), %v12612_v33  ;;  %12615 = vst [vmem:[%s20540_s20 + $0x128] sm:$0xff] (%p20675_p13), %v12614_v36 }
 0xde0   : > { %v12466_v18 = vadd.f32 %v12465_v13, %v20465_v12  ;;  %v12506_v47 = vadd.f32 %v12505_v4, %v20465_v12  ;;  %v12467_v58 = vpop.f32.mrb[10].mxu0  ;;  %v12507_v0 = vpop.f32.mrb[10].mxu1  ;;  %v12584_v49 = vld [vmem:[%s17573_s9 + $0x20] sm:$0xff] (%p20675_p13) }
 0xde1   : > { %12530 = vst [vmem:[%s17573_s9 + $0x40] sm:$0xff] %v12464_v14  ;;  %12546 = vst [vmem:[%s17573_s9 + $0xc0] sm:$0xff] %v12504_v25  ;;  %v12468_v61 = vadd.f32 %v12467_v58, %v20463_v10  ;;  %v12508_v50 = vadd.f32 %v12507_v0, %v20463_v10  ;;  %v12469_v51 = vpop.f32.mrb[11].mxu0  ;;  %v12509_v5 = vpop.f32.mrb[11].mxu1  ;;  %v12586_v35 = vld [vmem:[%s17573_s9 + $0x28] sm:$0xff] (%p20675_p13)  ;;  %v12616_v37 = vld [vmem:[%s17573_s9 + $0xa0] sm:$0xff] (%p20675_p13) }
 0xde2   : > { %12531 = vst [vmem:[%s17573_s9 + $0x48] sm:$0xff] %v12466_v18  ;;  %12547 = vst [vmem:[%s17573_s9 + $0xc8] sm:$0xff] %v12506_v47  ;;  %v12470_v9 = vadd.f32 %v12469_v51, %v20465_v12  ;;  %v12510_v55 = vadd.f32 %v12509_v5, %v20465_v12  ;;  %v12588_v22 = vld [vmem:[%s17573_s9 + $0x30] sm:$0xff] (%p20675_p13)  ;;  %v12618_v60 = vld [vmem:[%s17573_s9 + $0xa8] sm:$0xff] (%p20675_p13) }
 0xde3   : > { %12532 = vst [vmem:[%s17573_s9 + $0x50] sm:$0xff] %v12468_v61  ;;  %12548 = vst [vmem:[%s17573_s9 + $0xd0] sm:$0xff] %v12508_v50  ;;  %v12590_v20 = vld [vmem:[%s17573_s9 + $0x38] sm:$0xff] (%p20675_p13)  ;;  %v12620_v52 = vld [vmem:[%s17573_s9 + $0xb0] sm:$0xff] (%p20675_p13) }
 0xde4   : > { %12533 = vst [vmem:[%s17573_s9 + $0x58] sm:$0xff] %v12470_v9  ;;  %12549 = vst [vmem:[%s17573_s9 + $0xd8] sm:$0xff] %v12510_v55  ;;  %v12622_v26 = vld [vmem:[%s17573_s9 + $0xb8] sm:$0xff] (%p20675_p13) }
 0xde5   : > { %12585 = vst [vmem:[%s20540_s20 + $0x40] sm:$0xff] (%p20675_p13), %v12584_v49  ;;  %12587 = vst [vmem:[%s20540_s20 + $0x48] sm:$0xff] (%p20675_p13), %v12586_v35 }
 0xde6   : > { %v12473_v56 = vpop.f32.mrb[12].mxu0  ;;  %v12513_v59 = vpop.f32.mrb[12].mxu1  ;;  %12560 = sbr.rel (!%p20675_p13) target bundleno = 3574 (0xdf6), region = 88  ;;  %12589 = vst [vmem:[%s20540_s20 + $0x60] sm:$0xff] (%p20675_p13), %v12588_v22  ;;  %12591 = vst [vmem:[%s20540_s20 + $0x68] sm:$0xff] (%p20675_p13), %v12590_v20 }
 0xde7   : > { %v12474_v19 = vadd.f32 %v12473_v56, %v20463_v10  ;;  %v12514_v24 = vadd.f32 %v12513_v59, %v20463_v10  ;;  %v12475_v62 = vpop.f32.mrb[13].mxu0  ;;  %v12515_v38 = vpop.f32.mrb[13].mxu1  ;;  %12617 = vst [vmem:[%s20540_s20 + $0x140] sm:$0xff] (%p20675_p13), %v12616_v37  ;;  %12619 = vst [vmem:[%s20540_s20 + $0x148] sm:$0xff] (%p20675_p13), %v12618_v60 }
 0xde8   : > { %v12476_v63 = vadd.f32 %v12475_v62, %v20465_v12  ;;  %v12516_v17 = vadd.f32 %v12515_v38, %v20465_v12  ;;  %v12477_v6 = vpop.f32.mrb[14].mxu0  ;;  %v12517_v21 = vpop.f32.mrb[14].mxu1  ;;  %v12592_v23 = vld [vmem:[%s17573_s9 + $0x40] sm:$0xff] (%p20675_p13)  ;;  %12621 = vst [vmem:[%s20540_s20 + $0x160] sm:$0xff] (%p20675_p13), %v12620_v52  ;;  %12623 = vst [vmem:[%s20540_s20 + $0x168] sm:$0xff] (%p20675_p13), %v12622_v26 }
 0xde9   : > { %12534 = vst [vmem:[%s17573_s9 + $0x60] sm:$0xff] %v12474_v19  ;;  %12550 = vst [vmem:[%s17573_s9 + $0xe0] sm:$0xff] %v12514_v24  ;;  %v12478_v7 = vadd.f32 %v12477_v6, %v20463_v10  ;;  %v12518_v29 = vadd.f32 %v12517_v21, %v20463_v10  ;;  %v12479_v1 = vpop.f32.mrb[15].mxu0  ;;  %v12519_v3 = vpop.f32.mrb[15].mxu1  ;;  %v12576_v10 = vld [vmem:[%s17573_s9] sm:$0xff] (%p20675_p13)  ;;  %v12594_v45 = vld [vmem:[%s17573_s9 + $0x48] sm:$0xff] (%p20675_p13) }
 0xdea   : > { %12535 = vst [vmem:[%s17573_s9 + $0x68] sm:$0xff] %v12476_v63  ;;  %12551 = vst [vmem:[%s17573_s9 + $0xe8] sm:$0xff] %v12516_v17  ;;  %v12480_v31 = vadd.f32 %v12479_v1, %v20465_v12  ;;  %v12520_v53 = vadd.f32 %v12519_v3, %v20465_v12  ;;  %v12578_v12 = vld [vmem:[%s17573_s9 + $0x8] sm:$0xff] (%p20675_p13)  ;;  %v12596_v42 = vld [vmem:[%s17573_s9 + $0x50] sm:$0xff] (%p20675_p13) }
 0xdeb   : > { %12536 = vst [vmem:[%s17573_s9 + $0x70] sm:$0xff] %v12478_v7  ;;  %12552 = vst [vmem:[%s17573_s9 + $0xf0] sm:$0xff] %v12518_v29  ;;  %v12598_v27 = vld [vmem:[%s17573_s9 + $0x58] sm:$0xff] (%p20675_p13)  ;;  %v12624_v2 = vld [vmem:[%s17573_s9 + $0xc0] sm:$0xff] (%p20675_p13) }
 0xdec   : > { %12537 = vst [vmem:[%s17573_s9 + $0x78] sm:$0xff] %v12480_v31  ;;  %12553 = vst [vmem:[%s17573_s9 + $0xf8] sm:$0xff] %v12520_v53  ;;  %v12626_v39 = vld [vmem:[%s17573_s9 + $0xc8] sm:$0xff] (%p20675_p13)  ;;  %v12628_v40 = vld [vmem:[%s17573_s9 + $0xd0] sm:$0xff] (%p20675_p13) }
 0xded   : > { %12577 = vst [vmem:[%s20540_s20] sm:$0xff] %v12576_v10  ;;  %12579 = vst [vmem:[%s20540_s20 + $0x8] sm:$0xff] %v12578_v12  ;;  %v12630_v54 = vld [vmem:[%s17573_s9 + $0xd8] sm:$0xff] }
 0xdee   : > { %12593 = vst [vmem:[%s20540_s20 + $0x80] sm:$0xff] %v12592_v23  ;;  %12595 = vst [vmem:[%s20540_s20 + $0x88] sm:$0xff] %v12594_v45 }
 0xdef   : > { %12597 = vst [vmem:[%s20540_s20 + $0xa0] sm:$0xff] %v12596_v42  ;;  %12599 = vst [vmem:[%s20540_s20 + $0xa8] sm:$0xff] %v12598_v27 }
 0xdf0   : > { %v12600_v16 = vld [vmem:[%s17573_s9 + $0x60] sm:$0xff]  ;;  %12625 = vst [vmem:[%s20540_s20 + $0x180] sm:$0xff] %v12624_v2  ;;  %12627 = vst [vmem:[%s20540_s20 + $0x188] sm:$0xff] %v12626_v39 }
 0xdf1   : > { %v12602_v57 = vld [vmem:[%s17573_s9 + $0x68] sm:$0xff]  ;;  %12601 = vst [vmem:[%s20540_s20 + $0xc0] sm:$0xff] %v12600_v16  ;;  %12629 = vst [vmem:[%s20540_s20 + $0x1a0] sm:$0xff] %v12628_v40  ;;  %v12632_v34 = vld [vmem:[%s17573_s9 + $0xe0] sm:$0xff] }
 0xdf2   : > { %v12604_v28 = vld [vmem:[%s17573_s9 + $0x70] sm:$0xff]  ;;  %12603 = vst [vmem:[%s20540_s20 + $0xc8] sm:$0xff] %v12602_v57  ;;  %v12634_v46 = vld [vmem:[%s17573_s9 + $0xe8] sm:$0xff]  ;;  %12631 = vst [vmem:[%s20540_s20 + $0x1a8] sm:$0xff] %v12630_v54 }
 0xdf3   : > { %12605 = vst [vmem:[%s20540_s20 + $0xe0] sm:$0xff] %v12604_v28  ;;  %v12606_v41 = vld [vmem:[%s17573_s9 + $0x78] sm:$0xff]  ;;  %12633 = vst [vmem:[%s20540_s20 + $0x1c0] sm:$0xff] %v12632_v34  ;;  %v12636_v43 = vld [vmem:[%s17573_s9 + $0xf0] sm:$0xff] }
 0xdf4   : > { %12607 = vst [vmem:[%s20540_s20 + $0xe8] sm:$0xff] %v12606_v41  ;;  %12635 = vst [vmem:[%s20540_s20 + $0x1c8] sm:$0xff] %v12634_v46  ;;  %v12638_v15 = vld [vmem:[%s17573_s9 + $0xf8] sm:$0xff] }
 0xdf5   : > { %12637 = vst [vmem:[%s20540_s20 + $0x1e0] sm:$0xff] %v12636_v43  ;;  %12639 = vst [vmem:[%s20540_s20 + $0x1e8] sm:$0xff] %v12638_v15 }
 0xdf6 PF: > { %s20677_s16 = sld [smem:[#allocation13_spill]]  ;;  %s20678_s17 = sld [smem:[#allocation14_spill]] }
 0xdf7   : > { %s20679_s29 = smov %s17295_s30  ;;  %s20680_s30 = smov %s17299_s15 }
 0xdfc   : > { %p24_p1 = scmp.ge.s32.totalorder %s20677_s16, 4   ;;  %s20681_s15 = smov %s20678_s17 }
 0xdfe   :  { %26 = sbr.rel (!%p24_p1) target bundleno = 10 (0xa), region = 180 }
 0xe05   :  { %12667 = vsyncpa [#allocation5], 1 }
 0xe06   :  { %12669 = vsyncpa [#allocation5 + $0x1], 1 }
 0xe07   :  { %12670 = vsyncpa [#allocation7], 1 }

</bundles_post_ra>
